<compile_context>
chip_gen: v7x
topology: tpu7x:2x2x1
jax: 0.10.0
libtpu: 0.0.40
codegen_flags: <defaults>
</compile_context>

<pallas_src>
import numpy as np
import jax
import jax.numpy as jnp
from jax.experimental import pallas as pl
from jax.experimental.pallas import tpu as pltpu


# ---------------------------------------------------------------------------
# Host-side (trace-time) constants: per-tap 3-D boundary-validity masks.
# Constant-folded by XLA under jit (depend only on static shapes).
# ---------------------------------------------------------------------------
def _make_tap_masks(D, H, W, M_pad):
    M = D * H * W
    m = np.arange(M_pad)
    z = m // (H * W)
    y = (m // W) % H
    x = m % W
    in_vol = m < M
    masks = np.zeros((27, M_pad), np.float32)
    k = 0
    for oz in (-1, 0, 1):
        for oy in (-1, 0, 1):
            for ox in (-1, 0, 1):
                valid = (in_vol
                         & (z + oz >= 0) & (z + oz < D)
                         & (y + oy >= 0) & (y + oy < H)
                         & (x + ox >= 0) & (x + ox < W))
                masks[k] = valid.astype(np.float32)
                k += 1
    return masks


# ---------------------------------------------------------------------------
# Wrapper: one recurrent step of SequentialSemanticSegamentation.forward
# ---------------------------------------------------------------------------
def sequential_step(features, hidden_state, params):
    """features, hidden_state: [C_out, D, H, W] float32.

    Returns (logits [num_classes+1, D, H, W], new_hidden [C_out, D, H, W]).
    """
    C_out, D, H, W = hidden_state.shape
    M = D * H * W
    Mp = ((M + 127) // 128) * 128          # lane-dense spatial axis
    HW = H * W

    C1 = params["cls_b"].shape[0]          # num_classes + 1
    C1p = max(8, ((C1 + 7) // 8) * 8)      # pad classifier rows to sublanes

    # --- flattened activations (no concat / no im2col on the host) ----------
    h_flat = hidden_state.reshape(C_out, M)
    f_flat = features.reshape(C_out, M)
    if Mp != M:
        h_flat = jnp.pad(h_flat, ((0, 0), (0, Mp - M)))
        f_flat = jnp.pad(f_flat, ((0, 0), (0, Mp - M)))

    # --- per-tap fused conv weights [27, C_out, 2C] (bf16) -------------------
    # tap index k = kz*9 + ky*3 + kx ; columns 0:C apply to hidden, C:2C to
    # features (must match the in-kernel concat order [hidden ; features]).
    w_full = jnp.concatenate([params["hidden_w"], params["input_w"]], axis=1)
    w_taps = jnp.transpose(w_full, (2, 3, 4, 0, 1)) \
                .reshape(27, C_out, 2 * C_out).astype(jnp.bfloat16)
    b_sum = (params["hidden_b"] + params["input_b"]).reshape(C_out, 1) \
                .astype(jnp.float32)

    # --- classifier (1x1x1 conv == channel matmul), rows padded to C1p ------
    wc = params["cls_w"].reshape(C1, C_out)
    bc = params["cls_b"].reshape(C1, 1).astype(jnp.float32)
    if C1p != C1:
        wc = jnp.pad(wc, ((0, C1p - C1), (0, 0)))
        bc = jnp.pad(bc, ((0, C1p - C1), (0, 0)))
    wc = wc.astype(jnp.bfloat16)

    # --- per-tap boundary masks (trace-time constant) ------------------------
    masks = jnp.asarray(_make_tap_masks(D, H, W, Mp))          # [27, Mp] f32

    taps = [(dz - 1, dy - 1, dx - 1)
            for dz in range(3) for dy in range(3) for dx in range(3)]

    # ------------------------------------------------------------------------
    # Kernel: in-kernel im2col via lane rolls + 27 accumulated small dots,
    #         ReLU, then the 1x1x1 classifier.  Single grid step, everything
    #         VMEM-resident (~0.7 MB).
    # ------------------------------------------------------------------------
    def kernel(h_ref, f_ref, masks_ref, w_ref, bsum_ref, wc_ref, bc_ref,
               logits_ref, hidden_ref):
        # [hidden ; features] on the channel (sublane) axis, f32
        x = jnp.concatenate([h_ref[...], f_ref[...]], axis=0)   # [2C, Mp]

        acc = jnp.zeros((C_out, Mp), jnp.float32)
        for k, (oz, oy, ox) in enumerate(taps):
            off = oz * HW + oy * W + ox
            # shifted[:, m] = x[:, m + off]   (wraparound killed by the mask)
            shifted = x if off == 0 else pltpu.roll(x, (-off) % Mp, 1)
            contrib = jnp.dot(w_ref[k], shifted.astype(jnp.bfloat16),
                              preferred_element_type=jnp.float32)
            # per-column validity mask applied on the dot output
            acc = acc + contrib * masks_ref[k:k + 1, :]

        # conv_hidden(h) + conv_input(x) + folded biases, then ReLU(inplace)
        h = jnp.maximum(acc + bsum_ref[...], 0.0)
        hidden_ref[...] = h                                      # f32 hidden
        # classifier: Conv3d(C_out, num_classes+1, 1) == channel matmul
        logits_ref[...] = (jnp.dot(wc_ref[...], h.astype(jnp.bfloat16),
                                   preferred_element_type=jnp.float32)
                           + bc_ref[...])

    # --- VMEM / cost bookkeeping (tiny; well under every gen's scoped limit) -
    bytes_in = (2 * C_out * Mp * 4                 # hidden + features (f32)
                + 27 * Mp * 4                      # tap masks (f32)
                + 27 * C_out * 2 * C_out * 2       # fused tap weights (bf16)
                + (C_out + C1p * C_out + C1p) * 4)
    bytes_out = (C1p + C_out) * Mp * 4
    vmem_limit = int(min(32 * 1024 * 1024,
                         max(4 * (bytes_in + bytes_out), 4 * 1024 * 1024)))
    cost = pl.CostEstimate(
        flops=2 * C_out * (2 * C_out * 27) * Mp + 2 * C1p * C_out * Mp,
        transcendentals=0,
        bytes_accessed=bytes_in + bytes_out)

    logits_p, hidden_p = pl.pallas_call(
        kernel,
        out_shape=(jax.ShapeDtypeStruct((C1p, Mp), jnp.float32),
                   jax.ShapeDtypeStruct((C_out, Mp), jnp.float32)),
        grid=(1,),
        in_specs=[
            pl.BlockSpec((C_out, Mp), lambda i: (0, 0)),               # hidden
            pl.BlockSpec((C_out, Mp), lambda i: (0, 0)),               # features
            pl.BlockSpec((27, Mp), lambda i: (0, 0)),                  # tap masks
            pl.BlockSpec((27, C_out, 2 * C_out), lambda i: (0, 0, 0)), # tap weights
            pl.BlockSpec((C_out, 1), lambda i: (0, 0)),                # summed bias
            pl.BlockSpec((C1p, C_out), lambda i: (0, 0)),              # cls weight
            pl.BlockSpec((C1p, 1), lambda i: (0, 0)),                  # cls bias
        ],
        out_specs=(pl.BlockSpec((C1p, Mp), lambda i: (0, 0)),
                   pl.BlockSpec((C_out, Mp), lambda i: (0, 0))),
        input_output_aliases={0: 1},    # hidden input buffer -> hidden output
        compiler_params=pltpu.CompilerParams(
            dimension_semantics=("arbitrary",),
            vmem_limit_bytes=vmem_limit),
        cost_estimate=cost,
    )(h_flat, f_flat, masks, w_taps, b_sum, wc, bc)

    logits = logits_p[:C1, :M].reshape(C1, D, H, W)
    new_hidden = hidden_p[:, :M].reshape(C_out, D, H, W)
    return logits, new_hidden


# ---------------------------------------------------------------------------
# Deterministic parameter init (shapes from the module __init__)
# ---------------------------------------------------------------------------
def init_params(key, output_channels, num_classes):
    ks = jax.random.split(key, 6)
    C, C1 = output_channels, num_classes + 1
    scale = 0.05
    return {
        # Conv3d(C, C, 3, padding=1)
        "hidden_w": scale * jax.random.normal(ks[0], (C, C, 3, 3, 3), jnp.float32),
        "hidden_b": scale * jax.random.normal(ks[1], (C,), jnp.float32),
        # Conv3d(C, C, 3, padding=1)
        "input_w": scale * jax.random.normal(ks[2], (C, C, 3, 3, 3), jnp.float32),
        "input_b": scale * jax.random.normal(ks[3], (C,), jnp.float32),
        # Conv3d(C, num_classes + 1, 1)
        "cls_w": scale * jax.random.normal(ks[4], (C1, C, 1, 1, 1), jnp.float32),
        "cls_b": scale * jax.random.normal(ks[5], (C1,), jnp.float32),
    }


# ---------------------------------------------------------------------------
# Pure-numpy reference (f32 im2col conv path)
# ---------------------------------------------------------------------------
def _ref_step(features, hidden_state, params):
    C_out, D, H, W = hidden_state.shape

    def im2col(x):
        xp = np.pad(x, ((0, 0), (1, 1), (1, 1), (1, 1)))
        cols = []
        for dz in range(3):
            for dy in range(3):
                for dx in range(3):
                    cols.append(xp[:, dz:dz + D, dy:dy + H, dx:dx + W]
                                .reshape(C_out, -1))
        return np.stack(cols, axis=1).reshape(C_out * 27, -1)

    Xh = im2col(np.asarray(hidden_state))
    Xi = im2col(np.asarray(features))
    Wh = np.asarray(params["hidden_w"]).reshape(C_out, -1)
    Wi = np.asarray(params["input_w"]).reshape(C_out, -1)
    pre = (Wh @ Xh + Wi @ Xi
           + np.asarray(params["hidden_b"]).reshape(-1, 1)
           + np.asarray(params["input_b"]).reshape(-1, 1))
    h = np.maximum(pre, 0.0)
    C1 = params["cls_b"].shape[0]
    Wc = np.asarray(params["cls_w"]).reshape(C1, C_out)
    logits = Wc @ h + np.asarray(params["cls_b"]).reshape(-1, 1)
    return logits.reshape(C1, D, H, W), h.reshape(C_out, D, H, W)


if __name__ == "__main__":
    # resolution = [C, D, H, W] = [4, 8, 16, 16], output_channels = 8
    num_classes = 4
    C_out, D, H, W = 8, 8, 16, 16

    key = jax.random.PRNGKey(0)
    k_feat, k_hid, k_par = jax.random.split(key, 3)

    # `features` stands for backbone(*sensor_data) fused output,
    # `hidden_state` for the pose-calibrated previous hidden state.
    features = jax.random.normal(k_feat, (C_out, D, H, W), jnp.float32)
    hidden_state = jax.random.normal(k_hid, (C_out, D, H, W), jnp.float32)
    params = init_params(k_par, C_out, num_classes)

    step = jax.jit(lambda f, h: sequential_step(f, h, params))
    logits, new_hidden = step(features, hidden_state)
    jax.block_until_ready((logits, new_hidden))

    ref_logits, ref_hidden = _ref_step(np.asarray(features),
                                       np.asarray(hidden_state), params)
    np.testing.assert_allclose(np.asarray(new_hidden), ref_hidden,
                               rtol=5e-2, atol=5e-2)
    np.testing.assert_allclose(np.asarray(logits), ref_logits,
                               rtol=5e-2, atol=5e-2)

    assert logits.shape == (num_classes + 1, D, H, W)
    assert new_hidden.shape == (C_out, D, H, W)
    print("KERNEL_OK")
</pallas_src>

<mosaic_0001>
module attributes {stable_mosaic.version = 11 : i64} {
  func.func @kernel(%arg0: i32, %arg1: memref<8x2048xf32, #tpu.memory_space<vmem>>, %arg2: memref<8x2048xf32, #tpu.memory_space<vmem>>, %arg3: memref<27x2048xf32, #tpu.memory_space<vmem>>, %arg4: memref<27x8x16xbf16, #tpu.memory_space<vmem>>, %arg5: memref<8x1xf32, #tpu.memory_space<vmem>>, %arg6: memref<8x8xbf16, #tpu.memory_space<vmem>>, %arg7: memref<8x1xf32, #tpu.memory_space<vmem>>, %arg8: memref<8x2048xf32, #tpu.memory_space<vmem>>, %arg9: memref<8x2048xf32, #tpu.memory_space<vmem>>) attributes {dimension_semantics = [#tpu.dimension_semantics<arbitrary>], iteration_bounds = array<i64: 1>, scalar_prefetch = 0 : i64, scratch_operands = 0 : i64, tpu.core_type = #tpu.core_type<tc>, window_params = [{pipeline_mode = #tpu.pipeline_mode<synchronous>, transform_indices = @transform_0, window_bounds = array<i64: 8, 2048>}, {pipeline_mode = #tpu.pipeline_mode<synchronous>, transform_indices = @transform_1, window_bounds = array<i64: 8, 2048>}, {pipeline_mode = #tpu.pipeline_mode<synchronous>, transform_indices = @transform_2, window_bounds = array<i64: 27, 2048>}, {pipeline_mode = #tpu.pipeline_mode<synchronous>, transform_indices = @transform_3, window_bounds = array<i64: 27, 8, 16>}, {pipeline_mode = #tpu.pipeline_mode<synchronous>, transform_indices = @transform_4, window_bounds = array<i64: 8, 1>}, {pipeline_mode = #tpu.pipeline_mode<synchronous>, transform_indices = @transform_5, window_bounds = array<i64: 8, 8>}, {pipeline_mode = #tpu.pipeline_mode<synchronous>, transform_indices = @transform_6, window_bounds = array<i64: 8, 1>}, {pipeline_mode = #tpu.pipeline_mode<synchronous>, transform_indices = @transform_7, window_bounds = array<i64: 8, 2048>}, {pipeline_mode = #tpu.pipeline_mode<synchronous>, transform_indices = @transform_8, window_bounds = array<i64: 8, 2048>}]} {
    %c0 = arith.constant 0 : index
    %c0_0 = arith.constant 0 : index
    %0 = vector.load %arg1[%c0, %c0_0] : memref<8x2048xf32, #tpu.memory_space<vmem>>, vector<8x2048xf32>
    %c0_1 = arith.constant 0 : index
    %c0_2 = arith.constant 0 : index
    %1 = vector.load %arg2[%c0_1, %c0_2] : memref<8x2048xf32, #tpu.memory_space<vmem>>, vector<8x2048xf32>
    %2 = tpu.concatenate %0, %1 in 0 : vector<8x2048xf32>, vector<8x2048xf32> -> vector<16x2048xf32>
    %cst = arith.constant 0.000000e+00 : f32
    %3 = vector.broadcast %cst : f32 to vector<8x2048xf32>
    %c273_i32 = arith.constant 273 : i32
    %4 = tpu.dynamic_rotate %2 by %c273_i32 dim 1 : vector<16x2048xf32>, i32 -> vector<16x2048xf32>
    %c0_3 = arith.constant 0 : index
    %c0_4 = arith.constant 0 : index
    %c0_5 = arith.constant 0 : index
    %5 = vector.load %arg4[%c0_3, %c0_4, %c0_5] : memref<27x8x16xbf16, #tpu.memory_space<vmem>>, vector<1x8x16xbf16>
    %6 = vector.shape_cast %5 : vector<1x8x16xbf16> to vector<8x16xbf16>
    %7 = arith.truncf %4 : vector<16x2048xf32> to vector<16x2048xbf16>
    %cst_6 = arith.constant dense<0.000000e+00> : vector<8x2048xf32>
    %8 = tpu.matmul %6, %7, %cst_6 {dimension_numbers = #tpu.dot_dimension_numbers<[1], [0], [0], [1], [0, 0, 1, 1], [], []>} : vector<8x16xbf16>, vector<16x2048xbf16>, vector<8x2048xf32> -> vector<8x2048xf32>
    %c0_7 = arith.constant 0 : index
    %c0_8 = arith.constant 0 : index
    %9 = vector.load %arg3[%c0_7, %c0_8] : memref<27x2048xf32, #tpu.memory_space<vmem>>, vector<1x2048xf32>
    %10 = vector.broadcast %9 : vector<1x2048xf32> to vector<8x2048xf32>
    %11 = arith.mulf %8, %10 : vector<8x2048xf32>
    %12 = arith.addf %3, %11 : vector<8x2048xf32>
    %c272_i32 = arith.constant 272 : i32
    %13 = tpu.dynamic_rotate %2 by %c272_i32 dim 1 : vector<16x2048xf32>, i32 -> vector<16x2048xf32>
    %c1 = arith.constant 1 : index
    %c0_9 = arith.constant 0 : index
    %c0_10 = arith.constant 0 : index
    %14 = vector.load %arg4[%c1, %c0_9, %c0_10] : memref<27x8x16xbf16, #tpu.memory_space<vmem>>, vector<1x8x16xbf16>
    %15 = vector.shape_cast %14 : vector<1x8x16xbf16> to vector<8x16xbf16>
    %16 = arith.truncf %13 : vector<16x2048xf32> to vector<16x2048xbf16>
    %cst_11 = arith.constant dense<0.000000e+00> : vector<8x2048xf32>
    %17 = tpu.matmul %15, %16, %cst_11 {dimension_numbers = #tpu.dot_dimension_numbers<[1], [0], [0], [1], [0, 0, 1, 1], [], []>} : vector<8x16xbf16>, vector<16x2048xbf16>, vector<8x2048xf32> -> vector<8x2048xf32>
    %c1_12 = arith.constant 1 : index
    %c0_13 = arith.constant 0 : index
    %18 = vector.load %arg3[%c1_12, %c0_13] : memref<27x2048xf32, #tpu.memory_space<vmem>>, vector<1x2048xf32>
    %19 = vector.broadcast %18 : vector<1x2048xf32> to vector<8x2048xf32>
    %20 = arith.mulf %17, %19 : vector<8x2048xf32>
    %21 = arith.addf %12, %20 : vector<8x2048xf32>
    %c271_i32 = arith.constant 271 : i32
    %22 = tpu.dynamic_rotate %2 by %c271_i32 dim 1 : vector<16x2048xf32>, i32 -> vector<16x2048xf32>
    %c2 = arith.constant 2 : index
    %c0_14 = arith.constant 0 : index
    %c0_15 = arith.constant 0 : index
    %23 = vector.load %arg4[%c2, %c0_14, %c0_15] : memref<27x8x16xbf16, #tpu.memory_space<vmem>>, vector<1x8x16xbf16>
    %24 = vector.shape_cast %23 : vector<1x8x16xbf16> to vector<8x16xbf16>
    %25 = arith.truncf %22 : vector<16x2048xf32> to vector<16x2048xbf16>
    %cst_16 = arith.constant dense<0.000000e+00> : vector<8x2048xf32>
    %26 = tpu.matmul %24, %25, %cst_16 {dimension_numbers = #tpu.dot_dimension_numbers<[1], [0], [0], [1], [0, 0, 1, 1], [], []>} : vector<8x16xbf16>, vector<16x2048xbf16>, vector<8x2048xf32> -> vector<8x2048xf32>
    %c2_17 = arith.constant 2 : index
    %c0_18 = arith.constant 0 : index
    %27 = vector.load %arg3[%c2_17, %c0_18] : memref<27x2048xf32, #tpu.memory_space<vmem>>, vector<1x2048xf32>
    %28 = vector.broadcast %27 : vector<1x2048xf32> to vector<8x2048xf32>
    %29 = arith.mulf %26, %28 : vector<8x2048xf32>
    %30 = arith.addf %21, %29 : vector<8x2048xf32>
    %c257_i32 = arith.constant 257 : i32
    %31 = tpu.dynamic_rotate %2 by %c257_i32 dim 1 : vector<16x2048xf32>, i32 -> vector<16x2048xf32>
    %c3 = arith.constant 3 : index
    %c0_19 = arith.constant 0 : index
    %c0_20 = arith.constant 0 : index
    %32 = vector.load %arg4[%c3, %c0_19, %c0_20] : memref<27x8x16xbf16, #tpu.memory_space<vmem>>, vector<1x8x16xbf16>
    %33 = vector.shape_cast %32 : vector<1x8x16xbf16> to vector<8x16xbf16>
    %34 = arith.truncf %31 : vector<16x2048xf32> to vector<16x2048xbf16>
    %cst_21 = arith.constant dense<0.000000e+00> : vector<8x2048xf32>
    %35 = tpu.matmul %33, %34, %cst_21 {dimension_numbers = #tpu.dot_dimension_numbers<[1], [0], [0], [1], [0, 0, 1, 1], [], []>} : vector<8x16xbf16>, vector<16x2048xbf16>, vector<8x2048xf32> -> vector<8x2048xf32>
    %c3_22 = arith.constant 3 : index
    %c0_23 = arith.constant 0 : index
    %36 = vector.load %arg3[%c3_22, %c0_23] : memref<27x2048xf32, #tpu.memory_space<vmem>>, vector<1x2048xf32>
    %37 = vector.broadcast %36 : vector<1x2048xf32> to vector<8x2048xf32>
    %38 = arith.mulf %35, %37 : vector<8x2048xf32>
    %39 = arith.addf %30, %38 : vector<8x2048xf32>
    %c256_i32 = arith.constant 256 : i32
    %40 = tpu.dynamic_rotate %2 by %c256_i32 dim 1 : vector<16x2048xf32>, i32 -> vector<16x2048xf32>
    %c4 = arith.constant 4 : index
    %c0_24 = arith.constant 0 : index
    %c0_25 = arith.constant 0 : index
    %41 = vector.load %arg4[%c4, %c0_24, %c0_25] : memref<27x8x16xbf16, #tpu.memory_space<vmem>>, vector<1x8x16xbf16>
    %42 = vector.shape_cast %41 : vector<1x8x16xbf16> to vector<8x16xbf16>
    %43 = arith.truncf %40 : vector<16x2048xf32> to vector<16x2048xbf16>
    %cst_26 = arith.constant dense<0.000000e+00> : vector<8x2048xf32>
    %44 = tpu.matmul %42, %43, %cst_26 {dimension_numbers = #tpu.dot_dimension_numbers<[1], [0], [0], [1], [0, 0, 1, 1], [], []>} : vector<8x16xbf16>, vector<16x2048xbf16>, vector<8x2048xf32> -> vector<8x2048xf32>
    %c4_27 = arith.constant 4 : index
    %c0_28 = arith.constant 0 : index
    %45 = vector.load %arg3[%c4_27, %c0_28] : memref<27x2048xf32, #tpu.memory_space<vmem>>, vector<1x2048xf32>
    %46 = vector.broadcast %45 : vector<1x2048xf32> to vector<8x2048xf32>
    %47 = arith.mulf %44, %46 : vector<8x2048xf32>
    %48 = arith.addf %39, %47 : vector<8x2048xf32>
    %c255_i32 = arith.constant 255 : i32
    %49 = tpu.dynamic_rotate %2 by %c255_i32 dim 1 : vector<16x2048xf32>, i32 -> vector<16x2048xf32>
    %c5 = arith.constant 5 : index
    %c0_29 = arith.constant 0 : index
    %c0_30 = arith.constant 0 : index
    %50 = vector.load %arg4[%c5, %c0_29, %c0_30] : memref<27x8x16xbf16, #tpu.memory_space<vmem>>, vector<1x8x16xbf16>
    %51 = vector.shape_cast %50 : vector<1x8x16xbf16> to vector<8x16xbf16>
    %52 = arith.truncf %49 : vector<16x2048xf32> to vector<16x2048xbf16>
    %cst_31 = arith.constant dense<0.000000e+00> : vector<8x2048xf32>
    %53 = tpu.matmul %51, %52, %cst_31 {dimension_numbers = #tpu.dot_dimension_numbers<[1], [0], [0], [1], [0, 0, 1, 1], [], []>} : vector<8x16xbf16>, vector<16x2048xbf16>, vector<8x2048xf32> -> vector<8x2048xf32>
    %c5_32 = arith.constant 5 : index
    %c0_33 = arith.constant 0 : index
    %54 = vector.load %arg3[%c5_32, %c0_33] : memref<27x2048xf32, #tpu.memory_space<vmem>>, vector<1x2048xf32>
    %55 = vector.broadcast %54 : vector<1x2048xf32> to vector<8x2048xf32>
    %56 = arith.mulf %53, %55 : vector<8x2048xf32>
    %57 = arith.addf %48, %56 : vector<8x2048xf32>
    %c241_i32 = arith.constant 241 : i32
    %58 = tpu.dynamic_rotate %2 by %c241_i32 dim 1 : vector<16x2048xf32>, i32 -> vector<16x2048xf32>
    %c6 = arith.constant 6 : index
    %c0_34 = arith.constant 0 : index
    %c0_35 = arith.constant 0 : index
    %59 = vector.load %arg4[%c6, %c0_34, %c0_35] : memref<27x8x16xbf16, #tpu.memory_space<vmem>>, vector<1x8x16xbf16>
    %60 = vector.shape_cast %59 : vector<1x8x16xbf16> to vector<8x16xbf16>
    %61 = arith.truncf %58 : vector<16x2048xf32> to vector<16x2048xbf16>
    %cst_36 = arith.constant dense<0.000000e+00> : vector<8x2048xf32>
    %62 = tpu.matmul %60, %61, %cst_36 {dimension_numbers = #tpu.dot_dimension_numbers<[1], [0], [0], [1], [0, 0, 1, 1], [], []>} : vector<8x16xbf16>, vector<16x2048xbf16>, vector<8x2048xf32> -> vector<8x2048xf32>
    %c6_37 = arith.constant 6 : index
    %c0_38 = arith.constant 0 : index
    %63 = vector.load %arg3[%c6_37, %c0_38] : memref<27x2048xf32, #tpu.memory_space<vmem>>, vector<1x2048xf32>
    %64 = vector.broadcast %63 : vector<1x2048xf32> to vector<8x2048xf32>
    %65 = arith.mulf %62, %64 : vector<8x2048xf32>
    %66 = arith.addf %57, %65 : vector<8x2048xf32>
    %c240_i32 = arith.constant 240 : i32
    %67 = tpu.dynamic_rotate %2 by %c240_i32 dim 1 : vector<16x2048xf32>, i32 -> vector<16x2048xf32>
    %c7 = arith.constant 7 : index
    %c0_39 = arith.constant 0 : index
    %c0_40 = arith.constant 0 : index
    %68 = vector.load %arg4[%c7, %c0_39, %c0_40] : memref<27x8x16xbf16, #tpu.memory_space<vmem>>, vector<1x8x16xbf16>
    %69 = vector.shape_cast %68 : vector<1x8x16xbf16> to vector<8x16xbf16>
    %70 = arith.truncf %67 : vector<16x2048xf32> to vector<16x2048xbf16>
    %cst_41 = arith.constant dense<0.000000e+00> : vector<8x2048xf32>
    %71 = tpu.matmul %69, %70, %cst_41 {dimension_numbers = #tpu.dot_dimension_numbers<[1], [0], [0], [1], [0, 0, 1, 1], [], []>} : vector<8x16xbf16>, vector<16x2048xbf16>, vector<8x2048xf32> -> vector<8x2048xf32>
    %c7_42 = arith.constant 7 : index
    %c0_43 = arith.constant 0 : index
    %72 = vector.load %arg3[%c7_42, %c0_43] : memref<27x2048xf32, #tpu.memory_space<vmem>>, vector<1x2048xf32>
    %73 = vector.broadcast %72 : vector<1x2048xf32> to vector<8x2048xf32>
    %74 = arith.mulf %71, %73 : vector<8x2048xf32>
    %75 = arith.addf %66, %74 : vector<8x2048xf32>
    %c239_i32 = arith.constant 239 : i32
    %76 = tpu.dynamic_rotate %2 by %c239_i32 dim 1 : vector<16x2048xf32>, i32 -> vector<16x2048xf32>
    %c8 = arith.constant 8 : index
    %c0_44 = arith.constant 0 : index
    %c0_45 = arith.constant 0 : index
    %77 = vector.load %arg4[%c8, %c0_44, %c0_45] : memref<27x8x16xbf16, #tpu.memory_space<vmem>>, vector<1x8x16xbf16>
    %78 = vector.shape_cast %77 : vector<1x8x16xbf16> to vector<8x16xbf16>
    %79 = arith.truncf %76 : vector<16x2048xf32> to vector<16x2048xbf16>
    %cst_46 = arith.constant dense<0.000000e+00> : vector<8x2048xf32>
    %80 = tpu.matmul %78, %79, %cst_46 {dimension_numbers = #tpu.dot_dimension_numbers<[1], [0], [0], [1], [0, 0, 1, 1], [], []>} : vector<8x16xbf16>, vector<16x2048xbf16>, vector<8x2048xf32> -> vector<8x2048xf32>
    %c8_47 = arith.constant 8 : index
    %c0_48 = arith.constant 0 : index
    %81 = vector.load %arg3[%c8_47, %c0_48] : memref<27x2048xf32, #tpu.memory_space<vmem>>, vector<1x2048xf32>
    %82 = vector.broadcast %81 : vector<1x2048xf32> to vector<8x2048xf32>
    %83 = arith.mulf %80, %82 : vector<8x2048xf32>
    %84 = arith.addf %75, %83 : vector<8x2048xf32>
    %c17_i32 = arith.constant 17 : i32
    %85 = tpu.dynamic_rotate %2 by %c17_i32 dim 1 : vector<16x2048xf32>, i32 -> vector<16x2048xf32>
    %c9 = arith.constant 9 : index
    %c0_49 = arith.constant 0 : index
    %c0_50 = arith.constant 0 : index
    %86 = vector.load %arg4[%c9, %c0_49, %c0_50] : memref<27x8x16xbf16, #tpu.memory_space<vmem>>, vector<1x8x16xbf16>
    %87 = vector.shape_cast %86 : vector<1x8x16xbf16> to vector<8x16xbf16>
    %88 = arith.truncf %85 : vector<16x2048xf32> to vector<16x2048xbf16>
    %cst_51 = arith.constant dense<0.000000e+00> : vector<8x2048xf32>
    %89 = tpu.matmul %87, %88, %cst_51 {dimension_numbers = #tpu.dot_dimension_numbers<[1], [0], [0], [1], [0, 0, 1, 1], [], []>} : vector<8x16xbf16>, vector<16x2048xbf16>, vector<8x2048xf32> -> vector<8x2048xf32>
    %c9_52 = arith.constant 9 : index
    %c0_53 = arith.constant 0 : index
    %90 = vector.load %arg3[%c9_52, %c0_53] : memref<27x2048xf32, #tpu.memory_space<vmem>>, vector<1x2048xf32>
    %91 = vector.broadcast %90 : vector<1x2048xf32> to vector<8x2048xf32>
    %92 = arith.mulf %89, %91 : vector<8x2048xf32>
    %93 = arith.addf %84, %92 : vector<8x2048xf32>
    %c16_i32 = arith.constant 16 : i32
    %94 = tpu.dynamic_rotate %2 by %c16_i32 dim 1 : vector<16x2048xf32>, i32 -> vector<16x2048xf32>
    %c10 = arith.constant 10 : index
    %c0_54 = arith.constant 0 : index
    %c0_55 = arith.constant 0 : index
    %95 = vector.load %arg4[%c10, %c0_54, %c0_55] : memref<27x8x16xbf16, #tpu.memory_space<vmem>>, vector<1x8x16xbf16>
    %96 = vector.shape_cast %95 : vector<1x8x16xbf16> to vector<8x16xbf16>
    %97 = arith.truncf %94 : vector<16x2048xf32> to vector<16x2048xbf16>
    %cst_56 = arith.constant dense<0.000000e+00> : vector<8x2048xf32>
    %98 = tpu.matmul %96, %97, %cst_56 {dimension_numbers = #tpu.dot_dimension_numbers<[1], [0], [0], [1], [0, 0, 1, 1], [], []>} : vector<8x16xbf16>, vector<16x2048xbf16>, vector<8x2048xf32> -> vector<8x2048xf32>
    %c10_57 = arith.constant 10 : index
    %c0_58 = arith.constant 0 : index
    %99 = vector.load %arg3[%c10_57, %c0_58] : memref<27x2048xf32, #tpu.memory_space<vmem>>, vector<1x2048xf32>
    %100 = vector.broadcast %99 : vector<1x2048xf32> to vector<8x2048xf32>
    %101 = arith.mulf %98, %100 : vector<8x2048xf32>
    %102 = arith.addf %93, %101 : vector<8x2048xf32>
    %c15_i32 = arith.constant 15 : i32
    %103 = tpu.dynamic_rotate %2 by %c15_i32 dim 1 : vector<16x2048xf32>, i32 -> vector<16x2048xf32>
    %c11 = arith.constant 11 : index
    %c0_59 = arith.constant 0 : index
    %c0_60 = arith.constant 0 : index
    %104 = vector.load %arg4[%c11, %c0_59, %c0_60] : memref<27x8x16xbf16, #tpu.memory_space<vmem>>, vector<1x8x16xbf16>
    %105 = vector.shape_cast %104 : vector<1x8x16xbf16> to vector<8x16xbf16>
    %106 = arith.truncf %103 : vector<16x2048xf32> to vector<16x2048xbf16>
    %cst_61 = arith.constant dense<0.000000e+00> : vector<8x2048xf32>
    %107 = tpu.matmul %105, %106, %cst_61 {dimension_numbers = #tpu.dot_dimension_numbers<[1], [0], [0], [1], [0, 0, 1, 1], [], []>} : vector<8x16xbf16>, vector<16x2048xbf16>, vector<8x2048xf32> -> vector<8x2048xf32>
    %c11_62 = arith.constant 11 : index
    %c0_63 = arith.constant 0 : index
    %108 = vector.load %arg3[%c11_62, %c0_63] : memref<27x2048xf32, #tpu.memory_space<vmem>>, vector<1x2048xf32>
    %109 = vector.broadcast %108 : vector<1x2048xf32> to vector<8x2048xf32>
    %110 = arith.mulf %107, %109 : vector<8x2048xf32>
    %111 = arith.addf %102, %110 : vector<8x2048xf32>
    %c1_i32 = arith.constant 1 : i32
    %112 = tpu.dynamic_rotate %2 by %c1_i32 dim 1 : vector<16x2048xf32>, i32 -> vector<16x2048xf32>
    %c12 = arith.constant 12 : index
    %c0_64 = arith.constant 0 : index
    %c0_65 = arith.constant 0 : index
    %113 = vector.load %arg4[%c12, %c0_64, %c0_65] : memref<27x8x16xbf16, #tpu.memory_space<vmem>>, vector<1x8x16xbf16>
    %114 = vector.shape_cast %113 : vector<1x8x16xbf16> to vector<8x16xbf16>
    %115 = arith.truncf %112 : vector<16x2048xf32> to vector<16x2048xbf16>
    %cst_66 = arith.constant dense<0.000000e+00> : vector<8x2048xf32>
    %116 = tpu.matmul %114, %115, %cst_66 {dimension_numbers = #tpu.dot_dimension_numbers<[1], [0], [0], [1], [0, 0, 1, 1], [], []>} : vector<8x16xbf16>, vector<16x2048xbf16>, vector<8x2048xf32> -> vector<8x2048xf32>
    %c12_67 = arith.constant 12 : index
    %c0_68 = arith.constant 0 : index
    %117 = vector.load %arg3[%c12_67, %c0_68] : memref<27x2048xf32, #tpu.memory_space<vmem>>, vector<1x2048xf32>
    %118 = vector.broadcast %117 : vector<1x2048xf32> to vector<8x2048xf32>
    %119 = arith.mulf %116, %118 : vector<8x2048xf32>
    %120 = arith.addf %111, %119 : vector<8x2048xf32>
    %c13 = arith.constant 13 : index
    %c0_69 = arith.constant 0 : index
    %c0_70 = arith.constant 0 : index
    %121 = vector.load %arg4[%c13, %c0_69, %c0_70] : memref<27x8x16xbf16, #tpu.memory_space<vmem>>, vector<1x8x16xbf16>
    %122 = vector.shape_cast %121 : vector<1x8x16xbf16> to vector<8x16xbf16>
    %123 = arith.truncf %2 : vector<16x2048xf32> to vector<16x2048xbf16>
    %cst_71 = arith.constant dense<0.000000e+00> : vector<8x2048xf32>
    %124 = tpu.matmul %122, %123, %cst_71 {dimension_numbers = #tpu.dot_dimension_numbers<[1], [0], [0], [1], [0, 0, 1, 1], [], []>} : vector<8x16xbf16>, vector<16x2048xbf16>, vector<8x2048xf32> -> vector<8x2048xf32>
    %c13_72 = arith.constant 13 : index
    %c0_73 = arith.constant 0 : index
    %125 = vector.load %arg3[%c13_72, %c0_73] : memref<27x2048xf32, #tpu.memory_space<vmem>>, vector<1x2048xf32>
    %126 = vector.broadcast %125 : vector<1x2048xf32> to vector<8x2048xf32>
    %127 = arith.mulf %124, %126 : vector<8x2048xf32>
    %128 = arith.addf %120, %127 : vector<8x2048xf32>
    %c2047_i32 = arith.constant 2047 : i32
    %129 = tpu.dynamic_rotate %2 by %c2047_i32 dim 1 : vector<16x2048xf32>, i32 -> vector<16x2048xf32>
    %c14 = arith.constant 14 : index
    %c0_74 = arith.constant 0 : index
    %c0_75 = arith.constant 0 : index
    %130 = vector.load %arg4[%c14, %c0_74, %c0_75] : memref<27x8x16xbf16, #tpu.memory_space<vmem>>, vector<1x8x16xbf16>
    %131 = vector.shape_cast %130 : vector<1x8x16xbf16> to vector<8x16xbf16>
    %132 = arith.truncf %129 : vector<16x2048xf32> to vector<16x2048xbf16>
    %cst_76 = arith.constant dense<0.000000e+00> : vector<8x2048xf32>
    %133 = tpu.matmul %131, %132, %cst_76 {dimension_numbers = #tpu.dot_dimension_numbers<[1], [0], [0], [1], [0, 0, 1, 1], [], []>} : vector<8x16xbf16>, vector<16x2048xbf16>, vector<8x2048xf32> -> vector<8x2048xf32>
    %c14_77 = arith.constant 14 : index
    %c0_78 = arith.constant 0 : index
    %134 = vector.load %arg3[%c14_77, %c0_78] : memref<27x2048xf32, #tpu.memory_space<vmem>>, vector<1x2048xf32>
    %135 = vector.broadcast %134 : vector<1x2048xf32> to vector<8x2048xf32>
    %136 = arith.mulf %133, %135 : vector<8x2048xf32>
    %137 = arith.addf %128, %136 : vector<8x2048xf32>
    %c2033_i32 = arith.constant 2033 : i32
    %138 = tpu.dynamic_rotate %2 by %c2033_i32 dim 1 : vector<16x2048xf32>, i32 -> vector<16x2048xf32>
    %c15 = arith.constant 15 : index
    %c0_79 = arith.constant 0 : index
    %c0_80 = arith.constant 0 : index
    %139 = vector.load %arg4[%c15, %c0_79, %c0_80] : memref<27x8x16xbf16, #tpu.memory_space<vmem>>, vector<1x8x16xbf16>
    %140 = vector.shape_cast %139 : vector<1x8x16xbf16> to vector<8x16xbf16>
    %141 = arith.truncf %138 : vector<16x2048xf32> to vector<16x2048xbf16>
    %cst_81 = arith.constant dense<0.000000e+00> : vector<8x2048xf32>
    %142 = tpu.matmul %140, %141, %cst_81 {dimension_numbers = #tpu.dot_dimension_numbers<[1], [0], [0], [1], [0, 0, 1, 1], [], []>} : vector<8x16xbf16>, vector<16x2048xbf16>, vector<8x2048xf32> -> vector<8x2048xf32>
    %c15_82 = arith.constant 15 : index
    %c0_83 = arith.constant 0 : index
    %143 = vector.load %arg3[%c15_82, %c0_83] : memref<27x2048xf32, #tpu.memory_space<vmem>>, vector<1x2048xf32>
    %144 = vector.broadcast %143 : vector<1x2048xf32> to vector<8x2048xf32>
    %145 = arith.mulf %142, %144 : vector<8x2048xf32>
    %146 = arith.addf %137, %145 : vector<8x2048xf32>
    %c2032_i32 = arith.constant 2032 : i32
    %147 = tpu.dynamic_rotate %2 by %c2032_i32 dim 1 : vector<16x2048xf32>, i32 -> vector<16x2048xf32>
    %c16 = arith.constant 16 : index
    %c0_84 = arith.constant 0 : index
    %c0_85 = arith.constant 0 : index
    %148 = vector.load %arg4[%c16, %c0_84, %c0_85] : memref<27x8x16xbf16, #tpu.memory_space<vmem>>, vector<1x8x16xbf16>
    %149 = vector.shape_cast %148 : vector<1x8x16xbf16> to vector<8x16xbf16>
    %150 = arith.truncf %147 : vector<16x2048xf32> to vector<16x2048xbf16>
    %cst_86 = arith.constant dense<0.000000e+00> : vector<8x2048xf32>
    %151 = tpu.matmul %149, %150, %cst_86 {dimension_numbers = #tpu.dot_dimension_numbers<[1], [0], [0], [1], [0, 0, 1, 1], [], []>} : vector<8x16xbf16>, vector<16x2048xbf16>, vector<8x2048xf32> -> vector<8x2048xf32>
    %c16_87 = arith.constant 16 : index
    %c0_88 = arith.constant 0 : index
    %152 = vector.load %arg3[%c16_87, %c0_88] : memref<27x2048xf32, #tpu.memory_space<vmem>>, vector<1x2048xf32>
    %153 = vector.broadcast %152 : vector<1x2048xf32> to vector<8x2048xf32>
    %154 = arith.mulf %151, %153 : vector<8x2048xf32>
    %155 = arith.addf %146, %154 : vector<8x2048xf32>
    %c2031_i32 = arith.constant 2031 : i32
    %156 = tpu.dynamic_rotate %2 by %c2031_i32 dim 1 : vector<16x2048xf32>, i32 -> vector<16x2048xf32>
    %c17 = arith.constant 17 : index
    %c0_89 = arith.constant 0 : index
    %c0_90 = arith.constant 0 : index
    %157 = vector.load %arg4[%c17, %c0_89, %c0_90] : memref<27x8x16xbf16, #tpu.memory_space<vmem>>, vector<1x8x16xbf16>
    %158 = vector.shape_cast %157 : vector<1x8x16xbf16> to vector<8x16xbf16>
    %159 = arith.truncf %156 : vector<16x2048xf32> to vector<16x2048xbf16>
    %cst_91 = arith.constant dense<0.000000e+00> : vector<8x2048xf32>
    %160 = tpu.matmul %158, %159, %cst_91 {dimension_numbers = #tpu.dot_dimension_numbers<[1], [0], [0], [1], [0, 0, 1, 1], [], []>} : vector<8x16xbf16>, vector<16x2048xbf16>, vector<8x2048xf32> -> vector<8x2048xf32>
    %c17_92 = arith.constant 17 : index
    %c0_93 = arith.constant 0 : index
    %161 = vector.load %arg3[%c17_92, %c0_93] : memref<27x2048xf32, #tpu.memory_space<vmem>>, vector<1x2048xf32>
    %162 = vector.broadcast %161 : vector<1x2048xf32> to vector<8x2048xf32>
    %163 = arith.mulf %160, %162 : vector<8x2048xf32>
    %164 = arith.addf %155, %163 : vector<8x2048xf32>
    %c1809_i32 = arith.constant 1809 : i32
    %165 = tpu.dynamic_rotate %2 by %c1809_i32 dim 1 : vector<16x2048xf32>, i32 -> vector<16x2048xf32>
    %c18 = arith.constant 18 : index
    %c0_94 = arith.constant 0 : index
    %c0_95 = arith.constant 0 : index
    %166 = vector.load %arg4[%c18, %c0_94, %c0_95] : memref<27x8x16xbf16, #tpu.memory_space<vmem>>, vector<1x8x16xbf16>
    %167 = vector.shape_cast %166 : vector<1x8x16xbf16> to vector<8x16xbf16>
    %168 = arith.truncf %165 : vector<16x2048xf32> to vector<16x2048xbf16>
    %cst_96 = arith.constant dense<0.000000e+00> : vector<8x2048xf32>
    %169 = tpu.matmul %167, %168, %cst_96 {dimension_numbers = #tpu.dot_dimension_numbers<[1], [0], [0], [1], [0, 0, 1, 1], [], []>} : vector<8x16xbf16>, vector<16x2048xbf16>, vector<8x2048xf32> -> vector<8x2048xf32>
    %c18_97 = arith.constant 18 : index
    %c0_98 = arith.constant 0 : index
    %170 = vector.load %arg3[%c18_97, %c0_98] : memref<27x2048xf32, #tpu.memory_space<vmem>>, vector<1x2048xf32>
    %171 = vector.broadcast %170 : vector<1x2048xf32> to vector<8x2048xf32>
    %172 = arith.mulf %169, %171 : vector<8x2048xf32>
    %173 = arith.addf %164, %172 : vector<8x2048xf32>
    %c1808_i32 = arith.constant 1808 : i32
    %174 = tpu.dynamic_rotate %2 by %c1808_i32 dim 1 : vector<16x2048xf32>, i32 -> vector<16x2048xf32>
    %c19 = arith.constant 19 : index
    %c0_99 = arith.constant 0 : index
    %c0_100 = arith.constant 0 : index
    %175 = vector.load %arg4[%c19, %c0_99, %c0_100] : memref<27x8x16xbf16, #tpu.memory_space<vmem>>, vector<1x8x16xbf16>
    %176 = vector.shape_cast %175 : vector<1x8x16xbf16> to vector<8x16xbf16>
    %177 = arith.truncf %174 : vector<16x2048xf32> to vector<16x2048xbf16>
    %cst_101 = arith.constant dense<0.000000e+00> : vector<8x2048xf32>
    %178 = tpu.matmul %176, %177, %cst_101 {dimension_numbers = #tpu.dot_dimension_numbers<[1], [0], [0], [1], [0, 0, 1, 1], [], []>} : vector<8x16xbf16>, vector<16x2048xbf16>, vector<8x2048xf32> -> vector<8x2048xf32>
    %c19_102 = arith.constant 19 : index
    %c0_103 = arith.constant 0 : index
    %179 = vector.load %arg3[%c19_102, %c0_103] : memref<27x2048xf32, #tpu.memory_space<vmem>>, vector<1x2048xf32>
    %180 = vector.broadcast %179 : vector<1x2048xf32> to vector<8x2048xf32>
    %181 = arith.mulf %178, %180 : vector<8x2048xf32>
    %182 = arith.addf %173, %181 : vector<8x2048xf32>
    %c1807_i32 = arith.constant 1807 : i32
    %183 = tpu.dynamic_rotate %2 by %c1807_i32 dim 1 : vector<16x2048xf32>, i32 -> vector<16x2048xf32>
    %c20 = arith.constant 20 : index
    %c0_104 = arith.constant 0 : index
    %c0_105 = arith.constant 0 : index
    %184 = vector.load %arg4[%c20, %c0_104, %c0_105] : memref<27x8x16xbf16, #tpu.memory_space<vmem>>, vector<1x8x16xbf16>
    %185 = vector.shape_cast %184 : vector<1x8x16xbf16> to vector<8x16xbf16>
    %186 = arith.truncf %183 : vector<16x2048xf32> to vector<16x2048xbf16>
    %cst_106 = arith.constant dense<0.000000e+00> : vector<8x2048xf32>
    %187 = tpu.matmul %185, %186, %cst_106 {dimension_numbers = #tpu.dot_dimension_numbers<[1], [0], [0], [1], [0, 0, 1, 1], [], []>} : vector<8x16xbf16>, vector<16x2048xbf16>, vector<8x2048xf32> -> vector<8x2048xf32>
    %c20_107 = arith.constant 20 : index
    %c0_108 = arith.constant 0 : index
    %188 = vector.load %arg3[%c20_107, %c0_108] : memref<27x2048xf32, #tpu.memory_space<vmem>>, vector<1x2048xf32>
    %189 = vector.broadcast %188 : vector<1x2048xf32> to vector<8x2048xf32>
    %190 = arith.mulf %187, %189 : vector<8x2048xf32>
    %191 = arith.addf %182, %190 : vector<8x2048xf32>
    %c1793_i32 = arith.constant 1793 : i32
    %192 = tpu.dynamic_rotate %2 by %c1793_i32 dim 1 : vector<16x2048xf32>, i32 -> vector<16x2048xf32>
    %c21 = arith.constant 21 : index
    %c0_109 = arith.constant 0 : index
    %c0_110 = arith.constant 0 : index
    %193 = vector.load %arg4[%c21, %c0_109, %c0_110] : memref<27x8x16xbf16, #tpu.memory_space<vmem>>, vector<1x8x16xbf16>
    %194 = vector.shape_cast %193 : vector<1x8x16xbf16> to vector<8x16xbf16>
    %195 = arith.truncf %192 : vector<16x2048xf32> to vector<16x2048xbf16>
    %cst_111 = arith.constant dense<0.000000e+00> : vector<8x2048xf32>
    %196 = tpu.matmul %194, %195, %cst_111 {dimension_numbers = #tpu.dot_dimension_numbers<[1], [0], [0], [1], [0, 0, 1, 1], [], []>} : vector<8x16xbf16>, vector<16x2048xbf16>, vector<8x2048xf32> -> vector<8x2048xf32>
    %c21_112 = arith.constant 21 : index
    %c0_113 = arith.constant 0 : index
    %197 = vector.load %arg3[%c21_112, %c0_113] : memref<27x2048xf32, #tpu.memory_space<vmem>>, vector<1x2048xf32>
    %198 = vector.broadcast %197 : vector<1x2048xf32> to vector<8x2048xf32>
    %199 = arith.mulf %196, %198 : vector<8x2048xf32>
    %200 = arith.addf %191, %199 : vector<8x2048xf32>
    %c1792_i32 = arith.constant 1792 : i32
    %201 = tpu.dynamic_rotate %2 by %c1792_i32 dim 1 : vector<16x2048xf32>, i32 -> vector<16x2048xf32>
    %c22 = arith.constant 22 : index
    %c0_114 = arith.constant 0 : index
    %c0_115 = arith.constant 0 : index
    %202 = vector.load %arg4[%c22, %c0_114, %c0_115] : memref<27x8x16xbf16, #tpu.memory_space<vmem>>, vector<1x8x16xbf16>
    %203 = vector.shape_cast %202 : vector<1x8x16xbf16> to vector<8x16xbf16>
    %204 = arith.truncf %201 : vector<16x2048xf32> to vector<16x2048xbf16>
    %cst_116 = arith.constant dense<0.000000e+00> : vector<8x2048xf32>
    %205 = tpu.matmul %203, %204, %cst_116 {dimension_numbers = #tpu.dot_dimension_numbers<[1], [0], [0], [1], [0, 0, 1, 1], [], []>} : vector<8x16xbf16>, vector<16x2048xbf16>, vector<8x2048xf32> -> vector<8x2048xf32>
    %c22_117 = arith.constant 22 : index
    %c0_118 = arith.constant 0 : index
    %206 = vector.load %arg3[%c22_117, %c0_118] : memref<27x2048xf32, #tpu.memory_space<vmem>>, vector<1x2048xf32>
    %207 = vector.broadcast %206 : vector<1x2048xf32> to vector<8x2048xf32>
    %208 = arith.mulf %205, %207 : vector<8x2048xf32>
    %209 = arith.addf %200, %208 : vector<8x2048xf32>
    %c1791_i32 = arith.constant 1791 : i32
    %210 = tpu.dynamic_rotate %2 by %c1791_i32 dim 1 : vector<16x2048xf32>, i32 -> vector<16x2048xf32>
    %c23 = arith.constant 23 : index
    %c0_119 = arith.constant 0 : index
    %c0_120 = arith.constant 0 : index
    %211 = vector.load %arg4[%c23, %c0_119, %c0_120] : memref<27x8x16xbf16, #tpu.memory_space<vmem>>, vector<1x8x16xbf16>
    %212 = vector.shape_cast %211 : vector<1x8x16xbf16> to vector<8x16xbf16>
    %213 = arith.truncf %210 : vector<16x2048xf32> to vector<16x2048xbf16>
    %cst_121 = arith.constant dense<0.000000e+00> : vector<8x2048xf32>
    %214 = tpu.matmul %212, %213, %cst_121 {dimension_numbers = #tpu.dot_dimension_numbers<[1], [0], [0], [1], [0, 0, 1, 1], [], []>} : vector<8x16xbf16>, vector<16x2048xbf16>, vector<8x2048xf32> -> vector<8x2048xf32>
    %c23_122 = arith.constant 23 : index
    %c0_123 = arith.constant 0 : index
    %215 = vector.load %arg3[%c23_122, %c0_123] : memref<27x2048xf32, #tpu.memory_space<vmem>>, vector<1x2048xf32>
    %216 = vector.broadcast %215 : vector<1x2048xf32> to vector<8x2048xf32>
    %217 = arith.mulf %214, %216 : vector<8x2048xf32>
    %218 = arith.addf %209, %217 : vector<8x2048xf32>
    %c1777_i32 = arith.constant 1777 : i32
    %219 = tpu.dynamic_rotate %2 by %c1777_i32 dim 1 : vector<16x2048xf32>, i32 -> vector<16x2048xf32>
    %c24 = arith.constant 24 : index
    %c0_124 = arith.constant 0 : index
    %c0_125 = arith.constant 0 : index
    %220 = vector.load %arg4[%c24, %c0_124, %c0_125] : memref<27x8x16xbf16, #tpu.memory_space<vmem>>, vector<1x8x16xbf16>
    %221 = vector.shape_cast %220 : vector<1x8x16xbf16> to vector<8x16xbf16>
    %222 = arith.truncf %219 : vector<16x2048xf32> to vector<16x2048xbf16>
    %cst_126 = arith.constant dense<0.000000e+00> : vector<8x2048xf32>
    %223 = tpu.matmul %221, %222, %cst_126 {dimension_numbers = #tpu.dot_dimension_numbers<[1], [0], [0], [1], [0, 0, 1, 1], [], []>} : vector<8x16xbf16>, vector<16x2048xbf16>, vector<8x2048xf32> -> vector<8x2048xf32>
    %c24_127 = arith.constant 24 : index
    %c0_128 = arith.constant 0 : index
    %224 = vector.load %arg3[%c24_127, %c0_128] : memref<27x2048xf32, #tpu.memory_space<vmem>>, vector<1x2048xf32>
    %225 = vector.broadcast %224 : vector<1x2048xf32> to vector<8x2048xf32>
    %226 = arith.mulf %223, %225 : vector<8x2048xf32>
    %227 = arith.addf %218, %226 : vector<8x2048xf32>
    %c1776_i32 = arith.constant 1776 : i32
    %228 = tpu.dynamic_rotate %2 by %c1776_i32 dim 1 : vector<16x2048xf32>, i32 -> vector<16x2048xf32>
    %c25 = arith.constant 25 : index
    %c0_129 = arith.constant 0 : index
    %c0_130 = arith.constant 0 : index
    %229 = vector.load %arg4[%c25, %c0_129, %c0_130] : memref<27x8x16xbf16, #tpu.memory_space<vmem>>, vector<1x8x16xbf16>
    %230 = vector.shape_cast %229 : vector<1x8x16xbf16> to vector<8x16xbf16>
    %231 = arith.truncf %228 : vector<16x2048xf32> to vector<16x2048xbf16>
    %cst_131 = arith.constant dense<0.000000e+00> : vector<8x2048xf32>
    %232 = tpu.matmul %230, %231, %cst_131 {dimension_numbers = #tpu.dot_dimension_numbers<[1], [0], [0], [1], [0, 0, 1, 1], [], []>} : vector<8x16xbf16>, vector<16x2048xbf16>, vector<8x2048xf32> -> vector<8x2048xf32>
    %c25_132 = arith.constant 25 : index
    %c0_133 = arith.constant 0 : index
    %233 = vector.load %arg3[%c25_132, %c0_133] : memref<27x2048xf32, #tpu.memory_space<vmem>>, vector<1x2048xf32>
    %234 = vector.broadcast %233 : vector<1x2048xf32> to vector<8x2048xf32>
    %235 = arith.mulf %232, %234 : vector<8x2048xf32>
    %236 = arith.addf %227, %235 : vector<8x2048xf32>
    %c1775_i32 = arith.constant 1775 : i32
    %237 = tpu.dynamic_rotate %2 by %c1775_i32 dim 1 : vector<16x2048xf32>, i32 -> vector<16x2048xf32>
    %c26 = arith.constant 26 : index
    %c0_134 = arith.constant 0 : index
    %c0_135 = arith.constant 0 : index
    %238 = vector.load %arg4[%c26, %c0_134, %c0_135] : memref<27x8x16xbf16, #tpu.memory_space<vmem>>, vector<1x8x16xbf16>
    %239 = vector.shape_cast %238 : vector<1x8x16xbf16> to vector<8x16xbf16>
    %240 = arith.truncf %237 : vector<16x2048xf32> to vector<16x2048xbf16>
    %cst_136 = arith.constant dense<0.000000e+00> : vector<8x2048xf32>
    %241 = tpu.matmul %239, %240, %cst_136 {dimension_numbers = #tpu.dot_dimension_numbers<[1], [0], [0], [1], [0, 0, 1, 1], [], []>} : vector<8x16xbf16>, vector<16x2048xbf16>, vector<8x2048xf32> -> vector<8x2048xf32>
    %c26_137 = arith.constant 26 : index
    %c0_138 = arith.constant 0 : index
    %242 = vector.load %arg3[%c26_137, %c0_138] : memref<27x2048xf32, #tpu.memory_space<vmem>>, vector<1x2048xf32>
    %243 = vector.broadcast %242 : vector<1x2048xf32> to vector<8x2048xf32>
    %244 = arith.mulf %241, %243 : vector<8x2048xf32>
    %245 = arith.addf %236, %244 : vector<8x2048xf32>
    %c0_139 = arith.constant 0 : index
    %c0_140 = arith.constant 0 : index
    %246 = vector.load %arg5[%c0_139, %c0_140] : memref<8x1xf32, #tpu.memory_space<vmem>>, vector<8x1xf32>
    %247 = vector.broadcast %246 : vector<8x1xf32> to vector<8x2048xf32>
    %248 = arith.addf %245, %247 : vector<8x2048xf32>
    %cst_141 = arith.constant 0.000000e+00 : f32
    %249 = vector.broadcast %cst_141 : f32 to vector<8x2048xf32>
    %250 = arith.maximumf %248, %249 : vector<8x2048xf32>
    %c0_142 = arith.constant 0 : index
    %c0_143 = arith.constant 0 : index
    %251 = vector.load %arg9[%c0_142, %c0_143] : memref<8x2048xf32, #tpu.memory_space<vmem>>, vector<8x2048xf32>
    tpu.vector_store %arg9[%c0_142, %c0_143], %250 {strides = array<i32>} : memref<8x2048xf32, #tpu.memory_space<vmem>>, vector<8x2048xf32>,
    %c0_144 = arith.constant 0 : index
    %c0_145 = arith.constant 0 : index
    %252 = vector.load %arg6[%c0_144, %c0_145] : memref<8x8xbf16, #tpu.memory_space<vmem>>, vector<8x8xbf16>
    %253 = arith.truncf %250 : vector<8x2048xf32> to vector<8x2048xbf16>
    %cst_146 = arith.constant dense<0.000000e+00> : vector<8x2048xf32>
    %254 = tpu.matmul %252, %253, %cst_146 {dimension_numbers = #tpu.dot_dimension_numbers<[1], [0], [0], [1], [0, 0, 1, 1], [], []>} : vector<8x8xbf16>, vector<8x2048xbf16>, vector<8x2048xf32> -> vector<8x2048xf32>
    %c0_147 = arith.constant 0 : index
    %c0_148 = arith.constant 0 : index
    %255 = vector.load %arg7[%c0_147, %c0_148] : memref<8x1xf32, #tpu.memory_space<vmem>>, vector<8x1xf32>
    %256 = vector.broadcast %255 : vector<8x1xf32> to vector<8x2048xf32>
    %257 = arith.addf %254, %256 : vector<8x2048xf32>
    %c0_149 = arith.constant 0 : index
    %c0_150 = arith.constant 0 : index
    %258 = vector.load %arg8[%c0_149, %c0_150] : memref<8x2048xf32, #tpu.memory_space<vmem>>, vector<8x2048xf32>
    tpu.vector_store %arg8[%c0_149, %c0_150], %257 {strides = array<i32>} : memref<8x2048xf32, #tpu.memory_space<vmem>>, vector<8x2048xf32>,
    return
  }
  func.func @transform_0(%arg0: i32) -> (i32, i32) {
    %c0_i32 = arith.constant 0 : i32
    %c0_i32_0 = arith.constant 0 : i32
    %c0_i32_1 = arith.constant 0 : i32
    return %c0_i32, %c0_i32_0 : i32, i32
  }
  func.func @transform_1(%arg0: i32) -> (i32, i32) {
    %c0_i32 = arith.constant 0 : i32
    %c0_i32_0 = arith.constant 0 : i32
    %c0_i32_1 = arith.constant 0 : i32
    return %c0_i32, %c0_i32_0 : i32, i32
  }
  func.func @transform_2(%arg0: i32) -> (i32, i32) {
    %c0_i32 = arith.constant 0 : i32
    %c0_i32_0 = arith.constant 0 : i32
    %c0_i32_1 = arith.constant 0 : i32
    return %c0_i32, %c0_i32_0 : i32, i32
  }
  func.func @transform_3(%arg0: i32) -> (i32, i32, i32) {
    %c0_i32 = arith.constant 0 : i32
    %c0_i32_0 = arith.constant 0 : i32
    %c0_i32_1 = arith.constant 0 : i32
    %c0_i32_2 = arith.constant 0 : i32
    return %c0_i32, %c0_i32_0, %c0_i32_1 : i32, i32, i32
  }
  func.func @transform_4(%arg0: i32) -> (i32, i32) {
    %c0_i32 = arith.constant 0 : i32
    %c0_i32_0 = arith.constant 0 : i32
    %c0_i32_1 = arith.constant 0 : i32
    return %c0_i32, %c0_i32_0 : i32, i32
  }
  func.func @transform_5(%arg0: i32) -> (i32, i32) {
    %c0_i32 = arith.constant 0 : i32
    %c0_i32_0 = arith.constant 0 : i32
    %c0_i32_1 = arith.constant 0 : i32
    return %c0_i32, %c0_i32_0 : i32, i32
  }
  func.func @transform_6(%arg0: i32) -> (i32, i32) {
    %c0_i32 = arith.constant 0 : i32
    %c0_i32_0 = arith.constant 0 : i32
    %c0_i32_1 = arith.constant 0 : i32
    return %c0_i32, %c0_i32_0 : i32, i32
  }
  func.func @transform_7(%arg0: i32) -> (i32, i32) {
    %c0_i32 = arith.constant 0 : i32
    %c0_i32_0 = arith.constant 0 : i32
    %c0_i32_1 = arith.constant 0 : i32
    return %c0_i32, %c0_i32_0 : i32, i32
  }
  func.func @transform_8(%arg0: i32) -> (i32, i32) {
    %c0_i32 = arith.constant 0 : i32
    %c0_i32_0 = arith.constant 0 : i32
    %c0_i32_1 = arith.constant 0 : i32
    return %c0_i32, %c0_i32_0 : i32, i32
  }
}

</mosaic_0001>

<bundles_post_ra>
// kernel: _lambda_.1
= control target key start
LH: loop header
LB: loop body
LE: loop exit
PB: predicated region body
PF: predicated region fallthrough
CT: control target
= control target key end

     0   :  { %s14796_s21 = smov 17   ;;  %v20665_v34 = vmov 0   ;;  %s14798_s28 = smov 16   ;;  %v20660_v49 = vlaneseq  ;;  %vm177_vm1 = vcmask 130048   ;;  %vm13348_vm9 = vcmask 1043456   ;;  %s20651_s0 = inlined_call_operand.vmem [shape: f32[8,2048], index: 0, kind: input, shape index: {}, may-alias: {0,8}]   ;;  %s20652_s1 = inlined_call_operand.vmem [shape: f32[8,2048], index: 1, kind: input, shape index: {}]   ;;  %s20653_s3 = inlined_call_operand.vmem [shape: bf16[27,8,16], index: 3, kind: input, shape index: {}]   ;;  %s20654_s2 = inlined_call_operand.vmem [shape: f32[27,2048], index: 2, kind: input, shape index: {}]   ;;  %s20655_s4 = inlined_call_operand.vmem [shape: f32[8,1], index: 4, kind: input, shape index: {}]   ;;  %s20656_s6 = inlined_call_operand.vmem [shape: f32[8,1], index: 6, kind: input, shape index: {}]   ;;  %s20657_s8 = inlined_call_operand.vmem [shape: f32[8,2048], index: 8, kind: output, shape index: {1}, may-alias: {0,8}]   ;;  %s20658_s5 = inlined_call_operand.vmem [shape: bf16[8,8], index: 5, kind: input, shape index: {}]   ;;  %s20659_s7 = inlined_call_operand.vmem [shape: f32[8,2048], index: 7, kind: output, shape index: {0}]  }
   0x1   :  { %v43_v0 = vld [vmem:[%s20651_s0 + $0x70] sm:$0xff]  ;;  %v29_v2 = vld [vmem:[%s20651_s0] sm:$0xff]  ;;  %v44_v5 = vld [vmem:[%s20651_s0 + $0x78] sm:$0xff]  ;;  %254 = vmatprep.mubr.bf16.mxu1 %v20665_v34  ;;  %213 = vmatprep.mubr.bf16.mxu0 %v20665_v34  ;;  %s14800_s29 = smov 1   ;;  %s14801_s10 = smov 127   ;;  %vm13344_vm10 = vcmask 64512  }
   0x2   :  { %v59_v1 = vld [vmem:[%s20652_s1 + $0x70] sm:$0xff]  ;;  %v45_v4 = vld [vmem:[%s20652_s1] sm:$0xff]  ;;  %v60_v6 = vld [vmem:[%s20652_s1 + $0x78] sm:$0xff]  ;;  %14762 = vset.pattern.permute.xlu0 %v20665_v34  ;;  %14763 = vset.pattern.permute.xlu1 %v20665_v34  ;;  %v15067_v51 = vand.u32 127, %v20660_v49  ;;  %s14802_s11 = smov 113   ;;  %s14803_s20 = smov 112  }
   0x3   :  { %v14859_v3 = vpack.i.bf16 %v59_v1, %v43_v0  ;;  %v14870_v7 = vpack.i.bf16 %v45_v4, %v29_v2  ;;  %v30_v8 = vld [vmem:[%s20651_s0 + $0x8] sm:$0xff]  ;;  %v14880_v10 = vpack.i.bf16 %v60_v6, %v44_v5  ;;  %v31_v12 = vld [vmem:[%s20651_s0 + $0x10] sm:$0xff]  ;;  %v33_v18 = vld [vmem:[%s20651_s0 + $0x20] sm:$0xff] }
   0x4   :  { %v46_v9 = vld [vmem:[%s20652_s1 + $0x8] sm:$0xff]  ;;  %v47_v13 = vld [vmem:[%s20652_s1 + $0x10] sm:$0xff]  ;;  %v49_v19 = vld [vmem:[%s20652_s1 + $0x20] sm:$0xff]  ;;  %vm127_vm0 = vcmp.lt.s32.totalorder %v15067_v51, 17  ;;  %vm694_vm2 = vcmp.lt.s32.totalorder %v15067_v51, 16  ;;  %vm1262_vm3 = vcmp.lt.s32.totalorder %v15067_v51, 15 }
   0x5   :  { %14133 = vrot.lane.b32.xlu1 %v14859_v3, %s14796_s21  ;;  %14123 = vrot.lane.b32.xlu0 %v14870_v7, %s14796_s21  ;;  %v14884_v11 = vpack.i.bf16 %v46_v9, %v30_v8  ;;  %v42_v14 = vld [vmem:[%s20651_s0 + $0x68] sm:$0xff]  ;;  %v14900_v16 = vpack.i.bf16 %v47_v13, %v31_v12  ;;  %v32_v20 = vld [vmem:[%s20651_s0 + $0x18] sm:$0xff]  ;;  %v14920_v22 = vpack.i.bf16 %v49_v19, %v33_v18  ;;  %vm1830_vm4 = vcmp.lt.s32.totalorder %v15067_v51, 1 }
   0x6   :  { %v58_v15 = vld [vmem:[%s20652_s1 + $0x68] sm:$0xff]  ;;  %v48_v21 = vld [vmem:[%s20652_s1 + $0x18] sm:$0xff]  ;;  %v35_v24 = vld [vmem:[%s20651_s0 + $0x30] sm:$0xff]  ;;  %vm2869_vm5 = vcmp.lt.s32.totalorder %v15067_v51, 127  ;;  %vm3437_vm6 = vcmp.lt.s32.totalorder %v15067_v51, 113  ;;  %vm4005_vm7 = vcmp.lt.s32.totalorder %v15067_v51, 112 }
   0x7   :  { %v14904_v17 = vpack.i.bf16 %v58_v15, %v42_v14  ;;  %v14924_v23 = vpack.i.bf16 %v48_v21, %v32_v20  ;;  %v51_v25 = vld [vmem:[%s20652_s1 + $0x30] sm:$0xff]  ;;  %v34_v26 = vld [vmem:[%s20651_s0 + $0x28] sm:$0xff]  ;;  %v37_v30 = vld [vmem:[%s20651_s0 + $0x40] sm:$0xff]  ;;  %vm4573_vm8 = vcmp.lt.s32.totalorder %v15067_v51, 111 }
   0x8   :  { %v50_v27 = vld [vmem:[%s20652_s1 + $0x28] sm:$0xff]  ;;  %v14940_v28 = vpack.i.bf16 %v51_v25, %v35_v24  ;;  %v53_v31 = vld [vmem:[%s20652_s1 + $0x40] sm:$0xff]  ;;  %v36_v32 = vld [vmem:[%s20651_s0 + $0x38] sm:$0xff] }
   0x9   :  { %14138 = vrot.lane.b32.xlu1 %v14880_v10, %s14796_s21  ;;  %14128 = vrot.lane.b32.xlu0 %v14884_v11, %s14796_s21  ;;  %v14944_v29 = vpack.i.bf16 %v50_v27, %v34_v26  ;;  %v52_v33 = vld [vmem:[%s20652_s1 + $0x38] sm:$0xff]  ;;  %v14962_v35 = vpack.i.bf16 %v53_v31, %v37_v30  ;;  %v39_v37 = vld [vmem:[%s20651_s0 + $0x50] sm:$0xff] }
   0xa   :  { %v14967_v36 = vpack.i.bf16 %v52_v33, %v36_v32  ;;  %v55_v38 = vld [vmem:[%s20652_s1 + $0x50] sm:$0xff]  ;;  %v38_v39 = vld [vmem:[%s20651_s0 + $0x48] sm:$0xff]  ;;  %v41_v43 = vld [vmem:[%s20651_s0 + $0x60] sm:$0xff] }
   0xb   :  { %v54_v40 = vld [vmem:[%s20652_s1 + $0x48] sm:$0xff]  ;;  %v14984_v41 = vpack.i.bf16 %v55_v38, %v39_v37  ;;  %v57_v44 = vld [vmem:[%s20652_s1 + $0x60] sm:$0xff]  ;;  %v40_v45 = vld [vmem:[%s20651_s0 + $0x58] sm:$0xff] }
   0xc   :  { %v14988_v42 = vpack.i.bf16 %v54_v40, %v38_v39  ;;  %v56_v46 = vld [vmem:[%s20652_s1 + $0x58] sm:$0xff]  ;;  %v15004_v47 = vpack.i.bf16 %v57_v44, %v41_v43  ;;  %v15118_v25 = vld [vmem:[%s20653_s3] sm:$0xf] }
   0xd   :  { %14148 = vrot.lane.b32.xlu1 %v14900_v16, %s14796_s21  ;;  %14143 = vrot.lane.b32.xlu0 %v14904_v17, %s14796_s21  ;;  %v15008_v48 = vpack.i.bf16 %v56_v46, %v40_v45 }
  0x11   :  { %14158 = vrot.lane.b32.xlu1 %v14920_v22, %s14796_s21  ;;  %14153 = vrot.lane.b32.xlu0 %v14924_v23, %s14796_s21 }
  0x15   :  { %14168 = vrot.lane.b32.xlu1 %v14940_v28, %s14796_s21  ;;  %14163 = vrot.lane.b32.xlu0 %v14944_v29, %s14796_s21 }
  0x19   :  { %14178 = vrot.lane.b32.xlu1 %v14962_v35, %s14796_s21  ;;  %14173 = vrot.lane.b32.xlu0 %v14967_v36, %s14796_s21 }
  0x1d   :  { %14188 = vrot.lane.b32.xlu1 %v14984_v41, %s14796_s21  ;;  %14183 = vrot.lane.b32.xlu0 %v14988_v42, %s14796_s21 }
  0x21   :  { %14198 = vrot.lane.b32.xlu1 %v15004_v47, %s14796_s21  ;;  %14193 = vrot.lane.b32.xlu0 %v15008_v48, %s14796_s21  ;;  %s14799_s21 = smov 15  }
  0x25   :  { %14208 = vrot.lane.b32.xlu1 %v14884_v11, %s14798_s28  ;;  %14203 = vrot.lane.b32.xlu0 %v14870_v7, %s14798_s28 }
  0x29   :  { %14218 = vrot.lane.b32.xlu1 %v14880_v10, %s14798_s28  ;;  %14213 = vrot.lane.b32.xlu0 %v14859_v3, %s14798_s28 }
  0x2d   :  { %14228 = vrot.lane.b32.xlu1 %v14900_v16, %s14798_s28  ;;  %14223 = vrot.lane.b32.xlu0 %v14904_v17, %s14798_s28 }
  0x31   :  { %14238 = vrot.lane.b32.xlu1 %v14920_v22, %s14798_s28  ;;  %14233 = vrot.lane.b32.xlu0 %v14924_v23, %s14798_s28 }
  0x35   :  { %14248 = vrot.lane.b32.xlu1 %v14940_v28, %s14798_s28  ;;  %14243 = vrot.lane.b32.xlu0 %v14944_v29, %s14798_s28 }
  0x39   :  { %14258 = vrot.lane.b32.xlu1 %v14962_v35, %s14798_s28  ;;  %14253 = vrot.lane.b32.xlu0 %v14967_v36, %s14798_s28 }
  0x3d   :  { %14268 = vrot.lane.b32.xlu1 %v14984_v41, %s14798_s28  ;;  %14263 = vrot.lane.b32.xlu0 %v14988_v42, %s14798_s28 }
  0x41   :  { %14278 = vrot.lane.b32.xlu1 %v15004_v47, %s14798_s28  ;;  %14273 = vrot.lane.b32.xlu0 %v15008_v48, %s14798_s28 }
  0x45   :  { %14288 = vrot.lane.b32.xlu1 %v14884_v11, %s14799_s21  ;;  %14283 = vrot.lane.b32.xlu0 %v14870_v7, %s14799_s21 }
  0x49   :  { %14298 = vrot.lane.b32.xlu1 %v14880_v10, %s14799_s21  ;;  %14293 = vrot.lane.b32.xlu0 %v14859_v3, %s14799_s21 }
  0x4d   :  { %14308 = vrot.lane.b32.xlu1 %v14900_v16, %s14799_s21  ;;  %14303 = vrot.lane.b32.xlu0 %v14904_v17, %s14799_s21 }
  0x51   :  { %14318 = vrot.lane.b32.xlu1 %v14920_v22, %s14799_s21  ;;  %14313 = vrot.lane.b32.xlu0 %v14924_v23, %s14799_s21 }
  0x55   :  { %14328 = vrot.lane.b32.xlu1 %v14940_v28, %s14799_s21  ;;  %14323 = vrot.lane.b32.xlu0 %v14944_v29, %s14799_s21 }
  0x59   :  { %14338 = vrot.lane.b32.xlu1 %v14962_v35, %s14799_s21  ;;  %14333 = vrot.lane.b32.xlu0 %v14967_v36, %s14799_s21 }
  0x5d   :  { %14348 = vrot.lane.b32.xlu1 %v14984_v41, %s14799_s21  ;;  %14343 = vrot.lane.b32.xlu0 %v14988_v42, %s14799_s21 }
  0x61   :  { %14358 = vrot.lane.b32.xlu1 %v15004_v47, %s14799_s21  ;;  %14353 = vrot.lane.b32.xlu0 %v15008_v48, %s14799_s21 }
  0x65   :  { %14368 = vrot.lane.b32.xlu1 %v14884_v11, %s14800_s29  ;;  %14363 = vrot.lane.b32.xlu0 %v14870_v7, %s14800_s29 }
  0x69   :  { %14378 = vrot.lane.b32.xlu1 %v14880_v10, %s14800_s29  ;;  %14373 = vrot.lane.b32.xlu0 %v14859_v3, %s14800_s29 }
  0x6d   :  { %14388 = vrot.lane.b32.xlu1 %v14900_v16, %s14800_s29  ;;  %14383 = vrot.lane.b32.xlu0 %v14904_v17, %s14800_s29 }
  0x71   :  { %14398 = vrot.lane.b32.xlu1 %v14920_v22, %s14800_s29  ;;  %14393 = vrot.lane.b32.xlu0 %v14924_v23, %s14800_s29 }
  0x75   :  { %14408 = vrot.lane.b32.xlu1 %v14940_v28, %s14800_s29  ;;  %14403 = vrot.lane.b32.xlu0 %v14944_v29, %s14800_s29 }
  0x77   :  { %v14134_v50 = vpop.permute.xlu1 %14133  ;;  %v14124_v52 = vpop.permute.xlu0 %14123 }
  0x78   :  { %v14136_v53 = vunpack.i.h.bf16 %v14134_v50  ;;  %v14135_v54 = vunpack.i.l.bf16 %v14134_v50  ;;  %v14126_v56 = vunpack.i.h.bf16 %v14124_v52  ;;  %v14125_v57 = vunpack.i.l.bf16 %v14124_v52 }
  0x79   :  { %14418 = vrot.lane.b32.xlu1 %v14962_v35, %s14800_s29  ;;  %14413 = vrot.lane.b32.xlu0 %v14967_v36, %s14800_s29 }
  0x7b   :  { %v14139_v55 = vpop.permute.xlu1 %14138  ;;  %v14129_v60 = vpop.permute.xlu0 %14128 }
  0x7c   :  { %v14141_v58 = vunpack.i.h.bf16 %v14139_v55  ;;  %v14140_v59 = vunpack.i.l.bf16 %v14139_v55  ;;  %v14131_v61 = vunpack.i.h.bf16 %v14129_v60  ;;  %v14130_v62 = vunpack.i.l.bf16 %v14129_v60 }
  0x7d   :  { %14428 = vrot.lane.b32.xlu1 %v14984_v41, %s14800_s29  ;;  %14423 = vrot.lane.b32.xlu0 %v14988_v42, %s14800_s29 }
  0x7e   :  { %v128_v63 = vsel %vm127_vm0, %v14135_v54, %v14140_v59  ;;  %v129_v0 = vsel %vm127_vm0, %v14136_v53, %v14141_v58  ;;  %v158_v1 = vsel %vm127_vm0, %v14140_v59, %v14125_v57  ;;  %v159_v2 = vsel %vm127_vm0, %v14141_v58, %v14126_v56 }
  0x7f   :  { %v14149_v4 = vpop.permute.xlu1 %14148  ;;  %v15086_v5 = vpack.c.bf16 %v129_v0, %v128_v63  ;;  %v156_v6 = vsel %vm127_vm0, %v14125_v57, %v14130_v62  ;;  %v157_v8 = vsel %vm127_vm0, %v14126_v56, %v14131_v61  ;;  %v15092_v9 = vpack.c.bf16 %v159_v2, %v158_v1  ;;  %v15094_v12 = vpop.permute.xlu0 %14143 }
  0x80   :  { %v15096_v13 = vpack.c.bf16 %v157_v8, %v156_v6  ;;  %v14146_v14 = vunpack.i.h.bf16 %v15094_v12  ;;  %v14145_v15 = vunpack.i.l.bf16 %v15094_v12  ;;  %v14151_v18 = vunpack.i.h.bf16 %v14149_v4 }
  0x81   :  { %20954 = vst [vmem:[#allocation2_spill] sm:$0xff] %v15086_v5  ;;  %20955 = vst [vmem:[#allocation3_spill] sm:$0xff] %v15092_v9  ;;  %181 = vmatprep.subr.bf16.mxu0 %v15086_v5  ;;  %14438 = vrot.lane.b32.xlu1 %v15004_v47, %s14800_s29  ;;  %v14150_v19 = vunpack.i.l.bf16 %v14149_v4 }
  0x82   :  { %20956 = vst [vmem:[#allocation4_spill] sm:$0xff] %v15096_v13  ;;  %14433 = vrot.lane.b32.xlu0 %v15008_v48, %s14800_s29  ;;  %222 = vmatprep.subr.bf16.mxu1 %v15096_v13  ;;  %v130_v21 = vsel %vm127_vm0, %v14145_v15, %v14135_v54  ;;  %v131_v24 = vsel %vm127_vm0, %v14146_v14, %v14136_v53 }
  0x83   :  { %223 = vmatpush1.bf16.msra.mxu1 %v15092_v9  ;;  %v14159_v20 = vpop.permute.xlu1 %14158  ;;  %v14154_v26 = vpop.permute.xlu0 %14153  ;;  %v15120_v27 = vpack.c.bf16 %v131_v24, %v130_v21  ;;  %v154_v32 = vsel %vm127_vm0, %v14130_v62, %v14150_v19  ;;  %v155_v33 = vsel %vm127_vm0, %v14131_v61, %v14151_v18 }
  0x84   :  { %v14156_v30 = vunpack.i.h.bf16 %v14154_v26  ;;  %v14155_v31 = vunpack.i.l.bf16 %v14154_v26  ;;  %v14161_v37 = vunpack.i.h.bf16 %v14159_v20  ;;  %v14160_v38 = vunpack.i.l.bf16 %v14159_v20 }
  0x85   :  { %20957 = vst [vmem:[#allocation5_spill] sm:$0xff] %v15120_v27  ;;  %14448 = vrot.lane.b32.xlu1 %v14884_v11, %s14801_s10  ;;  %182 = vmatpush1.bf16.msra.mxu0 %v15120_v27  ;;  %v15142_v52 = vpack.c.bf16 %v155_v33, %v154_v32 }
  0x86   :  { %13750 = vmatmul.mubr.msk.bf16.vlgmr.msra.gmra.mrb[0].mxu1 %vm177_vm1, %v15118_v25  ;;  %v152_v40 = vsel %vm127_vm0, %v14150_v19, %v14155_v31  ;;  %v153_v43 = vsel %vm127_vm0, %v14151_v18, %v14156_v30  ;;  %14443 = vrot.lane.b32.xlu0 %v14870_v7, %s14801_s10  ;;  %v151_v53 = vsel %vm127_vm0, %v14156_v30, %v14161_v37 }
  0x87   :  { %v14169_v39 = vpop.permute.xlu1 %14168  ;;  %336 = vmatprep.mubr.bf16.mxu1 %v20665_v34  ;;  %v14164_v44 = vpop.permute.xlu0 %14163  ;;  %v15136_v45 = vpack.c.bf16 %v153_v43, %v152_v40  ;;  %20959 = vst [vmem:[#allocation7_spill] sm:$0xff] %v15142_v52  ;;  %v150_v54 = vsel %vm127_vm0, %v14155_v31, %v14160_v38 }
  0x88   :  { %v14166_v46 = vunpack.i.h.bf16 %v14164_v44  ;;  %v14165_v50 = vunpack.i.l.bf16 %v14164_v44  ;;  %13749 = vmatmul.mubr.msk.bf16.vlgmr.msra.gmra.mrb[0].mxu0 %vm177_vm1, %v15118_v25  ;;  %v14171_v55 = vunpack.i.h.bf16 %v14169_v39  ;;  %v14170_v56 = vunpack.i.l.bf16 %v14169_v39 }
  0x89   :  { %20958 = vst [vmem:[#allocation6_spill] sm:$0xff] %v15136_v45  ;;  %14458 = vrot.lane.b32.xlu1 %v14880_v10, %s14801_s10  ;;  %263 = vmatprep.subr.bf16.mxu0 %v15136_v45  ;;  %v15161_v0 = vpack.c.bf16 %v151_v53, %v150_v54 }
  0x8a   :  { %295 = vmatprep.mubr.bf16.mxu0 %v20665_v34  ;;  %264 = vmatpush1.bf16.msra.mxu0 %v15142_v52  ;;  %v148_v58 = vsel %vm127_vm0, %v14160_v38, %v14165_v50  ;;  %v149_v59 = vsel %vm127_vm0, %v14161_v37, %v14166_v46  ;;  %v147_v1 = vsel %vm127_vm0, %v14166_v46, %v14171_v55 }
  0x8b   :  { %v14179_v57 = vpop.permute.xlu1 %14178  ;;  %v14174_v60 = vpop.permute.xlu0 %14173  ;;  %v15157_v61 = vpack.c.bf16 %v149_v59, %v148_v58  ;;  %14453 = vrot.lane.b32.xlu0 %v14900_v16, %s14801_s10  ;;  %20961 = vst [vmem:[#allocation9_spill] sm:$0xff] %v15161_v0  ;;  %v146_v2 = vsel %vm127_vm0, %v14165_v50, %v14170_v56 }
  0x8c   :  { %v14176_v62 = vunpack.i.h.bf16 %v14174_v60  ;;  %v14175_v63 = vunpack.i.l.bf16 %v14174_v60  ;;  %v14181_v4 = vunpack.i.h.bf16 %v14179_v57  ;;  %v14180_v6 = vunpack.i.l.bf16 %v14179_v57 }
  0x8d   :  { %20960 = vst [vmem:[#allocation8_spill] sm:$0xff] %v15157_v61  ;;  %14468 = vrot.lane.b32.xlu1 %v14924_v23, %s14801_s10  ;;  %304 = vmatprep.subr.bf16.mxu1 %v15157_v61  ;;  %v15181_v30 = vpack.c.bf16 %v147_v1, %v146_v2  ;;  %v15908_v61 = vld [vmem:[%s20651_s0 + $0x30] sm:$0xff] }
  0x8e   :  { %305 = vmatpush1.bf16.msra.mxu1 %v15161_v0  ;;  %v144_v18 = vsel %vm127_vm0, %v14170_v56, %v14175_v63  ;;  %v145_v19 = vsel %vm127_vm0, %v14171_v55, %v14176_v62  ;;  %v143_v31 = vsel %vm127_vm0, %v14176_v62, %v14181_v4  ;;  %v142_v32 = vsel %vm127_vm0, %v14175_v63, %v14180_v6 }
  0x8f   :  { %v14189_v8 = vpop.permute.xlu1 %14188  ;;  %v14184_v20 = vpop.permute.xlu0 %14183  ;;  %v15175_v21 = vpack.c.bf16 %v145_v19, %v144_v18  ;;  %14463 = vrot.lane.b32.xlu0 %v14859_v3, %s14801_s10  ;;  %20963 = vst [vmem:[#allocation11_spill] sm:$0xff] %v15181_v30  ;;  %v15202_v55 = vpack.c.bf16 %v143_v31, %v142_v32 }
  0x90   :  { %v14186_v24 = vunpack.i.h.bf16 %v14184_v20  ;;  %v14185_v26 = vunpack.i.l.bf16 %v14184_v20  ;;  %13751 = vmatmul.mubr.msk.bf16.vlgmr.msra.gmra.mrb[4].mxu0 %vm177_vm1, %v15118_v25  ;;  %v14191_v33 = vunpack.i.h.bf16 %v14189_v8  ;;  %v14190_v37 = vunpack.i.l.bf16 %v14189_v8 }
  0x91   :  { %20962 = vst [vmem:[#allocation10_spill] sm:$0xff] %v15175_v21  ;;  %14478 = vrot.lane.b32.xlu1 %v14944_v29, %s14801_s10  ;;  %13752 = vmatmul.mubr.msk.bf16.vlgmr.msra.gmra.mrb[4].mxu1 %vm177_vm1, %v15118_v25  ;;  %20965 = vst [vmem:[#allocation13_spill] sm:$0xff] %v15202_v55 }
  0x92   :  { %345 = vmatprep.subr.bf16.mxu0 %v15175_v21  ;;  %v140_v39 = vsel %vm127_vm0, %v14180_v6, %v14185_v26  ;;  %v141_v40 = vsel %vm127_vm0, %v14181_v4, %v14186_v24  ;;  %377 = vmatprep.mubr.bf16.mxu0 %v20665_v34  ;;  %v139_v56 = vsel %vm127_vm0, %v14186_v24, %v14191_v33 }
  0x93   :  { %346 = vmatpush1.bf16.msra.mxu0 %v15181_v30  ;;  %v14199_v38 = vpop.permute.xlu1 %14198  ;;  %v14194_v46 = vpop.permute.xlu0 %14193  ;;  %v15198_v50 = vpack.c.bf16 %v141_v40, %v140_v39  ;;  %418 = vmatprep.mubr.bf16.mxu1 %v20665_v34  ;;  %v138_v57 = vsel %vm127_vm0, %v14185_v26, %v14190_v37  ;;  %v15875_v30 = vld [vmem:[%s20653_s3 + $0xc] sm:$0xf] }
  0x94   :  { %v14201_v43 = vunpack.i.h.bf16 %v14199_v38  ;;  %v14200_v44 = vunpack.i.l.bf16 %v14199_v38  ;;  %v14196_v53 = vunpack.i.h.bf16 %v14194_v46  ;;  %v14195_v54 = vunpack.i.l.bf16 %v14194_v46  ;;  %14473 = vrot.lane.b32.xlu0 %v14920_v22, %s14801_s10 }
  0x95   :  { %20964 = vst [vmem:[#allocation12_spill] sm:$0xff] %v15198_v50  ;;  %14488 = vrot.lane.b32.xlu1 %v14967_v36, %s14801_s10  ;;  %386 = vmatprep.subr.bf16.mxu1 %v15198_v50  ;;  %v15240_v19 = vpack.c.bf16 %v139_v56, %v138_v57 }
  0x96   :  { %v132_v58 = vsel %vm127_vm0, %v14200_v44, %v14145_v15  ;;  %v133_v59 = vsel %vm127_vm0, %v14201_v43, %v14146_v14  ;;  %v135_v60 = vsel %vm127_vm0, %v14196_v53, %v14201_v43  ;;  %v134_v62 = vsel %vm127_vm0, %v14195_v54, %v14200_v44  ;;  %387 = vmatpush1.bf16.msra.mxu1 %v15202_v55 }
  0x97   :  { %v15226_v63 = vpop.permute.xlu1 %14208  ;;  %v136_v1 = vsel %vm127_vm0, %v14190_v37, %v14195_v54  ;;  %v137_v15 = vsel %vm127_vm0, %v14191_v33, %v14196_v53  ;;  %v14204_v2 = vpop.permute.xlu0 %14203  ;;  %v15236_v6 = vpack.c.bf16 %v133_v59, %v132_v58  ;;  %20968 = vst [vmem:[#allocation16_spill] sm:$0xff] %v15240_v19  ;;  %v15242_v20 = vpack.c.bf16 %v135_v60, %v134_v62 }
  0x98   :  { %v14211_v12 = vunpack.i.h.bf16 %v15226_v63  ;;  %v14210_v14 = vunpack.i.l.bf16 %v15226_v63  ;;  %v15234_v4 = vpack.c.bf16 %v137_v15, %v136_v1  ;;  %v14206_v8 = vunpack.i.h.bf16 %v14204_v2  ;;  %13753 = vmatmul.mubr.msk.bf16.vlgmr.msra.gmra.mrb[8].mxu0 %vm177_vm1, %v15118_v25  ;;  %14483 = vrot.lane.b32.xlu0 %v14940_v28, %s14801_s10 }
  0x99   :  { %20967 = vst [vmem:[#allocation15_spill] sm:$0xff] %v15236_v6  ;;  %v14205_v18 = vunpack.i.l.bf16 %v14204_v2  ;;  %20969 = vst [vmem:[#allocation17_spill] sm:$0xff] %v15242_v20  ;;  %14498 = vrot.lane.b32.xlu1 %v14988_v42, %s14801_s10  ;;  %13754 = vmatmul.mubr.msk.bf16.vlgmr.msra.gmra.mrb[8].mxu1 %vm177_vm1, %v15118_v25 }
  0x9a   :  { %20966 = vst [vmem:[#allocation14_spill] sm:$0xff] %v15234_v4  ;;  %427 = vmatprep.subr.bf16.mxu0 %v15234_v4  ;;  %468 = vmatprep.subr.bf16.mxu1 %v15236_v6  ;;  %v724_v31 = vsel %vm694_vm2, %v14206_v8, %v14211_v12 }
  0x9b   :  { %428 = vmatpush1.bf16.msra.mxu0 %v15240_v19  ;;  %v14219_v24 = vpop.permute.xlu1 %14218  ;;  %v723_v26 = vsel %vm694_vm2, %v14205_v18, %v14210_v14  ;;  %469 = vmatpush1.bf16.msra.mxu1 %v15242_v20  ;;  %v14214_v37 = vpop.permute.xlu0 %14213 }
  0x9c   :  { %v14221_v32 = vunpack.i.h.bf16 %v14219_v24  ;;  %v14220_v33 = vunpack.i.l.bf16 %v14219_v24  ;;  %v15256_v38 = vpack.c.bf16 %v724_v31, %v723_v26  ;;  %459 = vmatprep.mubr.bf16.mxu0 %v20665_v34  ;;  %v14216_v39 = vunpack.i.h.bf16 %v14214_v37  ;;  %500 = vmatprep.mubr.bf16.mxu1 %v20665_v34 }
  0x9d   :  { %v14215_v40 = vunpack.i.l.bf16 %v14214_v37  ;;  %14508 = vrot.lane.b32.xlu1 %v15008_v48, %s14801_s10  ;;  %14493 = vrot.lane.b32.xlu0 %v14962_v35, %s14801_s10  ;;  %v15313_v37 = vld [vmem:[%s20653_s3 + $0x4] sm:$0xf] }
  0x9e   :  { %20970 = vst [vmem:[#allocation18_spill] sm:$0xff] %v15256_v38  ;;  %v725_v43 = vsel %vm694_vm2, %v14220_v33, %v14205_v18  ;;  %v726_v44 = vsel %vm694_vm2, %v14221_v32, %v14206_v8  ;;  %789 = vmatprep.subr.bf16.mxu1 %v15256_v38  ;;  %v696_v54 = vsel %vm694_vm2, %v14216_v39, %v14221_v32 }
  0x9f   :  { %v14229_v46 = vpop.permute.xlu1 %14228  ;;  %v695_v53 = vsel %vm694_vm2, %v14215_v40, %v14220_v33  ;;  %v15273_v56 = vpack.c.bf16 %v726_v44, %v725_v43  ;;  %v15275_v57 = vpop.permute.xlu0 %14223 }
  0xa0   :  { %v15277_v58 = vpack.c.bf16 %v696_v54, %v695_v53  ;;  %v14226_v59 = vunpack.i.h.bf16 %v15275_v57  ;;  %v14225_v60 = vunpack.i.l.bf16 %v15275_v57  ;;  %13755 = vmatmul.mubr.msk.bf16.vlgmr.msra.gmra.mrb[12].mxu0 %vm177_vm1, %v15118_v25  ;;  %v14231_v62 = vunpack.i.h.bf16 %v14229_v46 }
  0xa1   :  { %20971 = vst [vmem:[#allocation19_spill] sm:$0xff] %v15273_v56  ;;  %14518 = vrot.lane.b32.xlu1 %v14904_v17, %s14801_s10  ;;  %v14230_v63 = vunpack.i.l.bf16 %v14229_v46  ;;  %13756 = vmatmul.mubr.msk.bf16.vlgmr.msra.gmra.mrb[12].mxu1 %vm177_vm1, %v15118_v25 }
  0xa2   :  { %20972 = vst [vmem:[#allocation20_spill] sm:$0xff] %v15277_v58  ;;  %748 = vmatprep.subr.bf16.mxu0 %v15277_v58  ;;  %v697_v1 = vsel %vm694_vm2, %v14225_v60, %v14215_v40  ;;  %v698_v15 = vsel %vm694_vm2, %v14226_v59, %v14216_v39  ;;  %790 = vmatpush1.bf16.msra.mxu1 %v15273_v56 }
  0xa3   :  { %v14239_v2 = vpop.permute.xlu1 %14238  ;;  %780 = vmatprep.mubr.bf16.mxu0 %v20665_v34  ;;  %v14234_v8 = vpop.permute.xlu0 %14233  ;;  %v15298_v18 = vpack.c.bf16 %v698_v15, %v697_v1  ;;  %821 = vmatprep.mubr.bf16.mxu1 %v20665_v34  ;;  %v721_v26 = vsel %vm694_vm2, %v14210_v14, %v14230_v63  ;;  %v722_v31 = vsel %vm694_vm2, %v14211_v12, %v14231_v62 }
  0xa4   :  { %v14236_v25 = vunpack.i.h.bf16 %v14234_v8  ;;  %v14235_v24 = vunpack.i.l.bf16 %v14234_v8  ;;  %v14241_v32 = vunpack.i.h.bf16 %v14239_v2  ;;  %v14240_v33 = vunpack.i.l.bf16 %v14239_v2  ;;  %14503 = vrot.lane.b32.xlu0 %v14984_v41, %s14801_s10 }
  0xa5   :  { %20973 = vst [vmem:[#allocation21_spill] sm:$0xff] %v15298_v18  ;;  %14528 = vrot.lane.b32.xlu1 %v14884_v11, %s14802_s11  ;;  %749 = vmatpush1.bf16.msra.mxu0 %v15298_v18  ;;  %v15325_v46 = vpack.c.bf16 %v722_v31, %v721_v26 }
  0xa6   :  { %v719_v40 = vsel %vm694_vm2, %v14230_v63, %v14235_v24  ;;  %v720_v11 = vsel %vm694_vm2, %v14231_v62, %v14236_v25  ;;  %v718_v53 = vsel %vm694_vm2, %v14236_v25, %v14241_v32  ;;  %v717_v54 = vsel %vm694_vm2, %v14235_v24, %v14240_v33 }
  0xa7   :  { %v14249_v39 = vpop.permute.xlu1 %14248  ;;  %v14244_v14 = vpop.permute.xlu0 %14243  ;;  %v15319_v43 = vpack.c.bf16 %v720_v11, %v719_v40  ;;  %20975 = vst [vmem:[#allocation23_spill] sm:$0xff] %v15325_v46  ;;  %v15345_v24 = vpack.c.bf16 %v718_v53, %v717_v54 }
  0xa8   :  { %v14246_v12 = vunpack.i.h.bf16 %v14244_v14  ;;  %v14245_v44 = vunpack.i.l.bf16 %v14244_v14  ;;  %13760 = vmatmul.mubr.msk.bf16.vlgmr.msra.gmra.mrb[16].mxu0 %vm177_vm1, %v15313_v37  ;;  %v14251_v62 = vunpack.i.h.bf16 %v14249_v39  ;;  %v14250_v63 = vunpack.i.l.bf16 %v14249_v39  ;;  %14513 = vrot.lane.b32.xlu0 %v15004_v47, %s14801_s10 }
  0xa9   :  { %20974 = vst [vmem:[#allocation22_spill] sm:$0xff] %v15319_v43  ;;  %14538 = vrot.lane.b32.xlu1 %v14880_v10, %s14802_s11  ;;  %13761 = vmatmul.mubr.msk.bf16.vlgmr.msra.gmra.mrb[16].mxu1 %vm177_vm1, %v15313_v37  ;;  %20977 = vst [vmem:[#allocation25_spill] sm:$0xff] %v15345_v24 }
  0xaa   :  { %830 = vmatprep.subr.bf16.mxu0 %v15319_v43  ;;  %v715_v1 = vsel %vm694_vm2, %v14240_v33, %v14245_v44  ;;  %v716_v10 = vsel %vm694_vm2, %v14241_v32, %v14246_v12  ;;  %862 = vmatprep.mubr.bf16.mxu0 %v20665_v34  ;;  %v714_v26 = vsel %vm694_vm2, %v14246_v12, %v14251_v62 }
  0xab   :  { %831 = vmatpush1.bf16.msra.mxu0 %v15325_v46  ;;  %v14259_v41 = vpop.permute.xlu1 %14258  ;;  %v14254_v15 = vpop.permute.xlu0 %14253  ;;  %v15341_v2 = vpack.c.bf16 %v716_v10, %v715_v1  ;;  %903 = vmatprep.mubr.bf16.mxu1 %v20665_v34  ;;  %v713_v31 = vsel %vm694_vm2, %v14245_v44, %v14250_v63 }
  0xac   :  { %v14256_v8 = vunpack.i.h.bf16 %v14254_v15  ;;  %v14255_v25 = vunpack.i.l.bf16 %v14254_v15  ;;  %v14261_v32 = vunpack.i.h.bf16 %v14259_v41  ;;  %v14260_v33 = vunpack.i.l.bf16 %v14259_v41  ;;  %14523 = vrot.lane.b32.xlu0 %v14870_v7, %s14802_s11 }
  0xad   :  { %20976 = vst [vmem:[#allocation24_spill] sm:$0xff] %v15341_v2  ;;  %14548 = vrot.lane.b32.xlu1 %v14924_v23, %s14802_s11  ;;  %871 = vmatprep.subr.bf16.mxu1 %v15341_v2  ;;  %v15365_v44 = vpack.c.bf16 %v714_v26, %v713_v31 }
  0xae   :  { %872 = vmatpush1.bf16.msra.mxu1 %v15345_v24  ;;  %v711_v40 = vsel %vm694_vm2, %v14250_v63, %v14255_v25  ;;  %v712_v23 = vsel %vm694_vm2, %v14251_v62, %v14256_v8  ;;  %v710_v53 = vsel %vm694_vm2, %v14256_v8, %v14261_v32  ;;  %v709_v54 = vsel %vm694_vm2, %v14255_v25, %v14260_v33 }
  0xaf   :  { %v14269_v39 = vpop.permute.xlu1 %14268  ;;  %v14264_v47 = vpop.permute.xlu0 %14263  ;;  %v15361_v11 = vpack.c.bf16 %v712_v23, %v711_v40  ;;  %20979 = vst [vmem:[#allocation27_spill] sm:$0xff] %v15365_v44 }
  0xb0   :  { %v14266_v14 = vunpack.i.h.bf16 %v14264_v47  ;;  %v14265_v12 = vunpack.i.l.bf16 %v14264_v47  ;;  %13762 = vmatmul.mubr.msk.bf16.vlgmr.msra.gmra.mrb[20].mxu0 %vm177_vm1, %v15313_v37  ;;  %v14271_v62 = vunpack.i.h.bf16 %v14269_v39  ;;  %v14270_v63 = vunpack.i.l.bf16 %v14269_v39  ;;  %14533 = vrot.lane.b32.xlu0 %v14900_v16, %s14802_s11 }
  0xb1   :  { %20978 = vst [vmem:[#allocation26_spill] sm:$0xff] %v15361_v11  ;;  %14558 = vrot.lane.b32.xlu1 %v14944_v29, %s14802_s11  ;;  %13763 = vmatmul.mubr.msk.bf16.vlgmr.msra.gmra.mrb[20].mxu1 %vm177_vm1, %v15313_v37  ;;  %v15386_v39 = vpack.c.bf16 %v710_v53, %v709_v54 }
  0xb2   :  { %912 = vmatprep.subr.bf16.mxu0 %v15361_v11  ;;  %v707_v1 = vsel %vm694_vm2, %v14260_v33, %v14265_v12  ;;  %v708_v29 = vsel %vm694_vm2, %v14261_v32, %v14266_v14  ;;  %944 = vmatprep.mubr.bf16.mxu0 %v20665_v34  ;;  %v706_v32 = vsel %vm694_vm2, %v14266_v14, %v14271_v62 }
  0xb3   :  { %913 = vmatpush1.bf16.msra.mxu0 %v15365_v44  ;;  %v14279_v41 = vpop.permute.xlu1 %14278  ;;  %v14274_v8 = vpop.permute.xlu0 %14273  ;;  %v15382_v25 = vpack.c.bf16 %v708_v29, %v707_v1  ;;  %985 = vmatprep.mubr.bf16.mxu1 %v20665_v34  ;;  %20981 = vst [vmem:[#allocation29_spill] sm:$0xff] %v15386_v39  ;;  %v705_v33 = vsel %vm694_vm2, %v14265_v12, %v14270_v63 }
  0xb4   :  { %v14281_v10 = vunpack.i.h.bf16 %v14279_v41  ;;  %v14280_v15 = vunpack.i.l.bf16 %v14279_v41  ;;  %v14276_v26 = vunpack.i.h.bf16 %v14274_v8  ;;  %v14275_v31 = vunpack.i.l.bf16 %v14274_v8  ;;  %14543 = vrot.lane.b32.xlu0 %v14859_v3, %s14802_s11 }
  0xb5   :  { %20980 = vst [vmem:[#allocation28_spill] sm:$0xff] %v15382_v25  ;;  %14568 = vrot.lane.b32.xlu1 %v14967_v36, %s14802_s11  ;;  %953 = vmatprep.subr.bf16.mxu1 %v15382_v25  ;;  %v15424_v29 = vpack.c.bf16 %v706_v32, %v705_v33 }
  0xb6   :  { %v699_v40 = vsel %vm694_vm2, %v14280_v15, %v14225_v60  ;;  %v700_v7 = vsel %vm694_vm2, %v14281_v10, %v14226_v59  ;;  %v702_v36 = vsel %vm694_vm2, %v14276_v26, %v14281_v10  ;;  %v701_v23 = vsel %vm694_vm2, %v14275_v31, %v14280_v15  ;;  %954 = vmatpush1.bf16.msra.mxu1 %v15386_v39 }
  0xb7   :  { %v15410_v47 = vpop.permute.xlu1 %14288  ;;  %v703_v14 = vsel %vm694_vm2, %v14270_v63, %v14275_v31  ;;  %v704_v60 = vsel %vm694_vm2, %v14271_v62, %v14276_v26  ;;  %v14284_v12 = vpop.permute.xlu0 %14283  ;;  %v15420_v54 = vpack.c.bf16 %v700_v7, %v699_v40  ;;  %20984 = vst [vmem:[#allocation32_spill] sm:$0xff] %v15424_v29  ;;  %v15426_v63 = vpack.c.bf16 %v702_v36, %v701_v23 }
  0xb8   :  { %v14291_v57 = vunpack.i.h.bf16 %v15410_v47  ;;  %v14290_v59 = vunpack.i.l.bf16 %v15410_v47  ;;  %v15418_v53 = vpack.c.bf16 %v704_v60, %v703_v14  ;;  %v14286_v41 = vunpack.i.h.bf16 %v14284_v12  ;;  %13764 = vmatmul.mubr.msk.bf16.vlgmr.msra.gmra.mrb[24].mxu0 %vm177_vm1, %v15313_v37  ;;  %14553 = vrot.lane.b32.xlu0 %v14920_v22, %s14802_s11 }
  0xb9   :  { %20983 = vst [vmem:[#allocation31_spill] sm:$0xff] %v15420_v54  ;;  %v14285_v1 = vunpack.i.l.bf16 %v14284_v12  ;;  %20985 = vst [vmem:[#allocation33_spill] sm:$0xff] %v15426_v63  ;;  %13765 = vmatmul.mubr.msk.bf16.vlgmr.msra.gmra.mrb[24].mxu1 %vm177_vm1, %v15313_v37  ;;  %1035 = vmatprep.subr.bf16.mxu1 %v15420_v54  ;;  %v15672_v54 = vld [vmem:[%s20652_s1] sm:$0xff] }
  0xba   :  { %20982 = vst [vmem:[#allocation30_spill] sm:$0xff] %v15418_v53  ;;  %994 = vmatprep.subr.bf16.mxu0 %v15418_v53  ;;  %v1292_v15 = vsel %vm1262_vm3, %v14286_v41, %v14291_v57  ;;  %1036 = vmatpush1.bf16.msra.mxu1 %v15426_v63 }
  0xbb   :  { %995 = vmatpush1.bf16.msra.mxu0 %v15424_v29  ;;  %v14299_v62 = vpop.permute.xlu1 %14298  ;;  %v1291_v10 = vsel %vm1262_vm3, %v14285_v1, %v14290_v59  ;;  %v14294_v26 = vpop.permute.xlu0 %14293  ;;  %1026 = vmatprep.mubr.bf16.mxu0 %v20665_v34  ;;  %v21001_v29 = vmov 0  }
  0xbc   :  { %v14301_v16 = vunpack.i.h.bf16 %v14299_v62  ;;  %v14300_v8 = vunpack.i.l.bf16 %v14299_v62  ;;  %v15442_v31 = vpack.c.bf16 %v1292_v15, %v1291_v10  ;;  %v14296_v32 = vunpack.i.h.bf16 %v14294_v26  ;;  %1067 = vmatprep.mubr.bf16.mxu1 %v20665_v34  ;;  %14578 = vrot.lane.b32.xlu1 %v14988_v42, %s14802_s11 }
  0xbd   :  { %v14295_v33 = vunpack.i.l.bf16 %v14294_v26  ;;  %14563 = vrot.lane.b32.xlu0 %v14940_v28, %s14802_s11  ;;  %v15539_v28 = vld [vmem:[%s20652_s1 + $0x78] sm:$0xff] }
  0xbe   :  { %20986 = vst [vmem:[#allocation34_spill] sm:$0xff] %v15442_v31  ;;  %v1293_v40 = vsel %vm1262_vm3, %v14300_v8, %v14285_v1  ;;  %v1294_v7 = vsel %vm1262_vm3, %v14301_v16, %v14286_v41  ;;  %1357 = vmatprep.subr.bf16.mxu1 %v15442_v31  ;;  %v1264_v42 = vsel %vm1262_vm3, %v14296_v32, %v14301_v16 }
  0xbf   :  { %v15455_v36 = vpack.c.bf16 %v1294_v7, %v1293_v40  ;;  %v14309_v23 = vpop.permute.xlu1 %14308  ;;  %v1263_v14 = vsel %vm1262_vm3, %v14295_v33, %v14300_v8  ;;  %v15461_v60 = vpop.permute.xlu0 %14303 }
  0xc0   :  { %v15463_v12 = vpack.c.bf16 %v1264_v42, %v1263_v14  ;;  %v20661_v41 = vunpack.i.h.bf16 %v15461_v60  ;;  %v20662_v1 = vunpack.i.l.bf16 %v15461_v60  ;;  %13766 = vmatmul.mubr.msk.bf16.vlgmr.msra.gmra.mrb[28].mxu0 %vm177_vm1, %v15313_v37  ;;  %14588 = vrot.lane.b32.xlu1 %v15008_v48, %s14802_s11  ;;  %v14311_v3 = vunpack.i.h.bf16 %v14309_v23  ;;  %v15515_v14 = vld [vmem:[%s20653_s3 + $0x8] sm:$0xf] }
  0xc1   :  { %20987 = vst [vmem:[#allocation35_spill] sm:$0xff] %v15455_v36  ;;  %v14310_v62 = vunpack.i.l.bf16 %v14309_v23  ;;  %13767 = vmatmul.mubr.msk.bf16.vlgmr.msra.gmra.mrb[28].mxu1 %vm177_vm1, %v15313_v37  ;;  %1348 = vmatprep.mubr.bf16.mxu0 %v20665_v34  ;;  %v21003_v39 = vunpack.i.l.bf16 %v15461_v60  ;;  %v21004_v44 = vunpack.i.h.bf16 %v15461_v60 }
  0xc2   :  { %20988 = vst [vmem:[#allocation36_spill] sm:$0xff] %v15463_v12  ;;  %1316 = vmatprep.subr.bf16.mxu0 %v15463_v12  ;;  %v1265_v10 = vsel %vm1262_vm3, %v20662_v1, %v14295_v33  ;;  %v1266_v15 = vsel %vm1262_vm3, %v20661_v41, %v14296_v32  ;;  %1358 = vmatpush1.bf16.msra.mxu1 %v15455_v36  ;;  %v15494_v32 = vld [vmem:[%s20651_s0 + $0x8] sm:$0xff] }
  0xc3   :  { %v14319_v48 = vpop.permute.xlu1 %14318  ;;  %v15484_v16 = vpack.c.bf16 %v1266_v15, %v1265_v10  ;;  %v14314_v37 = vpop.permute.xlu0 %14313  ;;  %1389 = vmatprep.mubr.bf16.mxu1 %v20665_v34  ;;  %v15499_v33 = vld [vmem:[%s20652_s1 + $0x8] sm:$0xff]  ;;  %v1289_v22 = vsel %vm1262_vm3, %v14290_v59, %v14310_v62  ;;  %14573 = vrot.lane.b32.xlu0 %v14962_v35, %s14802_s11 }
  0xc4   :  { %v14316_v8 = vunpack.i.h.bf16 %v14314_v37  ;;  %v14315_v26 = vunpack.i.l.bf16 %v14314_v37  ;;  %14598 = vrot.lane.b32.xlu1 %v14904_v17, %s14802_s11  ;;  %v15503_v40 = vpack.i.bf16 %v15499_v33, %v15494_v32  ;;  %v1290_v17 = vsel %vm1262_vm3, %v14291_v57, %v14311_v3 }
  0xc5   :  { %20989 = vst [vmem:[#allocation37_spill] sm:$0xff] %v15484_v16  ;;  %v14321_v7 = vunpack.i.h.bf16 %v14319_v48  ;;  %v14320_v23 = vunpack.i.l.bf16 %v14319_v48  ;;  %1317 = vmatpush1.bf16.msra.mxu0 %v15484_v16  ;;  %v15525_v57 = vpack.c.bf16 %v1290_v17, %v1289_v22 }
  0xc6   :  { %v1287_v10 = vsel %vm1262_vm3, %v14310_v62, %v14315_v26  ;;  %v1288_v59 = vsel %vm1262_vm3, %v14311_v3, %v14316_v8  ;;  %v15534_v3 = vld [vmem:[%s20651_s0 + $0x78] sm:$0xff] }
  0xc7   :  { %v14329_v42 = vpop.permute.xlu1 %14328  ;;  %v14324_v47 = vpop.permute.xlu0 %14323  ;;  %v15521_v15 = vpack.c.bf16 %v1288_v59, %v1287_v10  ;;  %20991 = vst [vmem:[#allocation39_spill] sm:$0xff] %v15525_v57  ;;  %v15543_v62 = vpack.i.bf16 %v15539_v28, %v15534_v3  ;;  %v1286_v22 = vsel %vm1262_vm3, %v14316_v8, %v14321_v7  ;;  %v1285_v17 = vsel %vm1262_vm3, %v14315_v26, %v14320_v23 }
  0xc8   :  { %v14326_v48 = vunpack.i.h.bf16 %v14324_v47  ;;  %v14325_v37 = vunpack.i.l.bf16 %v14324_v47  ;;  %13773 = vmatmul.mubr.msk.bf16.vlgmr.msra.gmra.mrb[32].mxu0 %vm177_vm1, %v15515_v14  ;;  %14608 = vrot.lane.b32.xlu1 %v15503_v40, %s14803_s20  ;;  %v14331_v10 = vunpack.i.h.bf16 %v14329_v42  ;;  %v14330_v59 = vunpack.i.l.bf16 %v14329_v42 }
  0xc9   :  { %20990 = vst [vmem:[#allocation38_spill] sm:$0xff] %v15521_v15  ;;  %13774 = vmatmul.mubr.msk.bf16.vlgmr.msra.gmra.mrb[32].mxu1 %vm177_vm1, %v15515_v14  ;;  %1398 = vmatprep.subr.bf16.mxu0 %v15521_v15  ;;  %v15561_v26 = vpack.c.bf16 %v1286_v22, %v1285_v17 }
  0xca   :  { %1399 = vmatpush1.bf16.msra.mxu0 %v15525_v57  ;;  %v1283_v49 = vsel %vm1262_vm3, %v14320_v23, %v14325_v37  ;;  %v1284_v41 = vsel %vm1262_vm3, %v14321_v7, %v14326_v48  ;;  %1430 = vmatprep.mubr.bf16.mxu0 %v20665_v34  ;;  %v15570_v7 = vld [vmem:[%s20651_s0 + $0x50] sm:$0xff]  ;;  %v1282_v35 = vsel %vm1262_vm3, %v14326_v48, %v14331_v10  ;;  %v15596_v48 = vld [vmem:[%s20651_s0 + $0x18] sm:$0xff] }
  0xcb   :  { %v14339_v47 = vpop.permute.xlu1 %14338  ;;  %v14334_v8 = vpop.permute.xlu0 %14333  ;;  %v15557_v1 = vpack.c.bf16 %v1284_v41, %v1283_v49  ;;  %1471 = vmatprep.mubr.bf16.mxu1 %v20665_v34  ;;  %20993 = vst [vmem:[#allocation41_spill] sm:$0xff] %v15561_v26  ;;  %20994 = vst [vmem:[#allocation42_spill] sm:$0xff] %v15570_v7  ;;  %v15575_v49 = vld [vmem:[%s20652_s1 + $0x50] sm:$0xff]  ;;  %v1281_v23 = vsel %vm1262_vm3, %v14325_v37, %v14330_v59  ;;  %v15601_v37 = vld [vmem:[%s20652_s1 + $0x18] sm:$0xff] }
  0xcc   :  { %v14336_v42 = vunpack.i.h.bf16 %v14334_v8  ;;  %v14335_v16 = vunpack.i.l.bf16 %v14334_v8  ;;  %14618 = vrot.lane.b32.xlu1 %v15543_v62, %s14803_s20  ;;  %20995 = vst [vmem:[#allocation43_spill] sm:$0xff] %v15575_v49  ;;  %v15579_v41 = vpack.i.bf16 %v15575_v49, %v15570_v7  ;;  %v14341_v22 = vunpack.i.h.bf16 %v14339_v47 }
  0xcd   :  { %20992 = vst [vmem:[#allocation40_spill] sm:$0xff] %v15557_v1  ;;  %v14340_v17 = vunpack.i.l.bf16 %v14339_v47  ;;  %1439 = vmatprep.subr.bf16.mxu1 %v15557_v1  ;;  %v15605_v47 = vpack.i.bf16 %v15601_v37, %v15596_v48 }
  0xce   :  { %1440 = vmatpush1.bf16.msra.mxu1 %v15561_v26  ;;  %v1279_v34 = vsel %vm1262_vm3, %v14330_v59, %v14335_v16  ;;  %v1280_v12 = vsel %vm1262_vm3, %v14331_v10, %v14336_v42  ;;  %v15607_v59 = vpack.c.bf16 %v1282_v35, %v1281_v23  ;;  %14583 = vrot.lane.b32.xlu0 %v15579_v41, %s14802_s11 }
  0xcf   :  { %v14349_v8 = vpop.permute.xlu1 %14348  ;;  %v14344_v57 = vpop.permute.xlu0 %14343  ;;  %v15591_v36 = vpack.c.bf16 %v1280_v12, %v1279_v34  ;;  %v15616_v34 = vld [vmem:[%s20651_s0 + $0x60] sm:$0xff]  ;;  %v1277_v23 = vsel %vm1262_vm3, %v14335_v16, %v14340_v17 }
  0xd0   :  { %20997 = vst [vmem:[#allocation45_spill] sm:$0xff] %v15607_v59  ;;  %v14346_v10 = vunpack.i.h.bf16 %v14344_v57  ;;  %v14345_v26 = vunpack.i.l.bf16 %v14344_v57  ;;  %13775 = vmatmul.mubr.msk.bf16.vlgmr.msra.gmra.mrb[36].mxu0 %vm177_vm1, %v15515_v14  ;;  %20998 = vst [vmem:[#allocation46_spill] sm:$0xff] %v15616_v34  ;;  %v15621_v12 = vld [vmem:[%s20652_s1 + $0x60] sm:$0xff]  ;;  %v1278_v57 = vsel %vm1262_vm3, %v14336_v42, %v14341_v22  ;;  %v14351_v1 = vunpack.i.h.bf16 %v14349_v8  ;;  %14628 = vrot.lane.b32.xlu1 %v15605_v47, %s14803_s20 }
  0xd1   :  { %20996 = vst [vmem:[#allocation44_spill] sm:$0xff] %v15591_v36  ;;  %20999 = vst [vmem:[#allocation47_spill] sm:$0xff] %v15621_v12  ;;  %v15625_v35 = vpack.i.bf16 %v15621_v12, %v15616_v34  ;;  %v14350_v15 = vunpack.i.l.bf16 %v14349_v8  ;;  %13776 = vmatmul.mubr.msk.bf16.vlgmr.msra.gmra.mrb[36].mxu1 %vm177_vm1, %v15515_v14  ;;  %1480 = vmatprep.subr.bf16.mxu0 %v15591_v36  ;;  %v15667_v36 = vld [vmem:[%s20651_s0] sm:$0xff] }
  0xd2   :  { %1481 = vmatpush1.bf16.msra.mxu0 %v15607_v59  ;;  %v1275_v31 = vsel %vm1262_vm3, %v14340_v17, %v14345_v26  ;;  %v1276_v63 = vsel %vm1262_vm3, %v14341_v22, %v14346_v10  ;;  %1512 = vmatprep.mubr.bf16.mxu0 %v21001_v29  ;;  %v15647_v59 = vld [vmem:[%s20651_s0 + $0x28] sm:$0xff] }
  0xd3   :  { %v14359_v18 = vpop.permute.xlu1 %14358  ;;  %v14354_v58 = vpop.permute.xlu0 %14353  ;;  %v15640_v8 = vpack.c.bf16 %v1276_v63, %v1275_v31  ;;  %1553 = vmatprep.mubr.bf16.mxu1 %v21001_v29  ;;  %v15652_v22 = vld [vmem:[%s20652_s1 + $0x28] sm:$0xff]  ;;  %v15658_v63 = vpack.c.bf16 %v1278_v57, %v1277_v23  ;;  %14593 = vrot.lane.b32.xlu0 %v15625_v35, %s14802_s11  ;;  %v15676_v57 = vpack.i.bf16 %v15672_v54, %v15667_v36 }
  0xd4   :  { %v14361_v42 = vunpack.i.h.bf16 %v14359_v18  ;;  %v14360_v16 = vunpack.i.l.bf16 %v14359_v18  ;;  %v15656_v18 = vpack.i.bf16 %v15652_v22, %v15647_v59  ;;  %v14356_v31 = vunpack.i.h.bf16 %v14354_v58 }
  0xd5   :  { %21000 = vst [vmem:[#allocation48_spill] sm:$0xff] %v15640_v8  ;;  %21002 = vst [vmem:[#allocation49_spill] sm:$0xff] %v15658_v63  ;;  %v14355_v17 = vunpack.i.l.bf16 %v14354_v58  ;;  %v1274_v58 = vsel %vm1262_vm3, %v14346_v10, %v14351_v1  ;;  %v1273_v23 = vsel %vm1262_vm3, %v14345_v26, %v14350_v15  ;;  %1521 = vmatprep.subr.bf16.mxu1 %v15640_v8 }
  0xd6   :  { %v1267_v53 = vsel %vm1262_vm3, %v14360_v16, %v21003_v39  ;;  %v1268_v25 = vsel %vm1262_vm3, %v14361_v42, %v21004_v44  ;;  %v1270_v24 = vsel %vm1262_vm3, %v14356_v31, %v14361_v42  ;;  %1522 = vmatpush1.bf16.msra.mxu1 %v15658_v63  ;;  %v1272_v39 = vsel %vm1262_vm3, %v14351_v1, %v14356_v31  ;;  %v15727_v1 = vld [vmem:[%s20652_s1 + $0x38] sm:$0xff] }
  0xd7   :  { %v1269_v10 = vsel %vm1262_vm3, %v14355_v17, %v14360_v16  ;;  %v15696_v26 = vpop.permute.xlu1 %14368  ;;  %v1271_v8 = vsel %vm1262_vm3, %v14350_v15, %v14355_v17  ;;  %v14364_v42 = vpop.permute.xlu0 %14363  ;;  %v15708_v16 = vpack.c.bf16 %v1274_v58, %v1273_v23  ;;  %v15712_v15 = vpack.c.bf16 %v1268_v25, %v1267_v53  ;;  %14638 = vrot.lane.b32.xlu1 %v15656_v18, %s14803_s20 }
  0xd8   :  { %v15702_v60 = vpack.c.bf16 %v1270_v24, %v1269_v10  ;;  %v20715_v44 = vunpack.i.h.bf16 %v15696_v26  ;;  %v20716_v11 = vunpack.i.l.bf16 %v15696_v26  ;;  %v15706_v46 = vpack.c.bf16 %v1272_v39, %v1271_v8  ;;  %13777 = vmatmul.mubr.msk.bf16.vlgmr.msra.gmra.mrb[40].mxu0 %vm177_vm1, %v15515_v14  ;;  %v15722_v24 = vld [vmem:[%s20651_s0 + $0x38] sm:$0xff]  ;;  %14603 = vrot.lane.b32.xlu0 %v15676_v57, %s14803_s20 }
  0xd9   :  { %21007 = vst [vmem:[#allocation52_spill] sm:$0xff] %v15708_v16  ;;  %v14366_v63 = vunpack.i.h.bf16 %v14364_v42  ;;  %v14365_v2 = vunpack.i.l.bf16 %v14364_v42  ;;  %21008 = vst [vmem:[#allocation53_spill] sm:$0xff] %v15712_v15  ;;  %13778 = vmatmul.mubr.msk.bf16.vlgmr.msra.gmra.mrb[40].mxu1 %vm177_vm1, %v15515_v14  ;;  %v15731_v25 = vpack.i.bf16 %v15727_v1, %v15722_v24  ;;  %1603 = vmatprep.subr.bf16.mxu1 %v15712_v15  ;;  %v21016_v5 = vunpack.i.l.bf16 %v15696_v26 }
  0xda   :  { %21005 = vst [vmem:[#allocation50_spill] sm:$0xff] %v15702_v60  ;;  %21006 = vst [vmem:[#allocation51_spill] sm:$0xff] %v15706_v46  ;;  %1562 = vmatprep.subr.bf16.mxu0 %v15706_v46  ;;  %1604 = vmatpush1.bf16.msra.mxu1 %v15702_v60  ;;  %v15804_v46 = vld [vmem:[%s20651_s0 + $0x70] sm:$0xff]  ;;  %v21017_v19 = vunpack.i.h.bf16 %v15696_v26 }
  0xdb   :  { %1563 = vmatpush1.bf16.msra.mxu0 %v15708_v16  ;;  %v14379_v53 = vpop.permute.xlu1 %14378  ;;  %v1859_v8 = vsel %vm1830_vm4, %v14365_v2, %v20716_v11  ;;  %v1860_v31 = vsel %vm1830_vm4, %v14366_v63, %v20715_v44  ;;  %v14374_v23 = vpop.permute.xlu0 %14373  ;;  %1594 = vmatprep.mubr.bf16.mxu0 %v21001_v29  ;;  %v15753_v44 = vld [vmem:[%s20651_s0 + $0x10] sm:$0xff] }
  0xdc   :  { %v14381_v17 = vunpack.i.h.bf16 %v14379_v53  ;;  %v14380_v58 = vunpack.i.l.bf16 %v14379_v53  ;;  %v15744_v10 = vpack.c.bf16 %v1860_v31, %v1859_v8  ;;  %v14376_v39 = vunpack.i.h.bf16 %v14374_v23  ;;  %1635 = vmatprep.mubr.bf16.mxu1 %v21001_v29  ;;  %v15758_v53 = vld [vmem:[%s20652_s1 + $0x10] sm:$0xff]  ;;  %14648 = vrot.lane.b32.xlu1 %v15731_v25, %s14803_s20 }
  0xdd   :  { %v14375_v42 = vunpack.i.l.bf16 %v14374_v23  ;;  %v15762_v8 = vpack.i.bf16 %v15758_v53, %v15753_v44 }
  0xde   :  { %21009 = vst [vmem:[#allocation54_spill] sm:$0xff] %v15744_v10  ;;  %v1861_v31 = vsel %vm1830_vm4, %v14380_v58, %v14365_v2  ;;  %v1862_v23 = vsel %vm1830_vm4, %v14381_v17, %v14366_v63  ;;  %1925 = vmatprep.subr.bf16.mxu1 %v15744_v10  ;;  %v1832_v15 = vsel %vm1830_vm4, %v14376_v39, %v14381_v17  ;;  %v15780_v2 = vld [vmem:[%s20651_s0 + $0x48] sm:$0xff] }
  0xdf   :  { %v15771_v11 = vpack.c.bf16 %v1862_v23, %v1861_v31  ;;  %v14389_v60 = vpop.permute.xlu1 %14388  ;;  %v1831_v16 = vsel %vm1830_vm4, %v14375_v42, %v14380_v58  ;;  %v15785_v63 = vld [vmem:[%s20652_s1 + $0x48] sm:$0xff]  ;;  %v15791_v23 = vpop.permute.xlu0 %14383  ;;  %14613 = vrot.lane.b32.xlu0 %v15762_v8, %s14803_s20 }
  0xe0   :  { %v15789_v31 = vpack.i.bf16 %v15785_v63, %v15780_v2  ;;  %v15793_v58 = vpack.c.bf16 %v1832_v15, %v1831_v16  ;;  %13779 = vmatmul.mubr.msk.bf16.vlgmr.msra.gmra.mrb[44].mxu0 %vm177_vm1, %v15515_v14  ;;  %v15809_v16 = vld [vmem:[%s20652_s1 + $0x70] sm:$0xff]  ;;  %v14391_v17 = vunpack.i.h.bf16 %v14389_v60  ;;  %v14390_v10 = vunpack.i.l.bf16 %v14389_v60 }
  0xe1   :  { %21010 = vst [vmem:[#allocation55_spill] sm:$0xff] %v15771_v11  ;;  %v15813_v15 = vpack.i.bf16 %v15809_v16, %v15804_v46  ;;  %13780 = vmatmul.mubr.msk.bf16.vlgmr.msra.gmra.mrb[44].mxu1 %vm177_vm1, %v15515_v14  ;;  %v21012_v56 = vunpack.i.l.bf16 %v15791_v23  ;;  %v21013_v27 = vunpack.i.h.bf16 %v15791_v23  ;;  %v15832_v14 = vld [vmem:[%s20651_s0 + $0x58] sm:$0xff]  ;;  %1916 = vmatprep.mubr.bf16.mxu0 %v21001_v29 }
  0xe2   :  { %21011 = vst [vmem:[#allocation56_spill] sm:$0xff] %v15793_v58  ;;  %1884 = vmatprep.subr.bf16.mxu0 %v15793_v58  ;;  %1926 = vmatpush1.bf16.msra.mxu1 %v15771_v11  ;;  %v15852_v11 = vld [vmem:[%s20651_s0 + $0x20] sm:$0xff]  ;;  %v1858_v6 = vsel %vm1830_vm4, %v21017_v19, %v14391_v17  ;;  %v15886_v19 = vld [vmem:[%s20651_s0 + $0x68] sm:$0xff] }
  0xe3   :  { %v1833_v43 = vsel %vm1830_vm4, %v21012_v56, %v14375_v42  ;;  %v1834_v38 = vsel %vm1830_vm4, %v21013_v27, %v14376_v39  ;;  %v14399_v20 = vpop.permute.xlu1 %14398  ;;  %14658 = vrot.lane.b32.xlu1 %v15789_v31, %s14803_s20  ;;  %v15837_v56 = vld [vmem:[%s20652_s1 + $0x58] sm:$0xff]  ;;  %v14394_v39 = vpop.permute.xlu0 %14393  ;;  %1957 = vmatprep.mubr.bf16.mxu1 %v21001_v29  ;;  %21018 = vst [vmem:[#allocation59_spill] sm:$0xff] %v15886_v19 }
  0xe4   :  { %21014 = vst [vmem:[#allocation57_spill] sm:$0xff] %v15837_v56  ;;  %v15841_v60 = vpack.i.bf16 %v15837_v56, %v15832_v14  ;;  %v15843_v27 = vpack.c.bf16 %v1834_v38, %v1833_v43  ;;  %v14396_v42 = vunpack.i.h.bf16 %v14394_v39  ;;  %v14395_v58 = vunpack.i.l.bf16 %v14394_v39  ;;  %14623 = vrot.lane.b32.xlu0 %v15813_v15, %s14803_s20  ;;  %v15857_v38 = vld [vmem:[%s20652_s1 + $0x20] sm:$0xff] }
  0xe5   :  { %v15861_v43 = vpack.i.bf16 %v15857_v38, %v15852_v11  ;;  %v1857_v39 = vsel %vm1830_vm4, %v21016_v5, %v14390_v10  ;;  %v14401_v55 = vunpack.i.h.bf16 %v14399_v20  ;;  %v14400_v4 = vunpack.i.l.bf16 %v14399_v20  ;;  %v15891_v20 = vld [vmem:[%s20652_s1 + $0x68] sm:$0xff] }
  0xe6   :  { %21015 = vst [vmem:[#allocation58_spill] sm:$0xff] %v15843_v27  ;;  %1885 = vmatpush1.bf16.msra.mxu0 %v15843_v27  ;;  %v1855_v5 = vsel %vm1830_vm4, %v14390_v10, %v14395_v58  ;;  %v1856_v26 = vsel %vm1830_vm4, %v14391_v17, %v14396_v42  ;;  %21019 = vst [vmem:[#allocation60_spill] sm:$0xff] %v15891_v20  ;;  %v15895_v27 = vpack.i.bf16 %v15891_v20, %v15886_v19 }
  0xe7   :  { %v14409_v50 = vpop.permute.xlu1 %14408  ;;  %14668 = vrot.lane.b32.xlu1 %v15841_v60, %s14803_s20  ;;  %v14404_v0 = vpop.permute.xlu0 %14403  ;;  %v15897_v21 = vpack.c.bf16 %v1856_v26, %v1855_v5  ;;  %v15899_v10 = vpack.c.bf16 %v1858_v6, %v1857_v39  ;;  %v15913_v5 = vld [vmem:[%s20652_s1 + $0x30] sm:$0xff]  ;;  %v1853_v39 = vsel %vm1830_vm4, %v14395_v58, %v14400_v4 }
  0xe8   :  { %v14406_v17 = vunpack.i.h.bf16 %v14404_v0  ;;  %v14405_v52 = vunpack.i.l.bf16 %v14404_v0  ;;  %14633 = vrot.lane.b32.xlu0 %v15861_v43, %s14803_s20  ;;  %v15917_v6 = vpack.i.bf16 %v15913_v5, %v15908_v61  ;;  %v1854_v0 = vsel %vm1830_vm4, %v14396_v42, %v14401_v55 }
  0xe9   :  { %21020 = vst [vmem:[#allocation61_spill] sm:$0xff] %v15897_v21  ;;  %21021 = vst [vmem:[#allocation62_spill] sm:$0xff] %v15899_v10  ;;  %13786 = vmatmul.mubr.msk.bf16.vlgmr.msra.gmra.mrb[48].mxu0 %vm177_vm1, %v15875_v30  ;;  %v14411_v26 = vunpack.i.h.bf16 %v14409_v50  ;;  %v14410_v9 = vunpack.i.l.bf16 %v14409_v50  ;;  %13787 = vmatmul.mubr.msk.bf16.vlgmr.msra.gmra.mrb[48].mxu1 %vm177_vm1, %v15875_v30  ;;  %v15938_v50 = vld [vmem:[%s20651_s0 + $0x40] sm:$0xff]  ;;  %s14804_s0 = smov 111  }
  0xea   :  { %1966 = vmatprep.subr.bf16.mxu0 %v15897_v21  ;;  %v1851_v13 = vsel %vm1830_vm4, %v14400_v4, %v14405_v52  ;;  %v1852_v58 = vsel %vm1830_vm4, %v14401_v55, %v14406_v17  ;;  %1998 = vmatprep.mubr.bf16.mxu0 %v21001_v29  ;;  %v15949_v21 = vpack.c.bf16 %v1854_v0, %v1853_v39 }
  0xeb   :  { %1967 = vmatpush1.bf16.msra.mxu0 %v15899_v10  ;;  %v14419_v45 = vpop.permute.xlu1 %14418  ;;  %14678 = vrot.lane.b32.xlu1 %v15895_v27, %s14803_s20  ;;  %v14414_v42 = vpop.permute.xlu0 %14413  ;;  %v15943_v10 = vld [vmem:[%s20652_s1 + $0x40] sm:$0xff]  ;;  %v15951_v34 = vpack.c.bf16 %v1852_v58, %v1851_v13  ;;  %v1850_v49 = vsel %vm1830_vm4, %v14406_v17, %v14411_v26  ;;  %v1849_v7 = vsel %vm1830_vm4, %v14405_v52, %v14410_v9 }
  0xec   :  { %2039 = vmatprep.mubr.bf16.mxu1 %v21001_v29  ;;  %v15947_v4 = vpack.i.bf16 %v15943_v10, %v15938_v50  ;;  %21022 = vst [vmem:[#allocation63_spill] sm:$0xff] %v15949_v21  ;;  %v14416_v55 = vunpack.i.h.bf16 %v14414_v42  ;;  %v14415_v12 = vunpack.i.l.bf16 %v14414_v42  ;;  %14643 = vrot.lane.b32.xlu0 %v15917_v6, %s14803_s20  ;;  %v14421_v20 = vunpack.i.h.bf16 %v14419_v45 }
  0xed   :  { %v14420_v19 = vunpack.i.l.bf16 %v14419_v45  ;;  %2007 = vmatprep.subr.bf16.mxu1 %v15951_v34  ;;  %v15967_v39 = vpack.c.bf16 %v1850_v49, %v1849_v7 }
  0xee   :  { %v1847_v13 = vsel %vm1830_vm4, %v14410_v9, %v14415_v12  ;;  %2008 = vmatpush1.bf16.msra.mxu1 %v15949_v21  ;;  %v1848_v17 = vsel %vm1830_vm4, %v14411_v26, %v14416_v55  ;;  %v1846_v9 = vsel %vm1830_vm4, %v14416_v55, %v14421_v20 }
  0xef   :  { %v14429_v56 = vpop.permute.xlu1 %14428  ;;  %14688 = vrot.lane.b32.xlu1 %v15503_v40, %s14804_s0  ;;  %v14424_v0 = vpop.permute.xlu0 %14423  ;;  %21023 = vst [vmem:[#allocation64_spill] sm:$0xff] %v15967_v39  ;;  %v15971_v42 = vpack.c.bf16 %v1848_v17, %v1847_v13  ;;  %v1845_v40 = vsel %vm1830_vm4, %v14415_v12, %v14420_v19 }
  0xf0   :  { %v14426_v52 = vunpack.i.h.bf16 %v14424_v0  ;;  %v14425_v45 = vunpack.i.l.bf16 %v14424_v0  ;;  %14653 = vrot.lane.b32.xlu0 %v15947_v4, %s14803_s20  ;;  %v14431_v58 = vunpack.i.h.bf16 %v14429_v56  ;;  %v14430_v26 = vunpack.i.l.bf16 %v14429_v56 }
  0xf1   :  { %13788 = vmatmul.mubr.msk.bf16.vlgmr.msra.gmra.mrb[52].mxu0 %vm177_vm1, %v15875_v30  ;;  %21024 = vst [vmem:[#allocation65_spill] sm:$0xff] %v15971_v42  ;;  %13789 = vmatmul.mubr.msk.bf16.vlgmr.msra.gmra.mrb[52].mxu1 %vm177_vm1, %v15875_v30  ;;  %v15990_v56 = vpack.c.bf16 %v1846_v9, %v1845_v40  ;;  %v21028_v9 = vunpack.i.h.bf16 %v15791_v23 }
  0xf2   :  { %2080 = vmatprep.mubr.bf16.mxu0 %v21001_v29  ;;  %2048 = vmatprep.subr.bf16.mxu0 %v15971_v42  ;;  %v1843_v49 = vsel %vm1830_vm4, %v14420_v19, %v14425_v45  ;;  %v1844_v12 = vsel %vm1830_vm4, %v14421_v20, %v14426_v52  ;;  %v1842_v19 = vsel %vm1830_vm4, %v14426_v52, %v14431_v58 }
  0xf3   :  { %v14439_v7 = vpop.permute.xlu1 %14438  ;;  %2049 = vmatpush1.bf16.msra.mxu0 %v15967_v39  ;;  %14698 = vrot.lane.b32.xlu1 %v15543_v62, %s14804_s0  ;;  %21025 = vst [vmem:[#allocation66_spill] sm:$0xff] %v15990_v56  ;;  %v15992_v42 = vpack.c.bf16 %v1844_v12, %v1843_v49  ;;  %v1841_v62 = vsel %vm1830_vm4, %v14425_v45, %v14430_v26 }
  0xf4   :  { %v14441_v13 = vunpack.i.h.bf16 %v14439_v7  ;;  %v14440_v55 = vunpack.i.l.bf16 %v14439_v7  ;;  %v14434_v0 = vpop.permute.xlu0 %14433  ;;  %14663 = vrot.lane.b32.xlu0 %v15579_v41, %s14803_s20  ;;  %2121 = vmatprep.mubr.bf16.mxu1 %v21001_v29  ;;  %v21027_v7 = vunpack.i.l.bf16 %v15791_v23 }
  0xf5   :  { %v14436_v17 = vunpack.i.h.bf16 %v14434_v0  ;;  %v14435_v21 = vunpack.i.l.bf16 %v14434_v0  ;;  %21026 = vst [vmem:[#allocation67_spill] sm:$0xff] %v15992_v42  ;;  %2089 = vmatprep.subr.bf16.mxu1 %v15992_v42 }
  0xf6   :  { %v1835_v20 = vsel %vm1830_vm4, %v14440_v55, %v21027_v7  ;;  %v1836_v40 = vsel %vm1830_vm4, %v14441_v13, %v21028_v9  ;;  %2090 = vmatpush1.bf16.msra.mxu1 %v15990_v56  ;;  %v16029_v7 = vpack.c.bf16 %v1842_v19, %v1841_v62 }
  0xf7   :  { %v1838_v49 = vsel %vm1830_vm4, %v14436_v17, %v14441_v13  ;;  %v1837_v0 = vsel %vm1830_vm4, %v14435_v21, %v14440_v55  ;;  %v1839_v52 = vsel %vm1830_vm4, %v14430_v26, %v14435_v21  ;;  %v1840_v45 = vsel %vm1830_vm4, %v14431_v58, %v14436_v17  ;;  %v16018_v12 = vpop.permute.xlu1 %14448  ;;  %14708 = vrot.lane.b32.xlu1 %v15605_v47, %s14804_s0  ;;  %v21051_v17 = vld [vmem:[#allocation43_spill] sm:$0xff] }
  0xf8   :  { %v16020_v23 = vpack.c.bf16 %v1838_v49, %v1837_v0  ;;  %v16025_v13 = vpack.c.bf16 %v1840_v45, %v1839_v52  ;;  %v16027_v55 = vpack.c.bf16 %v1836_v40, %v1835_v20  ;;  %21032 = vst [vmem:[#allocation71_spill] sm:$0xff] %v16029_v7  ;;  %14673 = vrot.lane.b32.xlu0 %v15625_v35, %s14803_s20  ;;  %v16041_v47 = vpop.permute.xlu0 %14443  ;;  %v21054_v52 = vld [vmem:[#allocation46_spill] sm:$0xff]  ;;  %v21055_v45 = vld [vmem:[#allocation47_spill] sm:$0xff] }
  0xf9   :  { %13790 = vmatmul.mubr.msk.bf16.vlgmr.msra.gmra.mrb[56].mxu0 %vm177_vm1, %v15875_v30  ;;  %v16039_v21 = vpack.c.bf16 %v15539_v28, %v15534_v3  ;;  %13791 = vmatmul.mubr.msk.bf16.vlgmr.msra.gmra.mrb[56].mxu1 %vm177_vm1, %v15875_v30  ;;  %v16048_v58 = vpack.c.bf16 %v15499_v33, %v15494_v32  ;;  %v16062_v32 = vpack.c.bf16 %v15809_v16, %v15804_v46 }
  0xfa   :  { %21029 = vst [vmem:[#allocation68_spill] sm:$0xff] %v16020_v23  ;;  %21030 = vst [vmem:[#allocation69_spill] sm:$0xff] %v16025_v13  ;;  %2130 = vmatprep.subr.bf16.mxu0 %v16025_v13  ;;  %2171 = vmatprep.subr.bf16.mxu1 %v16027_v55  ;;  %v16071_v28 = vpack.c.bf16 %v15601_v37, %v15596_v48  ;;  %v16087_v46 = vpack.c.bf16 %v15652_v22, %v15647_v59 }
  0xfb   :  { %21031 = vst [vmem:[#allocation70_spill] sm:$0xff] %v16027_v55  ;;  %21033 = vst [vmem:[#allocation72_spill] sm:$0xff] %v16039_v21  ;;  %2131 = vmatpush1.bf16.msra.mxu0 %v16029_v7  ;;  %v16050_v26 = vpop.permute.xlu1 %14458  ;;  %14718 = vrot.lane.b32.xlu1 %v15656_v18, %s14804_s0  ;;  %v16077_v18 = vpack.c.bf16 %v15672_v54, %v15667_v36  ;;  %v16109_v48 = vpack.c.bf16 %v15758_v53, %v15753_v44  ;;  %v21045_v53 = vld [vmem:[#allocation57_spill] sm:$0xff] }
  0xfc   :  { %21034 = vst [vmem:[#allocation73_spill] sm:$0xff] %v16048_v58  ;;  %2172 = vmatpush1.bf16.msra.mxu1 %v16020_v23  ;;  %2162 = vmatprep.mubr.bf16.mxu0 %v21001_v29  ;;  %21035 = vst [vmem:[#allocation74_spill] sm:$0xff] %v16062_v32  ;;  %v16116_v59 = vpack.c.bf16 %v15727_v1, %v15722_v24  ;;  %v16122_v22 = vpack.c.bf16 %v15857_v38, %v15852_v11 }
  0xfd   :  { %14683 = vrot.lane.b32.xlu0 %v15676_v57, %s14804_s0  ;;  %2203 = vmatprep.mubr.bf16.mxu1 %v21001_v29  ;;  %v16064_v33 = vpop.permute.xlu0 %14453  ;;  %21036 = vst [vmem:[#allocation75_spill] sm:$0xff] %v16071_v28  ;;  %21037 = vst [vmem:[#allocation76_spill] sm:$0xff] %v16077_v18  ;;  %v16132_v57 = vpack.c.bf16 %v15785_v63, %v15780_v2  ;;  %v16149_v24 = vpack.c.bf16 %v15913_v5, %v15908_v61  ;;  %v14461_v2 = vunpack.i.h.bf16 %v16050_v26 }
  0xfe   :  { %2355 = vmatprep.subr.bf16.mxu0 %v16039_v21  ;;  %2396 = vmatprep.subr.bf16.mxu1 %v16048_v58  ;;  %21038 = vst [vmem:[#allocation77_spill] sm:$0xff] %v16087_v46  ;;  %21039 = vst [vmem:[#allocation78_spill] sm:$0xff] %v16109_v48  ;;  %v16154_v1 = vpack.c.bf16 %v15943_v10, %v15938_v50  ;;  %v14460_v63 = vunpack.i.l.bf16 %v16050_v26  ;;  %v14445_v61 = vunpack.i.l.bf16 %v16041_v47  ;;  %v20788_v38 = vunpack.i.l.bf16 %v16064_v33 }
  0xff   :  { %v16067_v3 = vpop.permute.xlu1 %14468  ;;  %14728 = vrot.lane.b32.xlu1 %v15731_v25, %s14804_s0  ;;  %21040 = vst [vmem:[#allocation79_spill] sm:$0xff] %v16116_v59  ;;  %21041 = vst [vmem:[#allocation80_spill] sm:$0xff] %v16122_v22  ;;  %v14451_v10 = vunpack.i.h.bf16 %v16018_v12  ;;  %v14450_v5 = vunpack.i.l.bf16 %v16018_v12  ;;  %v16219_v12 = vpack.c.bf16 %v21055_v45, %v21054_v52 }
 0x100   :  { %21042 = vst [vmem:[#allocation81_spill] sm:$0xff] %v16132_v57  ;;  %21043 = vst [vmem:[#allocation82_spill] sm:$0xff] %v16149_v24 }
 0x101   :  { %13792 = vmatmul.mubr.msk.bf16.vlgmr.msra.gmra.mrb[60].mxu0 %vm177_vm1, %v15875_v30  ;;  %14693 = vrot.lane.b32.xlu0 %v15762_v8, %s14804_s0  ;;  %v16097_v36 = vpop.permute.xlu0 %14463  ;;  %21044 = vst [vmem:[#allocation83_spill] sm:$0xff] %v16154_v1  ;;  %v16160_v8 = vpack.c.bf16 %v21045_v53, %v15832_v14  ;;  %v21048_v14 = vld [vmem:[#allocation60_spill] sm:$0xff]  ;;  %v2896_v62 = vsel %vm2869_vm5, %v14450_v5, %v20788_v38  ;;  %21056 = vst [vmem:[#allocation43_spill] sm:$0xff] %v16219_v12  ;;  %v14471_v53 = vunpack.i.h.bf16 %v16067_v3 }
 0x102   :  { %2356 = vmatpush1.bf16.msra.mxu0 %v16062_v32  ;;  %2387 = vmatprep.mubr.bf16.mxu0 %v21001_v29  ;;  %v20787_v40 = vunpack.i.l.bf16 %v16097_v36 }
 0x103   :  { %13793 = vmatmul.mubr.msk.bf16.vlgmr.msra.gmra.mrb[60].mxu1 %vm177_vm1, %v15875_v30  ;;  %2437 = vmatprep.subr.bf16.mxu0 %v16071_v28  ;;  %v16092_v54 = vpop.permute.xlu1 %14478  ;;  %v16105_v30 = vld [vmem:[%s20653_s3 + $0x10] sm:$0xf]  ;;  %21046 = vst [vmem:[#allocation57_spill] sm:$0xff] %v16160_v8 }
 0x104   :  { %14738 = vrot.lane.b32.xlu1 %v15789_v31, %s14804_s0  ;;  %2397 = vmatpush1.bf16.msra.mxu1 %v16077_v18  ;;  %v14446_v31 = vunpack.i.h.bf16 %v16041_v47 }
 0x105   :  { %14703 = vrot.lane.b32.xlu0 %v15813_v15, %s14804_s0  ;;  %2428 = vmatprep.mubr.bf16.mxu1 %v21001_v29  ;;  %v21047_v15 = vld [vmem:[#allocation59_spill] sm:$0xff] }
 0x106   :  { %2478 = vmatprep.subr.bf16.mxu1 %v16087_v46  ;;  %v16134_v44 = vpop.permute.xlu0 %14473  ;;  %v2901_v50 = vsel %vm2869_vm5, %v14461_v2, %v14446_v31 }
 0x107   :  { %v16112_v37 = vpop.permute.xlu1 %14488  ;;  %v14476_v47 = vunpack.i.h.bf16 %v16134_v44  ;;  %v14475_v26 = vunpack.i.l.bf16 %v16134_v44 }
 0x108   :  { %14748 = vrot.lane.b32.xlu1 %v15841_v60, %s14804_s0  ;;  %v16175_v60 = vpack.c.bf16 %v21048_v14, %v21047_v15  ;;  %v14470_v15 = vunpack.i.l.bf16 %v16067_v3 }
 0x109   :  { %13799 = vmatmul.mubr.msk.bf16.vlgmr.msra.gmra.mrb[64].mxu0 %vm177_vm1, %v16105_v30  ;;  %14713 = vrot.lane.b32.xlu0 %v15861_v43, %s14804_s0 }
 0x10a   :  { %2438 = vmatpush1.bf16.msra.mxu0 %v16109_v48  ;;  %2469 = vmatprep.mubr.bf16.mxu0 %v21001_v29  ;;  %v16166_v16 = vpop.permute.xlu0 %14483  ;;  %21049 = vst [vmem:[#allocation59_spill] sm:$0xff] %v16175_v60 }
 0x10b   :  { %13800 = vmatmul.mubr.msk.bf16.vlgmr.msra.gmra.mrb[64].mxu1 %vm177_vm1, %v16105_v30  ;;  %2519 = vmatprep.subr.bf16.mxu0 %v16116_v59  ;;  %v16139_v11 = vpop.permute.xlu1 %14498  ;;  %v14486_v44 = vunpack.i.h.bf16 %v16166_v16  ;;  %v20790_v3 = vunpack.i.l.bf16 %v16166_v16 }
 0x10c   :  { %14758 = vrot.lane.b32.xlu1 %v15895_v27, %s14804_s0  ;;  %2479 = vmatpush1.bf16.msra.mxu1 %v16122_v22  ;;  %v20789_v27 = vunpack.i.h.bf16 %v16064_v33 }
 0x10d   :  { %14723 = vrot.lane.b32.xlu0 %v15917_v6, %s14804_s0  ;;  %2510 = vmatprep.mubr.bf16.mxu1 %v21001_v29  ;;  %v2900_v6 = vsel %vm2869_vm5, %v14460_v63, %v14445_v61 }
 0x10e   :  { %2560 = vmatprep.subr.bf16.mxu1 %v16132_v57  ;;  %v2897_v20 = vsel %vm2869_vm5, %v14451_v10, %v20789_v27  ;;  %v16213_v49 = vpack.c.bf16 %v2901_v50, %v2900_v6  ;;  %v14481_v6 = vunpack.i.h.bf16 %v16092_v54  ;;  %v14480_v50 = vunpack.i.l.bf16 %v16092_v54 }
 0x10f   :  { %v16156_v25 = vpop.permute.xlu1 %14508  ;;  %v16209_v9 = vpop.permute.xlu0 %14493  ;;  %v16229_v14 = vpack.c.bf16 %v2897_v20, %v2896_v62  ;;  %v2870_v54 = vsel %vm2869_vm5, %v20787_v40, %v14460_v63  ;;  %v2892_v62 = vsel %vm2869_vm5, %v14470_v15, %v14475_v26  ;;  %v2899_v20 = vsel %vm2869_vm5, %v14446_v31, %v14451_v10 }
 0x110   :  { %v2898_v63 = vsel %vm2869_vm5, %v14445_v61, %v14450_v5  ;;  %v2888_v45 = vsel %vm2869_vm5, %v14480_v50, %v20790_v3  ;;  %v14496_v31 = vunpack.i.h.bf16 %v16209_v9  ;;  %v14495_v10 = vunpack.i.l.bf16 %v16209_v9 }
 0x111   :  { %13801 = vmatmul.mubr.msk.bf16.vlgmr.msra.gmra.mrb[68].mxu0 %vm177_vm1, %v16105_v30  ;;  %14733 = vrot.lane.b32.xlu0 %v15947_v4, %s14804_s0  ;;  %v21050_v4 = vld [vmem:[#allocation42_spill] sm:$0xff]  ;;  %21057 = vst [vmem:[#allocation46_spill] sm:$0xff] %v16229_v14  ;;  %v16277_v27 = vpack.c.bf16 %v2899_v20, %v2898_v63  ;;  %v14491_v61 = vunpack.i.h.bf16 %v16112_v37  ;;  %v14490_v5 = vunpack.i.l.bf16 %v16112_v37  ;;  %v21062_v63 = vunpack.i.h.bf16 %v16064_v33 }
 0x112   :  { %2520 = vmatpush1.bf16.msra.mxu0 %v16149_v24  ;;  %2551 = vmatprep.mubr.bf16.mxu0 %v21001_v29  ;;  %v16199_v19 = vpack.c.bf16 %v21051_v17, %v21050_v4  ;;  %21053 = vst [vmem:[#allocation42_spill] sm:$0xff] %v16213_v49  ;;  %v2891_v9 = vsel %vm2869_vm5, %v14476_v47, %v14481_v6 }
 0x113   :  { %13802 = vmatmul.mubr.msk.bf16.vlgmr.msra.gmra.mrb[68].mxu1 %vm177_vm1, %v16105_v30  ;;  %2601 = vmatprep.subr.bf16.mxu0 %v16160_v8  ;;  %v16184_v43 = vpop.permute.xlu1 %14518  ;;  %21060 = vst [vmem:[#allocation85_spill] sm:$0xff] %v16277_v27  ;;  %v2890_v20 = vsel %vm2869_vm5, %v14475_v26, %v14480_v50 }
 0x114   :  { %2561 = vmatpush1.bf16.msra.mxu1 %v16154_v1  ;;  %2592 = vmatprep.mubr.bf16.mxu1 %v21001_v29  ;;  %21052 = vst [vmem:[#allocation60_spill] sm:$0xff] %v16199_v19 }
 0x115   :  { %14743 = vrot.lane.b32.xlu0 %v15579_v41, %s14804_s0  ;;  %2642 = vmatprep.subr.bf16.mxu1 %v16175_v60  ;;  %v20786_v41 = vunpack.i.h.bf16 %v16097_v36 }
 0x116   :  { %v16250_v17 = vpop.permute.xlu0 %14503 }
 0x117   :  { %v16215_v0 = vpop.permute.xlu1 %14528 }
 0x119   :  { %13803 = vmatmul.mubr.msk.bf16.vlgmr.msra.gmra.mrb[72].mxu0 %vm177_vm1, %v16105_v30  ;;  %14753 = vrot.lane.b32.xlu0 %v15625_v35, %s14804_s0  ;;  %v2871_v35 = vsel %vm2869_vm5, %v20786_v41, %v14461_v2  ;;  %v2893_v2 = vsel %vm2869_vm5, %v14471_v53, %v14476_v47  ;;  %v2889_v41 = vsel %vm2869_vm5, %v14481_v6, %v14486_v44 }
 0x11a   :  { %2602 = vmatpush1.bf16.msra.mxu0 %v16199_v19  ;;  %2633 = vmatprep.mubr.bf16.mxu0 %v21001_v29  ;;  %v16263_v52 = vpack.c.bf16 %v2871_v35, %v2870_v54  ;;  %v16271_v40 = vpack.c.bf16 %v2893_v2, %v2892_v62  ;;  %v16283_v35 = vpack.c.bf16 %v2889_v41, %v2888_v45  ;;  %v16285_v54 = vpop.permute.xlu0 %14513  ;;  %v14501_v62 = vunpack.i.h.bf16 %v16139_v11 }
 0x11b   :  { %13804 = vmatmul.mubr.msk.bf16.vlgmr.msra.gmra.mrb[72].mxu1 %vm177_vm1, %v16105_v30  ;;  %2923 = vmatprep.subr.bf16.mxu0 %v16213_v49  ;;  %v16248_v4 = vpop.permute.xlu1 %14538  ;;  %v14500_v2 = vunpack.i.l.bf16 %v16139_v11  ;;  %v2884_v11 = vsel %vm2869_vm5, %v14490_v5, %v14495_v10  ;;  %v2885_v41 = vsel %vm2869_vm5, %v14491_v61, %v14496_v31  ;;  %v2895_v45 = vsel %vm2869_vm5, %v21062_v63, %v14471_v53 }
 0x11c   :  { %2643 = vmatpush1.bf16.msra.mxu1 %v16219_v12  ;;  %2674 = vmatprep.mubr.bf16.mxu1 %v21001_v29  ;;  %21058 = vst [vmem:[#allocation47_spill] sm:$0xff] %v16263_v52  ;;  %21059 = vst [vmem:[#allocation84_spill] sm:$0xff] %v16271_v40  ;;  %v21064_v53 = vunpack.i.l.bf16 %v16250_v17  ;;  %v16330_v6 = vpack.c.bf16 %v2885_v41, %v2884_v11  ;;  %v16336_v63 = vpack.c.bf16 %v2891_v9, %v2890_v20 }
 0x11d   :  { %2964 = vmatprep.subr.bf16.mxu1 %v16229_v14  ;;  %21061 = vst [vmem:[#allocation86_spill] sm:$0xff] %v16283_v35  ;;  %v14515_v49 = vunpack.i.l.bf16 %v16285_v54  ;;  %v14511_v11 = vunpack.i.h.bf16 %v16156_v25  ;;  %v14510_v41 = vunpack.i.l.bf16 %v16156_v25  ;;  %v14520_v9 = vunpack.i.l.bf16 %v16184_v43 }
 0x11e   :  { %21066 = vst [vmem:[#allocation87_spill] sm:$0xff] %v16330_v6  ;;  %v16332_v26 = vpop.permute.xlu0 %14523  ;;  %21068 = vst [vmem:[#allocation89_spill] sm:$0xff] %v16336_v63  ;;  %v21070_v20 = vunpack.i.l.bf16 %v16166_v16 }
 0x11f   :  { %v16273_v38 = vpop.permute.xlu1 %14548  ;;  %v2876_v16 = vsel %vm2869_vm5, %v14510_v41, %v14515_v49 }
 0x121   :  { %13805 = vmatmul.mubr.msk.bf16.vlgmr.msra.gmra.mrb[76].mxu0 %vm177_vm1, %v16105_v30 }
 0x122   :  { %2924 = vmatpush1.bf16.msra.mxu0 %v16263_v52  ;;  %2955 = vmatprep.mubr.bf16.mxu0 %v21001_v29  ;;  %v16320_v52 = vld [vmem:[%s20653_s3 + $0x14] sm:$0xf]  ;;  %v16363_v25 = vpop.permute.xlu0 %14533 }
 0x123   :  { %13806 = vmatmul.mubr.msk.bf16.vlgmr.msra.gmra.mrb[76].mxu1 %vm177_vm1, %v16105_v30  ;;  %3005 = vmatprep.subr.bf16.mxu0 %v16271_v40  ;;  %v16296_v37 = vpop.permute.xlu1 %14558  ;;  %v21063_v30 = vunpack.i.l.bf16 %v16064_v33  ;;  %v2880_v33 = vsel %vm2869_vm5, %v14500_v2, %v21064_v53 }
 0x124   :  { %2965 = vmatpush1.bf16.msra.mxu1 %v16277_v27  ;;  %2996 = vmatprep.mubr.bf16.mxu1 %v21001_v29 }
 0x125   :  { %v2894_v3 = vsel %vm2869_vm5, %v21063_v30, %v14470_v15  ;;  %3046 = vmatprep.subr.bf16.mxu1 %v16283_v35  ;;  %v21065_v15 = vunpack.i.h.bf16 %v16250_v17  ;;  %v14516_v30 = vunpack.i.h.bf16 %v16285_v54  ;;  %v14521_v54 = vunpack.i.h.bf16 %v16184_v43 }
 0x126   :  { %v16334_v50 = vpack.c.bf16 %v2895_v45, %v2894_v3  ;;  %v2887_v3 = vsel %vm2869_vm5, %v14486_v44, %v14491_v61  ;;  %v2886_v45 = vsel %vm2869_vm5, %v21070_v20, %v14490_v5  ;;  %v2882_v44 = vsel %vm2869_vm5, %v14495_v10, %v14500_v2 }
 0x127   :  { %v2881_v47 = vsel %vm2869_vm5, %v14501_v62, %v21065_v15  ;;  %v16344_v35 = vpop.permute.xlu1 %14568  ;;  %v2877_v43 = vsel %vm2869_vm5, %v14511_v11, %v14516_v30  ;;  %v21073_v5 = vunpack.i.l.bf16 %v16097_v36  ;;  %v14541_v20 = vunpack.i.h.bf16 %v16248_v4 }
 0x128   :  { %21067 = vst [vmem:[#allocation88_spill] sm:$0xff] %v16334_v50  ;;  %v16342_v53 = vpack.c.bf16 %v2881_v47, %v2880_v33  ;;  %v2883_v33 = vsel %vm2869_vm5, %v14496_v31, %v14501_v62  ;;  %v16374_v31 = vpack.c.bf16 %v2887_v3, %v2886_v45  ;;  %v21074_v62 = vunpack.i.h.bf16 %v16097_v36 }
 0x129   :  { %13812 = vmatmul.mubr.msk.bf16.vlgmr.msra.gmra.mrb[80].mxu0 %vm177_vm1, %v16320_v52  ;;  %v16376_v61 = vpack.c.bf16 %v2883_v33, %v2882_v44  ;;  %v2872_v10 = vsel %vm2869_vm5, %v14520_v9, %v21073_v5  ;;  %v16388_v47 = vpack.c.bf16 %v2877_v43, %v2876_v16  ;;  %v14540_v3 = vunpack.i.l.bf16 %v16248_v4  ;;  %v16394_v44 = vpop.permute.xlu0 %14543 }
 0x12a   :  { %21069 = vst [vmem:[#allocation90_spill] sm:$0xff] %v16342_v53  ;;  %3006 = vmatpush1.bf16.msra.mxu0 %v16334_v50  ;;  %3037 = vmatprep.mubr.bf16.mxu0 %v21001_v29  ;;  %21071 = vst [vmem:[#allocation91_spill] sm:$0xff] %v16374_v31  ;;  %v2873_v2 = vsel %vm2869_vm5, %v14521_v54, %v21074_v62  ;;  %v14526_v45 = vunpack.i.h.bf16 %v16332_v26  ;;  %v14525_v33 = vunpack.i.l.bf16 %v16332_v26  ;;  %v14531_v43 = vunpack.i.h.bf16 %v16215_v0 }
 0x12b   :  { %13813 = vmatmul.mubr.msk.bf16.vlgmr.msra.gmra.mrb[80].mxu1 %vm177_vm1, %v16320_v52  ;;  %3087 = vmatprep.subr.bf16.mxu0 %v16330_v6  ;;  %21072 = vst [vmem:[#allocation92_spill] sm:$0xff] %v16376_v61  ;;  %21075 = vst [vmem:[#allocation93_spill] sm:$0xff] %v16388_v47  ;;  %v16405_v4 = vpack.c.bf16 %v2873_v2, %v2872_v10  ;;  %v14530_v5 = vunpack.i.l.bf16 %v16215_v0  ;;  %v21077_v10 = vunpack.i.h.bf16 %v16250_v17  ;;  %v21078_v16 = vunpack.i.l.bf16 %v16250_v17 }
 0x12c   :  { %3047 = vmatpush1.bf16.msra.mxu1 %v16336_v63  ;;  %3078 = vmatprep.mubr.bf16.mxu1 %v21001_v29  ;;  %v3468_v62 = vsel %vm3437_vm6, %v14540_v3, %v14525_v33  ;;  %v3469_v36 = vsel %vm3437_vm6, %v14541_v20, %v14526_v45  ;;  %v21080_v17 = vunpack.i.h.bf16 %v16363_v25 }
 0x12d   :  { %3128 = vmatprep.subr.bf16.mxu1 %v16342_v53  ;;  %21076 = vst [vmem:[#allocation94_spill] sm:$0xff] %v16405_v4  ;;  %v2879_v2 = vsel %vm2869_vm5, %v21077_v10, %v14511_v11  ;;  %v2878_v0 = vsel %vm2869_vm5, %v21078_v16, %v14510_v41  ;;  %v21079_v53 = vunpack.i.l.bf16 %v16363_v25  ;;  %v14551_v16 = vunpack.i.h.bf16 %v16273_v38 }
 0x12e   :  { %v16386_v15 = vpop.permute.xlu1 %14578  ;;  %v3465_v41 = vsel %vm3437_vm6, %v14531_v43, %v21080_v17 }
 0x12f   :  { %v3464_v11 = vsel %vm3437_vm6, %v14530_v5, %v21079_v53 }
 0x130   :  { %v16455_v17 = vpack.c.bf16 %v3465_v41, %v3464_v11 }
 0x131   :  { %13814 = vmatmul.mubr.msk.bf16.vlgmr.msra.gmra.mrb[84].mxu0 %vm177_vm1, %v16320_v52 }
 0x132   :  { %3088 = vmatpush1.bf16.msra.mxu0 %v16374_v31  ;;  %3119 = vmatprep.mubr.bf16.mxu0 %v21001_v29  ;;  %v16408_v26 = vpop.permute.xlu1 %14588  ;;  %v16431_v31 = vpop.permute.xlu0 %14553  ;;  %21084 = vst [vmem:[#allocation98_spill] sm:$0xff] %v16455_v17 }
 0x133   :  { %13815 = vmatmul.mubr.msk.bf16.vlgmr.msra.gmra.mrb[84].mxu1 %vm177_vm1, %v16320_v52  ;;  %3169 = vmatprep.subr.bf16.mxu0 %v16388_v47  ;;  %v2874_v47 = vsel %vm2869_vm5, %v14515_v49, %v14520_v9  ;;  %v16447_v9 = vpack.c.bf16 %v2879_v2, %v2878_v0  ;;  %v14555_v53 = vunpack.i.l.bf16 %v16431_v31  ;;  %v14560_v2 = vunpack.i.l.bf16 %v16296_v37 }
 0x134   :  { %3129 = vmatpush1.bf16.msra.mxu1 %v16376_v61  ;;  %3160 = vmatprep.mubr.bf16.mxu1 %v21001_v29  ;;  %v2875_v61 = vsel %vm2869_vm5, %v14516_v30, %v14521_v54  ;;  %v20807_v30 = vunpack.i.l.bf16 %v16394_v44  ;;  %v16443_v54 = vpack.c.bf16 %v3469_v36, %v3468_v62  ;;  %v14550_v36 = vunpack.i.l.bf16 %v16273_v38 }
 0x135   :  { %3210 = vmatprep.subr.bf16.mxu1 %v16405_v4  ;;  %21082 = vst [vmem:[#allocation96_spill] sm:$0xff] %v16447_v9  ;;  %v16449_v10 = vpack.c.bf16 %v2875_v61, %v2874_v47  ;;  %v14556_v4 = vunpack.i.h.bf16 %v16431_v31  ;;  %v14561_v62 = vunpack.i.h.bf16 %v16296_v37  ;;  %v21085_v31 = vunpack.i.h.bf16 %v16394_v44 }
 0x136   :  { %21081 = vst [vmem:[#allocation95_spill] sm:$0xff] %v16443_v54  ;;  %v16445_v49 = vpop.permute.xlu1 %14598  ;;  %v16463_v61 = vpop.permute.xlu0 %14563  ;;  %v3438_v38 = vsel %vm3437_vm6, %v20807_v30, %v14540_v3 }
 0x137   :  { %21083 = vst [vmem:[#allocation97_spill] sm:$0xff] %v16449_v10  ;;  %v3439_v47 = vsel %vm3437_vm6, %v21085_v31, %v14541_v20  ;;  %v14566_v37 = vunpack.i.h.bf16 %v16463_v61  ;;  %v20818_v0 = vunpack.i.l.bf16 %v16463_v61  ;;  %v3460_v20 = vsel %vm3437_vm6, %v14550_v36, %v14555_v53 }
 0x138   :  { %v3461_v41 = vsel %vm3437_vm6, %v14551_v16, %v14556_v4  ;;  %v16487_v3 = vpack.c.bf16 %v3439_v47, %v3438_v38  ;;  %v14571_v38 = vunpack.i.h.bf16 %v16344_v35 }
 0x139   :  { %13816 = vmatmul.mubr.msk.bf16.vlgmr.msra.gmra.mrb[88].mxu0 %vm177_vm1, %v16320_v52  ;;  %v3456_v31 = vsel %vm3437_vm6, %v14560_v2, %v20818_v0  ;;  %v3457_v30 = vsel %vm3437_vm6, %v14561_v62, %v14566_v37  ;;  %v16499_v63 = vpack.c.bf16 %v3461_v41, %v3460_v20  ;;  %v3459_v41 = vsel %vm3437_vm6, %v14556_v4, %v14561_v62 }
 0x13a   :  { %3170 = vmatpush1.bf16.msra.mxu0 %v16447_v9  ;;  %3201 = vmatprep.mubr.bf16.mxu0 %v21001_v29  ;;  %v16478_v11 = vpop.permute.xlu1 %14608  ;;  %21086 = vst [vmem:[#allocation99_spill] sm:$0xff] %v16487_v3  ;;  %v14574_v9 = vpop.permute.xlu0 %14573  ;;  %v16506_v6 = vpack.c.bf16 %v3457_v30, %v3456_v31  ;;  %v3458_v31 = vsel %vm3437_vm6, %v14555_v53, %v14560_v2 }
 0x13b   :  { %13817 = vmatmul.mubr.msk.bf16.vlgmr.msra.gmra.mrb[88].mxu1 %vm177_vm1, %v16320_v52  ;;  %3491 = vmatprep.subr.bf16.mxu0 %v16443_v54  ;;  %v3467_v54 = vsel %vm3437_vm6, %v14526_v45, %v14531_v43  ;;  %21087 = vst [vmem:[#allocation100_spill] sm:$0xff] %v16499_v63  ;;  %v14575_v47 = vunpack.i.l.bf16 %v14574_v9  ;;  %v14570_v45 = vunpack.i.l.bf16 %v16344_v35  ;;  %v14580_v43 = vunpack.i.l.bf16 %v16386_v15  ;;  %v16544_v35 = vld [vmem:[%s20653_s3 + $0x18] sm:$0xf] }
 0x13c   :  { %3211 = vmatpush1.bf16.msra.mxu1 %v16449_v10  ;;  %3242 = vmatprep.mubr.bf16.mxu1 %v21001_v29  ;;  %v3466_v10 = vsel %vm3437_vm6, %v14525_v33, %v14530_v5  ;;  %21088 = vst [vmem:[#allocation101_spill] sm:$0xff] %v16506_v6  ;;  %v14581_v33 = vunpack.i.h.bf16 %v16386_v15 }
 0x13d   :  { %3532 = vmatprep.subr.bf16.mxu1 %v16455_v17  ;;  %v14576_v17 = vunpack.i.h.bf16 %v14574_v9  ;;  %v16508_v50 = vpack.c.bf16 %v3467_v54, %v3466_v10  ;;  %v3452_v15 = vsel %vm3437_vm6, %v14570_v45, %v14575_v47  ;;  %v21091_v10 = vunpack.i.l.bf16 %v16363_v25 }
 0x13e   :  { %v16504_v0 = vpop.permute.xlu1 %14618 }
 0x13f   :  { %21089 = vst [vmem:[#allocation102_spill] sm:$0xff] %v16508_v50  ;;  %v3453_v54 = vsel %vm3437_vm6, %v14571_v38, %v14576_v17  ;;  %v3462_v20 = vsel %vm3437_vm6, %v21091_v10, %v14550_v36 }
 0x140   :  { %v16518_v5 = vpop.permute.xlu0 %14583  ;;  %v16556_v62 = vpack.c.bf16 %v3453_v54, %v3452_v15  ;;  %v14601_v15 = vunpack.i.h.bf16 %v16445_v49  ;;  %v3455_v54 = vsel %vm3437_vm6, %v14566_v37, %v14571_v38  ;;  %v3451_v38 = vsel %vm3437_vm6, %v14576_v17, %v14581_v33 }
 0x141   :  { %13818 = vmatmul.mubr.msk.bf16.vlgmr.msra.gmra.mrb[92].mxu0 %vm177_vm1, %v16320_v52  ;;  %v20825_v30 = vunpack.i.l.bf16 %v16518_v5 }
 0x142   :  { %3492 = vmatpush1.bf16.msra.mxu0 %v16487_v3  ;;  %3523 = vmatprep.mubr.bf16.mxu0 %v21001_v29  ;;  %v16554_v36 = vpop.permute.xlu1 %14628  ;;  %21093 = vst [vmem:[#allocation103_spill] sm:$0xff] %v16556_v62 }
 0x143   :  { %13819 = vmatmul.mubr.msk.bf16.vlgmr.msra.gmra.mrb[92].mxu1 %vm177_vm1, %v16320_v52  ;;  %3573 = vmatprep.subr.bf16.mxu0 %v16499_v63  ;;  %v21090_v52 = vunpack.i.h.bf16 %v16363_v25  ;;  %v3448_v25 = vsel %vm3437_vm6, %v14580_v43, %v20825_v30  ;;  %v21116_v63 = vunpack.i.h.bf16 %v16478_v11 }
 0x144   :  { %3533 = vmatpush1.bf16.msra.mxu1 %v16508_v50  ;;  %3564 = vmatprep.mubr.bf16.mxu1 %v21001_v29  ;;  %v14600_v50 = vunpack.i.l.bf16 %v16445_v49 }
 0x145   :  { %v3463_v9 = vsel %vm3437_vm6, %v21090_v52, %v14551_v16  ;;  %3614 = vmatprep.subr.bf16.mxu1 %v16506_v6  ;;  %v21092_v16 = vunpack.i.h.bf16 %v16518_v5  ;;  %v14594_v53 = vpop.permute.xlu0 %14593  ;;  %v16560_v52 = vpack.c.bf16 %v3459_v41, %v3458_v31  ;;  %v14591_v6 = vunpack.i.h.bf16 %v16408_v26 }
 0x146   :  { %v16558_v2 = vpack.c.bf16 %v3463_v9, %v3462_v20  ;;  %v14596_v10 = vunpack.i.h.bf16 %v14594_v53  ;;  %v14595_v3 = vunpack.i.l.bf16 %v14594_v53  ;;  %v3450_v41 = vsel %vm3437_vm6, %v14575_v47, %v14580_v43 }
 0x147   :  { %v3449_v4 = vsel %vm3437_vm6, %v14581_v33, %v21092_v16  ;;  %21095 = vst [vmem:[#allocation105_spill] sm:$0xff] %v16560_v52  ;;  %v14590_v16 = vunpack.i.l.bf16 %v16408_v26  ;;  %v21097_v26 = vunpack.i.l.bf16 %v16463_v61  ;;  %v21098_v61 = vunpack.i.l.bf16 %v16394_v44 }
 0x148   :  { %21094 = vst [vmem:[#allocation104_spill] sm:$0xff] %v16558_v2  ;;  %v16564_v30 = vpack.c.bf16 %v3449_v4, %v3448_v25  ;;  %v3445_v37 = vsel %vm3437_vm6, %v14591_v6, %v14596_v10  ;;  %v14621_v25 = vunpack.i.h.bf16 %v16504_v0  ;;  %v21100_v53 = vunpack.i.h.bf16 %v16394_v44 }
 0x149   :  { %13825 = vmatmul.mubr.msk.bf16.vlgmr.msra.gmra.mrb[96].mxu0 %vm177_vm1, %v16544_v35  ;;  %v16576_v9 = vpop.permute.xlu1 %14638  ;;  %v3454_v20 = vsel %vm3437_vm6, %v21097_v26, %v14570_v45  ;;  %v3444_v49 = vsel %vm3437_vm6, %v14590_v16, %v14595_v3  ;;  %v3440_v45 = vsel %vm3437_vm6, %v14600_v50, %v21098_v61  ;;  %v16609_v47 = vpack.c.bf16 %v3451_v38, %v3450_v41 }
 0x14a   :  { %21096 = vst [vmem:[#allocation106_spill] sm:$0xff] %v16564_v30  ;;  %3574 = vmatpush1.bf16.msra.mxu0 %v16558_v2  ;;  %3605 = vmatprep.mubr.bf16.mxu0 %v21001_v29  ;;  %v16598_v31 = vpack.c.bf16 %v3455_v54, %v3454_v20  ;;  %v16601_v4 = vpop.permute.xlu0 %14603  ;;  %v3441_v17 = vsel %vm3437_vm6, %v14601_v15, %v21100_v53  ;;  %v14620_v43 = vunpack.i.l.bf16 %v16504_v0  ;;  %v21104_v53 = vunpack.i.h.bf16 %v16518_v5 }
 0x14b   :  { %13826 = vmatmul.mubr.msk.bf16.vlgmr.msra.gmra.mrb[96].mxu1 %vm177_vm1, %v16544_v35  ;;  %3655 = vmatprep.subr.bf16.mxu0 %v16556_v62  ;;  %v16607_v33 = vpack.c.bf16 %v3445_v37, %v3444_v49  ;;  %21102 = vst [vmem:[#allocation109_spill] sm:$0xff] %v16609_v47  ;;  %v20831_v26 = vunpack.i.h.bf16 %v16601_v4  ;;  %v20830_v54 = vunpack.i.l.bf16 %v16601_v4  ;;  %v16625_v0 = vpack.c.bf16 %v3441_v17, %v3440_v45 }
 0x14c   :  { %3615 = vmatpush1.bf16.msra.mxu1 %v16560_v52  ;;  %3646 = vmatprep.mubr.bf16.mxu1 %v21001_v29  ;;  %21099 = vst [vmem:[#allocation107_spill] sm:$0xff] %v16598_v31  ;;  %v3447_v17 = vsel %vm3437_vm6, %v21104_v53, %v14591_v6  ;;  %v21105_v44 = vunpack.i.l.bf16 %v16518_v5  ;;  %v3443_v49 = vsel %vm3437_vm6, %v14596_v10, %v14601_v15  ;;  %v14640_v52 = vunpack.i.l.bf16 %v16576_v9 }
 0x14d   :  { %3696 = vmatprep.subr.bf16.mxu1 %v16564_v30  ;;  %21101 = vst [vmem:[#allocation108_spill] sm:$0xff] %v16607_v33  ;;  %21103 = vst [vmem:[#allocation110_spill] sm:$0xff] %v16625_v0  ;;  %v4036_v61 = vsel %vm4005_vm7, %v14620_v43, %v20830_v54  ;;  %v4037_v45 = vsel %vm4005_vm7, %v14621_v25, %v20831_v26  ;;  %v3442_v54 = vsel %vm3437_vm6, %v14595_v3, %v14600_v50  ;;  %v21106_v26 = vlaneseq }
 0x14e   :  { %v16614_v20 = vpop.permute.xlu1 %14648  ;;  %v3446_v38 = vsel %vm3437_vm6, %v21105_v44, %v14590_v16  ;;  %v16660_v6 = vpack.c.bf16 %v4037_v45, %v4036_v61  ;;  %v21109_v16 = vunpack.i.l.bf16 %v16478_v11  ;;  %v21111_v50 = vunpack.i.h.bf16 %v16478_v11 }
 0x14f   :  { %v16674_v44 = vpack.c.bf16 %v3447_v17, %v3446_v38 }
 0x150   :  { %21107 = vst [vmem:[#allocation111_spill] sm:$0xff] %v16660_v6 }
 0x151   :  { %13827 = vmatmul.mubr.msk.bf16.vlgmr.msra.gmra.mrb[100].mxu0 %vm177_vm1, %v16544_v35  ;;  %v16627_v37 = vpop.permute.xlu0 %14613  ;;  %21112 = vst [vmem:[#allocation112_spill] sm:$0xff] %v16674_v44 }
 0x152   :  { %3656 = vmatpush1.bf16.msra.mxu0 %v16598_v31  ;;  %3687 = vmatprep.mubr.bf16.mxu0 %v21001_v29  ;;  %v21108_v5 = vunpack.i.l.bf16 %v16627_v37  ;;  %v21110_v15 = vunpack.i.h.bf16 %v16627_v37 }
 0x153   :  { %13828 = vmatmul.mubr.msk.bf16.vlgmr.msra.gmra.mrb[100].mxu1 %vm177_vm1, %v16544_v35  ;;  %3737 = vmatprep.subr.bf16.mxu0 %v16607_v33 }
 0x154   :  { %3697 = vmatpush1.bf16.msra.mxu1 %v16609_v47  ;;  %3728 = vmatprep.mubr.bf16.mxu1 %v21001_v29  ;;  %v519_v47 = vshrl.u32 %v21106_v26, 7  ;;  %v4032_v10 = vsel %vm4005_vm7, %v21109_v16, %v21108_v5  ;;  %v4033_v3 = vsel %vm4005_vm7, %v21111_v50, %v21110_v15  ;;  %v16676_v26 = vpack.c.bf16 %v3443_v49, %v3442_v54  ;;  %v509_v5 = vld [vmem:[%s20654_s2] ss:$8 sm:$0xf] }
 0x155   :  { %3778 = vmatprep.subr.bf16.mxu1 %v16625_v0  ;;  %v16655_v41 = vpop.permute.xlu1 %14658  ;;  %v16689_v15 = vpack.c.bf16 %v4033_v3, %v4032_v10  ;;  %v510_v54 = vld [vmem:[%s20654_s2] ss:$8 sm:$0xf0] }
 0x156   :  { %v16658_v33 = vpop.permute.xlu0 %14623  ;;  %21113 = vst [vmem:[#allocation113_spill] sm:$0xff] %v16676_v26  ;;  %v16711_v3 = vsub.s32 0, %v519_v47  ;;  %v14660_v8 = vunpack.i.l.bf16 %v16655_v41 }
 0x157   :  { %v20842_v61 = vunpack.i.h.bf16 %v16658_v33  ;;  %v20843_v45 = vunpack.i.l.bf16 %v16658_v33  ;;  %21114 = vst [vmem:[#allocation114_spill] sm:$0xff] %v16689_v15  ;;  %v21137_v59 = vunpack.i.h.bf16 %v16658_v33 }
 0x159   :  { %13829 = vmatmul.mubr.msk.bf16.vlgmr.msra.gmra.mrb[104].mxu0 %vm177_vm1, %v16544_v35  ;;  %v16682_v53 = vpop.f32.mrb[0].mxu1  ;;  %v16687_v16 = vpop.permute.xlu1 %14668  ;;  %v4007_v38 = vsel %vm4005_vm7, %v20842_v61, %v14621_v25  ;;  %v4006_v17 = vsel %vm4005_vm7, %v20843_v45, %v14620_v43  ;;  %v16721_v43 = vsub.s32 2, %v519_v47  ;;  %v14630_v45 = vunpack.i.l.bf16 %v16554_v36 }
 0x15a   :  { %3738 = vmatpush1.bf16.msra.mxu0 %v16674_v44  ;;  %v16695_v49 = vpop.f32.mrb[1].mxu1  ;;  %3769 = vmatprep.mubr.bf16.mxu0 %v21001_v29  ;;  %v16709_v50 = vpop.permute.xlu0 %14633  ;;  %v16713_v44 = vsub.s32 1, %v519_v47  ;;  %v16736_v62 = vpack.c.bf16 %v4007_v38, %v4006_v17 }
 0x15b   :  { %13830 = vmatmul.mubr.msk.bf16.vlgmr.msra.gmra.mrb[104].mxu1 %vm177_vm1, %v16544_v35  ;;  %v260_v10 = vpop.f32.mrb[2].mxu1  ;;  %4059 = vmatprep.subr.bf16.mxu0 %v16660_v6  ;;  %v16716_v0 = vpop.f32.mrb[0].mxu0  ;;  %v14636_v25 = vunpack.i.h.bf16 %v16709_v50  ;;  %v14635_v61 = vunpack.i.l.bf16 %v16709_v50  ;;  %v16725_v6 = vor.u32 %v510_v54, %v509_v5  ;;  %v14641_v50 = vunpack.i.h.bf16 %v16576_v9 }
 0x15c   :  { %3779 = vmatpush1.bf16.msra.mxu1 %v16676_v26  ;;  %v261_v31 = vpop.f32.mrb[3].mxu1  ;;  %3810 = vmatprep.mubr.bf16.mxu1 %v21001_v29  ;;  %v14631_v10 = vunpack.i.h.bf16 %v16554_v36  ;;  %v16727_v30 = vpop.f32.mrb[1].mxu0  ;;  %21115 = vst [vmem:[#allocation115_spill] sm:$0xff] %v16736_v62  ;;  %v21117_v36 = vunpack.i.h.bf16 %v16601_v4  ;;  %v21118_v54 = vunpack.i.l.bf16 %v16478_v11  ;;  %v13757_v11 = vld [vmem:[%s20654_s2 + $0x40] ss:$8 sm:$0xf] }
 0x15d   :  { %v16729_v26 = vpop.permute.xlu1 %14678  ;;  %4100 = vmatprep.subr.bf16.mxu1 %v16689_v15  ;;  %v16732_v31 = vsub.s32 3, %v519_v47  ;;  %v219_v2 = vpop.f32.mrb[2].mxu0  ;;  %v21119_v15 = vunpack.i.l.bf16 %v16601_v4  ;;  %v16766_v4 = vsub.s32 4, %v519_v47 }
 0x15e   :  { %v4035_v5 = vsel %vm4005_vm7, %v21117_v36, %v21116_v63  ;;  %v220_v40 = vpop.f32.mrb[3].mxu0  ;;  %v16750_v32 = vpop.permute.xlu0 %14643  ;;  %v4028_v2 = vsel %vm4005_vm7, %v14630_v45, %v14635_v61  ;;  %v4029_v9 = vsel %vm4005_vm7, %v14631_v10, %v14636_v25  ;;  %v16770_v36 = vsub.s32 6, %v519_v47 }
 0x15f   :  { %v4034_v27 = vsel %vm4005_vm7, %v21119_v15, %v21118_v54  ;;  %v16758_v17 = vpack.c.bf16 %v4029_v9, %v4028_v2  ;;  %v13758_v40 = vld [vmem:[%s20654_s2 + $0x40] ss:$8 sm:$0xf0]  ;;  %v16768_v15 = vsub.s32 5, %v519_v47  ;;  %v16776_v2 = vsub.s32 7, %v519_v47 }
 0x160   :  { %v16778_v9 = vpack.c.bf16 %v4035_v5, %v4034_v27  ;;  %v21122_v27 = vunpack.i.l.bf16 %v16750_v32  ;;  %v21123_v63 = vunpack.i.h.bf16 %v16750_v32  ;;  %v14650_v54 = vunpack.i.l.bf16 %v16614_v20 }
 0x161   :  { %21120 = vst [vmem:[#allocation116_spill] sm:$0xff] %v16758_v17  ;;  %13831 = vmatmul.mubr.msk.bf16.vlgmr.msra.gmra.mrb[108].mxu0 %vm177_vm1, %v16544_v35  ;;  %v16784_v14 = vpop.permute.xlu1 %14688 }
 0x162   :  { %21121 = vst [vmem:[#allocation117_spill] sm:$0xff] %v16778_v9  ;;  %4060 = vmatpush1.bf16.msra.mxu0 %v16736_v62  ;;  %4091 = vmatprep.mubr.bf16.mxu0 %v21001_v29  ;;  %v16791_v47 = vpop.permute.xlu0 %14653  ;;  %v4024_v5 = vsel %vm4005_vm7, %v14640_v52, %v21122_v27  ;;  %v4025_v38 = vsel %vm4005_vm7, %v14641_v50, %v21123_v63  ;;  %v13769_v63 = vld [vmem:[%s20654_s2 + $0x1] ss:$8 sm:$0xf0] }
 0x163   :  { %13832 = vmatmul.mubr.msk.bf16.vlgmr.msra.gmra.mrb[108].mxu1 %vm177_vm1, %v16544_v35  ;;  %4141 = vmatprep.subr.bf16.mxu0 %v16758_v17  ;;  %v16802_v62 = vor.u32 %v13758_v40, %v13757_v11  ;;  %v13768_v35 = vld [vmem:[%s20654_s2 + $0x1] ss:$8 sm:$0xf]  ;;  %v16809_v17 = vpop.f32.mrb[4].mxu0  ;;  %v14656_v12 = vunpack.i.h.bf16 %v16791_v47  ;;  %v14655_v27 = vunpack.i.l.bf16 %v16791_v47  ;;  %v16814_v21 = vpack.c.bf16 %v4025_v38, %v4024_v5 }
 0x164   :  { %4101 = vmatpush1.bf16.msra.mxu1 %v16778_v9  ;;  %4132 = vmatprep.mubr.bf16.mxu1 %v21001_v29  ;;  %v21125_v11 = vunpack.i.h.bf16 %v16627_v37  ;;  %v21126_v9 = vunpack.i.l.bf16 %v16627_v37  ;;  %v4027_v47 = vsel %vm4005_vm7, %v14636_v25, %v14641_v50  ;;  %v4026_v38 = vsel %vm4005_vm7, %v14635_v61, %v14640_v52  ;;  %v16831_v5 = vpop.f32.mrb[5].mxu0  ;;  %v16833_v60 = vpop.f32.mrb[4].mxu1  ;;  %v16848_v52 = vld [vmem:[%s20653_s3 + $0x1c] sm:$0xf] }
 0x165   :  { %21124 = vst [vmem:[#allocation118_spill] sm:$0xff] %v16814_v21  ;;  %v301_v25 = vpop.f32.mrb[6].mxu0  ;;  %v16843_v50 = vpop.f32.mrb[5].mxu1  ;;  %4182 = vmatprep.subr.bf16.mxu1 %v16814_v21  ;;  %v4020_v37 = vsel %vm4005_vm7, %v14650_v54, %v14655_v27  ;;  %v16864_v21 = vpack.c.bf16 %v4027_v47, %v4026_v38  ;;  %v14661_v61 = vunpack.i.h.bf16 %v16655_v41  ;;  %v21197_v51 = vrot.slane %v16802_v62, %v16770_v36 }
 0x166   :  { %v4031_v40 = vsel %vm4005_vm7, %v21125_v11, %v14631_v10  ;;  %v4030_v19 = vsel %vm4005_vm7, %v21126_v9, %v14630_v45  ;;  %v302_v9 = vpop.f32.mrb[7].mxu0  ;;  %v342_v11 = vpop.f32.mrb[6].mxu1  ;;  %v21127_v45 = vunpack.i.h.bf16 %v16614_v20  ;;  %v16859_v10 = vor.u32 %v13769_v63, %v13768_v35 }
 0x167   :  { %v16861_v1 = vpack.c.bf16 %v4031_v40, %v4030_v19  ;;  %21129 = vst [vmem:[#allocation120_spill] sm:$0xff] %v16864_v21  ;;  %v16866_v24 = vpop.permute.xlu1 %14698  ;;  %v343_v9 = vpop.f32.mrb[7].mxu1  ;;  %v4018_v63 = vsel %vm4005_vm7, %v14655_v27, %v14660_v8  ;;  %v14671_v20 = vunpack.i.h.bf16 %v16687_v16  ;;  %v14670_v27 = vunpack.i.l.bf16 %v16687_v16  ;;  %v13771_v16 = vld [vmem:[%s20654_s2 + $0x41] ss:$8 sm:$0xf0] }
 0x168   :  { %v4021_v25 = vsel %vm4005_vm7, %v21127_v45, %v14656_v12  ;;  %v16873_v57 = vpop.permute.xlu0 %14663  ;;  %v21131_v35 = vmov %v21127_v45 }
 0x169   :  { %21128 = vst [vmem:[#allocation119_spill] sm:$0xff] %v16861_v1  ;;  %v16868_v11 = vpack.c.bf16 %v4021_v25, %v4020_v37  ;;  %13838 = vmatmul.mubr.msk.bf16.vlgmr.msra.gmra.mrb[112].mxu0 %vm177_vm1, %v16848_v52  ;;  %v14666_v40 = vunpack.i.h.bf16 %v16873_v57  ;;  %v14665_v41 = vunpack.i.l.bf16 %v16873_v57  ;;  %v21132_v25 = vunpack.i.h.bf16 %v16750_v32 }
 0x16a   :  { %4142 = vmatpush1.bf16.msra.mxu0 %v16861_v1  ;;  %4173 = vmatprep.mubr.bf16.mxu0 %v21001_v29  ;;  %v21133_v37 = vunpack.i.l.bf16 %v16750_v32 }
 0x16b   :  { %21130 = vst [vmem:[#allocation121_spill] sm:$0xff] %v16868_v11  ;;  %13839 = vmatmul.mubr.msk.bf16.vlgmr.msra.gmra.mrb[112].mxu1 %vm177_vm1, %v16848_v52  ;;  %4223 = vmatprep.subr.bf16.mxu0 %v16868_v11  ;;  %v16899_v9 = vpop.permute.xlu1 %14708  ;;  %v16901_v38 = vpop.f32.mrb[8].mxu0  ;;  %v4016_v47 = vsel %vm4005_vm7, %v14660_v8, %v14665_v41  ;;  %v4023_v19 = vsel %vm4005_vm7, %v21132_v25, %v21131_v35  ;;  %v13770_v8 = vld [vmem:[%s20654_s2 + $0x41] ss:$8 sm:$0xf]  ;;  %v21135_v25 = vunpack.i.l.bf16 %v16658_v33 }
 0x16c   :  { %4183 = vmatpush1.bf16.msra.mxu1 %v16864_v21  ;;  %4214 = vmatprep.mubr.bf16.mxu1 %v21001_v29  ;;  %v4022_v45 = vsel %vm4005_vm7, %v21133_v37, %v14650_v54  ;;  %v4019_v21 = vsel %vm4005_vm7, %v14656_v12, %v14661_v61  ;;  %v16924_v11 = vpop.f32.mrb[9].mxu0  ;;  %v16926_v57 = vpop.f32.mrb[8].mxu1  ;;  %v4017_v32 = vsel %vm4005_vm7, %v14661_v61, %v14666_v40  ;;  %v21136_v61 = vunpack.i.l.bf16 %v16729_v26 }
 0x16d   :  { %v383_v1 = vpop.f32.mrb[10].mxu0  ;;  %v16929_v22 = vpop.f32.mrb[9].mxu1  ;;  %v21138_v12 = vunpack.i.h.bf16 %v16729_v26 }
 0x16e   :  { %v14674_v35 = vpop.permute.xlu0 %14673  ;;  %v384_v37 = vpop.f32.mrb[11].mxu0  ;;  %v16941_v1 = vpack.c.bf16 %v4017_v32, %v4016_v47  ;;  %v4008_v54 = vsel %vm4005_vm7, %v21136_v61, %v21135_v25  ;;  %v16958_v47 = vpack.c.bf16 %v4023_v19, %v4022_v45  ;;  %v16960_v32 = vpack.c.bf16 %v4019_v21, %v4018_v63 }
 0x16f   :  { %v4009_v48 = vsel %vm4005_vm7, %v21138_v12, %v21137_v59  ;;  %v14676_v37 = vunpack.i.h.bf16 %v14674_v35  ;;  %v14675_v46 = vunpack.i.l.bf16 %v14674_v35  ;;  %v424_v18 = vpop.f32.mrb[10].mxu1  ;;  %v16962_v28 = vpop.permute.xlu1 %14718  ;;  %v16980_v63 = vor.u32 %v13771_v16, %v13770_v8 }
 0x170   :  { %21134 = vst [vmem:[#allocation122_spill] sm:$0xff] %v16941_v1  ;;  %21139 = vst [vmem:[#allocation123_spill] sm:$0xff] %v16958_v47  ;;  %v425_v25 = vpop.f32.mrb[11].mxu1  ;;  %4264 = vmatprep.subr.bf16.mxu1 %v16941_v1  ;;  %v16975_v18 = vpack.c.bf16 %v4009_v48, %v4008_v54  ;;  %v4015_v35 = vsel %vm4005_vm7, %v14666_v40, %v14671_v20  ;;  %v4014_v54 = vsel %vm4005_vm7, %v14665_v41, %v14670_v27 }
 0x171   :  { %21140 = vst [vmem:[#allocation124_spill] sm:$0xff] %v16960_v32  ;;  %13840 = vmatmul.mubr.msk.bf16.vlgmr.msra.gmra.mrb[116].mxu0 %vm177_vm1, %v16848_v52  ;;  %v4012_v19 = vsel %vm4005_vm7, %v14670_v27, %v14675_v46  ;;  %v4013_v48 = vsel %vm4005_vm7, %v14671_v20, %v14676_v37  ;;  %v21143_v33 = vmov %v21138_v12  ;;  %v21144_v41 = vunpack.i.l.bf16 %v16729_v26 }
 0x172   :  { %4224 = vmatpush1.bf16.msra.mxu0 %v16958_v47  ;;  %21141 = vst [vmem:[#allocation125_spill] sm:$0xff] %v16975_v18  ;;  %4255 = vmatprep.mubr.bf16.mxu0 %v21001_v29  ;;  %v16988_v61 = vpop.permute.xlu0 %14683  ;;  %v17001_v21 = vpack.c.bf16 %v4013_v48, %v4012_v19  ;;  %v4011_v20 = vsel %vm4005_vm7, %v14676_v37, %v21143_v33  ;;  %v14691_v1 = vunpack.i.h.bf16 %v16784_v14 }
 0x173   :  { %13841 = vmatmul.mubr.msk.bf16.vlgmr.msra.gmra.mrb[116].mxu1 %vm177_vm1, %v16848_v52  ;;  %v14686_v8 = vunpack.i.h.bf16 %v16988_v61  ;;  %v16997_v25 = vpop.permute.xlu1 %14728  ;;  %v16999_v40 = vpop.f32.mrb[12].mxu0  ;;  %v4010_v27 = vsel %vm4005_vm7, %v14675_v46, %v21144_v41  ;;  %v14690_v41 = vunpack.i.l.bf16 %v16784_v14  ;;  %v17033_v48 = vpack.c.bf16 %v4015_v35, %v4014_v54 }
 0x174   :  { %4265 = vmatpush1.bf16.msra.mxu1 %v16960_v32  ;;  %21142 = vst [vmem:[#allocation126_spill] sm:$0xff] %v17001_v21  ;;  %4296 = vmatprep.mubr.bf16.mxu1 %v21001_v29  ;;  %v17013_v59 = vpop.f32.mrb[13].mxu0  ;;  %v17015_v45 = vpop.f32.mrb[12].mxu1  ;;  %v21147_v46 = vunpack.i.l.bf16 %v16866_v24  ;;  %v21148_v32 = vunpack.i.h.bf16 %v16866_v24  ;;  %v17047_v33 = vpack.c.bf16 %v4011_v20, %v4010_v27  ;;  %v21152_v20 = vrot.slane %v16725_v6, %v16732_v31 }
 0x175   :  { %4346 = vmatprep.subr.bf16.mxu1 %v16975_v18  ;;  %v465_v12 = vpop.f32.mrb[14].mxu0  ;;  %v17021_v16 = vpop.f32.mrb[13].mxu1  ;;  %4305 = vmatprep.subr.bf16.mxu0 %v17001_v21  ;;  %21145 = vst [vmem:[#allocation127_spill] sm:$0xff] %v17033_v48  ;;  %v21146_v18 = vunpack.i.l.bf16 %v16988_v61 }
 0x176   :  { %v17035_v12 = vpop.permute.xlu0 %14693  ;;  %v466_v19 = vpop.f32.mrb[15].mxu0  ;;  %v4605_v37 = vsel %vm4573_vm8, %v21148_v32, %v14686_v8  ;;  %21149 = vst [vmem:[#allocation128_spill] sm:$0xff] %v17047_v33  ;;  %v601_v27 = vmul.f32 %v21152_v20, %v16695_v49  ;;  %v21155_v49 = vrot.slane %v16725_v6, %v16766_v4 }
 0x177   :  { %v4604_v26 = vsel %vm4573_vm8, %v21147_v46, %v21146_v18  ;;  %v20923_v35 = vunpack.i.h.bf16 %v17035_v12  ;;  %v20922_v54 = vunpack.i.l.bf16 %v17035_v12  ;;  %v506_v21 = vpop.f32.mrb[14].mxu1  ;;  %v17051_v19 = vpop.permute.xlu1 %14738  ;;  %v21151_v18 = vrot.slane %v16725_v6, %v16721_v43 }
 0x178   :  { %v17053_v47 = vpack.c.bf16 %v4605_v37, %v4604_v26  ;;  %v507_v58 = vpop.f32.mrb[15].mxu1  ;;  %v21154_v26 = vrot.slane %v16725_v6, %v16713_v44 }
 0x179   :  { %v600_v46 = vmul.f32 %v21151_v18, %v16682_v53  ;;  %13842 = vmatmul.mubr.msk.bf16.vlgmr.msra.gmra.mrb[120].mxu0 %vm177_vm1, %v16848_v52  ;;  %v21153_v53 = vrot.slane %v16725_v6, %v16711_v3  ;;  %v4600_v58 = vsel %vm4573_vm8, %v14690_v41, %v20922_v54  ;;  %v17088_v18 = vmul.f32 %v21155_v49, %v16809_v17 }
 0x17a   :  { %21150 = vst [vmem:[#allocation129_spill] sm:$0xff] %v17053_v47  ;;  %4306 = vmatpush1.bf16.msra.mxu0 %v17033_v48  ;;  %4337 = vmatprep.mubr.bf16.mxu0 %v21001_v29  ;;  %v599_v37 = vmul.f32 %v21154_v26, %v16727_v30  ;;  %v4601_v20 = vsel %vm4573_vm8, %v14691_v1, %v20923_v35  ;;  %v14711_v54 = vunpack.i.h.bf16 %v16899_v9  ;;  %v14710_v35 = vunpack.i.l.bf16 %v16899_v9 }
 0x17b   :  { %v598_v14 = vmul.f32 %v21153_v53, %v16716_v0  ;;  %13843 = vmatmul.mubr.msk.bf16.vlgmr.msra.gmra.mrb[120].mxu1 %vm177_vm1, %v16848_v52  ;;  %v17092_v0 = vpop.permute.xlu0 %14703  ;;  %4627 = vmatprep.subr.bf16.mxu0 %v17053_v47  ;;  %v21156_v30 = vrot.slane %v16725_v6, %v16768_v15  ;;  %v17108_v49 = vpop.permute.xlu1 %14748  ;;  %v17111_v32 = vpack.c.bf16 %v4601_v20, %v4600_v58  ;;  %v21161_v20 = vunpack.i.l.bf16 %v16866_v24 }
 0x17c   :  { %4347 = vmatpush1.bf16.msra.mxu1 %v17047_v33  ;;  %v782_v21 = vpop.f32.mrb[16].mxu0  ;;  %4378 = vmatprep.mubr.bf16.mxu1 %v21001_v29  ;;  %v823_v26 = vpop.f32.mrb[16].mxu1  ;;  %v21159_v33 = vunpack.i.h.bf16 %v16866_v24  ;;  %v21160_v48 = vunpack.i.h.bf16 %v17092_v0  ;;  %v21162_v9 = vunpack.i.l.bf16 %v17092_v0 }
 0x17d   :  { %v17103_v53 = vmul.f32 %v21156_v30, %v16831_v5  ;;  %21157 = vst [vmem:[#allocation130_spill] sm:$0xff] %v17111_v32  ;;  %v4603_v5 = vsel %vm4573_vm8, %v14686_v8, %v14691_v1  ;;  %v21158_v30 = vrot.slane %v16859_v10, %v16711_v3  ;;  %v784_v47 = vpop.f32.mrb[17].mxu0  ;;  %v21163_v8 = vrot.slane %v16859_v10, %v16713_v44  ;;  %v825_v55 = vpop.f32.mrb[17].mxu1 }
 0x17e   :  { %v4575_v58 = vsel %vm4573_vm8, %v21160_v48, %v21159_v33  ;;  %v4574_v1 = vsel %vm4573_vm8, %v21162_v9, %v21161_v20  ;;  %v786_v7 = vpop.f32.mrb[18].mxu0  ;;  %4668 = vmatprep.subr.bf16.mxu1 %v17111_v32  ;;  %v21165_v48 = vunpack.i.l.bf16 %v16988_v61  ;;  %v827_v61 = vpop.f32.mrb[18].mxu1 }
 0x17f   :  { %v1166_v17 = vmul.f32 %v21158_v30, %v782_v21  ;;  %v1167_v21 = vmul.f32 %v21163_v8, %v784_v47  ;;  %v21164_v30 = vrot.slane %v16859_v10, %v16721_v43  ;;  %v17143_v33 = vpack.c.bf16 %v4575_v58, %v4574_v1  ;;  %v14714_v8 = vpop.permute.xlu0 %14713  ;;  %v787_v56 = vpop.f32.mrb[19].mxu0 }
 0x180   :  { %v4602_v24 = vsel %vm4573_vm8, %v21165_v48, %v14690_v41  ;;  %v21167_v47 = vrot.slane %v16859_v10, %v16732_v31  ;;  %v14715_v32 = vunpack.i.l.bf16 %v14714_v8  ;;  %v21168_v41 = vrot.slane %v16725_v6, %v16770_v36 }
 0x181   :  { %v1168_v23 = vmul.f32 %v21164_v30, %v823_v26  ;;  %21166 = vst [vmem:[#allocation131_spill] sm:$0xff] %v17143_v33  ;;  %v17145_v20 = vadd.f32 %v1166_v17, %v598_v14  ;;  %v17150_v26 = vadd.f32 %v1167_v21, %v599_v37  ;;  %v14716_v30 = vunpack.i.h.bf16 %v14714_v8  ;;  %13844 = vmatmul.mubr.msk.bf16.vlgmr.msra.gmra.mrb[124].mxu0 %vm177_vm1, %v16848_v52 }
 0x182   :  { %v1169_v9 = vmul.f32 %v21167_v47, %v825_v55  ;;  %v604_v58 = vmul.f32 %v21168_v41, %v16833_v60  ;;  %v21169_v14 = vrot.slane %v16725_v6, %v16776_v2  ;;  %v21170_v56 = vrot.slane %v16802_v62, %v16711_v3  ;;  %4628 = vmatpush1.bf16.msra.mxu0 %v17143_v33 }
 0x183   :  { %v17152_v7 = vadd.f32 %v1168_v23, %v600_v46  ;;  %v828_v46 = vpop.f32.mrb[19].mxu1  ;;  %v14721_v37 = vunpack.i.h.bf16 %v16962_v28  ;;  %v14720_v60 = vunpack.i.l.bf16 %v16962_v28  ;;  %v17174_v1 = vpack.c.bf16 %v4603_v5, %v4602_v24  ;;  %4659 = vmatprep.mubr.bf16.mxu0 %v21001_v29  ;;  %13845 = vmatmul.mubr.msk.bf16.vlgmr.msra.gmra.mrb[124].mxu1 %vm177_vm1, %v16848_v52  ;;  %v14724_v21 = vpop.permute.xlu0 %14723 }
 0x184   :  { %v605_v17 = vmul.f32 %v21169_v14, %v16843_v50  ;;  %v17166_v55 = vmul.f32 %v21170_v56, %v16901_v38  ;;  %v17168_v23 = vadd.f32 %v1169_v9, %v601_v27  ;;  %v4596_v6 = vsel %vm4573_vm8, %v14710_v35, %v14715_v32  ;;  %v17205_v9 = vpop.permute.xlu1 %14758  ;;  %v864_v52 = vpop.f32.mrb[20].mxu0  ;;  %4700 = vmatprep.mubr.bf16.mxu1 %v21001_v29 }
 0x185   :  { %21171 = vst [vmem:[#allocation132_spill] sm:$0xff] %v17174_v1  ;;  %v21172_v50 = vrot.slane %v16802_v62, %v16713_v44  ;;  %v21173_v27 = vrot.slane %v16802_v62, %v16721_v43  ;;  %v14731_v5 = vunpack.i.h.bf16 %v16997_v25  ;;  %v4597_v48 = vsel %vm4573_vm8, %v14711_v54, %v14716_v30  ;;  %4669 = vmatpush1.bf16.msra.mxu1 %v17174_v1  ;;  %v905_v46 = vpop.f32.mrb[20].mxu1 }
 0x186   :  { %v21174_v24 = vunpack.i.h.bf16 %v17035_v12  ;;  %v21175_v47 = vunpack.i.l.bf16 %v17035_v12  ;;  %v14725_v8 = vunpack.i.l.bf16 %v14724_v21  ;;  %v17208_v61 = vpack.c.bf16 %v4597_v48, %v4596_v6 }
 0x187   :  { %v17184_v38 = vmul.f32 %v21172_v50, %v16924_v11  ;;  %v17190_v28 = vmul.f32 %v21173_v27, %v16926_v57  ;;  %v14730_v41 = vunpack.i.l.bf16 %v16997_v25  ;;  %v21177_v12 = vrot.slane %v16859_v10, %v16766_v4 }
 0x188   :  { %v4599_v11 = vsel %vm4573_vm8, %v21174_v24, %v14711_v54  ;;  %v4598_v57 = vsel %vm4573_vm8, %v21175_v47, %v14710_v35  ;;  %21176 = vst [vmem:[#allocation133_spill] sm:$0xff] %v17208_v61  ;;  %v14726_v54 = vunpack.i.h.bf16 %v14724_v21  ;;  %v866_v35 = vpop.f32.mrb[21].mxu0  ;;  %v4595_v50 = vsel %vm4573_vm8, %v14716_v30, %v14721_v37  ;;  %v907_v47 = vpop.f32.mrb[21].mxu1  ;;  %4709 = vmatprep.subr.bf16.mxu0 %v17208_v61 }
 0x189   :  { %v1170_v56 = vmul.f32 %v21177_v12, %v864_v52  ;;  %v4594_v6 = vsel %vm4573_vm8, %v14715_v32, %v14720_v60  ;;  %v21178_v27 = vrot.slane %v16859_v10, %v16768_v15  ;;  %v21179_v25 = vrot.slane %v16859_v10, %v16770_v36  ;;  %v868_v24 = vpop.f32.mrb[22].mxu0  ;;  %v17230_v52 = vld [vmem:[%s20653_s3 + $0x20] sm:$0xf] }
 0x18a   :  { %v17232_v30 = vpack.c.bf16 %v4599_v11, %v4598_v57  ;;  %v21180_v12 = vrot.slane %v16859_v10, %v16776_v2  ;;  %v909_v57 = vpop.f32.mrb[22].mxu1  ;;  %13851 = vmatmul.mubr.msk.bf16.vlgmr.msra.gmra.mrb[128].mxu0 %vm177_vm1, %v17230_v52 }
 0x18b   :  { %v1171_v48 = vmul.f32 %v21178_v27, %v866_v35  ;;  %v1172_v21 = vmul.f32 %v21179_v25, %v905_v46  ;;  %v17235_v32 = vadd.f32 %v1170_v56, %v17088_v18  ;;  %v14734_v27 = vpop.permute.xlu0 %14733  ;;  %v869_v46 = vpop.f32.mrb[23].mxu0  ;;  %v4592_v25 = vsel %vm4573_vm8, %v14720_v60, %v14725_v8  ;;  %4741 = vmatprep.mubr.bf16.mxu0 %v21001_v29 }
 0x18c   :  { %v1173_v35 = vmul.f32 %v21180_v12, %v907_v47  ;;  %v14736_v33 = vunpack.i.h.bf16 %v14734_v27  ;;  %v14735_v11 = vunpack.i.l.bf16 %v14734_v27  ;;  %v14740_v18 = vunpack.i.l.bf16 %v17051_v19  ;;  %v910_v10 = vpop.f32.mrb[23].mxu1  ;;  %4710 = vmatpush1.bf16.msra.mxu0 %v17232_v30  ;;  %13852 = vmatmul.mubr.msk.bf16.vlgmr.msra.gmra.mrb[128].mxu1 %vm177_vm1, %v17230_v52  ;;  %v946_v46 = vpop.f32.mrb[24].mxu0 }
 0x18d   :  { %v17243_v24 = vadd.f32 %v1171_v48, %v17103_v53  ;;  %v17245_v14 = vadd.f32 %v1172_v21, %v604_v58  ;;  %v17248_v56 = vpack.c.bf16 %v4595_v50, %v4594_v6  ;;  %v4593_v60 = vsel %vm4573_vm8, %v14721_v37, %v14726_v54  ;;  %4782 = vmatprep.mubr.bf16.mxu1 %v21001_v29 }
 0x18e   :  { %v17250_v1 = vadd.f32 %v1173_v35, %v605_v17  ;;  %v21182_v53 = vrot.slane %v16802_v62, %v16732_v31  ;;  %v20947_v48 = vunpack.i.h.bf16 %v17205_v9  ;;  %v20944_v21 = vunpack.i.l.bf16 %v17205_v9 }
 0x18f   :  { %21181 = vst [vmem:[#allocation134_spill] sm:$0xff] %v17248_v56  ;;  %v17263_v17 = vpack.c.bf16 %v4593_v60, %v4592_v25  ;;  %v14751_v50 = vunpack.i.h.bf16 %v17108_v49  ;;  %v4591_v37 = vsel %vm4573_vm8, %v14726_v54, %v14731_v5  ;;  %v14744_v6 = vpop.permute.xlu0 %14743  ;;  %v4589_v47 = vsel %vm4573_vm8, %v14731_v5, %v14736_v33  ;;  %v948_v60 = vpop.f32.mrb[25].mxu0 }
 0x190   :  { %v609_v58 = vmul.f32 %v21182_v53, %v16929_v22  ;;  %v4588_v22 = vsel %vm4573_vm8, %v14730_v41, %v14735_v11  ;;  %v4590_v12 = vsel %vm4573_vm8, %v14725_v8, %v14730_v41  ;;  %v14746_v35 = vunpack.i.h.bf16 %v14744_v6  ;;  %v987_v53 = vpop.f32.mrb[24].mxu1 }
 0x191   :  { %4750 = vmatprep.subr.bf16.mxu1 %v17263_v17  ;;  %v14745_v27 = vunpack.i.l.bf16 %v14744_v6  ;;  %v17278_v25 = vpack.c.bf16 %v4589_v47, %v4588_v22  ;;  %v14750_v54 = vunpack.i.l.bf16 %v17108_v49  ;;  %v21183_v57 = vunpack.i.h.bf16 %v17051_v19 }
 0x192   :  { %v4586_v5 = vsel %vm4573_vm8, %v14735_v11, %v14740_v18  ;;  %4751 = vmatpush1.bf16.msra.mxu1 %v17248_v56  ;;  %v21184_v8 = vrot.slane %v16980_v63, %v16711_v3  ;;  %v21185_v6 = vrot.slane %v16980_v63, %v16713_v44  ;;  %v21186_v22 = vrot.slane %v16980_v63, %v16721_v43 }
 0x193   :  { %v4587_v10 = vsel %vm4573_vm8, %v14736_v33, %v21183_v57  ;;  %v950_v33 = vpop.f32.mrb[26].mxu0  ;;  %v989_v57 = vpop.f32.mrb[25].mxu1  ;;  %4791 = vmatprep.subr.bf16.mxu0 %v17278_v25  ;;  %v21187_v11 = vunpack.i.l.bf16 %v17092_v0  ;;  %v4584_v56 = vsel %vm4573_vm8, %v14740_v18, %v14745_v27  ;;  %13853 = vmatmul.mubr.msk.bf16.vlgmr.msra.gmra.mrb[132].mxu0 %vm177_vm1, %v17230_v52 }
 0x194   :  { %v1174_v41 = vmul.f32 %v21184_v8, %v946_v46  ;;  %v1175_v49 = vmul.f32 %v21185_v6, %v948_v60  ;;  %v1176_v47 = vmul.f32 %v21186_v22, %v987_v53  ;;  %v21188_v8 = vunpack.i.h.bf16 %v17092_v0  ;;  %v13781_v53 = vld [vmem:[%s20654_s2 + $0x2] ss:$8 sm:$0xf]  ;;  %v991_v0 = vpop.f32.mrb[26].mxu1  ;;  %4823 = vmatprep.mubr.bf16.mxu0 %v21001_v29 }
 0x195   :  { %v4576_v46 = vsel %vm4573_vm8, %v20944_v21, %v21187_v11  ;;  %v17314_v6 = vpack.c.bf16 %v4591_v37, %v4590_v12  ;;  %v21189_v33 = vrot.slane %v16980_v63, %v16732_v31  ;;  %v951_v21 = vpop.f32.mrb[27].mxu0  ;;  %v992_v12 = vpop.f32.mrb[27].mxu1  ;;  %13854 = vmatmul.mubr.msk.bf16.vlgmr.msra.gmra.mrb[132].mxu1 %vm177_vm1, %v17230_v52 }
 0x196   :  { %v4577_v60 = vsel %vm4573_vm8, %v20947_v48, %v21188_v8  ;;  %v17317_v22 = vadd.f32 %v1174_v41, %v17166_v55  ;;  %v13782_v8 = vld [vmem:[%s20654_s2 + $0x2] ss:$8 sm:$0xf0]  ;;  %v17327_v48 = vpack.c.bf16 %v4587_v10, %v4586_v5  ;;  %v17330_v37 = vadd.f32 %v1175_v49, %v17184_v38  ;;  %v1028_v0 = vpop.f32.mrb[28].mxu0  ;;  %4864 = vmatprep.mubr.bf16.mxu1 %v21001_v29 }
 0x197   :  { %v1177_v11 = vmul.f32 %v21189_v33, %v989_v57  ;;  %v17333_v55 = vadd.f32 %v1176_v47, %v17190_v28  ;;  %v21190_v41 = vunpack.i.h.bf16 %v17051_v19  ;;  %v14754_v57 = vpop.permute.xlu0 %14753  ;;  %4792 = vmatpush1.bf16.msra.mxu0 %v17314_v6  ;;  %v1145_v28 = vrot.slane %v16980_v63, %v16770_v36  ;;  %v1030_v12 = vpop.f32.mrb[29].mxu0 }
 0x198   :  { %v14756_v5 = vunpack.i.h.bf16 %v14754_v57  ;;  %v14755_v38 = vunpack.i.l.bf16 %v14754_v57  ;;  %v1149_v19 = vrot.slane %v16980_v63, %v16776_v2  ;;  %v17351_v49 = vor.u32 %v13782_v8, %v13781_v53 }
 0x199   :  { %v4585_v21 = vsel %vm4573_vm8, %v21190_v41, %v14746_v35  ;;  %v17339_v18 = vadd.f32 %v1177_v11, %v609_v58  ;;  %v21191_v58 = vrot.slane %v16802_v62, %v16766_v4  ;;  %v17360_v47 = vpack.c.bf16 %v4577_v60, %v4576_v46 }
 0x19a   :  { %v17343_v10 = vpack.c.bf16 %v4585_v21, %v4584_v56  ;;  %v4580_v33 = vsel %vm4573_vm8, %v14750_v54, %v14755_v38  ;;  %v4583_v11 = vsel %vm4573_vm8, %v14746_v35, %v14751_v50  ;;  %v4582_v53 = vsel %vm4573_vm8, %v14745_v27, %v14750_v54 }
 0x19b   :  { %v610_v56 = vmul.f32 %v21191_v58, %v16999_v40  ;;  %v4581_v40 = vsel %vm4573_vm8, %v14751_v50, %v14756_v5  ;;  %v21192_v46 = vunpack.i.h.bf16 %v17205_v9  ;;  %v21193_v8 = vunpack.i.l.bf16 %v17205_v9  ;;  %v1069_v50 = vpop.f32.mrb[28].mxu1  ;;  %13855 = vmatmul.mubr.msk.bf16.vlgmr.msra.gmra.mrb[136].mxu0 %vm177_vm1, %v17230_v52 }
 0x19c   :  { %4832 = vmatprep.subr.bf16.mxu1 %v17343_v10  ;;  %v21194_v27 = vrot.slane %v16980_v63, %v16766_v4  ;;  %v17384_v41 = vpack.c.bf16 %v4581_v40, %v4580_v33  ;;  %v21196_v21 = vrot.slane %v16802_v62, %v16768_v15  ;;  %v612_v9 = vmul.f32 %v21197_v51, %v17015_v45 }
 0x19d   :  { %4833 = vmatpush1.bf16.msra.mxu1 %v17327_v48  ;;  %v4579_v60 = vsel %vm4573_vm8, %v14756_v5, %v21192_v46  ;;  %v4578_v35 = vsel %vm4573_vm8, %v14755_v38, %v21193_v8  ;;  %v21198_v5 = vrot.slane %v16980_v63, %v16768_v15  ;;  %v1180_v58 = vmul.f32 %v1145_v28, %v1069_v50  ;;  %v1071_v46 = vpop.f32.mrb[29].mxu1 }
 0x19e   :  { %4914 = vmatprep.subr.bf16.mxu1 %v17360_v47  ;;  %v1178_v54 = vmul.f32 %v21194_v27, %v1028_v0  ;;  %21195 = vst [vmem:[#allocation135_spill] sm:$0xff] %v17384_v41  ;;  %v611_v57 = vmul.f32 %v21196_v21, %v17013_v59  ;;  %v1032_v0 = vpop.f32.mrb[30].mxu0  ;;  %v21199_v33 = vrot.slane %v16802_v62, %v16776_v2  ;;  %v1073_v21 = vpop.f32.mrb[30].mxu1 }
 0x19f   :  { %v1179_v38 = vmul.f32 %v21198_v5, %v1030_v12  ;;  %v1181_v59 = vmul.f32 %v1149_v19, %v1071_v46  ;;  %v1033_v27 = vpop.f32.mrb[31].mxu0  ;;  %4873 = vmatprep.subr.bf16.mxu0 %v17384_v41  ;;  %v17404_v45 = vpack.c.bf16 %v4583_v11, %v4582_v53  ;;  %v17406_v51 = vpack.c.bf16 %v4579_v60, %v4578_v35  ;;  %v1074_v12 = vpop.f32.mrb[31].mxu1  ;;  %v21202_v60 = vld [vmem:[#allocation6_spill] sm:$0xff] }
 0x1a0   :  { %v613_v40 = vmul.f32 %v21199_v33, %v17021_v16  ;;  %v17401_v8 = vadd.f32 %v1178_v54, %v610_v56  ;;  %v17410_v28 = vadd.f32 %v1180_v58, %v612_v9  ;;  %v1657_v62 = vrot.slane %v17351_v49, %v16711_v3  ;;  %4905 = vmatprep.mubr.bf16.mxu0 %v21001_v29  ;;  %v21201_v56 = vld [vmem:[#allocation4_spill] sm:$0xff]  ;;  %v1350_v53 = vpop.f32.mrb[32].mxu0 }
 0x1a1   :  { %21200 = vst [vmem:[#allocation136_spill] sm:$0xff] %v17404_v45  ;;  %v17408_v63 = vadd.f32 %v1179_v38, %v611_v57  ;;  %4874 = vmatpush1.bf16.msra.mxu0 %v17404_v45  ;;  %v1661_v16 = vrot.slane %v17351_v49, %v16713_v44  ;;  %v1665_v19 = vrot.slane %v17351_v49, %v16721_v43  ;;  %v1352_v54 = vpop.f32.mrb[33].mxu0  ;;  %v1391_v57 = vpop.f32.mrb[32].mxu1 }
 0x1a2   :  { %v17412_v50 = vadd.f32 %v1181_v59, %v613_v40  ;;  %13856 = vmatmul.mubr.msk.bf16.vlgmr.msra.gmra.mrb[136].mxu1 %vm177_vm1, %v17230_v52  ;;  %5082 = vmatprep.subr.bf16.mxu0 %v21201_v56  ;;  %v1669_v11 = vrot.slane %v17351_v49, %v16732_v31  ;;  %v1734_v35 = vmul.f32 %v1657_v62, %v1350_v53  ;;  %v1354_v38 = vpop.f32.mrb[34].mxu0  ;;  %v1393_v58 = vpop.f32.mrb[33].mxu1  ;;  %v21203_v62 = vld [vmem:[#allocation3_spill] sm:$0xff] }
 0x1a3   :  { %4915 = vmatpush1.bf16.msra.mxu1 %v17406_v51  ;;  %4946 = vmatprep.mubr.bf16.mxu1 %v21001_v29  ;;  %v1735_v9 = vmul.f32 %v1661_v16, %v1352_v54  ;;  %v1736_v5 = vmul.f32 %v1665_v19, %v1391_v57  ;;  %v1355_v33 = vpop.f32.mrb[35].mxu0  ;;  %v1395_v40 = vpop.f32.mrb[34].mxu1  ;;  %v1677_v16 = vrot.slane %v17351_v49, %v16768_v15  ;;  %v21204_v19 = vld [vmem:[#allocation8_spill] sm:$0xff]  ;;  %v21205_v53 = vld [vmem:[#allocation7_spill] sm:$0xff]  ;;  %v21206_v54 = vld [vmem:[#allocation10_spill] sm:$0xff] }
 0x1a4   :  { %5123 = vmatprep.subr.bf16.mxu1 %v21202_v60  ;;  %v17433_v0 = vadd.f32 %v1734_v35, %v17145_v20  ;;  %v1737_v46 = vmul.f32 %v1669_v11, %v1393_v58  ;;  %v1396_v21 = vpop.f32.mrb[35].mxu1  ;;  %13857 = vmatmul.mubr.msk.bf16.vlgmr.msra.gmra.mrb[140].mxu0 %vm177_vm1, %v17230_v52  ;;  %v1673_v20 = vrot.slane %v17351_v49, %v16766_v4  ;;  %v1432_v35 = vpop.f32.mrb[36].mxu0 }
 0x1a5   :  { %v17436_v59 = vadd.f32 %v1735_v9, %v17150_v26  ;;  %v17439_v27 = vadd.f32 %v1736_v5, %v17152_v7  ;;  %5083 = vmatpush1.bf16.msra.mxu0 %v21203_v62  ;;  %v1681_v26 = vrot.slane %v17351_v49, %v16770_v36  ;;  %5114 = vmatprep.mubr.bf16.mxu0 %v21001_v29  ;;  %v13783_v7 = vld [vmem:[%s20654_s2 + $0x42] ss:$8 sm:$0xf]  ;;  %v1434_v9 = vpop.f32.mrb[37].mxu0  ;;  %v1473_v5 = vpop.f32.mrb[36].mxu1 }
 0x1a6   :  { %v17442_v12 = vadd.f32 %v1737_v46, %v17168_v23  ;;  %v13784_v23 = vld [vmem:[%s20654_s2 + $0x42] ss:$8 sm:$0xf0]  ;;  %5164 = vmatprep.subr.bf16.mxu0 %v21204_v19  ;;  %v1685_v11 = vrot.slane %v17351_v49, %v16776_v2  ;;  %v1738_v57 = vmul.f32 %v1673_v20, %v1432_v35  ;;  %v1739_v58 = vmul.f32 %v1677_v16, %v1434_v9  ;;  %v1475_v33 = vpop.f32.mrb[37].mxu1  ;;  %v17473_v49 = vld [vmem:[%s20653_s3 + $0x24] sm:$0xf] }
 0x1a7   :  { %v17468_v38 = vor.u32 %v13784_v23, %v13783_v7  ;;  %v1740_v46 = vmul.f32 %v1681_v26, %v1473_v5  ;;  %v1477_v56 = vpop.f32.mrb[38].mxu1  ;;  %v21207_v23 = vld [vmem:[#allocation9_spill] sm:$0xff]  ;;  %v21210_v35 = vld [vmem:[#allocation14_spill] sm:$0xff] }
 0x1a8   :  { %v17476_v40 = vadd.f32 %v1738_v57, %v17235_v32  ;;  %v1741_v21 = vmul.f32 %v1685_v11, %v1475_v33  ;;  %v17479_v20 = vadd.f32 %v1739_v58, %v17243_v24  ;;  %v1478_v16 = vpop.f32.mrb[39].mxu1 }
 0x1a9   :  { %v17482_v7 = vadd.f32 %v1740_v46, %v17245_v14  ;;  %v1689_v32 = vrot.slane %v17468_v38, %v16711_v3  ;;  %v1693_v56 = vrot.slane %v17468_v38, %v16713_v44  ;;  %v1697_v24 = vrot.slane %v17468_v38, %v16721_v43 }
 0x1aa   :  { %13858 = vmatmul.mubr.msk.bf16.vlgmr.msra.gmra.mrb[140].mxu1 %vm177_vm1, %v17230_v52  ;;  %v1436_v52 = vpop.f32.mrb[38].mxu0  ;;  %v17485_v26 = vadd.f32 %v1741_v21, %v17250_v1  ;;  %v21208_v1 = vld [vmem:[#allocation12_spill] sm:$0xff]  ;;  %v1701_v14 = vrot.slane %v17468_v38, %v16732_v31 }
 0x1ab   :  { %5124 = vmatpush1.bf16.msra.mxu1 %v21205_v53  ;;  %5155 = vmatprep.mubr.bf16.mxu1 %v21001_v29  ;;  %v1437_v62 = vpop.f32.mrb[39].mxu0 }
 0x1ac   :  { %5205 = vmatprep.subr.bf16.mxu1 %v21206_v54  ;;  %13864 = vmatmul.mubr.msk.bf16.vlgmr.msra.gmra.mrb[144].mxu0 %vm177_vm1, %v17473_v49  ;;  %v21209_v62 = vld [vmem:[#allocation11_spill] sm:$0xff]  ;;  %v1514_v11 = vpop.f32.mrb[40].mxu0  ;;  %v1555_v5 = vpop.f32.mrb[40].mxu1 }
 0x1ad   :  { %5165 = vmatpush1.bf16.msra.mxu0 %v21207_v23  ;;  %5196 = vmatprep.mubr.bf16.mxu0 %v21001_v29  ;;  %v1742_v57 = vmul.f32 %v1689_v32, %v1514_v11  ;;  %v1516_v9 = vpop.f32.mrb[41].mxu0  ;;  %v1744_v46 = vmul.f32 %v1697_v24, %v1555_v5  ;;  %v1557_v33 = vpop.f32.mrb[41].mxu1  ;;  %v21212_v24 = vld [vmem:[#allocation15_spill] sm:$0xff] }
 0x1ae   :  { %5246 = vmatprep.subr.bf16.mxu0 %v21208_v1  ;;  %v1743_v58 = vmul.f32 %v1693_v56, %v1516_v9  ;;  %v1518_v52 = vpop.f32.mrb[42].mxu0  ;;  %v1745_v16 = vmul.f32 %v1701_v14, %v1557_v33  ;;  %v1559_v23 = vpop.f32.mrb[42].mxu1  ;;  %v21211_v56 = vld [vmem:[#allocation13_spill] sm:$0xff]  ;;  %v21213_v14 = vld [vmem:[#allocation16_spill] sm:$0xff] }
 0x1af   :  { %v17506_v21 = vadd.f32 %v1742_v57, %v17317_v22  ;;  %v1519_v1 = vpop.f32.mrb[43].mxu0  ;;  %v17512_v54 = vadd.f32 %v1744_v46, %v17333_v55  ;;  %v1705_v22 = vrot.slane %v17468_v38, %v16766_v4  ;;  %v1709_v23 = vrot.slane %v17468_v38, %v16768_v15  ;;  %v13794_v55 = vld [vmem:[%s20654_s2 + $0x3] ss:$8 sm:$0xf] }
 0x1b0   :  { %v17515_v32 = vadd.f32 %v1745_v16, %v17339_v18  ;;  %v13795_v18 = vld [vmem:[%s20654_s2 + $0x3] ss:$8 sm:$0xf0]  ;;  %v1717_v1 = vrot.slane %v17468_v38, %v16776_v2 }
 0x1b2   :  { %13865 = vmatmul.mubr.msk.bf16.vlgmr.msra.gmra.mrb[144].mxu1 %vm177_vm1, %v17473_v49 }
 0x1b3   :  { %5206 = vmatpush1.bf16.msra.mxu1 %v21209_v62  ;;  %5237 = vmatprep.mubr.bf16.mxu1 %v21001_v29  ;;  %v17509_v62 = vadd.f32 %v1743_v58, %v17330_v37  ;;  %v1713_v37 = vrot.slane %v17468_v38, %v16770_v36  ;;  %v1596_v11 = vpop.f32.mrb[44].mxu0  ;;  %v17541_v58 = vor.u32 %v13795_v18, %v13794_v55 }
 0x1b4   :  { %5287 = vmatprep.subr.bf16.mxu1 %v21210_v35  ;;  %v1560_v35 = vpop.f32.mrb[43].mxu1  ;;  %13866 = vmatmul.mubr.msk.bf16.vlgmr.msra.gmra.mrb[148].mxu0 %vm177_vm1, %v17473_v49  ;;  %v1746_v57 = vmul.f32 %v1705_v22, %v1596_v11  ;;  %v1598_v9 = vpop.f32.mrb[45].mxu0 }
 0x1b5   :  { %5247 = vmatpush1.bf16.msra.mxu0 %v21211_v56  ;;  %5278 = vmatprep.mubr.bf16.mxu0 %v21001_v29  ;;  %v21214_v35 = vld [vmem:[#allocation2_spill] sm:$0xff]  ;;  %v1637_v5 = vpop.f32.mrb[44].mxu1  ;;  %v1747_v46 = vmul.f32 %v1709_v23, %v1598_v9  ;;  %v1600_v33 = vpop.f32.mrb[46].mxu0  ;;  %v21215_v23 = vld [vmem:[#allocation17_spill] sm:$0xff] }
 0x1b6   :  { %5328 = vmatprep.subr.bf16.mxu0 %v21212_v24  ;;  %v1748_v52 = vmul.f32 %v1713_v37, %v1637_v5  ;;  %v1639_v16 = vpop.f32.mrb[45].mxu1  ;;  %v17544_v24 = vadd.f32 %v1746_v57, %v17401_v8  ;;  %v1601_v56 = vpop.f32.mrb[47].mxu0  ;;  %v2225_v8 = vrot.slane %v17541_v58, %v16711_v3  ;;  %v21217_v37 = vld [vmem:[#allocation5_spill] sm:$0xff] }
 0x1b7   :  { %v1749_v38 = vmul.f32 %v1717_v1, %v1639_v16  ;;  %v17547_v53 = vadd.f32 %v1747_v46, %v17408_v63  ;;  %v2229_v56 = vrot.slane %v17541_v58, %v16713_v44  ;;  %v2233_v63 = vrot.slane %v17541_v58, %v16721_v43  ;;  %v21218_v1 = vld [vmem:[#allocation22_spill] sm:$0xff] }
 0x1b9   :  { %v17553_v55 = vadd.f32 %v1749_v38, %v17412_v50  ;;  %v2237_v50 = vrot.slane %v17541_v58, %v16732_v31 }
 0x1ba   :  { %13867 = vmatmul.mubr.msk.bf16.vlgmr.msra.gmra.mrb[148].mxu1 %vm177_vm1, %v17473_v49 }
 0x1bb   :  { %5288 = vmatpush1.bf16.msra.mxu1 %v21213_v14  ;;  %5319 = vmatprep.mubr.bf16.mxu1 %v21001_v29  ;;  %v1641_v14 = vpop.f32.mrb[46].mxu1 }
 0x1bc   :  { %5369 = vmatprep.subr.bf16.mxu1 %v21214_v35  ;;  %v17550_v35 = vadd.f32 %v1748_v52, %v17410_v28  ;;  %v1642_v22 = vpop.f32.mrb[47].mxu1  ;;  %13868 = vmatmul.mubr.msk.bf16.vlgmr.msra.gmra.mrb[152].mxu0 %vm177_vm1, %v17473_v49  ;;  %v21216_v28 = vld [vmem:[#allocation18_spill] sm:$0xff]  ;;  %v1918_v18 = vpop.f32.mrb[48].mxu0 }
 0x1bd   :  { %5329 = vmatpush1.bf16.msra.mxu0 %v21215_v23  ;;  %5360 = vmatprep.mubr.bf16.mxu0 %v21001_v29  ;;  %v2302_v14 = vmul.f32 %v2225_v8, %v1918_v18  ;;  %v1920_v11 = vpop.f32.mrb[49].mxu0  ;;  %v1959_v57 = vpop.f32.mrb[48].mxu1  ;;  %v21221_v18 = vld [vmem:[#allocation23_spill] sm:$0xff] }
 0x1be   :  { %5537 = vmatprep.subr.bf16.mxu0 %v21216_v28  ;;  %v2303_v9 = vmul.f32 %v2229_v56, %v1920_v11  ;;  %v2304_v5 = vmul.f32 %v2233_v63, %v1959_v57  ;;  %v1922_v46 = vpop.f32.mrb[50].mxu0  ;;  %v1961_v52 = vpop.f32.mrb[49].mxu1  ;;  %v21219_v56 = vld [vmem:[#allocation19_spill] sm:$0xff]  ;;  %v2245_v63 = vrot.slane %v17541_v58, %v16768_v15  ;;  %v21222_v11 = vld [vmem:[#allocation26_spill] sm:$0xff] }
 0x1bf   :  { %v17574_v33 = vadd.f32 %v2302_v14, %v17433_v0  ;;  %v2305_v16 = vmul.f32 %v2237_v50, %v1961_v52  ;;  %v1923_v38 = vpop.f32.mrb[51].mxu0  ;;  %v1963_v22 = vpop.f32.mrb[50].mxu1  ;;  %v2241_v0 = vrot.slane %v17541_v58, %v16766_v4  ;;  %v2249_v50 = vrot.slane %v17541_v58, %v16770_v36 }
 0x1c0   :  { %v17577_v28 = vadd.f32 %v2303_v9, %v17436_v59  ;;  %v13796_v59 = vld [vmem:[%s20654_s2 + $0x43] ss:$8 sm:$0xf]  ;;  %v2253_v14 = vrot.slane %v17541_v58, %v16776_v2 }
 0x1c1   :  { %v17583_v8 = vadd.f32 %v2305_v16, %v17442_v12  ;;  %v21220_v12 = vld [vmem:[#allocation24_spill] sm:$0xff]  ;;  %v17614_v16 = vld [vmem:[%s20653_s3 + $0x28] sm:$0xf] }
 0x1c2   :  { %13869 = vmatmul.mubr.msk.bf16.vlgmr.msra.gmra.mrb[152].mxu1 %vm177_vm1, %v17473_v49 }
 0x1c3   :  { %5370 = vmatpush1.bf16.msra.mxu1 %v21217_v37  ;;  %5401 = vmatprep.mubr.bf16.mxu1 %v21001_v29  ;;  %v17580_v37 = vadd.f32 %v2304_v5, %v17439_v27  ;;  %v13797_v27 = vld [vmem:[%s20654_s2 + $0x43] ss:$8 sm:$0xf0] }
 0x1c4   :  { %5578 = vmatprep.subr.bf16.mxu1 %v21218_v1  ;;  %v1964_v1 = vpop.f32.mrb[51].mxu1  ;;  %13870 = vmatmul.mubr.msk.bf16.vlgmr.msra.gmra.mrb[156].mxu0 %vm177_vm1, %v17473_v49  ;;  %v17609_v5 = vor.u32 %v13797_v27, %v13796_v59 }
 0x1c5   :  { %5538 = vmatpush1.bf16.msra.mxu0 %v21219_v56  ;;  %5569 = vmatprep.mubr.bf16.mxu0 %v21001_v29  ;;  %v2000_v1 = vpop.f32.mrb[52].mxu0  ;;  %v2041_v46 = vpop.f32.mrb[52].mxu1 }
 0x1c6   :  { %5619 = vmatprep.subr.bf16.mxu0 %v21220_v12  ;;  %v2306_v57 = vmul.f32 %v2241_v0, %v2000_v1  ;;  %v2002_v9 = vpop.f32.mrb[53].mxu0  ;;  %v2308_v58 = vmul.f32 %v2249_v50, %v2041_v46  ;;  %v2043_v22 = vpop.f32.mrb[53].mxu1  ;;  %v2257_v1 = vrot.slane %v17609_v5, %v16711_v3  ;;  %v21223_v50 = vld [vmem:[#allocation25_spill] sm:$0xff] }
 0x1c7   :  { %v2004_v52 = vpop.f32.mrb[54].mxu0  ;;  %v2309_v0 = vmul.f32 %v2253_v14, %v2043_v22  ;;  %v2045_v59 = vpop.f32.mrb[54].mxu1  ;;  %v21225_v14 = vld [vmem:[#allocation27_spill] sm:$0xff] }
 0x1c8   :  { %v17617_v38 = vadd.f32 %v2306_v57, %v17476_v40  ;;  %v2005_v56 = vpop.f32.mrb[55].mxu0  ;;  %v2046_v27 = vpop.f32.mrb[55].mxu1 }
 0x1c9   :  { %v17630_v40 = vadd.f32 %v2309_v0, %v17485_v26  ;;  %v2265_v56 = vrot.slane %v17609_v5, %v16721_v43  ;;  %v2269_v26 = vrot.slane %v17609_v5, %v16732_v31 }
 0x1ca   :  { %13871 = vmatmul.mubr.msk.bf16.vlgmr.msra.gmra.mrb[156].mxu1 %vm177_vm1, %v17473_v49  ;;  %v2307_v49 = vmul.f32 %v2245_v63, %v2002_v9  ;;  %v17623_v63 = vadd.f32 %v2308_v58, %v17482_v7  ;;  %v21224_v7 = vld [vmem:[#allocation28_spill] sm:$0xff]  ;;  %v21226_v9 = vld [vmem:[#allocation30_spill] sm:$0xff] }
 0x1cb   :  { %5579 = vmatpush1.bf16.msra.mxu1 %v21221_v18  ;;  %5610 = vmatprep.mubr.bf16.mxu1 %v21001_v29 }
 0x1cc   :  { %5660 = vmatprep.subr.bf16.mxu1 %v21222_v11  ;;  %v17620_v11 = vadd.f32 %v2307_v49, %v17479_v20  ;;  %13877 = vmatmul.mubr.msk.bf16.vlgmr.msra.gmra.mrb[160].mxu0 %vm177_vm1, %v17614_v16  ;;  %v2261_v20 = vrot.slane %v17609_v5, %v16713_v44  ;;  %v2082_v57 = vpop.f32.mrb[56].mxu0  ;;  %v2123_v58 = vpop.f32.mrb[56].mxu1 }
 0x1cd   :  { %5620 = vmatpush1.bf16.msra.mxu0 %v21223_v50  ;;  %5651 = vmatprep.mubr.bf16.mxu0 %v21001_v29  ;;  %v2310_v49 = vmul.f32 %v2257_v1, %v2082_v57  ;;  %v2084_v46 = vpop.f32.mrb[57].mxu0  ;;  %v2312_v59 = vmul.f32 %v2265_v56, %v2123_v58  ;;  %v2125_v27 = vpop.f32.mrb[57].mxu1  ;;  %v2273_v1 = vrot.slane %v17609_v5, %v16766_v4 }
 0x1ce   :  { %5701 = vmatprep.subr.bf16.mxu0 %v21224_v7  ;;  %v2311_v52 = vmul.f32 %v2261_v20, %v2084_v46  ;;  %v2086_v22 = vpop.f32.mrb[58].mxu0  ;;  %v2313_v50 = vmul.f32 %v2269_v26, %v2125_v27  ;;  %v2127_v18 = vpop.f32.mrb[58].mxu1  ;;  %v21227_v20 = vld [vmem:[#allocation29_spill] sm:$0xff]  ;;  %v2285_v57 = vrot.slane %v17609_v5, %v16776_v2  ;;  %v21230_v26 = vld [vmem:[#allocation20_spill] sm:$0xff] }
 0x1cf   :  { %v17647_v0 = vadd.f32 %v2310_v49, %v17506_v21  ;;  %v2087_v7 = vpop.f32.mrb[59].mxu0  ;;  %v17653_v12 = vadd.f32 %v2312_v59, %v17512_v54  ;;  %v13807_v54 = vld [vmem:[%s20654_s2 + $0x4] ss:$8 sm:$0xf] }
 0x1d0   :  { %v17660_v21 = vadd.f32 %v2313_v50, %v17515_v32  ;;  %v13808_v18 = vld [vmem:[%s20654_s2 + $0x4] ss:$8 sm:$0xf0]  ;;  %v2281_v50 = vrot.slane %v17609_v5, %v16770_v36 }
 0x1d1   :  { %v21228_v32 = vld [vmem:[#allocation31_spill] sm:$0xff]  ;;  %v21229_v7 = vld [vmem:[#allocation32_spill] sm:$0xff]  ;;  %v17682_v46 = vor.u32 %v13808_v18, %v13807_v54  ;;  %v21231_v54 = vld [vmem:[#allocation33_spill] sm:$0xff] }
 0x1d2   :  { %13878 = vmatmul.mubr.msk.bf16.vlgmr.msra.gmra.mrb[160].mxu1 %vm177_vm1, %v17614_v16  ;;  %v21233_v18 = vld [vmem:[#allocation21_spill] sm:$0xff] }
 0x1d3   :  { %5661 = vmatpush1.bf16.msra.mxu1 %v21225_v14  ;;  %5692 = vmatprep.mubr.bf16.mxu1 %v21001_v29  ;;  %v17650_v14 = vadd.f32 %v2311_v52, %v17509_v62  ;;  %v2277_v62 = vrot.slane %v17609_v5, %v16768_v15 }
 0x1d4   :  { %5742 = vmatprep.subr.bf16.mxu1 %v21226_v9  ;;  %v2128_v9 = vpop.f32.mrb[59].mxu1  ;;  %13879 = vmatmul.mubr.msk.bf16.vlgmr.msra.gmra.mrb[164].mxu0 %vm177_vm1, %v17614_v16  ;;  %v2164_v56 = vpop.f32.mrb[60].mxu0 }
 0x1d5   :  { %5702 = vmatpush1.bf16.msra.mxu0 %v21227_v20  ;;  %5733 = vmatprep.mubr.bf16.mxu0 %v21001_v29  ;;  %v2314_v9 = vmul.f32 %v2273_v1, %v2164_v56  ;;  %v2166_v49 = vpop.f32.mrb[61].mxu0 }
 0x1d6   :  { %5783 = vmatprep.subr.bf16.mxu0 %v21228_v32  ;;  %v2315_v52 = vmul.f32 %v2277_v62, %v2166_v49  ;;  %v2205_v58 = vpop.f32.mrb[60].mxu1  ;;  %v2168_v22 = vpop.f32.mrb[62].mxu0  ;;  %v2696_v62 = vrot.slane %v17682_v46, %v16711_v3 }
 0x1d7   :  { %v17685_v59 = vadd.f32 %v2314_v9, %v17544_v24  ;;  %v2316_v27 = vmul.f32 %v2281_v50, %v2205_v58  ;;  %v2169_v32 = vpop.f32.mrb[63].mxu0  ;;  %v21234_v50 = vld [vmem:[#allocation38_spill] sm:$0xff] }
 0x1d8   :  { %v17688_v20 = vadd.f32 %v2315_v52, %v17547_v53  ;;  %v2700_v53 = vrot.slane %v17682_v46, %v16713_v44 }
 0x1da   :  { %13880 = vmatmul.mubr.msk.bf16.vlgmr.msra.gmra.mrb[164].mxu1 %vm177_vm1, %v17614_v16 }
 0x1db   :  { %5743 = vmatpush1.bf16.msra.mxu1 %v21229_v7  ;;  %5774 = vmatprep.mubr.bf16.mxu1 %v21001_v29  ;;  %v2207_v7 = vpop.f32.mrb[61].mxu1 }
 0x1dc   :  { %5824 = vmatprep.subr.bf16.mxu1 %v21230_v26  ;;  %v2317_v5 = vmul.f32 %v2285_v57, %v2207_v7  ;;  %v2209_v23 = vpop.f32.mrb[62].mxu1  ;;  %v17691_v26 = vadd.f32 %v2316_v27, %v17550_v35  ;;  %13881 = vmatmul.mubr.msk.bf16.vlgmr.msra.gmra.mrb[168].mxu0 %vm177_vm1, %v17614_v16  ;;  %v21232_v35 = vld [vmem:[#allocation34_spill] sm:$0xff]  ;;  %v2389_v32 = vpop.f32.mrb[64].mxu0 }
 0x1dd   :  { %v2210_v1 = vpop.f32.mrb[63].mxu1  ;;  %5784 = vmatpush1.bf16.msra.mxu0 %v21231_v54  ;;  %5815 = vmatprep.mubr.bf16.mxu0 %v21001_v29  ;;  %v2704_v23 = vrot.slane %v17682_v46, %v16721_v43  ;;  %v2773_v7 = vmul.f32 %v2696_v62, %v2389_v32  ;;  %v2391_v56 = vpop.f32.mrb[65].mxu0  ;;  %v2712_v62 = vrot.slane %v17682_v46, %v16766_v4  ;;  %v21237_v32 = vld [vmem:[#allocation39_spill] sm:$0xff] }
 0x1de   :  { %v17698_v24 = vadd.f32 %v2317_v5, %v17553_v55  ;;  %5992 = vmatprep.subr.bf16.mxu0 %v21232_v35  ;;  %v2708_v55 = vrot.slane %v17682_v46, %v16732_v31  ;;  %v2774_v57 = vmul.f32 %v2700_v53, %v2391_v56  ;;  %v2430_v9 = vpop.f32.mrb[64].mxu1  ;;  %v2393_v49 = vpop.f32.mrb[66].mxu0  ;;  %v21235_v53 = vld [vmem:[#allocation35_spill] sm:$0xff] }
 0x1df   :  { %v17715_v52 = vadd.f32 %v2773_v7, %v17574_v33  ;;  %v2775_v58 = vmul.f32 %v2704_v23, %v2430_v9  ;;  %v2432_v22 = vpop.f32.mrb[65].mxu1  ;;  %v2394_v27 = vpop.f32.mrb[67].mxu0  ;;  %v2720_v23 = vrot.slane %v17682_v46, %v16770_v36  ;;  %v21238_v7 = vld [vmem:[#allocation44_spill] sm:$0xff] }
 0x1e0   :  { %v17718_v5 = vadd.f32 %v2774_v57, %v17577_v28  ;;  %v2776_v1 = vmul.f32 %v2708_v55, %v2432_v22  ;;  %v2434_v35 = vpop.f32.mrb[66].mxu1  ;;  %v2716_v28 = vrot.slane %v17682_v46, %v16768_v15  ;;  %v17755_v22 = vld [vmem:[%s20653_s3 + $0x2c] sm:$0xf] }
 0x1e1   :  { %v13810_v35 = vld [vmem:[%s20654_s2 + $0x44] ss:$8 sm:$0xf0] }
 0x1e2   :  { %13882 = vmatmul.mubr.msk.bf16.vlgmr.msra.gmra.mrb[168].mxu1 %vm177_vm1, %v17614_v16  ;;  %v17728_v33 = vadd.f32 %v2776_v1, %v17583_v8  ;;  %v21236_v8 = vld [vmem:[#allocation40_spill] sm:$0xff] }
 0x1e3   :  { %5825 = vmatpush1.bf16.msra.mxu1 %v21233_v18  ;;  %5856 = vmatprep.mubr.bf16.mxu1 %v21001_v29  ;;  %v17721_v18 = vadd.f32 %v2775_v58, %v17580_v37  ;;  %v13809_v37 = vld [vmem:[%s20654_s2 + $0x44] ss:$8 sm:$0xf] }
 0x1e4   :  { %6033 = vmatprep.subr.bf16.mxu1 %v21234_v50  ;;  %v2435_v50 = vpop.f32.mrb[67].mxu1  ;;  %13883 = vmatmul.mubr.msk.bf16.vlgmr.msra.gmra.mrb[172].mxu0 %vm177_vm1, %v17614_v16  ;;  %v2471_v55 = vpop.f32.mrb[68].mxu0  ;;  %v17750_v9 = vor.u32 %v13810_v35, %v13809_v37 }
 0x1e5   :  { %5993 = vmatpush1.bf16.msra.mxu0 %v21235_v53  ;;  %6024 = vmatprep.mubr.bf16.mxu0 %v21001_v29  ;;  %v2724_v50 = vrot.slane %v17682_v46, %v16776_v2  ;;  %v2777_v56 = vmul.f32 %v2712_v62, %v2471_v55  ;;  %v2473_v57 = vpop.f32.mrb[69].mxu0 }
 0x1e6   :  { %6074 = vmatprep.subr.bf16.mxu0 %v21236_v8  ;;  %v2512_v49 = vpop.f32.mrb[68].mxu1  ;;  %v2475_v58 = vpop.f32.mrb[70].mxu0  ;;  %v2728_v55 = vrot.slane %v17750_v9, %v16711_v3 }
 0x1e7   :  { %v17758_v27 = vadd.f32 %v2777_v56, %v17617_v38  ;;  %v2779_v46 = vmul.f32 %v2720_v23, %v2512_v49  ;;  %v2514_v1 = vpop.f32.mrb[69].mxu1  ;;  %v2476_v53 = vpop.f32.mrb[71].mxu0  ;;  %v21239_v23 = vld [vmem:[#allocation41_spill] sm:$0xff] }
 0x1e8   :  { %v2780_v62 = vmul.f32 %v2724_v50, %v2514_v1  ;;  %v2516_v37 = vpop.f32.mrb[70].mxu1  ;;  %v2736_v53 = vrot.slane %v17750_v9, %v16721_v43  ;;  %v21241_v50 = vld [vmem:[#allocation45_spill] sm:$0xff] }
 0x1e9   :  { %v2517_v35 = vpop.f32.mrb[71].mxu1 }
 0x1ea   :  { %13884 = vmatmul.mubr.msk.bf16.vlgmr.msra.gmra.mrb[172].mxu1 %vm177_vm1, %v17614_v16  ;;  %v2778_v16 = vmul.f32 %v2716_v28, %v2473_v57  ;;  %v17764_v28 = vadd.f32 %v2779_v46, %v17623_v63  ;;  %v17771_v38 = vadd.f32 %v2780_v62, %v17630_v40  ;;  %v21240_v63 = vld [vmem:[#allocation48_spill] sm:$0xff]  ;;  %v2740_v40 = vrot.slane %v17750_v9, %v16732_v31  ;;  %v21242_v57 = vld [vmem:[#allocation51_spill] sm:$0xff] }
 0x1eb   :  { %6034 = vmatpush1.bf16.msra.mxu1 %v21237_v32  ;;  %6065 = vmatprep.mubr.bf16.mxu1 %v21001_v29 }
 0x1ec   :  { %6115 = vmatprep.subr.bf16.mxu1 %v21238_v7  ;;  %v17761_v7 = vadd.f32 %v2778_v16, %v17620_v11  ;;  %13890 = vmatmul.mubr.msk.bf16.vlgmr.msra.gmra.mrb[176].mxu0 %vm177_vm1, %v17755_v22  ;;  %v2732_v11 = vrot.slane %v17750_v9, %v16713_v44  ;;  %v2553_v56 = vpop.f32.mrb[72].mxu0 }
 0x1ed   :  { %6075 = vmatpush1.bf16.msra.mxu0 %v21239_v23  ;;  %6106 = vmatprep.mubr.bf16.mxu0 %v21001_v29  ;;  %v2781_v16 = vmul.f32 %v2728_v55, %v2553_v56  ;;  %v2555_v49 = vpop.f32.mrb[73].mxu0  ;;  %v2744_v55 = vrot.slane %v17750_v9, %v16766_v4  ;;  %v2756_v56 = vrot.slane %v17750_v9, %v16776_v2 }
 0x1ee   :  { %6156 = vmatprep.subr.bf16.mxu0 %v21240_v63  ;;  %v2782_v58 = vmul.f32 %v2732_v11, %v2555_v49  ;;  %v2594_v46 = vpop.f32.mrb[72].mxu1  ;;  %v2557_v1 = vpop.f32.mrb[74].mxu0  ;;  %v21243_v11 = vld [vmem:[#allocation49_spill] sm:$0xff] }
 0x1ef   :  { %v17788_v62 = vadd.f32 %v2781_v16, %v17647_v0  ;;  %v2783_v37 = vmul.f32 %v2736_v53, %v2594_v46  ;;  %v2596_v35 = vpop.f32.mrb[73].mxu1  ;;  %v2558_v63 = vpop.f32.mrb[75].mxu0 }
 0x1f0   :  { %v2784_v23 = vmul.f32 %v2740_v40, %v2596_v35  ;;  %v2598_v32 = vpop.f32.mrb[74].mxu1  ;;  %v21245_v63 = vld [vmem:[#allocation52_spill] sm:$0xff] }
 0x1f1   :  { %v17794_v8 = vadd.f32 %v2783_v37, %v17653_v12  ;;  %v13820_v12 = vld [vmem:[%s20654_s2 + $0x5] ss:$8 sm:$0xf] }
 0x1f2   :  { %13891 = vmatmul.mubr.msk.bf16.vlgmr.msra.gmra.mrb[176].mxu1 %vm177_vm1, %v17755_v22  ;;  %v17801_v0 = vadd.f32 %v2784_v23, %v17660_v21  ;;  %v13821_v32 = vld [vmem:[%s20654_s2 + $0x5] ss:$8 sm:$0xf0]  ;;  %v2752_v23 = vrot.slane %v17750_v9, %v16770_v36 }
 0x1f3   :  { %6116 = vmatpush1.bf16.msra.mxu1 %v21241_v50  ;;  %6147 = vmatprep.mubr.bf16.mxu1 %v21001_v29  ;;  %v17791_v50 = vadd.f32 %v2782_v58, %v17650_v14  ;;  %v2748_v14 = vrot.slane %v17750_v9, %v16768_v15  ;;  %v21244_v21 = vld [vmem:[#allocation53_spill] sm:$0xff]  ;;  %v21246_v40 = vld [vmem:[#allocation36_spill] sm:$0xff]  ;;  %v17823_v49 = vor.u32 %v13821_v32, %v13820_v12  ;;  %v21247_v12 = vld [vmem:[#allocation50_spill] sm:$0xff] }
 0x1f4   :  { %6197 = vmatprep.subr.bf16.mxu1 %v21242_v57  ;;  %v2599_v57 = vpop.f32.mrb[75].mxu1  ;;  %13892 = vmatmul.mubr.msk.bf16.vlgmr.msra.gmra.mrb[180].mxu0 %vm177_vm1, %v17755_v22  ;;  %v2635_v53 = vpop.f32.mrb[76].mxu0  ;;  %v21249_v32 = vld [vmem:[#allocation37_spill] sm:$0xff] }
 0x1f5   :  { %6157 = vmatpush1.bf16.msra.mxu0 %v21243_v11  ;;  %6188 = vmatprep.mubr.bf16.mxu0 %v21001_v29  ;;  %v2785_v57 = vmul.f32 %v2744_v55, %v2635_v53  ;;  %v2637_v16 = vpop.f32.mrb[77].mxu0 }
 0x1f6   :  { %6238 = vmatprep.subr.bf16.mxu0 %v21244_v21  ;;  %v2786_v58 = vmul.f32 %v2748_v14, %v2637_v16  ;;  %v2676_v46 = vpop.f32.mrb[76].mxu1  ;;  %v2639_v1 = vpop.f32.mrb[78].mxu0  ;;  %v3264_v14 = vrot.slane %v17823_v49, %v16711_v3 }
 0x1f7   :  { %v17826_v37 = vadd.f32 %v2785_v57, %v17685_v59  ;;  %v2787_v35 = vmul.f32 %v2752_v23, %v2676_v46  ;;  %v2640_v21 = vpop.f32.mrb[79].mxu0  ;;  %v21250_v23 = vld [vmem:[#allocation61_spill] sm:$0xff] }
 0x1f8   :  { %v17829_v11 = vadd.f32 %v2786_v58, %v17688_v20  ;;  %v3268_v20 = vrot.slane %v17823_v49, %v16713_v44 }
 0x1fa   :  { %13893 = vmatmul.mubr.msk.bf16.vlgmr.msra.gmra.mrb[180].mxu1 %vm177_vm1, %v17755_v22 }
 0x1fb   :  { %6198 = vmatpush1.bf16.msra.mxu1 %v21245_v63  ;;  %6229 = vmatprep.mubr.bf16.mxu1 %v21001_v29  ;;  %v2678_v63 = vpop.f32.mrb[77].mxu1 }
 0x1fc   :  { %6279 = vmatprep.subr.bf16.mxu1 %v21246_v40  ;;  %v2788_v9 = vmul.f32 %v2756_v56, %v2678_v63  ;;  %v2680_v54 = vpop.f32.mrb[78].mxu1  ;;  %v17832_v40 = vadd.f32 %v2787_v35, %v17691_v26  ;;  %13894 = vmatmul.mubr.msk.bf16.vlgmr.msra.gmra.mrb[184].mxu0 %vm177_vm1, %v17755_v22  ;;  %v21248_v26 = vld [vmem:[#allocation54_spill] sm:$0xff]  ;;  %v2957_v21 = vpop.f32.mrb[80].mxu0 }
 0x1fd   :  { %v2681_v55 = vpop.f32.mrb[79].mxu1  ;;  %6239 = vmatpush1.bf16.msra.mxu0 %v21247_v12  ;;  %6270 = vmatprep.mubr.bf16.mxu0 %v21001_v29  ;;  %v3272_v54 = vrot.slane %v17823_v49, %v16721_v43  ;;  %v3341_v63 = vmul.f32 %v3264_v14, %v2957_v21  ;;  %v2959_v53 = vpop.f32.mrb[81].mxu0  ;;  %v3280_v14 = vrot.slane %v17823_v49, %v16766_v4 }
 0x1fe   :  { %v17839_v59 = vadd.f32 %v2788_v9, %v17698_v24  ;;  %6447 = vmatprep.subr.bf16.mxu0 %v21248_v26  ;;  %v3276_v24 = vrot.slane %v17823_v49, %v16732_v31  ;;  %v3342_v56 = vmul.f32 %v3268_v20, %v2959_v53  ;;  %v2998_v57 = vpop.f32.mrb[80].mxu1  ;;  %v2961_v16 = vpop.f32.mrb[82].mxu0  ;;  %v21251_v20 = vld [vmem:[#allocation55_spill] sm:$0xff] }
 0x1ff   :  { %v17856_v58 = vadd.f32 %v3341_v63, %v17715_v52  ;;  %v3343_v46 = vmul.f32 %v3272_v54, %v2998_v57  ;;  %v3000_v1 = vpop.f32.mrb[81].mxu1  ;;  %v2962_v35 = vpop.f32.mrb[83].mxu0  ;;  %v21252_v54 = vld [vmem:[#allocation62_spill] sm:$0xff] }
 0x200   :  { %v17859_v9 = vadd.f32 %v3342_v56, %v17718_v5  ;;  %v3344_v55 = vmul.f32 %v3276_v24, %v3000_v1  ;;  %v3002_v26 = vpop.f32.mrb[82].mxu1  ;;  %v3284_v5 = vrot.slane %v17823_v49, %v16768_v15  ;;  %v3292_v24 = vrot.slane %v17823_v49, %v16776_v2 }
 0x201   :  { %v13823_v26 = vld [vmem:[%s20654_s2 + $0x45] ss:$8 sm:$0xf0] }
 0x202   :  { %13895 = vmatmul.mubr.msk.bf16.vlgmr.msra.gmra.mrb[184].mxu1 %vm177_vm1, %v17755_v22  ;;  %v17869_v52 = vadd.f32 %v3344_v55, %v17728_v33  ;;  %v3288_v33 = vrot.slane %v17823_v49, %v16770_v36 }
 0x203   :  { %6280 = vmatpush1.bf16.msra.mxu1 %v21249_v32  ;;  %6311 = vmatprep.mubr.bf16.mxu1 %v21001_v29  ;;  %v17862_v32 = vadd.f32 %v3343_v46, %v17721_v18  ;;  %v13822_v18 = vld [vmem:[%s20654_s2 + $0x45] ss:$8 sm:$0xf]  ;;  %v17896_v46 = vld [vmem:[%s20653_s3 + $0x30] sm:$0xf] }
 0x204   :  { %6488 = vmatprep.subr.bf16.mxu1 %v21250_v23  ;;  %v3003_v23 = vpop.f32.mrb[83].mxu1  ;;  %13896 = vmatmul.mubr.msk.bf16.vlgmr.msra.gmra.mrb[188].mxu0 %vm177_vm1, %v17755_v22  ;;  %v3039_v21 = vpop.f32.mrb[84].mxu0  ;;  %v17891_v56 = vor.u32 %v13823_v26, %v13822_v18 }
 0x205   :  { %6448 = vmatpush1.bf16.msra.mxu0 %v21251_v20  ;;  %6479 = vmatprep.mubr.bf16.mxu0 %v21001_v29  ;;  %v21253_v23 = vld [vmem:[#allocation65_spill] sm:$0xff]  ;;  %v3345_v63 = vmul.f32 %v3280_v14, %v3039_v21  ;;  %v3041_v53 = vpop.f32.mrb[85].mxu0 }
 0x206   :  { %6529 = vmatprep.subr.bf16.mxu0 %v15951_v34  ;;  %v3080_v57 = vpop.f32.mrb[84].mxu1  ;;  %v3043_v16 = vpop.f32.mrb[86].mxu0  ;;  %v3296_v21 = vrot.slane %v17891_v56, %v16711_v3 }
 0x207   :  { %v17899_v1 = vadd.f32 %v3345_v63, %v17758_v27  ;;  %v3347_v49 = vmul.f32 %v3288_v33, %v3080_v57  ;;  %v3082_v35 = vpop.f32.mrb[85].mxu1  ;;  %v3044_v55 = vpop.f32.mrb[87].mxu0  ;;  %v21254_v33 = vld [vmem:[#allocation63_spill] sm:$0xff] }
 0x208   :  { %v3348_v14 = vmul.f32 %v3292_v24, %v3082_v35  ;;  %v3084_v18 = vpop.f32.mrb[86].mxu1 }
 0x209   :  { %v3085_v26 = vpop.f32.mrb[87].mxu1 }
 0x20a   :  { %13897 = vmatmul.mubr.msk.bf16.vlgmr.msra.gmra.mrb[188].mxu1 %vm177_vm1, %v17755_v22  ;;  %v3346_v22 = vmul.f32 %v3284_v5, %v3041_v53  ;;  %v17905_v5 = vadd.f32 %v3347_v49, %v17764_v28  ;;  %v17912_v27 = vadd.f32 %v3348_v14, %v17771_v38  ;;  %v3304_v28 = vrot.slane %v17891_v56, %v16721_v43 }
 0x20b   :  { %6489 = vmatpush1.bf16.msra.mxu1 %v21252_v54  ;;  %6520 = vmatprep.mubr.bf16.mxu1 %v21001_v29  ;;  %v3308_v38 = vrot.slane %v17891_v56, %v16732_v31 }
 0x20c   :  { %6570 = vmatprep.subr.bf16.mxu1 %v21253_v23  ;;  %v17902_v20 = vadd.f32 %v3346_v22, %v17761_v7  ;;  %13903 = vmatmul.mubr.msk.bf16.vlgmr.msra.gmra.mrb[192].mxu0 %vm177_vm1, %v17896_v46  ;;  %v3300_v7 = vrot.slane %v17891_v56, %v16713_v44  ;;  %v3121_v24 = vpop.f32.mrb[88].mxu0 }
 0x20d   :  { %6530 = vmatpush1.bf16.msra.mxu0 %v21254_v33  ;;  %6561 = vmatprep.mubr.bf16.mxu0 %v21001_v29  ;;  %v3349_v63 = vmul.f32 %v3296_v21, %v3121_v24  ;;  %v3123_v53 = vpop.f32.mrb[89].mxu0  ;;  %v3312_v21 = vrot.slane %v17891_v56, %v16766_v4 }
 0x20e   :  { %6611 = vmatprep.subr.bf16.mxu0 %v15992_v42  ;;  %v3350_v22 = vmul.f32 %v3300_v7, %v3123_v53  ;;  %v3162_v57 = vpop.f32.mrb[88].mxu1  ;;  %v3125_v16 = vpop.f32.mrb[90].mxu0  ;;  %v21255_v7 = vld [vmem:[#allocation66_spill] sm:$0xff] }
 0x20f   :  { %v17929_v49 = vadd.f32 %v3349_v63, %v17788_v62  ;;  %v3351_v35 = vmul.f32 %v3304_v28, %v3162_v57  ;;  %v3164_v55 = vpop.f32.mrb[89].mxu1  ;;  %v3126_v14 = vpop.f32.mrb[91].mxu0  ;;  %v21257_v28 = vld [vmem:[#allocation71_spill] sm:$0xff]  ;;  %v21258_v63 = vld [vmem:[#allocation56_spill] sm:$0xff] }
 0x210   :  { %v17932_v18 = vadd.f32 %v3350_v22, %v17791_v50  ;;  %v3352_v26 = vmul.f32 %v3308_v38, %v3164_v55  ;;  %v3316_v50 = vrot.slane %v17891_v56, %v16768_v15  ;;  %v3324_v38 = vrot.slane %v17891_v56, %v16776_v2 }
 0x211   :  { %v17935_v42 = vadd.f32 %v3351_v35, %v17794_v8  ;;  %v21256_v8 = vld [vmem:[#allocation70_spill] sm:$0xff] }
 0x212   :  { %13904 = vmatmul.mubr.msk.bf16.vlgmr.msra.gmra.mrb[192].mxu1 %vm177_vm1, %v17896_v46  ;;  %v17942_v62 = vadd.f32 %v3352_v26, %v17801_v0  ;;  %v3320_v0 = vrot.slane %v17891_v56, %v16770_v36 }
 0x213   :  { %6571 = vmatpush1.bf16.msra.mxu1 %v15967_v39  ;;  %6602 = vmatprep.mubr.bf16.mxu1 %v21001_v29  ;;  %v3166_v39 = vpop.f32.mrb[90].mxu1 }
 0x214   :  { %6652 = vmatprep.subr.bf16.mxu1 %v16025_v13  ;;  %v3167_v13 = vpop.f32.mrb[91].mxu1  ;;  %13905 = vmatmul.mubr.msk.bf16.vlgmr.msra.gmra.mrb[196].mxu0 %vm177_vm1, %v17896_v46  ;;  %v13833_v39 = vld [vmem:[%s20654_s2 + $0x6] ss:$8 sm:$0xf]  ;;  %v3203_v24 = vpop.f32.mrb[92].mxu0 }
 0x215   :  { %6612 = vmatpush1.bf16.msra.mxu0 %v21255_v7  ;;  %6643 = vmatprep.mubr.bf16.mxu0 %v21001_v29  ;;  %v13834_v13 = vld [vmem:[%s20654_s2 + $0x6] ss:$8 sm:$0xf0]  ;;  %v3353_v53 = vmul.f32 %v3312_v21, %v3203_v24  ;;  %v3205_v22 = vpop.f32.mrb[93].mxu0 }
 0x216   :  { %6693 = vmatprep.subr.bf16.mxu0 %v21256_v8  ;;  %v17964_v57 = vor.u32 %v13834_v13, %v13833_v39  ;;  %v3354_v16 = vmul.f32 %v3316_v50, %v3205_v22  ;;  %v3244_v35 = vpop.f32.mrb[92].mxu1  ;;  %v3207_v55 = vpop.f32.mrb[94].mxu0  ;;  %v21259_v39 = vld [vmem:[#allocation68_spill] sm:$0xff]  ;;  %v21261_v13 = vld [vmem:[#allocation58_spill] sm:$0xff]  ;;  %v21262_v24 = vld [vmem:[#allocation75_spill] sm:$0xff] }
 0x217   :  { %v17967_v14 = vadd.f32 %v3353_v53, %v17826_v37  ;;  %v3355_v26 = vmul.f32 %v3320_v0, %v3244_v35  ;;  %v3208_v8 = vpop.f32.mrb[95].mxu0 }
 0x218   :  { %v17970_v7 = vadd.f32 %v3354_v16, %v17829_v11  ;;  %v3832_v50 = vrot.slane %v17964_v57, %v16711_v3  ;;  %v3836_v11 = vrot.slane %v17964_v57, %v16713_v44 }
 0x21a   :  { %13906 = vmatmul.mubr.msk.bf16.vlgmr.msra.gmra.mrb[196].mxu1 %vm177_vm1, %v17896_v46 }
 0x21b   :  { %6653 = vmatpush1.bf16.msra.mxu1 %v21257_v28  ;;  %6684 = vmatprep.mubr.bf16.mxu1 %v21001_v29  ;;  %v3246_v28 = vpop.f32.mrb[93].mxu1 }
 0x21c   :  { %6734 = vmatprep.subr.bf16.mxu1 %v21258_v63  ;;  %v3356_v56 = vmul.f32 %v3324_v38, %v3246_v28  ;;  %v3248_v33 = vpop.f32.mrb[94].mxu1  ;;  %v17973_v63 = vadd.f32 %v3355_v26, %v17832_v40  ;;  %13907 = vmatmul.mubr.msk.bf16.vlgmr.msra.gmra.mrb[200].mxu0 %vm177_vm1, %v17896_v46  ;;  %v3840_v40 = vrot.slane %v17964_v57, %v16721_v43  ;;  %v3525_v8 = vpop.f32.mrb[96].mxu0 }
 0x21d   :  { %v3249_v21 = vpop.f32.mrb[95].mxu1  ;;  %6694 = vmatpush1.bf16.msra.mxu0 %v21259_v39  ;;  %6725 = vmatprep.mubr.bf16.mxu0 %v21001_v29  ;;  %v21260_v33 = vld [vmem:[#allocation73_spill] sm:$0xff]  ;;  %v3909_v0 = vmul.f32 %v3832_v50, %v3525_v8  ;;  %v3527_v28 = vpop.f32.mrb[97].mxu0 }
 0x21e   :  { %v17980_v37 = vadd.f32 %v3356_v56, %v17839_v59  ;;  %6902 = vmatprep.subr.bf16.mxu0 %v21260_v33  ;;  %v3844_v59 = vrot.slane %v17964_v57, %v16732_v31  ;;  %v3910_v38 = vmul.f32 %v3836_v11, %v3527_v28  ;;  %v3566_v53 = vpop.f32.mrb[96].mxu1  ;;  %v3529_v22 = vpop.f32.mrb[98].mxu0  ;;  %v3848_v11 = vrot.slane %v17964_v57, %v16766_v4  ;;  %v21264_v8 = vld [vmem:[#allocation77_spill] sm:$0xff]  ;;  %v21265_v28 = vld [vmem:[#allocation78_spill] sm:$0xff] }
 0x21f   :  { %v17997_v16 = vadd.f32 %v3909_v0, %v17856_v58  ;;  %v3911_v35 = vmul.f32 %v3840_v40, %v3566_v53  ;;  %v3568_v55 = vpop.f32.mrb[97].mxu1  ;;  %v3530_v26 = vpop.f32.mrb[99].mxu0  ;;  %v3852_v40 = vrot.slane %v17964_v57, %v16768_v15  ;;  %v3860_v0 = vrot.slane %v17964_v57, %v16776_v2 }
 0x220   :  { %v18000_v56 = vadd.f32 %v3910_v38, %v17859_v9  ;;  %v3912_v21 = vmul.f32 %v3844_v59, %v3568_v55  ;;  %v3570_v33 = vpop.f32.mrb[98].mxu1  ;;  %v21263_v9 = vld [vmem:[#allocation76_spill] sm:$0xff] }
 0x221   :  { %v3571_v50 = vpop.f32.mrb[99].mxu1  ;;  %v13836_v33 = vld [vmem:[%s20654_s2 + $0x46] ss:$8 sm:$0xf0] }
 0x222   :  { %13908 = vmatmul.mubr.msk.bf16.vlgmr.msra.gmra.mrb[200].mxu1 %vm177_vm1, %v17896_v46  ;;  %v18010_v58 = vadd.f32 %v3912_v21, %v17869_v52  ;;  %v3856_v52 = vrot.slane %v17964_v57, %v16770_v36  ;;  %v18037_v21 = vld [vmem:[%s20653_s3 + $0x34] sm:$0xf] }
 0x223   :  { %6735 = vmatpush1.bf16.msra.mxu1 %v21261_v13  ;;  %6766 = vmatprep.mubr.bf16.mxu1 %v21001_v29  ;;  %v18003_v13 = vadd.f32 %v3911_v35, %v17862_v32  ;;  %v13835_v32 = vld [vmem:[%s20654_s2 + $0x46] ss:$8 sm:$0xf] }
 0x224   :  { %6943 = vmatprep.subr.bf16.mxu1 %v21262_v24  ;;  %13909 = vmatmul.mubr.msk.bf16.vlgmr.msra.gmra.mrb[204].mxu0 %vm177_vm1, %v17896_v46  ;;  %v3607_v59 = vpop.f32.mrb[100].mxu0  ;;  %v18031_v22 = vor.u32 %v13836_v33, %v13835_v32  ;;  %v21266_v35 = vld [vmem:[#allocation79_spill] sm:$0xff] }
 0x225   :  { %6903 = vmatpush1.bf16.msra.mxu0 %v21263_v9  ;;  %6934 = vmatprep.mubr.bf16.mxu0 %v21001_v29  ;;  %v3913_v38 = vmul.f32 %v3848_v11, %v3607_v59  ;;  %v3609_v53 = vpop.f32.mrb[101].mxu0 }
 0x226   :  { %6984 = vmatprep.subr.bf16.mxu0 %v21264_v8  ;;  %v3648_v55 = vpop.f32.mrb[100].mxu1  ;;  %v3611_v26 = vpop.f32.mrb[102].mxu0 }
 0x227   :  { %v18040_v57 = vadd.f32 %v3913_v38, %v17899_v1  ;;  %v3915_v50 = vmul.f32 %v3856_v52, %v3648_v55  ;;  %v3650_v9 = vpop.f32.mrb[101].mxu1  ;;  %v3868_v52 = vrot.slane %v18031_v22, %v16713_v44  ;;  %v21270_v55 = vld [vmem:[#allocation57_spill] sm:$0xff] }
 0x228   :  { %v3916_v32 = vmul.f32 %v3860_v0, %v3650_v9  ;;  %v3652_v33 = vpop.f32.mrb[102].mxu1  ;;  %v21268_v9 = vld [vmem:[#allocation81_spill] sm:$0xff] }
 0x229   :  { %v3653_v59 = vpop.f32.mrb[103].mxu1 }
 0x22a   :  { %13910 = vmatmul.mubr.msk.bf16.vlgmr.msra.gmra.mrb[204].mxu1 %vm177_vm1, %v17896_v46  ;;  %v3914_v46 = vmul.f32 %v3852_v40, %v3609_v53  ;;  %v18046_v40 = vadd.f32 %v3915_v50, %v17905_v5  ;;  %v3864_v53 = vrot.slane %v18031_v22, %v16711_v3  ;;  %v18053_v1 = vadd.f32 %v3916_v32, %v17912_v27 }
 0x22b   :  { %6944 = vmatpush1.bf16.msra.mxu1 %v21265_v28  ;;  %6975 = vmatprep.mubr.bf16.mxu1 %v21001_v29  ;;  %v3612_v28 = vpop.f32.mrb[103].mxu0  ;;  %v3872_v5 = vrot.slane %v18031_v22, %v16721_v43  ;;  %v3876_v27 = vrot.slane %v18031_v22, %v16732_v31 }
 0x22c   :  { %7025 = vmatprep.subr.bf16.mxu1 %v21266_v35  ;;  %v18043_v11 = vadd.f32 %v3914_v46, %v17902_v20  ;;  %13916 = vmatmul.mubr.msk.bf16.vlgmr.msra.gmra.mrb[208].mxu0 %vm177_vm1, %v18037_v21  ;;  %v21267_v20 = vld [vmem:[#allocation80_spill] sm:$0xff]  ;;  %v3689_v0 = vpop.f32.mrb[104].mxu0  ;;  %v21269_v28 = vld [vmem:[#allocation82_spill] sm:$0xff] }
 0x22d   :  { %6985 = vmatpush1.bf16.msra.mxu0 %v21267_v20  ;;  %7016 = vmatprep.mubr.bf16.mxu0 %v21001_v29  ;;  %v3917_v38 = vmul.f32 %v3864_v53, %v3689_v0  ;;  %v3691_v46 = vpop.f32.mrb[105].mxu0  ;;  %v3892_v0 = vrot.slane %v18031_v22, %v16776_v2 }
 0x22e   :  { %7066 = vmatprep.subr.bf16.mxu0 %v21268_v9  ;;  %v3918_v26 = vmul.f32 %v3868_v52, %v3691_v46  ;;  %v3730_v50 = vpop.f32.mrb[104].mxu1  ;;  %v3693_v32 = vpop.f32.mrb[106].mxu0  ;;  %v3880_v52 = vrot.slane %v18031_v22, %v16766_v4  ;;  %v21274_v46 = vld [vmem:[#allocation72_spill] sm:$0xff] }
 0x22f   :  { %v18070_v33 = vadd.f32 %v3917_v38, %v17929_v49  ;;  %v3919_v59 = vmul.f32 %v3872_v5, %v3730_v50  ;;  %v3732_v9 = vpop.f32.mrb[105].mxu1  ;;  %v3694_v20 = vpop.f32.mrb[107].mxu0  ;;  %v13847_v5 = vld [vmem:[%s20654_s2 + $0x7] ss:$8 sm:$0xf0] }
 0x230   :  { %v18073_v35 = vadd.f32 %v3918_v26, %v17932_v18  ;;  %v3920_v8 = vmul.f32 %v3876_v27, %v3732_v9  ;;  %v3884_v20 = vrot.slane %v18031_v22, %v16768_v15  ;;  %v21271_v18 = vld [vmem:[#allocation83_spill] sm:$0xff]  ;;  %v21273_v27 = vld [vmem:[#allocation60_spill] sm:$0xff] }
 0x231   :  { %v18076_v24 = vadd.f32 %v3919_v59, %v17935_v42  ;;  %v13846_v42 = vld [vmem:[%s20654_s2 + $0x7] ss:$8 sm:$0xf] }
 0x232   :  { %13917 = vmatmul.mubr.msk.bf16.vlgmr.msra.gmra.mrb[208].mxu1 %vm177_vm1, %v18037_v21  ;;  %v18083_v49 = vadd.f32 %v3920_v8, %v17942_v62  ;;  %v3888_v62 = vrot.slane %v18031_v22, %v16770_v36  ;;  %v21272_v8 = vld [vmem:[#allocation59_spill] sm:$0xff]  ;;  %v18105_v26 = vor.u32 %v13847_v5, %v13846_v42  ;;  %v21278_v5 = vld [vmem:[#allocation84_spill] sm:$0xff] }
 0x233   :  { %7026 = vmatpush1.bf16.msra.mxu1 %v21269_v28  ;;  %7057 = vmatprep.mubr.bf16.mxu1 %v21001_v29  ;;  %v3734_v28 = vpop.f32.mrb[106].mxu1  ;;  %v21275_v42 = vld [vmem:[#allocation43_spill] sm:$0xff] }
 0x234   :  { %7107 = vmatprep.subr.bf16.mxu1 %v21270_v55  ;;  %v3735_v53 = vpop.f32.mrb[107].mxu1  ;;  %13918 = vmatmul.mubr.msk.bf16.vlgmr.msra.gmra.mrb[212].mxu0 %vm177_vm1, %v18037_v21  ;;  %v3771_v9 = vpop.f32.mrb[108].mxu0 }
 0x235   :  { %7067 = vmatpush1.bf16.msra.mxu0 %v21271_v18  ;;  %7098 = vmatprep.mubr.bf16.mxu0 %v21001_v29  ;;  %v3921_v28 = vmul.f32 %v3880_v52, %v3771_v9  ;;  %v3773_v38 = vpop.f32.mrb[109].mxu0 }
 0x236   :  { %7148 = vmatprep.subr.bf16.mxu0 %v21272_v8  ;;  %v3922_v50 = vmul.f32 %v3884_v20, %v3773_v38  ;;  %v3812_v32 = vpop.f32.mrb[108].mxu1  ;;  %v3775_v59 = vpop.f32.mrb[110].mxu0  ;;  %v4400_v20 = vrot.slane %v18105_v26, %v16711_v3 }
 0x237   :  { %v18108_v53 = vadd.f32 %v3921_v28, %v17967_v14  ;;  %v3923_v8 = vmul.f32 %v3888_v62, %v3812_v32  ;;  %v3814_v18 = vpop.f32.mrb[109].mxu1  ;;  %v3776_v55 = vpop.f32.mrb[111].mxu0 }
 0x238   :  { %v18111_v22 = vadd.f32 %v3922_v50, %v17970_v7  ;;  %v3816_v39 = vpop.f32.mrb[110].mxu1  ;;  %v4404_v7 = vrot.slane %v18105_v26, %v16713_v44  ;;  %v21277_v55 = vld [vmem:[#allocation74_spill] sm:$0xff] }
 0x239   :  { %v18114_v52 = vadd.f32 %v3923_v8, %v17973_v63  ;;  %v3817_v9 = vpop.f32.mrb[111].mxu1  ;;  %v21276_v63 = vld [vmem:[#allocation46_spill] sm:$0xff]  ;;  %v4408_v39 = vrot.slane %v18105_v26, %v16721_v43 }
 0x23a   :  { %13919 = vmatmul.mubr.msk.bf16.vlgmr.msra.gmra.mrb[212].mxu1 %vm177_vm1, %v18037_v21 }
 0x23b   :  { %7108 = vmatpush1.bf16.msra.mxu1 %v21273_v27  ;;  %7139 = vmatprep.mubr.bf16.mxu1 %v21001_v29  ;;  %v3924_v27 = vmul.f32 %v3892_v0, %v3814_v18 }
 0x23c   :  { %7189 = vmatprep.subr.bf16.mxu1 %v21274_v46  ;;  %13920 = vmatmul.mubr.msk.bf16.vlgmr.msra.gmra.mrb[216].mxu0 %vm177_vm1, %v18037_v21  ;;  %v4093_v18 = vpop.f32.mrb[112].mxu0 }
 0x23d   :  { %v18121_v14 = vadd.f32 %v3924_v27, %v17980_v37  ;;  %7149 = vmatpush1.bf16.msra.mxu0 %v21275_v42  ;;  %7180 = vmatprep.mubr.bf16.mxu0 %v21001_v29  ;;  %v4412_v37 = vrot.slane %v18105_v26, %v16732_v31  ;;  %v4477_v62 = vmul.f32 %v4400_v20, %v4093_v18  ;;  %v4095_v8 = vpop.f32.mrb[113].mxu0 }
 0x23e   :  { %7357 = vmatprep.subr.bf16.mxu0 %v21276_v63  ;;  %v4478_v0 = vmul.f32 %v4404_v7, %v4095_v8  ;;  %v4134_v27 = vpop.f32.mrb[112].mxu1  ;;  %v4097_v28 = vpop.f32.mrb[114].mxu0  ;;  %v4416_v20 = vrot.slane %v18105_v26, %v16766_v4  ;;  %v21279_v7 = vld [vmem:[#allocation85_spill] sm:$0xff] }
 0x23f   :  { %v18138_v38 = vadd.f32 %v4477_v62, %v17997_v16  ;;  %v4479_v50 = vmul.f32 %v4408_v39, %v4134_v27  ;;  %v4136_v32 = vpop.f32.mrb[113].mxu1  ;;  %v4098_v59 = vpop.f32.mrb[115].mxu0  ;;  %v13849_v39 = vld [vmem:[%s20654_s2 + $0x47] ss:$8 sm:$0xf0] }
 0x240   :  { %v18141_v9 = vadd.f32 %v4478_v0, %v18000_v56  ;;  %v4480_v63 = vmul.f32 %v4412_v37, %v4136_v32  ;;  %v4420_v56 = vrot.slane %v18105_v26, %v16768_v15  ;;  %v4428_v37 = vrot.slane %v18105_v26, %v16776_v2 }
 0x241   :  { %v18144_v42 = vadd.f32 %v4479_v50, %v18003_v13  ;;  %v13848_v13 = vld [vmem:[%s20654_s2 + $0x47] ss:$8 sm:$0xf]  ;;  %v18178_v50 = vld [vmem:[%s20653_s3 + $0x38] sm:$0xf] }
 0x242   :  { %13921 = vmatmul.mubr.msk.bf16.vlgmr.msra.gmra.mrb[216].mxu1 %vm177_vm1, %v18037_v21  ;;  %v18151_v16 = vadd.f32 %v4480_v63, %v18010_v58  ;;  %v21280_v58 = vld [vmem:[#allocation86_spill] sm:$0xff]  ;;  %v4424_v63 = vrot.slane %v18105_v26, %v16770_v36  ;;  %v18173_v0 = vor.u32 %v13849_v39, %v13848_v13 }
 0x243   :  { %7190 = vmatpush1.bf16.msra.mxu1 %v21277_v55  ;;  %7221 = vmatprep.mubr.bf16.mxu1 %v21001_v29  ;;  %v4138_v55 = vpop.f32.mrb[114].mxu1 }
 0x244   :  { %7398 = vmatprep.subr.bf16.mxu1 %v21278_v5  ;;  %v4139_v5 = vpop.f32.mrb[115].mxu1  ;;  %13922 = vmatmul.mubr.msk.bf16.vlgmr.msra.gmra.mrb[220].mxu0 %vm177_vm1, %v18037_v21  ;;  %v21281_v55 = vld [vmem:[#allocation88_spill] sm:$0xff]  ;;  %v4175_v18 = vpop.f32.mrb[116].mxu0 }
 0x245   :  { %7358 = vmatpush1.bf16.msra.mxu0 %v21279_v7  ;;  %7389 = vmatprep.mubr.bf16.mxu0 %v21001_v29  ;;  %v21282_v5 = vld [vmem:[#allocation87_spill] sm:$0xff]  ;;  %v4481_v62 = vmul.f32 %v4416_v20, %v4175_v18  ;;  %v4177_v8 = vpop.f32.mrb[117].mxu0  ;;  %v4432_v18 = vrot.slane %v18173_v0, %v16711_v3 }
 0x246   :  { %7439 = vmatprep.subr.bf16.mxu0 %v21280_v58  ;;  %v4216_v27 = vpop.f32.mrb[116].mxu1  ;;  %v4179_v28 = vpop.f32.mrb[118].mxu0 }
 0x247   :  { %v18181_v32 = vadd.f32 %v4481_v62, %v18040_v57  ;;  %v4483_v26 = vmul.f32 %v4424_v63, %v4216_v27  ;;  %v4218_v59 = vpop.f32.mrb[117].mxu1  ;;  %v4180_v7 = vpop.f32.mrb[119].mxu0  ;;  %v21283_v63 = vld [vmem:[#allocation89_spill] sm:$0xff] }
 0x248   :  { %v4484_v20 = vmul.f32 %v4428_v37, %v4218_v59  ;;  %v4220_v13 = vpop.f32.mrb[118].mxu1  ;;  %v4440_v7 = vrot.slane %v18173_v0, %v16721_v43  ;;  %v21285_v37 = vld [vmem:[#allocation91_spill] sm:$0xff] }
 0x249   :  { %v4221_v39 = vpop.f32.mrb[119].mxu1 }
 0x24a   :  { %13923 = vmatmul.mubr.msk.bf16.vlgmr.msra.gmra.mrb[220].mxu1 %vm177_vm1, %v18037_v21  ;;  %v4482_v21 = vmul.f32 %v4420_v56, %v4177_v8  ;;  %v18187_v56 = vadd.f32 %v4483_v26, %v18046_v40  ;;  %v18194_v57 = vadd.f32 %v4484_v20, %v18053_v1  ;;  %v21284_v40 = vld [vmem:[#allocation90_spill] sm:$0xff]  ;;  %v4444_v1 = vrot.slane %v18173_v0, %v16732_v31  ;;  %v21286_v8 = vld [vmem:[#allocation93_spill] sm:$0xff] }
 0x24b   :  { %7399 = vmatpush1.bf16.msra.mxu1 %v21281_v55  ;;  %7430 = vmatprep.mubr.bf16.mxu1 %v21001_v29 }
 0x24c   :  { %7480 = vmatprep.subr.bf16.mxu1 %v21282_v5  ;;  %v18184_v5 = vadd.f32 %v4482_v21, %v18043_v11  ;;  %13929 = vmatmul.mubr.msk.bf16.vlgmr.msra.gmra.mrb[224].mxu0 %vm177_vm1, %v18178_v50  ;;  %v4436_v11 = vrot.slane %v18173_v0, %v16713_v44  ;;  %v4257_v62 = vpop.f32.mrb[120].mxu0 }
 0x24d   :  { %7440 = vmatpush1.bf16.msra.mxu0 %v21283_v63  ;;  %7471 = vmatprep.mubr.bf16.mxu0 %v21001_v29  ;;  %v4485_v21 = vmul.f32 %v4432_v18, %v4257_v62  ;;  %v4259_v27 = vpop.f32.mrb[121].mxu0  ;;  %v4448_v18 = vrot.slane %v18173_v0, %v16766_v4  ;;  %v4460_v62 = vrot.slane %v18173_v0, %v16776_v2 }
 0x24e   :  { %7521 = vmatprep.subr.bf16.mxu0 %v21284_v40  ;;  %v4486_v28 = vmul.f32 %v4436_v11, %v4259_v27  ;;  %v4298_v26 = vpop.f32.mrb[120].mxu1  ;;  %v4261_v59 = vpop.f32.mrb[122].mxu0  ;;  %v21287_v11 = vld [vmem:[#allocation92_spill] sm:$0xff] }
 0x24f   :  { %v18211_v20 = vadd.f32 %v4485_v21, %v18070_v33  ;;  %v4487_v13 = vmul.f32 %v4440_v7, %v4298_v26  ;;  %v4300_v39 = vpop.f32.mrb[121].mxu1  ;;  %v4262_v40 = vpop.f32.mrb[123].mxu0 }
 0x250   :  { %v4488_v63 = vmul.f32 %v4444_v1, %v4300_v39  ;;  %v4302_v55 = vpop.f32.mrb[122].mxu1  ;;  %v21289_v40 = vld [vmem:[#allocation96_spill] sm:$0xff]  ;;  %v21290_v1 = vld [vmem:[#allocation42_spill] sm:$0xff] }
 0x251   :  { %v18217_v58 = vadd.f32 %v4487_v13, %v18076_v24  ;;  %v13859_v24 = vld [vmem:[%s20654_s2 + $0x80] ss:$8 sm:$0xf] }
 0x252   :  { %13930 = vmatmul.mubr.msk.bf16.vlgmr.msra.gmra.mrb[224].mxu1 %vm177_vm1, %v18178_v50  ;;  %v18224_v33 = vadd.f32 %v4488_v63, %v18083_v49  ;;  %v13860_v55 = vld [vmem:[%s20654_s2 + $0x80] ss:$8 sm:$0xf0]  ;;  %v4456_v63 = vrot.slane %v18173_v0, %v16770_v36 }
 0x253   :  { %7481 = vmatpush1.bf16.msra.mxu1 %v21285_v37  ;;  %7512 = vmatprep.mubr.bf16.mxu1 %v21001_v29  ;;  %v18214_v37 = vadd.f32 %v4486_v28, %v18073_v35  ;;  %v4452_v35 = vrot.slane %v18173_v0, %v16768_v15  ;;  %v21288_v49 = vld [vmem:[#allocation94_spill] sm:$0xff]  ;;  %v18246_v27 = vor.u32 %v13860_v55, %v13859_v24  ;;  %v21291_v24 = vld [vmem:[#allocation97_spill] sm:$0xff]  ;;  %v21293_v55 = vld [vmem:[#allocation47_spill] sm:$0xff] }
 0x254   :  { %7562 = vmatprep.subr.bf16.mxu1 %v21286_v8  ;;  %v4303_v8 = vpop.f32.mrb[123].mxu1  ;;  %13931 = vmatmul.mubr.msk.bf16.vlgmr.msra.gmra.mrb[228].mxu0 %vm177_vm1, %v18178_v50  ;;  %v4339_v7 = vpop.f32.mrb[124].mxu0 }
 0x255   :  { %7522 = vmatpush1.bf16.msra.mxu0 %v21287_v11  ;;  %7553 = vmatprep.mubr.bf16.mxu0 %v21001_v29  ;;  %v4489_v8 = vmul.f32 %v4448_v18, %v4339_v7  ;;  %v4341_v21 = vpop.f32.mrb[125].mxu0 }
 0x256   :  { %7603 = vmatprep.subr.bf16.mxu0 %v21288_v49  ;;  %v4490_v28 = vmul.f32 %v4452_v35, %v4341_v21  ;;  %v4380_v26 = vpop.f32.mrb[124].mxu1  ;;  %v4343_v59 = vpop.f32.mrb[126].mxu0  ;;  %v4968_v35 = vrot.slane %v18246_v27, %v16711_v3 }
 0x257   :  { %v18249_v13 = vadd.f32 %v4489_v8, %v18108_v53  ;;  %v4491_v39 = vmul.f32 %v4456_v63, %v4380_v26  ;;  %v4344_v49 = vpop.f32.mrb[127].mxu0  ;;  %v21294_v63 = vld [vmem:[#allocation100_spill] sm:$0xff] }
 0x258   :  { %v18252_v11 = vadd.f32 %v4490_v28, %v18111_v22  ;;  %v4972_v22 = vrot.slane %v18246_v27, %v16713_v44 }
 0x25a   :  { %13932 = vmatmul.mubr.msk.bf16.vlgmr.msra.gmra.mrb[228].mxu1 %vm177_vm1, %v18178_v50 }
 0x25b   :  { %7563 = vmatpush1.bf16.msra.mxu1 %v21289_v40  ;;  %7594 = vmatprep.mubr.bf16.mxu1 %v21001_v29  ;;  %v4382_v40 = vpop.f32.mrb[125].mxu1 }
 0x25c   :  { %7644 = vmatprep.subr.bf16.mxu1 %v21290_v1  ;;  %v4492_v0 = vmul.f32 %v4460_v62, %v4382_v40  ;;  %v4384_v46 = vpop.f32.mrb[126].mxu1  ;;  %v18255_v1 = vadd.f32 %v4491_v39, %v18114_v52  ;;  %13933 = vmatmul.mubr.msk.bf16.vlgmr.msra.gmra.mrb[232].mxu0 %vm177_vm1, %v18178_v50  ;;  %v4976_v52 = vrot.slane %v18246_v27, %v16721_v43 }
 0x25d   :  { %v4385_v18 = vpop.f32.mrb[127].mxu1  ;;  %7604 = vmatpush1.bf16.msra.mxu0 %v21291_v24  ;;  %7635 = vmatprep.mubr.bf16.mxu0 %v21001_v29  ;;  %v21292_v46 = vld [vmem:[#allocation98_spill] sm:$0xff]  ;;  %v4661_v49 = vpop.f32.mrb[128].mxu0 }
 0x25e   :  { %v18262_v53 = vadd.f32 %v4492_v0, %v18121_v14  ;;  %7812 = vmatprep.subr.bf16.mxu0 %v21292_v46  ;;  %v4980_v14 = vrot.slane %v18246_v27, %v16732_v31  ;;  %v5045_v40 = vmul.f32 %v4968_v35, %v4661_v49  ;;  %v4663_v7 = vpop.f32.mrb[129].mxu0  ;;  %v4984_v35 = vrot.slane %v18246_v27, %v16766_v4  ;;  %v21297_v49 = vld [vmem:[#allocation104_spill] sm:$0xff] }
 0x25f   :  { %v5046_v62 = vmul.f32 %v4972_v22, %v4663_v7  ;;  %v4702_v8 = vpop.f32.mrb[128].mxu1  ;;  %v4665_v21 = vpop.f32.mrb[130].mxu0  ;;  %v21295_v22 = vld [vmem:[#allocation102_spill] sm:$0xff] }
 0x260   :  { %v18279_v28 = vadd.f32 %v5045_v40, %v18138_v38  ;;  %v5047_v26 = vmul.f32 %v4976_v52, %v4702_v8  ;;  %v4704_v59 = vpop.f32.mrb[129].mxu1  ;;  %v4666_v39 = vpop.f32.mrb[131].mxu0  ;;  %v4992_v52 = vrot.slane %v18246_v27, %v16770_v36  ;;  %v21298_v40 = vld [vmem:[#allocation103_spill] sm:$0xff] }
 0x261   :  { %v18282_v0 = vadd.f32 %v5046_v62, %v18141_v9  ;;  %v5048_v18 = vmul.f32 %v4980_v14, %v4704_v59  ;;  %v4706_v46 = vpop.f32.mrb[130].mxu1  ;;  %v4988_v9 = vrot.slane %v18246_v27, %v16768_v15  ;;  %v18319_v59 = vld [vmem:[%s20653_s3 + $0x3c] sm:$0xf] }
 0x262   :  { %13934 = vmatmul.mubr.msk.bf16.vlgmr.msra.gmra.mrb[232].mxu1 %vm177_vm1, %v18178_v50  ;;  %v13862_v46 = vld [vmem:[%s20654_s2 + $0xc0] ss:$8 sm:$0xf0] }
 0x263   :  { %7645 = vmatpush1.bf16.msra.mxu1 %v21293_v55  ;;  %7676 = vmatprep.mubr.bf16.mxu1 %v21001_v29  ;;  %v18285_v55 = vadd.f32 %v5047_v26, %v18144_v42  ;;  %v18292_v38 = vadd.f32 %v5048_v18, %v18151_v16  ;;  %v13861_v42 = vld [vmem:[%s20654_s2 + $0xc0] ss:$8 sm:$0xf] }
 0x264   :  { %7853 = vmatprep.subr.bf16.mxu1 %v21294_v63  ;;  %v4707_v63 = vpop.f32.mrb[131].mxu1  ;;  %13935 = vmatmul.mubr.msk.bf16.vlgmr.msra.gmra.mrb[236].mxu0 %vm177_vm1, %v18178_v50  ;;  %v21296_v16 = vld [vmem:[#allocation101_spill] sm:$0xff]  ;;  %v18314_v8 = vor.u32 %v13862_v46, %v13861_v42 }
 0x265   :  { %7813 = vmatpush1.bf16.msra.mxu0 %v21295_v22  ;;  %7844 = vmatprep.mubr.bf16.mxu0 %v21001_v29  ;;  %v4996_v63 = vrot.slane %v18246_v27, %v16776_v2 }
 0x266   :  { %7894 = vmatprep.subr.bf16.mxu0 %v21296_v16  ;;  %v4743_v14 = vpop.f32.mrb[132].mxu0 }
 0x267   :  { %v5049_v7 = vmul.f32 %v4984_v35, %v4743_v14  ;;  %v4745_v62 = vpop.f32.mrb[133].mxu0  ;;  %v5000_v14 = vrot.slane %v18314_v8, %v16711_v3 }
 0x268   :  { %v4784_v21 = vpop.f32.mrb[132].mxu1  ;;  %v4747_v26 = vpop.f32.mrb[134].mxu0 }
 0x269   :  { %v18322_v39 = vadd.f32 %v5049_v7, %v18181_v32  ;;  %v5051_v27 = vmul.f32 %v4992_v52, %v4784_v21  ;;  %v4786_v18 = vpop.f32.mrb[133].mxu1  ;;  %v4748_v22 = vpop.f32.mrb[135].mxu0  ;;  %v21299_v52 = vld [vmem:[#allocation105_spill] sm:$0xff] }
 0x26a   :  { %13936 = vmatmul.mubr.msk.bf16.vlgmr.msra.gmra.mrb[236].mxu1 %vm177_vm1, %v18178_v50  ;;  %v5050_v50 = vmul.f32 %v4988_v9, %v4745_v62  ;;  %v5052_v35 = vmul.f32 %v4996_v63, %v4786_v18  ;;  %v4788_v42 = vpop.f32.mrb[134].mxu1  ;;  %v5008_v22 = vrot.slane %v18314_v8, %v16721_v43  ;;  %v21301_v63 = vld [vmem:[#allocation107_spill] sm:$0xff]  ;;  %v21302_v62 = vld [vmem:[#allocation108_spill] sm:$0xff] }
 0x26b   :  { %7854 = vmatpush1.bf16.msra.mxu1 %v21297_v49  ;;  %7885 = vmatprep.mubr.bf16.mxu1 %v21001_v29  ;;  %v18328_v9 = vadd.f32 %v5051_v27, %v18187_v56  ;;  %v4789_v46 = vpop.f32.mrb[135].mxu1  ;;  %v21300_v56 = vld [vmem:[#allocation106_spill] sm:$0xff] }
 0x26c   :  { %7935 = vmatprep.subr.bf16.mxu1 %v21298_v40  ;;  %v18325_v40 = vadd.f32 %v5050_v50, %v18184_v5  ;;  %13942 = vmatmul.mubr.msk.bf16.vlgmr.msra.gmra.mrb[240].mxu0 %vm177_vm1, %v18319_v59  ;;  %v18335_v32 = vadd.f32 %v5052_v35, %v18194_v57  ;;  %v5004_v5 = vrot.slane %v18314_v8, %v16713_v44 }
 0x26d   :  { %7895 = vmatpush1.bf16.msra.mxu0 %v21299_v52  ;;  %7926 = vmatprep.mubr.bf16.mxu0 %v21001_v29  ;;  %v5012_v57 = vrot.slane %v18314_v8, %v16732_v31 }
 0x26e   :  { %7976 = vmatprep.subr.bf16.mxu0 %v21300_v56  ;;  %v4825_v7 = vpop.f32.mrb[136].mxu0 }
 0x26f   :  { %v5053_v50 = vmul.f32 %v5000_v14, %v4825_v7  ;;  %v4827_v21 = vpop.f32.mrb[137].mxu0  ;;  %v5016_v14 = vrot.slane %v18314_v8, %v16766_v4  ;;  %v5028_v7 = vrot.slane %v18314_v8, %v16776_v2 }
 0x270   :  { %v5054_v26 = vmul.f32 %v5004_v5, %v4827_v21  ;;  %v4829_v18 = vpop.f32.mrb[138].mxu0  ;;  %v21303_v5 = vld [vmem:[#allocation109_spill] sm:$0xff] }
 0x271   :  { %v18352_v35 = vadd.f32 %v5053_v50, %v18211_v20  ;;  %v4830_v56 = vpop.f32.mrb[139].mxu0 }
 0x272   :  { %13943 = vmatmul.mubr.msk.bf16.vlgmr.msra.gmra.mrb[240].mxu1 %vm177_vm1, %v18319_v59  ;;  %v21305_v56 = vld [vmem:[#allocation112_spill] sm:$0xff] }
 0x273   :  { %7936 = vmatpush1.bf16.msra.mxu1 %v21301_v63  ;;  %7967 = vmatprep.mubr.bf16.mxu1 %v21001_v29  ;;  %v18355_v63 = vadd.f32 %v5054_v26, %v18214_v37  ;;  %v5020_v37 = vrot.slane %v18314_v8, %v16768_v15 }
 0x274   :  { %8017 = vmatprep.subr.bf16.mxu1 %v21302_v62  ;;  %13944 = vmatmul.mubr.msk.bf16.vlgmr.msra.gmra.mrb[244].mxu0 %vm177_vm1, %v18319_v59 }
 0x275   :  { %v4866_v27 = vpop.f32.mrb[136].mxu1  ;;  %7977 = vmatpush1.bf16.msra.mxu0 %v21303_v5  ;;  %8008 = vmatprep.mubr.bf16.mxu0 %v21001_v29 }
 0x276   :  { %v5055_v42 = vmul.f32 %v5008_v22, %v4866_v27  ;;  %v4868_v46 = vpop.f32.mrb[137].mxu1 }
 0x277   :  { %v5056_v52 = vmul.f32 %v5012_v57, %v4868_v46  ;;  %v4870_v49 = vpop.f32.mrb[138].mxu1  ;;  %v4907_v22 = vpop.f32.mrb[140].mxu0  ;;  %v21306_v57 = vld [vmem:[#allocation95_spill] sm:$0xff] }
 0x278   :  { %v18358_v16 = vadd.f32 %v5055_v42, %v18217_v58  ;;  %v4871_v62 = vpop.f32.mrb[139].mxu1  ;;  %v13872_v58 = vld [vmem:[%s20654_s2 + $0x81] ss:$8 sm:$0xf]  ;;  %v4909_v50 = vpop.f32.mrb[141].mxu0 }
 0x279   :  { %v18365_v20 = vadd.f32 %v5056_v52, %v18224_v33  ;;  %v13873_v49 = vld [vmem:[%s20654_s2 + $0x81] ss:$8 sm:$0xf0]  ;;  %v5024_v52 = vrot.slane %v18314_v8, %v16770_v36  ;;  %v5057_v62 = vmul.f32 %v5016_v14, %v4907_v22  ;;  %v5058_v26 = vmul.f32 %v5020_v37, %v4909_v50  ;;  %v4911_v18 = vpop.f32.mrb[142].mxu0 }
 0x27a   :  { %13945 = vmatmul.mubr.msk.bf16.vlgmr.msra.gmra.mrb[244].mxu1 %vm177_vm1, %v18319_v59  ;;  %v21304_v33 = vld [vmem:[#allocation110_spill] sm:$0xff]  ;;  %v18387_v21 = vor.u32 %v13873_v49, %v13872_v58  ;;  %v21307_v58 = vld [vmem:[#allocation113_spill] sm:$0xff]  ;;  %v21309_v49 = vld [vmem:[#allocation99_spill] sm:$0xff] }
 0x27b   :  { %8058 = vmatprep.subr.bf16.mxu0 %v21304_v33  ;;  %8018 = vmatpush1.bf16.msra.mxu1 %v21305_v56  ;;  %v18390_v42 = vadd.f32 %v5057_v62, %v18249_v13  ;;  %v4912_v33 = vpop.f32.mrb[143].mxu0  ;;  %v18393_v5 = vadd.f32 %v5058_v26, %v18252_v11 }
 0x27c   :  { %8049 = vmatprep.mubr.bf16.mxu1 %v21001_v29  ;;  %8099 = vmatprep.subr.bf16.mxu1 %v21306_v57  ;;  %v5423_v37 = vrot.slane %v18387_v21, %v16711_v3  ;;  %v5427_v11 = vrot.slane %v18387_v21, %v16713_v44 }
 0x27d   :  { %v4948_v27 = vpop.f32.mrb[140].mxu1  ;;  %13946 = vmatmul.mubr.msk.bf16.vlgmr.msra.gmra.mrb[248].mxu0 %vm177_vm1, %v18319_v59 }
 0x27e   :  { %v5059_v46 = vmul.f32 %v5024_v52, %v4948_v27  ;;  %v4950_v56 = vpop.f32.mrb[141].mxu1  ;;  %8059 = vmatpush1.bf16.msra.mxu0 %v21307_v58  ;;  %8090 = vmatprep.mubr.bf16.mxu0 %v21001_v29  ;;  %v21310_v52 = vld [vmem:[#allocation116_spill] sm:$0xff] }
 0x27f   :  { %v5060_v8 = vmul.f32 %v5028_v7, %v4950_v56  ;;  %v4952_v24 = vpop.f32.mrb[142].mxu1  ;;  %v5116_v33 = vpop.f32.mrb[144].mxu0 }
 0x280   :  { %v18396_v57 = vadd.f32 %v5059_v46, %v18255_v1  ;;  %v4953_v14 = vpop.f32.mrb[143].mxu1  ;;  %v21308_v1 = vld [vmem:[#allocation114_spill] sm:$0xff]  ;;  %v5431_v24 = vrot.slane %v18387_v21, %v16721_v43  ;;  %v5500_v56 = vmul.f32 %v5423_v37, %v5116_v33  ;;  %v5118_v22 = vpop.f32.mrb[145].mxu0  ;;  %v5439_v37 = vrot.slane %v18387_v21, %v16766_v4  ;;  %v21313_v33 = vld [vmem:[#allocation119_spill] sm:$0xff] }
 0x281   :  { %v18403_v13 = vadd.f32 %v5060_v8, %v18262_v53  ;;  %8267 = vmatprep.subr.bf16.mxu0 %v21308_v1  ;;  %v5435_v53 = vrot.slane %v18387_v21, %v16732_v31  ;;  %v5501_v7 = vmul.f32 %v5427_v11, %v5118_v22  ;;  %v5120_v50 = vpop.f32.mrb[146].mxu0  ;;  %v21311_v11 = vld [vmem:[#allocation117_spill] sm:$0xff] }
 0x282   :  { %13947 = vmatmul.mubr.msk.bf16.vlgmr.msra.gmra.mrb[248].mxu1 %vm177_vm1, %v18319_v59  ;;  %v18420_v26 = vadd.f32 %v5500_v56, %v18279_v28  ;;  %v5121_v46 = vpop.f32.mrb[147].mxu0  ;;  %v21314_v56 = vld [vmem:[#allocation121_spill] sm:$0xff] }
 0x283   :  { %8100 = vmatpush1.bf16.msra.mxu1 %v21309_v49  ;;  %8131 = vmatprep.mubr.bf16.mxu1 %v21001_v29  ;;  %v18423_v8 = vadd.f32 %v5501_v7, %v18282_v0  ;;  %v5443_v0 = vrot.slane %v18387_v21, %v16768_v15 }
 0x284   :  { %8308 = vmatprep.subr.bf16.mxu1 %v21310_v52 }
 0x285   :  { %v5157_v62 = vpop.f32.mrb[144].mxu1  ;;  %13948 = vmatmul.mubr.msk.bf16.vlgmr.msra.gmra.mrb[252].mxu0 %vm177_vm1, %v18319_v59 }
 0x286   :  { %v5502_v27 = vmul.f32 %v5431_v24, %v5157_v62  ;;  %v5159_v18 = vpop.f32.mrb[145].mxu1  ;;  %8268 = vmatpush1.bf16.msra.mxu0 %v21311_v11  ;;  %8299 = vmatprep.mubr.bf16.mxu0 %v21001_v29  ;;  %v5447_v24 = vrot.slane %v18387_v21, %v16770_v36 }
 0x287   :  { %v5503_v14 = vmul.f32 %v5435_v53, %v5159_v18  ;;  %v5161_v1 = vpop.f32.mrb[146].mxu1  ;;  %v5198_v53 = vpop.f32.mrb[148].mxu0  ;;  %v18460_v18 = vld [vmem:[%s20653_s3 + $0x40] sm:$0xf] }
 0x288   :  { %v18426_v49 = vadd.f32 %v5502_v27, %v18285_v55  ;;  %v5162_v52 = vpop.f32.mrb[147].mxu1  ;;  %v13874_v55 = vld [vmem:[%s20654_s2 + $0xc1] ss:$8 sm:$0xf]  ;;  %v5504_v22 = vmul.f32 %v5439_v37, %v5198_v53  ;;  %v5200_v7 = vpop.f32.mrb[149].mxu0 }
 0x289   :  { %v18433_v28 = vadd.f32 %v5503_v14, %v18292_v38  ;;  %v13875_v1 = vld [vmem:[%s20654_s2 + $0xc1] ss:$8 sm:$0xf0]  ;;  %v5451_v52 = vrot.slane %v18387_v21, %v16776_v2  ;;  %v5202_v27 = vpop.f32.mrb[150].mxu0 }
 0x28a   :  { %13949 = vmatmul.mubr.msk.bf16.vlgmr.msra.gmra.mrb[252].mxu1 %vm177_vm1, %v18319_v59  ;;  %v21312_v38 = vld [vmem:[#allocation118_spill] sm:$0xff]  ;;  %v18455_v62 = vor.u32 %v13875_v1, %v13874_v55  ;;  %v5505_v59 = vmul.f32 %v5443_v0, %v5200_v7  ;;  %v18463_v46 = vadd.f32 %v5504_v22, %v18322_v39  ;;  %v5203_v11 = vpop.f32.mrb[151].mxu0 }
 0x28b   :  { %8349 = vmatprep.subr.bf16.mxu0 %v21312_v38  ;;  %8309 = vmatpush1.bf16.msra.mxu1 %v21313_v33  ;;  %v21318_v7 = vld [vmem:[#allocation126_spill] sm:$0xff] }
 0x28c   :  { %8340 = vmatprep.mubr.bf16.mxu1 %v21001_v29  ;;  %8390 = vmatprep.subr.bf16.mxu1 %v21314_v56  ;;  %v18466_v56 = vadd.f32 %v5505_v59, %v18325_v40  ;;  %v5455_v53 = vrot.slane %v18455_v62, %v16711_v3  ;;  %v5459_v40 = vrot.slane %v18455_v62, %v16713_v44 }
 0x28d   :  { %v5239_v50 = vpop.f32.mrb[148].mxu1  ;;  %13955 = vmatmul.mubr.msk.bf16.vlgmr.msra.gmra.mrb[0].mxu0 %vm177_vm1, %v18460_v18  ;;  %v5463_v11 = vrot.slane %v18455_v62, %v16721_v43 }
 0x28e   :  { %v5506_v21 = vmul.f32 %v5447_v24, %v5239_v50  ;;  %v5241_v14 = vpop.f32.mrb[149].mxu1  ;;  %v21315_v24 = vld [vmem:[#allocation120_spill] sm:$0xff]  ;;  %8381 = vmatprep.mubr.bf16.mxu0 %v21001_v29 }
 0x28f   :  { %v5507_v37 = vmul.f32 %v5451_v52, %v5241_v14  ;;  %v5243_v55 = vpop.f32.mrb[150].mxu1  ;;  %8350 = vmatpush1.bf16.msra.mxu0 %v21315_v24  ;;  %v21317_v52 = vld [vmem:[#allocation123_spill] sm:$0xff]  ;;  %v5280_v22 = vpop.f32.mrb[152].mxu0 }
 0x290   :  { %v18469_v0 = vadd.f32 %v5506_v21, %v18328_v9  ;;  %v5244_v1 = vpop.f32.mrb[151].mxu1  ;;  %v21316_v9 = vld [vmem:[#allocation122_spill] sm:$0xff]  ;;  %v5508_v59 = vmul.f32 %v5455_v53, %v5280_v22  ;;  %v5282_v50 = vpop.f32.mrb[153].mxu0  ;;  %v5471_v53 = vrot.slane %v18455_v62, %v16766_v4  ;;  %v5483_v22 = vrot.slane %v18455_v62, %v16776_v2 }
 0x291   :  { %v18476_v39 = vadd.f32 %v5507_v37, %v18335_v32  ;;  %8431 = vmatprep.subr.bf16.mxu0 %v21316_v9  ;;  %v5467_v32 = vrot.slane %v18455_v62, %v16732_v31  ;;  %v5509_v27 = vmul.f32 %v5459_v40, %v5282_v50  ;;  %v5284_v14 = vpop.f32.mrb[154].mxu0  ;;  %v21319_v40 = vld [vmem:[#allocation124_spill] sm:$0xff] }
 0x292   :  { %13956 = vmatmul.mubr.msk.bf16.vlgmr.msra.gmra.mrb[0].mxu1 %vm177_vm1, %v18460_v18  ;;  %v18493_v37 = vadd.f32 %v5508_v59, %v18352_v35  ;;  %v5285_v9 = vpop.f32.mrb[155].mxu0 }
 0x293   :  { %8391 = vmatpush1.bf16.msra.mxu1 %v21317_v52  ;;  %8422 = vmatprep.mubr.bf16.mxu1 %v21001_v29  ;;  %v18496_v52 = vadd.f32 %v5509_v27, %v18355_v63  ;;  %v5475_v63 = vrot.slane %v18455_v62, %v16768_v15  ;;  %v21321_v9 = vld [vmem:[#allocation127_spill] sm:$0xff] }
 0x294   :  { %8472 = vmatprep.subr.bf16.mxu1 %v21318_v7 }
 0x295   :  { %v5321_v21 = vpop.f32.mrb[152].mxu1  ;;  %13957 = vmatmul.mubr.msk.bf16.vlgmr.msra.gmra.mrb[4].mxu0 %vm177_vm1, %v18460_v18 }
 0x296   :  { %v5510_v55 = vmul.f32 %v5463_v11, %v5321_v21  ;;  %v5323_v1 = vpop.f32.mrb[153].mxu1  ;;  %8432 = vmatpush1.bf16.msra.mxu0 %v21319_v40  ;;  %8463 = vmatprep.mubr.bf16.mxu0 %v21001_v29 }
 0x297   :  { %v5511_v24 = vmul.f32 %v5467_v32, %v5323_v1  ;;  %v5325_v33 = vpop.f32.mrb[154].mxu1  ;;  %v5362_v11 = vpop.f32.mrb[156].mxu0  ;;  %v21322_v32 = vld [vmem:[#allocation111_spill] sm:$0xff] }
 0x298   :  { %v18499_v38 = vadd.f32 %v5510_v55, %v18358_v16  ;;  %v5326_v7 = vpop.f32.mrb[155].mxu1  ;;  %v13885_v16 = vld [vmem:[%s20654_s2 + $0x82] ss:$8 sm:$0xf]  ;;  %v5364_v59 = vpop.f32.mrb[157].mxu0 }
 0x299   :  { %v18506_v35 = vadd.f32 %v5511_v24, %v18365_v20  ;;  %v13886_v33 = vld [vmem:[%s20654_s2 + $0x82] ss:$8 sm:$0xf0]  ;;  %v5479_v24 = vrot.slane %v18455_v62, %v16770_v36  ;;  %v5512_v7 = vmul.f32 %v5471_v53, %v5362_v11  ;;  %v5513_v27 = vmul.f32 %v5475_v63, %v5364_v59  ;;  %v5366_v14 = vpop.f32.mrb[158].mxu0 }
 0x29a   :  { %13958 = vmatmul.mubr.msk.bf16.vlgmr.msra.gmra.mrb[4].mxu1 %vm177_vm1, %v18460_v18  ;;  %v21320_v20 = vld [vmem:[#allocation125_spill] sm:$0xff]  ;;  %v18528_v50 = vor.u32 %v13886_v33, %v13885_v16  ;;  %v21323_v16 = vld [vmem:[#allocation128_spill] sm:$0xff]  ;;  %v21325_v33 = vld [vmem:[#allocation115_spill] sm:$0xff] }
 0x29b   :  { %8513 = vmatprep.subr.bf16.mxu0 %v21320_v20  ;;  %8473 = vmatpush1.bf16.msra.mxu1 %v21321_v9  ;;  %v18531_v55 = vadd.f32 %v5512_v7, %v18390_v42  ;;  %v5367_v20 = vpop.f32.mrb[159].mxu0  ;;  %v18534_v40 = vadd.f32 %v5513_v27, %v18393_v5 }
 0x29c   :  { %8504 = vmatprep.mubr.bf16.mxu1 %v21001_v29  ;;  %8554 = vmatprep.subr.bf16.mxu1 %v21322_v32  ;;  %v5878_v63 = vrot.slane %v18528_v50, %v16711_v3  ;;  %v5882_v5 = vrot.slane %v18528_v50, %v16713_v44 }
 0x29d   :  { %v5403_v21 = vpop.f32.mrb[156].mxu1  ;;  %13959 = vmatmul.mubr.msk.bf16.vlgmr.msra.gmra.mrb[8].mxu0 %vm177_vm1, %v18460_v18 }
 0x29e   :  { %v5514_v1 = vmul.f32 %v5479_v24, %v5403_v21  ;;  %v5405_v9 = vpop.f32.mrb[157].mxu1  ;;  %8514 = vmatpush1.bf16.msra.mxu0 %v21323_v16  ;;  %8545 = vmatprep.mubr.bf16.mxu0 %v21001_v29 }
 0x29f   :  { %v5515_v62 = vmul.f32 %v5483_v22, %v5405_v9  ;;  %v5407_v58 = vpop.f32.mrb[158].mxu1  ;;  %v5571_v20 = vpop.f32.mrb[160].mxu0 }
 0x2a0   :  { %v18537_v32 = vadd.f32 %v5514_v1, %v18396_v57  ;;  %v5408_v53 = vpop.f32.mrb[159].mxu1  ;;  %v21324_v57 = vld [vmem:[#allocation130_spill] sm:$0xff]  ;;  %v5886_v58 = vrot.slane %v18528_v50, %v16721_v43  ;;  %v5955_v24 = vmul.f32 %v5878_v63, %v5571_v20  ;;  %v5573_v9 = vpop.f32.mrb[161].mxu0  ;;  %v5894_v63 = vrot.slane %v18528_v50, %v16766_v4 }
 0x2a1   :  { %v18544_v42 = vadd.f32 %v5515_v62, %v18403_v13  ;;  %8722 = vmatprep.subr.bf16.mxu0 %v21324_v57  ;;  %v5890_v13 = vrot.slane %v18528_v50, %v16732_v31  ;;  %v5956_v11 = vmul.f32 %v5882_v5, %v5573_v9  ;;  %v5575_v7 = vpop.f32.mrb[162].mxu0  ;;  %v21326_v5 = vld [vmem:[#allocation132_spill] sm:$0xff]  ;;  %v5906_v20 = vrot.slane %v18528_v50, %v16776_v2 }
 0x2a2   :  { %13960 = vmatmul.mubr.msk.bf16.vlgmr.msra.gmra.mrb[8].mxu1 %vm177_vm1, %v18460_v18  ;;  %v18561_v59 = vadd.f32 %v5955_v24, %v18420_v26  ;;  %v5576_v14 = vpop.f32.mrb[163].mxu0  ;;  %v18601_v7 = vld [vmem:[%s20653_s3 + $0x44] sm:$0xf] }
 0x2a3   :  { %8555 = vmatpush1.bf16.msra.mxu1 %v21325_v33  ;;  %8586 = vmatprep.mubr.bf16.mxu1 %v21001_v29  ;;  %v18564_v1 = vadd.f32 %v5956_v11, %v18423_v8  ;;  %v5898_v8 = vrot.slane %v18528_v50, %v16768_v15 }
 0x2a4   :  { %8763 = vmatprep.subr.bf16.mxu1 %v17208_v61 }
 0x2a5   :  { %v5612_v22 = vpop.f32.mrb[160].mxu1  ;;  %13961 = vmatmul.mubr.msk.bf16.vlgmr.msra.gmra.mrb[12].mxu0 %vm177_vm1, %v18460_v18 }
 0x2a6   :  { %v5957_v27 = vmul.f32 %v5886_v58, %v5612_v22  ;;  %v5614_v21 = vpop.f32.mrb[161].mxu1  ;;  %8723 = vmatpush1.bf16.msra.mxu0 %v21326_v5  ;;  %8754 = vmatprep.mubr.bf16.mxu0 %v21001_v29 }
 0x2a7   :  { %v5958_v62 = vmul.f32 %v5890_v13, %v5614_v21  ;;  %v5616_v53 = vpop.f32.mrb[162].mxu1  ;;  %8804 = vmatprep.subr.bf16.mxu0 %v17263_v17  ;;  %v5653_v58 = vpop.f32.mrb[164].mxu0 }
 0x2a8   :  { %v18567_v57 = vadd.f32 %v5957_v27, %v18426_v49  ;;  %v5617_v61 = vpop.f32.mrb[163].mxu1  ;;  %v13888_v49 = vld [vmem:[%s20654_s2 + $0xc2] ss:$8 sm:$0xf0]  ;;  %v5959_v13 = vmul.f32 %v5894_v63, %v5653_v58  ;;  %v5655_v24 = vpop.f32.mrb[165].mxu0 }
 0x2a9   :  { %v18574_v26 = vadd.f32 %v5958_v62, %v18433_v28  ;;  %v13887_v61 = vld [vmem:[%s20654_s2 + $0xc2] ss:$8 sm:$0xf]  ;;  %v5902_v28 = vrot.slane %v18528_v50, %v16770_v36  ;;  %v5657_v22 = vpop.f32.mrb[166].mxu0 }
 0x2aa   :  { %13962 = vmatmul.mubr.msk.bf16.vlgmr.msra.gmra.mrb[12].mxu1 %vm177_vm1, %v18460_v18  ;;  %v18596_v9 = vor.u32 %v13888_v49, %v13887_v61  ;;  %v5960_v18 = vmul.f32 %v5898_v8, %v5655_v24  ;;  %v18604_v27 = vadd.f32 %v5959_v13, %v18463_v46  ;;  %v5658_v14 = vpop.f32.mrb[167].mxu0 }
 0x2ab   :  { %8764 = vmatpush1.bf16.msra.mxu1 %v17232_v30  ;;  %8795 = vmatprep.mubr.bf16.mxu1 %v21001_v29 }
 0x2ac   :  { %8845 = vmatprep.subr.bf16.mxu1 %v17278_v25  ;;  %v18607_v62 = vadd.f32 %v5960_v18, %v18466_v56  ;;  %v5910_v49 = vrot.slane %v18596_v9, %v16711_v3  ;;  %v5914_v56 = vrot.slane %v18596_v9, %v16713_v44 }
 0x2ad   :  { %v5694_v11 = vpop.f32.mrb[164].mxu1  ;;  %13968 = vmatmul.mubr.msk.bf16.vlgmr.msra.gmra.mrb[16].mxu0 %vm177_vm1, %v18601_v7 }
 0x2ae   :  { %v5961_v50 = vmul.f32 %v5902_v28, %v5694_v11  ;;  %v5696_v21 = vpop.f32.mrb[165].mxu1  ;;  %v21327_v28 = vld [vmem:[#allocation134_spill] sm:$0xff]  ;;  %8836 = vmatprep.mubr.bf16.mxu0 %v21001_v29 }
 0x2af   :  { %v5962_v53 = vmul.f32 %v5906_v20, %v5696_v21  ;;  %v5698_v63 = vpop.f32.mrb[166].mxu1  ;;  %8805 = vmatpush1.bf16.msra.mxu0 %v21327_v28  ;;  %v5735_v58 = vpop.f32.mrb[168].mxu0 }
 0x2b0   :  { %v18610_v8 = vadd.f32 %v5961_v50, %v18469_v0  ;;  %v5699_v61 = vpop.f32.mrb[167].mxu1  ;;  %8886 = vmatprep.subr.bf16.mxu0 %v17343_v10  ;;  %v5918_v0 = vrot.slane %v18596_v9, %v16721_v43  ;;  %v5963_v20 = vmul.f32 %v5910_v49, %v5735_v58  ;;  %v5737_v13 = vpop.f32.mrb[169].mxu0  ;;  %v5926_v49 = vrot.slane %v18596_v9, %v16766_v4  ;;  %v21328_v58 = vld [vmem:[#allocation129_spill] sm:$0xff] }
 0x2b1   :  { %v18617_v46 = vadd.f32 %v5962_v53, %v18476_v39  ;;  %v5922_v39 = vrot.slane %v18596_v9, %v16732_v31  ;;  %v5964_v24 = vmul.f32 %v5914_v56, %v5737_v13  ;;  %v5739_v11 = vpop.f32.mrb[170].mxu0 }
 0x2b2   :  { %13969 = vmatmul.mubr.msk.bf16.vlgmr.msra.gmra.mrb[16].mxu1 %vm177_vm1, %v18601_v7  ;;  %v18634_v22 = vadd.f32 %v5963_v20, %v18493_v37  ;;  %v5740_v14 = vpop.f32.mrb[171].mxu0 }
 0x2b3   :  { %8846 = vmatpush1.bf16.msra.mxu1 %v17314_v6  ;;  %8877 = vmatprep.mubr.bf16.mxu1 %v21001_v29  ;;  %v18637_v53 = vadd.f32 %v5964_v24, %v18496_v52  ;;  %v5930_v52 = vrot.slane %v18596_v9, %v16768_v15 }
 0x2b4   :  { %8927 = vmatprep.subr.bf16.mxu1 %v17384_v41 }
 0x2b5   :  { %v5776_v18 = vpop.f32.mrb[168].mxu1  ;;  %13970 = vmatmul.mubr.msk.bf16.vlgmr.msra.gmra.mrb[20].mxu0 %vm177_vm1, %v18601_v7 }
 0x2b6   :  { %v5965_v50 = vmul.f32 %v5918_v0, %v5776_v18  ;;  %v5778_v21 = vpop.f32.mrb[169].mxu1  ;;  %8887 = vmatpush1.bf16.msra.mxu0 %v17327_v48  ;;  %8918 = vmatprep.mubr.bf16.mxu0 %v21001_v29  ;;  %v5938_v0 = vrot.slane %v18596_v9, %v16776_v2 }
 0x2b7   :  { %v5966_v63 = vmul.f32 %v5922_v39, %v5778_v21  ;;  %v5780_v61 = vpop.f32.mrb[170].mxu1  ;;  %8968 = vmatprep.subr.bf16.mxu0 %v17360_v47  ;;  %v5817_v56 = vpop.f32.mrb[172].mxu0 }
 0x2b8   :  { %v18640_v5 = vadd.f32 %v5965_v50, %v18499_v38  ;;  %v5781_v41 = vpop.f32.mrb[171].mxu1  ;;  %v13899_v38 = vld [vmem:[%s20654_s2 + $0x83] ss:$8 sm:$0xf0]  ;;  %v5967_v39 = vmul.f32 %v5926_v49, %v5817_v56  ;;  %v5819_v20 = vpop.f32.mrb[173].mxu0 }
 0x2b9   :  { %v18647_v37 = vadd.f32 %v5966_v63, %v18506_v35  ;;  %v13898_v41 = vld [vmem:[%s20654_s2 + $0x83] ss:$8 sm:$0xf]  ;;  %v5934_v35 = vrot.slane %v18596_v9, %v16770_v36  ;;  %v5968_v24 = vmul.f32 %v5930_v52, %v5819_v20  ;;  %v5821_v11 = vpop.f32.mrb[174].mxu0 }
 0x2ba   :  { %13971 = vmatmul.mubr.msk.bf16.vlgmr.msra.gmra.mrb[20].mxu1 %vm177_vm1, %v18601_v7  ;;  %v18669_v13 = vor.u32 %v13899_v38, %v13898_v41  ;;  %v18672_v50 = vadd.f32 %v5967_v39, %v18531_v55  ;;  %v5822_v63 = vpop.f32.mrb[175].mxu0 }
 0x2bb   :  { %8928 = vmatpush1.bf16.msra.mxu1 %v17404_v45  ;;  %8959 = vmatprep.mubr.bf16.mxu1 %v21001_v29  ;;  %v18675_v61 = vadd.f32 %v5968_v24, %v18534_v40 }
 0x2bc   :  { %9009 = vmatprep.subr.bf16.mxu1 %v21328_v58  ;;  %v6333_v52 = vrot.slane %v18669_v13, %v16711_v3  ;;  %v6337_v40 = vrot.slane %v18669_v13, %v16713_v44 }
 0x2bd   :  { %v5858_v18 = vpop.f32.mrb[172].mxu1  ;;  %13972 = vmatmul.mubr.msk.bf16.vlgmr.msra.gmra.mrb[24].mxu0 %vm177_vm1, %v18601_v7 }
 0x2be   :  { %v5969_v21 = vmul.f32 %v5934_v35, %v5858_v18  ;;  %v5860_v14 = vpop.f32.mrb[173].mxu1  ;;  %8969 = vmatpush1.bf16.msra.mxu0 %v17406_v51  ;;  %9000 = vmatprep.mubr.bf16.mxu0 %v21001_v29 }
 0x2bf   :  { %v5970_v9 = vmul.f32 %v5938_v0, %v5860_v14  ;;  %v5862_v45 = vpop.f32.mrb[174].mxu1  ;;  %9177 = vmatprep.subr.bf16.mxu0 %v21202_v60  ;;  %v6026_v41 = vpop.f32.mrb[176].mxu0 }
 0x2c0   :  { %v18678_v58 = vadd.f32 %v5969_v21, %v18537_v32  ;;  %v5863_v49 = vpop.f32.mrb[175].mxu1  ;;  %v6341_v45 = vrot.slane %v18669_v13, %v16721_v43  ;;  %v21329_v32 = vld [vmem:[#allocation131_spill] sm:$0xff]  ;;  %v6410_v38 = vmul.f32 %v6333_v52, %v6026_v41  ;;  %v6028_v35 = vpop.f32.mrb[177].mxu0  ;;  %v21332_v41 = vld [vmem:[#allocation9_spill] sm:$0xff] }
 0x2c1   :  { %v18685_v55 = vadd.f32 %v5970_v9, %v18544_v42  ;;  %v6345_v42 = vrot.slane %v18669_v13, %v16732_v31  ;;  %v6411_v56 = vmul.f32 %v6337_v40, %v6028_v35  ;;  %v6030_v39 = vpop.f32.mrb[178].mxu0  ;;  %v21330_v49 = vld [vmem:[#allocation7_spill] sm:$0xff]  ;;  %v21333_v35 = vld [vmem:[#allocation12_spill] sm:$0xff] }
 0x2c2   :  { %13973 = vmatmul.mubr.msk.bf16.vlgmr.msra.gmra.mrb[24].mxu1 %vm177_vm1, %v18601_v7  ;;  %v6031_v24 = vpop.f32.mrb[179].mxu0  ;;  %v18702_v18 = vadd.f32 %v6410_v38, %v18561_v59  ;;  %v6353_v59 = vrot.slane %v18669_v13, %v16768_v15  ;;  %v13901_v52 = vld [vmem:[%s20654_s2 + $0xc3] ss:$8 sm:$0xf0]  ;;  %v6361_v38 = vrot.slane %v18669_v13, %v16776_v2 }
 0x2c3   :  { %9010 = vmatpush1.bf16.msra.mxu1 %v21329_v32  ;;  %9041 = vmatprep.mubr.bf16.mxu1 %v21001_v29  ;;  %v18705_v14 = vadd.f32 %v6411_v56, %v18564_v1  ;;  %v13900_v1 = vld [vmem:[%s20654_s2 + $0xc3] ss:$8 sm:$0xf] }
 0x2c4   :  { %9218 = vmatprep.subr.bf16.mxu1 %v21204_v19  ;;  %v6349_v19 = vrot.slane %v18669_v13, %v16766_v4 }
 0x2c5   :  { %v6067_v0 = vpop.f32.mrb[176].mxu1  ;;  %13974 = vmatmul.mubr.msk.bf16.vlgmr.msra.gmra.mrb[28].mxu0 %vm177_vm1, %v18601_v7 }
 0x2c6   :  { %v6412_v20 = vmul.f32 %v6341_v45, %v6067_v0  ;;  %v6069_v60 = vpop.f32.mrb[177].mxu1  ;;  %9178 = vmatpush1.bf16.msra.mxu0 %v21330_v49  ;;  %9209 = vmatprep.mubr.bf16.mxu0 %v21001_v29  ;;  %v6357_v45 = vrot.slane %v18669_v13, %v16770_v36  ;;  %v18737_v0 = vor.u32 %v13901_v52, %v13900_v1 }
 0x2c7   :  { %v6413_v11 = vmul.f32 %v6345_v42, %v6069_v60  ;;  %v6071_v21 = vpop.f32.mrb[178].mxu1  ;;  %v6108_v42 = vpop.f32.mrb[180].mxu0  ;;  %v18742_v60 = vld [vmem:[%s20653_s3 + $0x48] sm:$0xf] }
 0x2c8   :  { %v6072_v63 = vpop.f32.mrb[179].mxu1  ;;  %v18712_v9 = vadd.f32 %v6412_v20, %v18567_v57  ;;  %v21331_v57 = vld [vmem:[#allocation10_spill] sm:$0xff]  ;;  %v6110_v56 = vpop.f32.mrb[181].mxu0 }
 0x2c9   :  { %v18725_v40 = vadd.f32 %v6413_v11, %v18574_v26  ;;  %9259 = vmatprep.subr.bf16.mxu0 %v21331_v57  ;;  %v6414_v26 = vmul.f32 %v6349_v19, %v6108_v42  ;;  %v6112_v20 = vpop.f32.mrb[182].mxu0  ;;  %v21334_v57 = vld [vmem:[#allocation11_spill] sm:$0xff] }
 0x2ca   :  { %13975 = vmatmul.mubr.msk.bf16.vlgmr.msra.gmra.mrb[28].mxu1 %vm177_vm1, %v18601_v7  ;;  %v6415_v7 = vmul.f32 %v6353_v59, %v6110_v56  ;;  %v6113_v21 = vpop.f32.mrb[183].mxu0  ;;  %v6365_v59 = vrot.slane %v18737_v0, %v16711_v3 }
 0x2cb   :  { %9219 = vmatpush1.bf16.msra.mxu1 %v21332_v41  ;;  %9250 = vmatprep.mubr.bf16.mxu1 %v21001_v29  ;;  %v18745_v13 = vadd.f32 %v6414_v26, %v18604_v27  ;;  %v6369_v27 = vrot.slane %v18737_v0, %v16713_v44  ;;  %v6373_v41 = vrot.slane %v18737_v0, %v16721_v43 }
 0x2cc   :  { %9300 = vmatprep.subr.bf16.mxu1 %v21333_v35  ;;  %v18748_v19 = vadd.f32 %v6415_v7, %v18607_v62  ;;  %v21337_v35 = vld [vmem:[#allocation15_spill] sm:$0xff] }
 0x2cd   :  { %v6149_v39 = vpop.f32.mrb[180].mxu1  ;;  %13981 = vmatmul.mubr.msk.bf16.vlgmr.msra.gmra.mrb[32].mxu0 %vm177_vm1, %v18742_v60 }
 0x2ce   :  { %v6416_v24 = vmul.f32 %v6357_v45, %v6149_v39  ;;  %v6151_v11 = vpop.f32.mrb[181].mxu1  ;;  %9260 = vmatpush1.bf16.msra.mxu0 %v21334_v57  ;;  %9291 = vmatprep.mubr.bf16.mxu0 %v21001_v29  ;;  %v21335_v45 = vld [vmem:[#allocation14_spill] sm:$0xff] }
 0x2cf   :  { %v6417_v63 = vmul.f32 %v6361_v38, %v6151_v11  ;;  %v6153_v49 = vpop.f32.mrb[182].mxu1  ;;  %9341 = vmatprep.subr.bf16.mxu0 %v21335_v45  ;;  %v6190_v42 = vpop.f32.mrb[184].mxu0  ;;  %v6377_v38 = vrot.slane %v18737_v0, %v16732_v31  ;;  %v21338_v45 = vld [vmem:[#allocation16_spill] sm:$0xff] }
 0x2d0   :  { %v6154_v1 = vpop.f32.mrb[183].mxu1  ;;  %v18755_v52 = vadd.f32 %v6416_v24, %v18610_v8  ;;  %v21336_v8 = vld [vmem:[#allocation13_spill] sm:$0xff]  ;;  %v6192_v26 = vpop.f32.mrb[185].mxu0 }
 0x2d1   :  { %v18762_v62 = vadd.f32 %v6417_v63, %v18617_v46  ;;  %v6418_v46 = vmul.f32 %v6365_v59, %v6190_v42  ;;  %v6419_v56 = vmul.f32 %v6369_v27, %v6192_v26  ;;  %v6194_v39 = vpop.f32.mrb[186].mxu0  ;;  %v6381_v59 = vrot.slane %v18737_v0, %v16766_v4  ;;  %v21341_v26 = vld [vmem:[#allocation4_spill] sm:$0xff] }
 0x2d2   :  { %13982 = vmatmul.mubr.msk.bf16.vlgmr.msra.gmra.mrb[32].mxu1 %vm177_vm1, %v18742_v60  ;;  %v6195_v11 = vpop.f32.mrb[187].mxu0  ;;  %v6389_v42 = vrot.slane %v18737_v0, %v16770_v36 }
 0x2d3   :  { %9301 = vmatpush1.bf16.msra.mxu1 %v21336_v8  ;;  %9332 = vmatprep.mubr.bf16.mxu1 %v21001_v29  ;;  %v18775_v21 = vadd.f32 %v6418_v46, %v18634_v22  ;;  %v18778_v1 = vadd.f32 %v6419_v56, %v18637_v53  ;;  %v6385_v22 = vrot.slane %v18737_v0, %v16768_v15  ;;  %v13911_v53 = vld [vmem:[%s20654_s2 + $0x84] ss:$8 sm:$0xf] }
 0x2d4   :  { %9382 = vmatprep.subr.bf16.mxu1 %v21337_v35  ;;  %v6393_v46 = vrot.slane %v18737_v0, %v16776_v2 }
 0x2d5   :  { %v6231_v7 = vpop.f32.mrb[184].mxu1  ;;  %13983 = vmatmul.mubr.msk.bf16.vlgmr.msra.gmra.mrb[36].mxu0 %vm177_vm1, %v18742_v60 }
 0x2d6   :  { %v6420_v20 = vmul.f32 %v6373_v41, %v6231_v7  ;;  %v6233_v24 = vpop.f32.mrb[185].mxu1  ;;  %9342 = vmatpush1.bf16.msra.mxu0 %v21338_v45  ;;  %9373 = vmatprep.mubr.bf16.mxu0 %v21001_v29  ;;  %v13912_v41 = vld [vmem:[%s20654_s2 + $0x84] ss:$8 sm:$0xf0] }
 0x2d7   :  { %v6421_v63 = vmul.f32 %v6377_v38, %v6233_v24  ;;  %v6235_v49 = vpop.f32.mrb[186].mxu1  ;;  %v21340_v38 = vld [vmem:[#allocation17_spill] sm:$0xff]  ;;  %v6272_v35 = vpop.f32.mrb[188].mxu0  ;;  %v18810_v7 = vor.u32 %v13912_v41, %v13911_v53  ;;  %v21343_v41 = vld [vmem:[#allocation22_spill] sm:$0xff] }
 0x2d8   :  { %v6236_v57 = vpop.f32.mrb[187].mxu1  ;;  %v18785_v27 = vadd.f32 %v6420_v20, %v18640_v5  ;;  %v21339_v5 = vld [vmem:[#allocation2_spill] sm:$0xff]  ;;  %v6274_v56 = vpop.f32.mrb[189].mxu0  ;;  %v21342_v53 = vld [vmem:[#allocation5_spill] sm:$0xff] }
 0x2d9   :  { %v18798_v8 = vadd.f32 %v6421_v63, %v18647_v37  ;;  %9423 = vmatprep.subr.bf16.mxu0 %v21339_v5  ;;  %v6422_v37 = vmul.f32 %v6381_v59, %v6272_v35  ;;  %v6423_v39 = vmul.f32 %v6385_v22, %v6274_v56  ;;  %v6276_v24 = vpop.f32.mrb[190].mxu0  ;;  %v6788_v59 = vrot.slane %v18810_v7, %v16711_v3 }
 0x2da   :  { %13984 = vmatmul.mubr.msk.bf16.vlgmr.msra.gmra.mrb[36].mxu1 %vm177_vm1, %v18742_v60  ;;  %v6277_v49 = vpop.f32.mrb[191].mxu0 }
 0x2db   :  { %9383 = vmatpush1.bf16.msra.mxu1 %v21340_v38  ;;  %9414 = vmatprep.mubr.bf16.mxu1 %v21001_v29  ;;  %v18813_v57 = vadd.f32 %v6422_v37, %v18672_v50  ;;  %v18816_v0 = vadd.f32 %v6423_v39, %v18675_v61  ;;  %v6792_v50 = vrot.slane %v18810_v7, %v16713_v44 }
 0x2dc   :  { %9464 = vmatprep.subr.bf16.mxu1 %v21341_v26  ;;  %v21345_v26 = vld [vmem:[#allocation24_spill] sm:$0xff] }
 0x2dd   :  { %v6313_v20 = vpop.f32.mrb[188].mxu1  ;;  %13985 = vmatmul.mubr.msk.bf16.vlgmr.msra.gmra.mrb[40].mxu0 %vm177_vm1, %v18742_v60 }
 0x2de   :  { %v6424_v11 = vmul.f32 %v6389_v42, %v6313_v20  ;;  %v6315_v63 = vpop.f32.mrb[189].mxu1  ;;  %9424 = vmatpush1.bf16.msra.mxu0 %v21342_v53  ;;  %9455 = vmatprep.mubr.bf16.mxu0 %v21001_v29  ;;  %v6796_v42 = vrot.slane %v18810_v7, %v16721_v43 }
 0x2df   :  { %v6425_v45 = vmul.f32 %v6393_v46, %v6315_v63  ;;  %v6317_v5 = vpop.f32.mrb[190].mxu1  ;;  %9632 = vmatprep.subr.bf16.mxu0 %v21343_v41  ;;  %v6481_v35 = vpop.f32.mrb[192].mxu0  ;;  %v6800_v46 = vrot.slane %v18810_v7, %v16732_v31 }
 0x2e0   :  { %v6318_v38 = vpop.f32.mrb[191].mxu1  ;;  %v18823_v22 = vadd.f32 %v6424_v11, %v18678_v58  ;;  %v21344_v58 = vld [vmem:[#allocation3_spill] sm:$0xff]  ;;  %v6483_v37 = vpop.f32.mrb[193].mxu0 }
 0x2e1   :  { %v18830_v61 = vadd.f32 %v6425_v45, %v18685_v55  ;;  %v6865_v55 = vmul.f32 %v6788_v59, %v6481_v35  ;;  %v6866_v56 = vmul.f32 %v6792_v50, %v6483_v37  ;;  %v6485_v20 = vpop.f32.mrb[194].mxu0  ;;  %v6804_v59 = vrot.slane %v18810_v7, %v16766_v4  ;;  %v21346_v50 = vld [vmem:[#allocation23_spill] sm:$0xff]  ;;  %v21348_v35 = vld [vmem:[#allocation25_spill] sm:$0xff] }
 0x2e2   :  { %13986 = vmatmul.mubr.msk.bf16.vlgmr.msra.gmra.mrb[40].mxu1 %vm177_vm1, %v18742_v60  ;;  %v6486_v49 = vpop.f32.mrb[195].mxu0 }
 0x2e3   :  { %9465 = vmatpush1.bf16.msra.mxu1 %v21344_v58  ;;  %9496 = vmatprep.mubr.bf16.mxu1 %v21001_v29  ;;  %v18843_v24 = vadd.f32 %v6865_v55, %v18702_v18  ;;  %v18846_v45 = vadd.f32 %v6866_v56, %v18705_v14  ;;  %v6808_v14 = vrot.slane %v18810_v7, %v16768_v15  ;;  %v21349_v55 = vld [vmem:[#allocation28_spill] sm:$0xff] }
 0x2e4   :  { %9673 = vmatprep.subr.bf16.mxu1 %v21345_v26  ;;  %v6812_v58 = vrot.slane %v18810_v7, %v16770_v36  ;;  %v6816_v26 = vrot.slane %v18810_v7, %v16776_v2 }
 0x2e5   :  { %v6522_v39 = vpop.f32.mrb[192].mxu1  ;;  %13987 = vmatmul.mubr.msk.bf16.vlgmr.msra.gmra.mrb[44].mxu0 %vm177_vm1, %v18742_v60 }
 0x2e6   :  { %v6867_v11 = vmul.f32 %v6796_v42, %v6522_v39  ;;  %v6524_v63 = vpop.f32.mrb[193].mxu1  ;;  %9633 = vmatpush1.bf16.msra.mxu0 %v21346_v50  ;;  %9664 = vmatprep.mubr.bf16.mxu0 %v21001_v29  ;;  %v13914_v42 = vld [vmem:[%s20654_s2 + $0xc4] ss:$8 sm:$0xf0] }
 0x2e7   :  { %v6868_v5 = vmul.f32 %v6800_v46, %v6524_v63  ;;  %v6526_v38 = vpop.f32.mrb[194].mxu1  ;;  %v6563_v46 = vpop.f32.mrb[196].mxu0  ;;  %v18883_v63 = vld [vmem:[%s20653_s3 + $0x4c] sm:$0xf] }
 0x2e8   :  { %v18849_v53 = vadd.f32 %v6867_v11, %v18712_v9  ;;  %v6527_v41 = vpop.f32.mrb[195].mxu1  ;;  %v13913_v9 = vld [vmem:[%s20654_s2 + $0xc4] ss:$8 sm:$0xf]  ;;  %v6869_v37 = vmul.f32 %v6804_v59, %v6563_v46  ;;  %v6565_v56 = vpop.f32.mrb[197].mxu0 }
 0x2e9   :  { %v18856_v18 = vadd.f32 %v6868_v5, %v18725_v40  ;;  %v21347_v40 = vld [vmem:[#allocation26_spill] sm:$0xff]  ;;  %v18878_v39 = vor.u32 %v13914_v42, %v13913_v9  ;;  %v6567_v11 = vpop.f32.mrb[198].mxu0 }
 0x2ea   :  { %13988 = vmatmul.mubr.msk.bf16.vlgmr.msra.gmra.mrb[44].mxu1 %vm177_vm1, %v18742_v60  ;;  %9714 = vmatprep.subr.bf16.mxu0 %v21347_v40  ;;  %v6870_v60 = vmul.f32 %v6808_v14, %v6565_v56  ;;  %v18886_v49 = vadd.f32 %v6869_v37, %v18745_v13  ;;  %v6568_v38 = vpop.f32.mrb[199].mxu0  ;;  %v21350_v40 = vld [vmem:[#allocation27_spill] sm:$0xff] }
 0x2eb   :  { %9674 = vmatpush1.bf16.msra.mxu1 %v21348_v35  ;;  %9705 = vmatprep.mubr.bf16.mxu1 %v21001_v29  ;;  %v6820_v42 = vrot.slane %v18878_v39, %v16711_v3  ;;  %v21352_v35 = vld [vmem:[#allocation29_spill] sm:$0xff] }
 0x2ec   :  { %9755 = vmatprep.subr.bf16.mxu1 %v21349_v55  ;;  %v18889_v41 = vadd.f32 %v6870_v60, %v18748_v19  ;;  %v6824_v19 = vrot.slane %v18878_v39, %v16713_v44 }
 0x2ed   :  { %v6604_v20 = vpop.f32.mrb[196].mxu1  ;;  %13994 = vmatmul.mubr.msk.bf16.vlgmr.msra.gmra.mrb[48].mxu0 %vm177_vm1, %v18883_v63 }
 0x2ee   :  { %v6871_v7 = vmul.f32 %v6812_v58, %v6604_v20  ;;  %v6606_v5 = vpop.f32.mrb[197].mxu1  ;;  %9715 = vmatpush1.bf16.msra.mxu0 %v21350_v40  ;;  %9746 = vmatprep.mubr.bf16.mxu0 %v21001_v29  ;;  %v6828_v58 = vrot.slane %v18878_v39, %v16721_v43 }
 0x2ef   :  { %v6872_v59 = vmul.f32 %v6816_v26, %v6606_v5  ;;  %v6608_v50 = vpop.f32.mrb[198].mxu1  ;;  %v6645_v46 = vpop.f32.mrb[200].mxu0  ;;  %v21353_v26 = vld [vmem:[#allocation31_spill] sm:$0xff] }
 0x2f0   :  { %v18892_v14 = vadd.f32 %v6871_v7, %v18755_v52  ;;  %v6609_v9 = vpop.f32.mrb[199].mxu1  ;;  %v21351_v52 = vld [vmem:[#allocation30_spill] sm:$0xff]  ;;  %v6873_v55 = vmul.f32 %v6820_v42, %v6645_v46  ;;  %v6647_v37 = vpop.f32.mrb[201].mxu0  ;;  %v6836_v42 = vrot.slane %v18878_v39, %v16766_v4  ;;  %v21356_v46 = vld [vmem:[#allocation33_spill] sm:$0xff] }
 0x2f1   :  { %v18899_v13 = vadd.f32 %v6872_v59, %v18762_v62  ;;  %9796 = vmatprep.subr.bf16.mxu0 %v21351_v52  ;;  %v6832_v62 = vrot.slane %v18878_v39, %v16732_v31  ;;  %v6874_v56 = vmul.f32 %v6824_v19, %v6647_v37  ;;  %v6649_v20 = vpop.f32.mrb[202].mxu0  ;;  %v21354_v19 = vld [vmem:[#allocation32_spill] sm:$0xff] }
 0x2f2   :  { %13995 = vmatmul.mubr.msk.bf16.vlgmr.msra.gmra.mrb[48].mxu1 %vm177_vm1, %v18883_v63  ;;  %v18916_v11 = vadd.f32 %v6873_v55, %v18775_v21  ;;  %v6650_v38 = vpop.f32.mrb[203].mxu0  ;;  %v21357_v55 = vld [vmem:[#allocation18_spill] sm:$0xff] }
 0x2f3   :  { %9756 = vmatpush1.bf16.msra.mxu1 %v21352_v35  ;;  %9787 = vmatprep.mubr.bf16.mxu1 %v21001_v29  ;;  %v18919_v59 = vadd.f32 %v6874_v56, %v18778_v1  ;;  %v6840_v1 = vrot.slane %v18878_v39, %v16768_v15  ;;  %v6844_v35 = vrot.slane %v18878_v39, %v16770_v36 }
 0x2f4   :  { %9837 = vmatprep.subr.bf16.mxu1 %v21353_v26  ;;  %v6848_v26 = vrot.slane %v18878_v39, %v16776_v2 }
 0x2f5   :  { %v6686_v60 = vpop.f32.mrb[200].mxu1  ;;  %13996 = vmatmul.mubr.msk.bf16.vlgmr.msra.gmra.mrb[52].mxu0 %vm177_vm1, %v18883_v63 }
 0x2f6   :  { %v6875_v7 = vmul.f32 %v6828_v58, %v6686_v60  ;;  %v6688_v5 = vpop.f32.mrb[201].mxu1  ;;  %9797 = vmatpush1.bf16.msra.mxu0 %v21354_v19  ;;  %9828 = vmatprep.mubr.bf16.mxu0 %v21001_v29  ;;  %v13925_v58 = vld [vmem:[%s20654_s2 + $0x85] ss:$8 sm:$0xf0] }
 0x2f7   :  { %v6876_v50 = vmul.f32 %v6832_v62, %v6688_v5  ;;  %v6690_v9 = vpop.f32.mrb[202].mxu1  ;;  %v6727_v62 = vpop.f32.mrb[204].mxu0 }
 0x2f8   :  { %v18922_v40 = vadd.f32 %v6875_v7, %v18785_v27  ;;  %v6691_v52 = vpop.f32.mrb[203].mxu1  ;;  %v13924_v27 = vld [vmem:[%s20654_s2 + $0x85] ss:$8 sm:$0xf]  ;;  %v6877_v37 = vmul.f32 %v6836_v42, %v6727_v62  ;;  %v6729_v56 = vpop.f32.mrb[205].mxu0 }
 0x2f9   :  { %v18929_v21 = vadd.f32 %v6876_v50, %v18798_v8  ;;  %v21355_v8 = vld [vmem:[#allocation20_spill] sm:$0xff]  ;;  %v18951_v60 = vor.u32 %v13925_v58, %v13924_v27  ;;  %v6878_v20 = vmul.f32 %v6840_v1, %v6729_v56  ;;  %v6731_v5 = vpop.f32.mrb[206].mxu0  ;;  %v21358_v27 = vld [vmem:[#allocation21_spill] sm:$0xff] }
 0x2fa   :  { %13997 = vmatmul.mubr.msk.bf16.vlgmr.msra.gmra.mrb[52].mxu1 %vm177_vm1, %v18883_v63  ;;  %9878 = vmatprep.subr.bf16.mxu0 %v21355_v8  ;;  %v18954_v38 = vadd.f32 %v6877_v37, %v18813_v57  ;;  %v6732_v52 = vpop.f32.mrb[207].mxu0 }
 0x2fb   :  { %9838 = vmatpush1.bf16.msra.mxu1 %v21356_v46  ;;  %9869 = vmatprep.mubr.bf16.mxu1 %v21001_v29  ;;  %v18957_v19 = vadd.f32 %v6878_v20, %v18816_v0  ;;  %v7243_v1 = vrot.slane %v18951_v60, %v16711_v3  ;;  %v7247_v0 = vrot.slane %v18951_v60, %v16713_v44 }
 0x2fc   :  { %9919 = vmatprep.subr.bf16.mxu1 %v21357_v55  ;;  %v7251_v58 = vrot.slane %v18951_v60, %v16721_v43 }
 0x2fd   :  { %v6768_v7 = vpop.f32.mrb[204].mxu1  ;;  %13998 = vmatmul.mubr.msk.bf16.vlgmr.msra.gmra.mrb[56].mxu0 %vm177_vm1, %v18883_v63 }
 0x2fe   :  { %v6879_v50 = vmul.f32 %v6844_v35, %v6768_v7  ;;  %v6770_v9 = vpop.f32.mrb[205].mxu1  ;;  %9879 = vmatpush1.bf16.msra.mxu0 %v21358_v27  ;;  %9910 = vmatprep.mubr.bf16.mxu0 %v21001_v29  ;;  %v21360_v35 = vld [vmem:[#allocation19_spill] sm:$0xff] }
 0x2ff   :  { %v6880_v39 = vmul.f32 %v6848_v26, %v6770_v9  ;;  %v6772_v8 = vpop.f32.mrb[206].mxu1  ;;  %v6936_v62 = vpop.f32.mrb[208].mxu0  ;;  %v21361_v26 = vld [vmem:[#allocation40_spill] sm:$0xff] }
 0x300   :  { %v18960_v46 = vadd.f32 %v6879_v50, %v18823_v22  ;;  %v6773_v42 = vpop.f32.mrb[207].mxu1  ;;  %v21359_v22 = vld [vmem:[#allocation38_spill] sm:$0xff]  ;;  %v7320_v55 = vmul.f32 %v7243_v1, %v6936_v62  ;;  %v6938_v37 = vpop.f32.mrb[209].mxu0  ;;  %v7259_v1 = vrot.slane %v18951_v60, %v16766_v4  ;;  %v21364_v62 = vld [vmem:[#allocation41_spill] sm:$0xff] }
 0x301   :  { %v18967_v57 = vadd.f32 %v6880_v39, %v18830_v61  ;;  %10087 = vmatprep.subr.bf16.mxu0 %v21359_v22  ;;  %v7255_v61 = vrot.slane %v18951_v60, %v16732_v31  ;;  %v7321_v56 = vmul.f32 %v7247_v0, %v6938_v37  ;;  %v6940_v7 = vpop.f32.mrb[210].mxu0  ;;  %v21362_v0 = vld [vmem:[#allocation39_spill] sm:$0xff] }
 0x302   :  { %13999 = vmatmul.mubr.msk.bf16.vlgmr.msra.gmra.mrb[56].mxu1 %vm177_vm1, %v18883_v63  ;;  %v18984_v5 = vadd.f32 %v7320_v55, %v18843_v24  ;;  %v6941_v52 = vpop.f32.mrb[211].mxu0  ;;  %v21365_v55 = vld [vmem:[#allocation48_spill] sm:$0xff] }
 0x303   :  { %9920 = vmatpush1.bf16.msra.mxu1 %v21360_v35  ;;  %9951 = vmatprep.mubr.bf16.mxu1 %v21001_v29  ;;  %v18987_v39 = vadd.f32 %v7321_v56, %v18846_v45  ;;  %v7263_v45 = vrot.slane %v18951_v60, %v16768_v15  ;;  %v7267_v35 = vrot.slane %v18951_v60, %v16770_v36 }
 0x304   :  { %10128 = vmatprep.subr.bf16.mxu1 %v21361_v26  ;;  %v7271_v26 = vrot.slane %v18951_v60, %v16776_v2 }
 0x305   :  { %v6977_v20 = vpop.f32.mrb[208].mxu1  ;;  %14000 = vmatmul.mubr.msk.bf16.vlgmr.msra.gmra.mrb[60].mxu0 %vm177_vm1, %v18883_v63 }
 0x306   :  { %v7322_v50 = vmul.f32 %v7251_v58, %v6977_v20  ;;  %v6979_v9 = vpop.f32.mrb[209].mxu1  ;;  %10088 = vmatpush1.bf16.msra.mxu0 %v21362_v0  ;;  %10119 = vmatprep.mubr.bf16.mxu0 %v21001_v29  ;;  %v13927_v58 = vld [vmem:[%s20654_s2 + $0xc5] ss:$8 sm:$0xf0] }
 0x307   :  { %v7323_v8 = vmul.f32 %v7255_v61, %v6979_v9  ;;  %v6981_v42 = vpop.f32.mrb[210].mxu1  ;;  %v7018_v61 = vpop.f32.mrb[212].mxu0  ;;  %v19024_v9 = vld [vmem:[%s20653_s3 + $0x50] sm:$0xf] }
 0x308   :  { %v18990_v27 = vadd.f32 %v7322_v50, %v18849_v53  ;;  %v6982_v22 = vpop.f32.mrb[211].mxu1  ;;  %v13926_v53 = vld [vmem:[%s20654_s2 + $0xc5] ss:$8 sm:$0xf]  ;;  %v7324_v37 = vmul.f32 %v7259_v1, %v7018_v61  ;;  %v7020_v56 = vpop.f32.mrb[213].mxu0 }
 0x309   :  { %v18997_v24 = vadd.f32 %v7323_v8, %v18856_v18  ;;  %v21363_v18 = vld [vmem:[#allocation44_spill] sm:$0xff]  ;;  %v19019_v20 = vor.u32 %v13927_v58, %v13926_v53  ;;  %v7022_v50 = vpop.f32.mrb[214].mxu0 }
 0x30a   :  { %14001 = vmatmul.mubr.msk.bf16.vlgmr.msra.gmra.mrb[60].mxu1 %vm177_vm1, %v18883_v63  ;;  %10169 = vmatprep.subr.bf16.mxu0 %v21363_v18  ;;  %v7325_v63 = vmul.f32 %v7263_v45, %v7020_v56  ;;  %v19027_v52 = vadd.f32 %v7324_v37, %v18886_v49  ;;  %v7023_v42 = vpop.f32.mrb[215].mxu0  ;;  %v21366_v18 = vld [vmem:[#allocation45_spill] sm:$0xff] }
 0x30b   :  { %10129 = vmatpush1.bf16.msra.mxu1 %v21364_v62  ;;  %10160 = vmatprep.mubr.bf16.mxu1 %v21001_v29  ;;  %v7275_v58 = vrot.slane %v19019_v20, %v16711_v3  ;;  %v21368_v62 = vld [vmem:[#allocation49_spill] sm:$0xff] }
 0x30c   :  { %10210 = vmatprep.subr.bf16.mxu1 %v21365_v55  ;;  %v19030_v22 = vadd.f32 %v7325_v63, %v18889_v41  ;;  %v7279_v41 = vrot.slane %v19019_v20, %v16713_v44 }
 0x30d   :  { %v7059_v7 = vpop.f32.mrb[212].mxu1  ;;  %14007 = vmatmul.mubr.msk.bf16.vlgmr.msra.gmra.mrb[64].mxu0 %vm177_vm1, %v19024_v9 }
 0x30e   :  { %v7326_v60 = vmul.f32 %v7267_v35, %v7059_v7  ;;  %v7061_v8 = vpop.f32.mrb[213].mxu1  ;;  %10170 = vmatpush1.bf16.msra.mxu0 %v21366_v18  ;;  %10201 = vmatprep.mubr.bf16.mxu0 %v21001_v29  ;;  %v7283_v35 = vrot.slane %v19019_v20, %v16721_v43 }
 0x30f   :  { %v7327_v1 = vmul.f32 %v7271_v26, %v7061_v8  ;;  %v7063_v0 = vpop.f32.mrb[214].mxu1  ;;  %v7100_v61 = vpop.f32.mrb[216].mxu0  ;;  %v21369_v26 = vld [vmem:[#allocation53_spill] sm:$0xff] }
 0x310   :  { %v19033_v45 = vadd.f32 %v7326_v60, %v18892_v14  ;;  %v7064_v53 = vpop.f32.mrb[215].mxu1  ;;  %v21367_v14 = vld [vmem:[#allocation51_spill] sm:$0xff]  ;;  %v7328_v55 = vmul.f32 %v7275_v58, %v7100_v61  ;;  %v7102_v37 = vpop.f32.mrb[217].mxu0  ;;  %v7291_v58 = vrot.slane %v19019_v20, %v16766_v4 }
 0x311   :  { %v19040_v49 = vadd.f32 %v7327_v1, %v18899_v13  ;;  %10251 = vmatprep.subr.bf16.mxu0 %v21367_v14  ;;  %v7287_v13 = vrot.slane %v19019_v20, %v16732_v31  ;;  %v7329_v56 = vmul.f32 %v7279_v41, %v7102_v37  ;;  %v7104_v7 = vpop.f32.mrb[218].mxu0  ;;  %v21370_v41 = vld [vmem:[#allocation52_spill] sm:$0xff] }
 0x312   :  { %14008 = vmatmul.mubr.msk.bf16.vlgmr.msra.gmra.mrb[64].mxu1 %vm177_vm1, %v19024_v9  ;;  %v19057_v50 = vadd.f32 %v7328_v55, %v18916_v11  ;;  %v7105_v42 = vpop.f32.mrb[219].mxu0 }
 0x313   :  { %10211 = vmatpush1.bf16.msra.mxu1 %v21368_v62  ;;  %10242 = vmatprep.mubr.bf16.mxu1 %v21001_v29  ;;  %v19060_v1 = vadd.f32 %v7329_v56, %v18919_v59  ;;  %v7295_v59 = vrot.slane %v19019_v20, %v16768_v15  ;;  %v7299_v62 = vrot.slane %v19019_v20, %v16770_v36 }
 0x314   :  { %10292 = vmatprep.subr.bf16.mxu1 %v21369_v26  ;;  %v21372_v26 = vld [vmem:[#allocation34_spill] sm:$0xff] }
 0x315   :  { %v7141_v63 = vpop.f32.mrb[216].mxu1  ;;  %14009 = vmatmul.mubr.msk.bf16.vlgmr.msra.gmra.mrb[68].mxu0 %vm177_vm1, %v19024_v9 }
 0x316   :  { %v7330_v60 = vmul.f32 %v7283_v35, %v7141_v63  ;;  %v7143_v8 = vpop.f32.mrb[217].mxu1  ;;  %10252 = vmatpush1.bf16.msra.mxu0 %v21370_v41  ;;  %10283 = vmatprep.mubr.bf16.mxu0 %v21001_v29  ;;  %v13938_v35 = vld [vmem:[%s20654_s2 + $0x86] ss:$8 sm:$0xf0] }
 0x317   :  { %v7331_v0 = vmul.f32 %v7287_v13, %v7143_v8  ;;  %v7145_v53 = vpop.f32.mrb[218].mxu1  ;;  %v7182_v61 = vpop.f32.mrb[220].mxu0  ;;  %v7303_v13 = vrot.slane %v19019_v20, %v16776_v2 }
 0x318   :  { %v19063_v18 = vadd.f32 %v7330_v60, %v18922_v40  ;;  %v7146_v14 = vpop.f32.mrb[219].mxu1  ;;  %v13937_v40 = vld [vmem:[%s20654_s2 + $0x86] ss:$8 sm:$0xf]  ;;  %v7332_v55 = vmul.f32 %v7291_v58, %v7182_v61  ;;  %v7184_v37 = vpop.f32.mrb[221].mxu0 }
 0x319   :  { %v19070_v11 = vadd.f32 %v7331_v0, %v18929_v21  ;;  %v21371_v21 = vld [vmem:[#allocation36_spill] sm:$0xff]  ;;  %v19092_v56 = vor.u32 %v13938_v35, %v13937_v40  ;;  %v7333_v63 = vmul.f32 %v7295_v59, %v7184_v37  ;;  %v7186_v60 = vpop.f32.mrb[222].mxu0  ;;  %v21373_v40 = vld [vmem:[#allocation37_spill] sm:$0xff] }
 0x31a   :  { %14010 = vmatmul.mubr.msk.bf16.vlgmr.msra.gmra.mrb[68].mxu1 %vm177_vm1, %v19024_v9  ;;  %10333 = vmatprep.subr.bf16.mxu0 %v21371_v21  ;;  %v19095_v8 = vadd.f32 %v7332_v55, %v18954_v38  ;;  %v7187_v0 = vpop.f32.mrb[223].mxu0  ;;  %v21375_v21 = vld [vmem:[#allocation35_spill] sm:$0xff] }
 0x31b   :  { %10293 = vmatpush1.bf16.msra.mxu1 %v21247_v12  ;;  %10324 = vmatprep.mubr.bf16.mxu1 %v21001_v29  ;;  %v19098_v53 = vadd.f32 %v7333_v63, %v18957_v19  ;;  %v7698_v59 = vrot.slane %v19092_v56, %v16711_v3  ;;  %v7702_v19 = vrot.slane %v19092_v56, %v16713_v44 }
 0x31c   :  { %10374 = vmatprep.subr.bf16.mxu1 %v21372_v26  ;;  %v7706_v35 = vrot.slane %v19092_v56, %v16721_v43 }
 0x31d   :  { %v7223_v7 = vpop.f32.mrb[220].mxu1  ;;  %14011 = vmatmul.mubr.msk.bf16.vlgmr.msra.gmra.mrb[72].mxu0 %vm177_vm1, %v19024_v9 }
 0x31e   :  { %v7334_v42 = vmul.f32 %v7299_v62, %v7223_v7  ;;  %v7225_v12 = vpop.f32.mrb[221].mxu1  ;;  %10334 = vmatpush1.bf16.msra.mxu0 %v21373_v40  ;;  %10365 = vmatprep.mubr.bf16.mxu0 %v21001_v29 }
 0x31f   :  { %v7335_v20 = vmul.f32 %v7303_v13, %v7225_v12  ;;  %v7227_v14 = vpop.f32.mrb[222].mxu1  ;;  %v7391_v62 = vpop.f32.mrb[224].mxu0 }
 0x320   :  { %v19101_v41 = vadd.f32 %v7334_v42, %v18960_v46  ;;  %v7228_v58 = vpop.f32.mrb[223].mxu1  ;;  %v21374_v46 = vld [vmem:[#allocation61_spill] sm:$0xff]  ;;  %v7775_v61 = vmul.f32 %v7698_v59, %v7391_v62  ;;  %v7393_v13 = vpop.f32.mrb[225].mxu0 }
 0x321   :  { %v19108_v38 = vadd.f32 %v7335_v20, %v18967_v57  ;;  %10542 = vmatprep.subr.bf16.mxu0 %v21374_v46  ;;  %v7710_v57 = vrot.slane %v19092_v56, %v16732_v31  ;;  %v7776_v26 = vmul.f32 %v7702_v19, %v7393_v13  ;;  %v7395_v37 = vpop.f32.mrb[226].mxu0  ;;  %v7714_v58 = vrot.slane %v19092_v56, %v16766_v4  ;;  %v13940_v59 = vld [vmem:[%s20654_s2 + $0xc6] ss:$8 sm:$0xf0] }
 0x322   :  { %14012 = vmatmul.mubr.msk.bf16.vlgmr.msra.gmra.mrb[72].mxu1 %vm177_vm1, %v19024_v9  ;;  %v19125_v63 = vadd.f32 %v7775_v61, %v18984_v5  ;;  %v7396_v42 = vpop.f32.mrb[227].mxu0  ;;  %v7726_v19 = vrot.slane %v19092_v56, %v16776_v2  ;;  %v21377_v46 = vld [vmem:[#allocation67_spill] sm:$0xff]  ;;  %v19165_v61 = vld [vmem:[%s20653_s3 + $0x54] sm:$0xf] }
 0x323   :  { %10375 = vmatpush1.bf16.msra.mxu1 %v21375_v21  ;;  %10406 = vmatprep.mubr.bf16.mxu1 %v21001_v29  ;;  %v19128_v12 = vadd.f32 %v7776_v26, %v18987_v39  ;;  %v7718_v39 = vrot.slane %v19092_v56, %v16768_v15 }
 0x324   :  { %10583 = vmatprep.subr.bf16.mxu1 %v15951_v34 }
 0x325   :  { %v7432_v55 = vpop.f32.mrb[224].mxu1  ;;  %14013 = vmatmul.mubr.msk.bf16.vlgmr.msra.gmra.mrb[76].mxu0 %vm177_vm1, %v19024_v9 }
 0x326   :  { %v7777_v7 = vmul.f32 %v7706_v35, %v7432_v55  ;;  %v7434_v60 = vpop.f32.mrb[225].mxu1  ;;  %10543 = vmatpush1.bf16.msra.mxu0 %v21252_v54  ;;  %10574 = vmatprep.mubr.bf16.mxu0 %v21001_v29  ;;  %v7722_v54 = vrot.slane %v19092_v56, %v16770_v36 }
 0x327   :  { %v7778_v0 = vmul.f32 %v7710_v57, %v7434_v60  ;;  %v7436_v20 = vpop.f32.mrb[226].mxu1  ;;  %10624 = vmatprep.subr.bf16.mxu0 %v21253_v23  ;;  %v7473_v40 = vpop.f32.mrb[228].mxu0 }
 0x328   :  { %v19131_v14 = vadd.f32 %v7777_v7, %v18990_v27  ;;  %v7437_v34 = vpop.f32.mrb[227].mxu1  ;;  %v13939_v27 = vld [vmem:[%s20654_s2 + $0xc6] ss:$8 sm:$0xf]  ;;  %v7779_v35 = vmul.f32 %v7714_v58, %v7473_v40  ;;  %v7475_v21 = vpop.f32.mrb[229].mxu0 }
 0x329   :  { %v19138_v5 = vadd.f32 %v7778_v0, %v18997_v24  ;;  %v21376_v24 = vld [vmem:[#allocation63_spill] sm:$0xff]  ;;  %v19160_v62 = vor.u32 %v13940_v59, %v13939_v27  ;;  %v7477_v23 = vpop.f32.mrb[230].mxu0  ;;  %v21378_v34 = vld [vmem:[#allocation64_spill] sm:$0xff]  ;;  %v21381_v59 = vld [vmem:[#allocation70_spill] sm:$0xff] }
 0x32a   :  { %14014 = vmatmul.mubr.msk.bf16.vlgmr.msra.gmra.mrb[76].mxu1 %vm177_vm1, %v19024_v9  ;;  %v7780_v9 = vmul.f32 %v7718_v39, %v7475_v21  ;;  %v19168_v13 = vadd.f32 %v7779_v35, %v19027_v52  ;;  %v7478_v55 = vpop.f32.mrb[231].mxu0  ;;  %v21380_v39 = vld [vmem:[#allocation66_spill] sm:$0xff] }
 0x32b   :  { %10584 = vmatpush1.bf16.msra.mxu1 %v21376_v24  ;;  %10615 = vmatprep.mubr.bf16.mxu1 %v21001_v29  ;;  %v7730_v20 = vrot.slane %v19160_v62, %v16711_v3  ;;  %v7738_v58 = vrot.slane %v19160_v62, %v16721_v43 }
 0x32c   :  { %10665 = vmatprep.subr.bf16.mxu1 %v21377_v46  ;;  %v19171_v37 = vadd.f32 %v7780_v9, %v19030_v22  ;;  %v7734_v22 = vrot.slane %v19160_v62, %v16713_v44 }
 0x32d   :  { %v7514_v57 = vpop.f32.mrb[228].mxu1  ;;  %14020 = vmatmul.mubr.msk.bf16.vlgmr.msra.gmra.mrb[80].mxu0 %vm177_vm1, %v19165_v61 }
 0x32e   :  { %v7781_v56 = vmul.f32 %v7722_v54, %v7514_v57  ;;  %v7516_v26 = vpop.f32.mrb[229].mxu1  ;;  %10625 = vmatpush1.bf16.msra.mxu0 %v21378_v34  ;;  %10656 = vmatprep.mubr.bf16.mxu0 %v21001_v29  ;;  %v7754_v34 = vrot.slane %v19160_v62, %v16770_v36 }
 0x32f   :  { %v7782_v7 = vmul.f32 %v7726_v19, %v7516_v26  ;;  %v7518_v60 = vpop.f32.mrb[230].mxu1  ;;  %v7555_v27 = vpop.f32.mrb[232].mxu0 }
 0x330   :  { %v19174_v42 = vadd.f32 %v7781_v56, %v19033_v45  ;;  %v7519_v0 = vpop.f32.mrb[231].mxu1  ;;  %v21379_v45 = vld [vmem:[#allocation69_spill] sm:$0xff]  ;;  %v7783_v54 = vmul.f32 %v7730_v20, %v7555_v27  ;;  %v7557_v24 = vpop.f32.mrb[233].mxu0  ;;  %v7746_v60 = vrot.slane %v19160_v62, %v16766_v4 }
 0x331   :  { %v19181_v52 = vadd.f32 %v7782_v7, %v19040_v49  ;;  %10706 = vmatprep.subr.bf16.mxu0 %v21379_v45  ;;  %v7742_v49 = vrot.slane %v19160_v62, %v16732_v31  ;;  %v7784_v40 = vmul.f32 %v7734_v22, %v7557_v24  ;;  %v7559_v46 = vpop.f32.mrb[234].mxu0  ;;  %v21382_v0 = vld [vmem:[#allocation71_spill] sm:$0xff]  ;;  %v21384_v22 = vld [vmem:[#allocation68_spill] sm:$0xff] }
 0x332   :  { %14021 = vmatmul.mubr.msk.bf16.vlgmr.msra.gmra.mrb[80].mxu1 %vm177_vm1, %v19165_v61  ;;  %v19198_v35 = vadd.f32 %v7783_v54, %v19057_v50  ;;  %v7560_v57 = vpop.f32.mrb[235].mxu0  ;;  %v13951_v20 = vld [vmem:[%s20654_s2 + $0x87] ss:$8 sm:$0xf0] }
 0x333   :  { %10666 = vmatpush1.bf16.msra.mxu1 %v21380_v39  ;;  %10697 = vmatprep.mubr.bf16.mxu1 %v21001_v29  ;;  %v19201_v23 = vadd.f32 %v7784_v40, %v19060_v1  ;;  %v7750_v1 = vrot.slane %v19160_v62, %v16768_v15  ;;  %v21385_v39 = vld [vmem:[#allocation54_spill] sm:$0xff] }
 0x334   :  { %10747 = vmatprep.subr.bf16.mxu1 %v21381_v59 }
 0x335   :  { %v7596_v19 = vpop.f32.mrb[232].mxu1  ;;  %14022 = vmatmul.mubr.msk.bf16.vlgmr.msra.gmra.mrb[84].mxu0 %vm177_vm1, %v19165_v61 }
 0x336   :  { %v7785_v21 = vmul.f32 %v7738_v58, %v7596_v19  ;;  %v7598_v9 = vpop.f32.mrb[233].mxu1  ;;  %10707 = vmatpush1.bf16.msra.mxu0 %v21382_v0  ;;  %10738 = vmatprep.mubr.bf16.mxu0 %v21001_v29  ;;  %v7758_v58 = vrot.slane %v19160_v62, %v16776_v2  ;;  %v21386_v0 = vld [vmem:[#allocation58_spill] sm:$0xff] }
 0x337   :  { %v7786_v56 = vmul.f32 %v7742_v49, %v7598_v9  ;;  %v7600_v26 = vpop.f32.mrb[234].mxu1  ;;  %v7637_v45 = vpop.f32.mrb[236].mxu0 }
 0x338   :  { %v19204_v55 = vadd.f32 %v7785_v21, %v19063_v18  ;;  %v7601_v7 = vpop.f32.mrb[235].mxu1  ;;  %v13950_v18 = vld [vmem:[%s20654_s2 + $0x87] ss:$8 sm:$0xf]  ;;  %v7787_v27 = vmul.f32 %v7746_v60, %v7637_v45  ;;  %v7639_v49 = vpop.f32.mrb[237].mxu0 }
 0x339   :  { %v19211_v50 = vadd.f32 %v7786_v56, %v19070_v11  ;;  %v21383_v11 = vld [vmem:[#allocation56_spill] sm:$0xff]  ;;  %v19233_v59 = vor.u32 %v13951_v20, %v13950_v18  ;;  %v7788_v54 = vmul.f32 %v7750_v1, %v7639_v49  ;;  %v7641_v40 = vpop.f32.mrb[238].mxu0  ;;  %v21387_v1 = vld [vmem:[#allocation75_spill] sm:$0xff] }
 0x33a   :  { %14023 = vmatmul.mubr.msk.bf16.vlgmr.msra.gmra.mrb[84].mxu1 %vm177_vm1, %v19165_v61  ;;  %10788 = vmatprep.subr.bf16.mxu0 %v21383_v11  ;;  %v19236_v19 = vadd.f32 %v7787_v27, %v19095_v8  ;;  %v7642_v9 = vpop.f32.mrb[239].mxu0  ;;  %v21388_v18 = vld [vmem:[#allocation55_spill] sm:$0xff] }
 0x33b   :  { %10748 = vmatpush1.bf16.msra.mxu1 %v21384_v22  ;;  %10779 = vmatprep.mubr.bf16.mxu1 %v21001_v29  ;;  %v19239_v57 = vadd.f32 %v7788_v54, %v19098_v53  ;;  %v8153_v60 = vrot.slane %v19233_v59, %v16711_v3  ;;  %v8157_v53 = vrot.slane %v19233_v59, %v16713_v44  ;;  %v21389_v22 = vld [vmem:[#allocation77_spill] sm:$0xff] }
 0x33c   :  { %10829 = vmatprep.subr.bf16.mxu1 %v21385_v39 }
 0x33d   :  { %v7678_v24 = vpop.f32.mrb[236].mxu1  ;;  %14024 = vmatmul.mubr.msk.bf16.vlgmr.msra.gmra.mrb[88].mxu0 %vm177_vm1, %v19165_v61 }
 0x33e   :  { %v7789_v46 = vmul.f32 %v7754_v34, %v7678_v24  ;;  %v7680_v21 = vpop.f32.mrb[237].mxu1  ;;  %10789 = vmatpush1.bf16.msra.mxu0 %v21386_v0  ;;  %10820 = vmatprep.mubr.bf16.mxu0 %v21001_v29  ;;  %v21391_v0 = vld [vmem:[#allocation79_spill] sm:$0xff] }
 0x33f   :  { %v7790_v62 = vmul.f32 %v7758_v58, %v7680_v21  ;;  %v7682_v56 = vpop.f32.mrb[238].mxu1  ;;  %10997 = vmatprep.subr.bf16.mxu0 %v21387_v1  ;;  %v7846_v20 = vpop.f32.mrb[240].mxu0  ;;  %v21392_v1 = vld [vmem:[#allocation80_spill] sm:$0xff] }
 0x340   :  { %v19242_v26 = vadd.f32 %v7789_v46, %v19101_v41  ;;  %v7683_v7 = vpop.f32.mrb[239].mxu1  ;;  %v8161_v41 = vrot.slane %v19233_v59, %v16721_v43  ;;  %v8230_v11 = vmul.f32 %v8153_v60, %v7846_v20  ;;  %v7848_v34 = vpop.f32.mrb[241].mxu0  ;;  %v8169_v56 = vrot.slane %v19233_v59, %v16766_v4  ;;  %v13953_v60 = vld [vmem:[%s20654_s2 + $0xc7] ss:$8 sm:$0xf0] }
 0x341   :  { %v19249_v8 = vadd.f32 %v7790_v62, %v19108_v38  ;;  %v8165_v38 = vrot.slane %v19233_v59, %v16732_v31  ;;  %v8231_v45 = vmul.f32 %v8157_v53, %v7848_v34  ;;  %v7850_v39 = vpop.f32.mrb[242].mxu0  ;;  %v8173_v7 = vrot.slane %v19233_v59, %v16768_v15 }
 0x342   :  { %14025 = vmatmul.mubr.msk.bf16.vlgmr.msra.gmra.mrb[88].mxu1 %vm177_vm1, %v19165_v61  ;;  %v19266_v27 = vadd.f32 %v8230_v11, %v19125_v63  ;;  %v7851_v24 = vpop.f32.mrb[243].mxu0  ;;  %v21393_v11 = vld [vmem:[#allocation81_spill] sm:$0xff] }
 0x343   :  { %10830 = vmatpush1.bf16.msra.mxu1 %v21388_v18  ;;  %10861 = vmatprep.mubr.bf16.mxu1 %v21001_v29  ;;  %v19269_v40 = vadd.f32 %v8231_v45, %v19128_v12  ;;  %v21390_v12 = vld [vmem:[#allocation78_spill] sm:$0xff]  ;;  %v19306_v45 = vld [vmem:[%s20653_s3 + $0x58] sm:$0xf] }
 0x344   :  { %11038 = vmatprep.subr.bf16.mxu1 %v21389_v22 }
 0x345   :  { %v7887_v58 = vpop.f32.mrb[240].mxu1  ;;  %14026 = vmatmul.mubr.msk.bf16.vlgmr.msra.gmra.mrb[92].mxu0 %vm177_vm1, %v19165_v61 }
 0x346   :  { %v8232_v49 = vmul.f32 %v8161_v41, %v7887_v58  ;;  %v7889_v54 = vpop.f32.mrb[241].mxu1  ;;  %10998 = vmatpush1.bf16.msra.mxu0 %v21390_v12  ;;  %11029 = vmatprep.mubr.bf16.mxu0 %v21001_v29  ;;  %v8181_v41 = vrot.slane %v19233_v59, %v16776_v2  ;;  %v21395_v12 = vld [vmem:[#allocation57_spill] sm:$0xff] }
 0x347   :  { %v8233_v46 = vmul.f32 %v8165_v38, %v7889_v54  ;;  %v7891_v21 = vpop.f32.mrb[242].mxu1  ;;  %11079 = vmatprep.subr.bf16.mxu0 %v21391_v0  ;;  %v7928_v53 = vpop.f32.mrb[244].mxu0 }
 0x348   :  { %v19272_v9 = vadd.f32 %v8232_v49, %v19131_v14  ;;  %v7892_v62 = vpop.f32.mrb[243].mxu1  ;;  %v13952_v14 = vld [vmem:[%s20654_s2 + $0xc7] ss:$8 sm:$0xf]  ;;  %v8234_v18 = vmul.f32 %v8169_v56, %v7928_v53  ;;  %v7930_v20 = vpop.f32.mrb[245].mxu0 }
 0x349   :  { %v19279_v63 = vadd.f32 %v8233_v46, %v19138_v5  ;;  %v8177_v5 = vrot.slane %v19233_v59, %v16770_v36  ;;  %v19300_v38 = vor.u32 %v13953_v60, %v13952_v14  ;;  %v7932_v22 = vpop.f32.mrb[246].mxu0  ;;  %v21396_v60 = vld [vmem:[#allocation83_spill] sm:$0xff] }
 0x34a   :  { %14027 = vmatmul.mubr.msk.bf16.vlgmr.msra.gmra.mrb[92].mxu1 %vm177_vm1, %v19165_v61  ;;  %v8235_v61 = vmul.f32 %v8173_v7, %v7930_v20  ;;  %v19309_v59 = vadd.f32 %v8234_v18, %v19168_v13  ;;  %v7933_v49 = vpop.f32.mrb[247].mxu0  ;;  %v21397_v53 = vld [vmem:[#allocation59_spill] sm:$0xff] }
 0x34b   :  { %11039 = vmatpush1.bf16.msra.mxu1 %v21392_v1  ;;  %11070 = vmatprep.mubr.bf16.mxu1 %v21001_v29  ;;  %v8185_v56 = vrot.slane %v19300_v38, %v16711_v3  ;;  %v8189_v7 = vrot.slane %v19300_v38, %v16713_v44 }
 0x34c   :  { %11120 = vmatprep.subr.bf16.mxu1 %v21393_v11  ;;  %v19312_v54 = vadd.f32 %v8235_v61, %v19171_v37  ;;  %v21394_v37 = vld [vmem:[#allocation82_spill] sm:$0xff] }
 0x34d   :  { %v7969_v34 = vpop.f32.mrb[244].mxu1  ;;  %14033 = vmatmul.mubr.msk.bf16.vlgmr.msra.gmra.mrb[96].mxu0 %vm177_vm1, %v19306_v45 }
 0x34e   :  { %v8236_v58 = vmul.f32 %v8177_v5, %v7969_v34  ;;  %v7971_v39 = vpop.f32.mrb[245].mxu1  ;;  %11080 = vmatpush1.bf16.msra.mxu0 %v21394_v37  ;;  %11111 = vmatprep.mubr.bf16.mxu0 %v21001_v29 }
 0x34f   :  { %v8237_v24 = vmul.f32 %v8181_v41, %v7971_v39  ;;  %v7973_v46 = vpop.f32.mrb[246].mxu1  ;;  %11161 = vmatprep.subr.bf16.mxu0 %v21395_v12  ;;  %v21400_v12 = vld [vmem:[#allocation43_spill] sm:$0xff] }
 0x350   :  { %v19315_v21 = vadd.f32 %v8236_v58, %v19174_v42  ;;  %v7974_v62 = vpop.f32.mrb[247].mxu1  ;;  %v8193_v42 = vrot.slane %v19300_v38, %v16721_v43  ;;  %v8010_v14 = vpop.f32.mrb[248].mxu0  ;;  %v8201_v46 = vrot.slane %v19300_v38, %v16766_v4 }
 0x351   :  { %v19322_v13 = vadd.f32 %v8237_v24, %v19181_v52  ;;  %v8197_v52 = vrot.slane %v19300_v38, %v16732_v31  ;;  %v8238_v5 = vmul.f32 %v8185_v56, %v8010_v14  ;;  %v8012_v0 = vpop.f32.mrb[249].mxu0  ;;  %v8205_v62 = vrot.slane %v19300_v38, %v16768_v15  ;;  %v13964_v56 = vld [vmem:[%s20654_s2 + $0x100] ss:$8 sm:$0xf0] }
 0x352   :  { %14034 = vmatmul.mubr.msk.bf16.vlgmr.msra.gmra.mrb[96].mxu1 %vm177_vm1, %v19306_v45  ;;  %v8239_v41 = vmul.f32 %v8189_v7, %v8012_v0  ;;  %v8014_v18 = vpop.f32.mrb[250].mxu0  ;;  %v21399_v7 = vld [vmem:[#allocation72_spill] sm:$0xff] }
 0x353   :  { %11121 = vmatpush1.bf16.msra.mxu1 %v21396_v60  ;;  %11152 = vmatprep.mubr.bf16.mxu1 %v21001_v29  ;;  %v19339_v20 = vadd.f32 %v8238_v5, %v19198_v35  ;;  %v8015_v34 = vpop.f32.mrb[251].mxu0  ;;  %v21401_v60 = vld [vmem:[#allocation73_spill] sm:$0xff] }
 0x354   :  { %11202 = vmatprep.subr.bf16.mxu1 %v21397_v53  ;;  %v19342_v22 = vadd.f32 %v8239_v41, %v19201_v23  ;;  %v21398_v23 = vld [vmem:[#allocation60_spill] sm:$0xff] }
 0x355   :  { %v8051_v1 = vpop.f32.mrb[248].mxu1  ;;  %14035 = vmatmul.mubr.msk.bf16.vlgmr.msra.gmra.mrb[100].mxu0 %vm177_vm1, %v19306_v45 }
 0x356   :  { %v8240_v11 = vmul.f32 %v8193_v42, %v8051_v1  ;;  %v8053_v61 = vpop.f32.mrb[249].mxu1  ;;  %11162 = vmatpush1.bf16.msra.mxu0 %v21398_v23  ;;  %11193 = vmatprep.mubr.bf16.mxu0 %v21001_v29  ;;  %v8213_v42 = vrot.slane %v19300_v38, %v16776_v2 }
 0x357   :  { %v8241_v58 = vmul.f32 %v8197_v52, %v8053_v61  ;;  %v8055_v39 = vpop.f32.mrb[250].mxu1  ;;  %11243 = vmatprep.subr.bf16.mxu0 %v21399_v7 }
 0x358   :  { %v19345_v49 = vadd.f32 %v8240_v11, %v19204_v55  ;;  %v8056_v24 = vpop.f32.mrb[251].mxu1  ;;  %v13963_v55 = vld [vmem:[%s20654_s2 + $0x100] ss:$8 sm:$0xf]  ;;  %v8092_v37 = vpop.f32.mrb[252].mxu0 }
 0x359   :  { %v19352_v35 = vadd.f32 %v8241_v58, %v19211_v50  ;;  %v8209_v50 = vrot.slane %v19300_v38, %v16770_v36  ;;  %v8242_v14 = vmul.f32 %v8201_v46, %v8092_v37  ;;  %v8094_v52 = vpop.f32.mrb[253].mxu0  ;;  %v19374_v5 = vor.u32 %v13964_v56, %v13963_v55  ;;  %v21404_v55 = vld [vmem:[#allocation76_spill] sm:$0xff] }
 0x35a   :  { %14036 = vmatmul.mubr.msk.bf16.vlgmr.msra.gmra.mrb[100].mxu1 %vm177_vm1, %v19306_v45  ;;  %v8243_v0 = vmul.f32 %v8205_v62, %v8094_v52  ;;  %v8096_v41 = vpop.f32.mrb[254].mxu0  ;;  %v21402_v62 = vld [vmem:[#allocation74_spill] sm:$0xff] }
 0x35b   :  { %11203 = vmatpush1.bf16.msra.mxu1 %v21400_v12  ;;  %11234 = vmatprep.mubr.bf16.mxu1 %v21001_v29  ;;  %v19377_v1 = vadd.f32 %v8242_v14, %v19236_v19  ;;  %v8097_v61 = vpop.f32.mrb[255].mxu0  ;;  %v8608_v46 = vrot.slane %v19374_v5, %v16711_v3  ;;  %v8616_v23 = vrot.slane %v19374_v5, %v16721_v43 }
 0x35c   :  { %11284 = vmatprep.subr.bf16.mxu1 %v21401_v60  ;;  %v19380_v38 = vadd.f32 %v8243_v0, %v19239_v57  ;;  %v8612_v57 = vrot.slane %v19374_v5, %v16713_v44 }
 0x35d   :  { %v8133_v53 = vpop.f32.mrb[252].mxu1  ;;  %14037 = vmatmul.mubr.msk.bf16.vlgmr.msra.gmra.mrb[104].mxu0 %vm177_vm1, %v19306_v45 }
 0x35e   :  { %v8244_v18 = vmul.f32 %v8209_v50, %v8133_v53  ;;  %v8135_v11 = vpop.f32.mrb[253].mxu1  ;;  %11244 = vmatpush1.bf16.msra.mxu0 %v21402_v62  ;;  %11275 = vmatprep.mubr.bf16.mxu0 %v21001_v29  ;;  %v21405_v50 = vld [vmem:[#allocation86_spill] sm:$0xff]  ;;  %v8632_v62 = vrot.slane %v19374_v5, %v16770_v36 }
 0x35f   :  { %v8245_v34 = vmul.f32 %v8213_v42, %v8135_v11  ;;  %v8137_v58 = vpop.f32.mrb[254].mxu1 }
 0x360   :  { %v19383_v39 = vadd.f32 %v8244_v18, %v19242_v26  ;;  %v8138_v24 = vpop.f32.mrb[255].mxu1  ;;  %v21403_v26 = vld [vmem:[#allocation84_spill] sm:$0xff]  ;;  %v8301_v56 = vpop.f32.mrb[0].mxu0  ;;  %v8624_v58 = vrot.slane %v19374_v5, %v16766_v4 }
 0x361   :  { %v19390_v19 = vadd.f32 %v8245_v34, %v19249_v8  ;;  %11452 = vmatprep.subr.bf16.mxu0 %v21403_v26  ;;  %v8620_v8 = vrot.slane %v19374_v5, %v16732_v31  ;;  %v8685_v7 = vmul.f32 %v8608_v46, %v8301_v56  ;;  %v8303_v37 = vpop.f32.mrb[1].mxu0  ;;  %v21406_v24 = vld [vmem:[#allocation88_spill] sm:$0xff] }
 0x362   :  { %14038 = vmatmul.mubr.msk.bf16.vlgmr.msra.gmra.mrb[104].mxu1 %vm177_vm1, %v19306_v45  ;;  %v8686_v42 = vmul.f32 %v8612_v57, %v8303_v37  ;;  %v8305_v14 = vpop.f32.mrb[2].mxu0  ;;  %v13966_v46 = vld [vmem:[%s20654_s2 + $0x140] ss:$8 sm:$0xf0] }
 0x363   :  { %11285 = vmatpush1.bf16.msra.mxu1 %v21404_v55  ;;  %11316 = vmatprep.mubr.bf16.mxu1 %v21001_v29  ;;  %v19407_v52 = vadd.f32 %v8685_v7, %v19266_v27  ;;  %v8306_v53 = vpop.f32.mrb[3].mxu0  ;;  %v21408_v57 = vld [vmem:[#allocation89_spill] sm:$0xff]  ;;  %v21409_v55 = vld [vmem:[#allocation90_spill] sm:$0xff] }
 0x364   :  { %11493 = vmatprep.subr.bf16.mxu1 %v21405_v50  ;;  %v19410_v41 = vadd.f32 %v8686_v42, %v19269_v40  ;;  %v8628_v40 = vrot.slane %v19374_v5, %v16768_v15  ;;  %v19447_v42 = vld [vmem:[%s20653_s3 + $0x5c] sm:$0xf] }
 0x365   :  { %v8342_v12 = vpop.f32.mrb[0].mxu1  ;;  %14039 = vmatmul.mubr.msk.bf16.vlgmr.msra.gmra.mrb[108].mxu0 %vm177_vm1, %v19306_v45 }
 0x366   :  { %v8687_v60 = vmul.f32 %v8616_v23, %v8342_v12  ;;  %v8344_v0 = vpop.f32.mrb[1].mxu1  ;;  %11453 = vmatpush1.bf16.msra.mxu0 %v21406_v24  ;;  %11484 = vmatprep.mubr.bf16.mxu0 %v21001_v29  ;;  %v8636_v23 = vrot.slane %v19374_v5, %v16776_v2  ;;  %v21410_v24 = vld [vmem:[#allocation91_spill] sm:$0xff] }
 0x367   :  { %v8688_v18 = vmul.f32 %v8620_v8, %v8344_v0  ;;  %v8346_v11 = vpop.f32.mrb[2].mxu1 }
 0x368   :  { %v19413_v61 = vadd.f32 %v8687_v60, %v19272_v9  ;;  %v8347_v34 = vpop.f32.mrb[3].mxu1  ;;  %v13965_v9 = vld [vmem:[%s20654_s2 + $0x140] ss:$8 sm:$0xf]  ;;  %v8383_v26 = vpop.f32.mrb[4].mxu0 }
 0x369   :  { %v19420_v27 = vadd.f32 %v8688_v18, %v19279_v63  ;;  %v21407_v63 = vld [vmem:[#allocation87_spill] sm:$0xff]  ;;  %v8689_v56 = vmul.f32 %v8624_v58, %v8383_v26  ;;  %v8385_v8 = vpop.f32.mrb[5].mxu0  ;;  %v19442_v50 = vor.u32 %v13966_v46, %v13965_v9  ;;  %v21412_v9 = vld [vmem:[#allocation92_spill] sm:$0xff] }
 0x36a   :  { %14040 = vmatmul.mubr.msk.bf16.vlgmr.msra.gmra.mrb[108].mxu1 %vm177_vm1, %v19306_v45  ;;  %11534 = vmatprep.subr.bf16.mxu0 %v21407_v63  ;;  %v8690_v45 = vmul.f32 %v8628_v40, %v8385_v8  ;;  %v8387_v37 = vpop.f32.mrb[6].mxu0  ;;  %v21413_v63 = vld [vmem:[#allocation94_spill] sm:$0xff] }
 0x36b   :  { %11494 = vmatpush1.bf16.msra.mxu1 %v21408_v57  ;;  %11525 = vmatprep.mubr.bf16.mxu1 %v21001_v29  ;;  %v19450_v12 = vadd.f32 %v8689_v56, %v19309_v59  ;;  %v8388_v60 = vpop.f32.mrb[7].mxu0  ;;  %v8640_v58 = vrot.slane %v19442_v50, %v16711_v3  ;;  %v8648_v40 = vrot.slane %v19442_v50, %v16721_v43 }
 0x36c   :  { %11575 = vmatprep.subr.bf16.mxu1 %v21409_v55  ;;  %v19453_v0 = vadd.f32 %v8690_v45, %v19312_v54  ;;  %v8644_v54 = vrot.slane %v19442_v50, %v16713_v44 }
 0x36d   :  { %v8424_v7 = vpop.f32.mrb[4].mxu1  ;;  %14046 = vmatmul.mubr.msk.bf16.vlgmr.msra.gmra.mrb[112].mxu0 %vm177_vm1, %v19447_v42 }
 0x36e   :  { %v8691_v5 = vmul.f32 %v8632_v62, %v8424_v7  ;;  %v8426_v14 = vpop.f32.mrb[5].mxu1  ;;  %11535 = vmatpush1.bf16.msra.mxu0 %v21410_v24  ;;  %11566 = vmatprep.mubr.bf16.mxu0 %v21001_v29  ;;  %v8664_v24 = vrot.slane %v19442_v50, %v16770_v36 }
 0x36f   :  { %v8692_v53 = vmul.f32 %v8636_v23, %v8426_v14  ;;  %v8428_v18 = vpop.f32.mrb[6].mxu1 }
 0x370   :  { %v19456_v11 = vadd.f32 %v8691_v5, %v19315_v21  ;;  %v8429_v34 = vpop.f32.mrb[7].mxu1  ;;  %v21411_v21 = vld [vmem:[#allocation93_spill] sm:$0xff]  ;;  %v8465_v46 = vpop.f32.mrb[8].mxu0  ;;  %v8656_v18 = vrot.slane %v19442_v50, %v16766_v4 }
 0x371   :  { %v19463_v59 = vadd.f32 %v8692_v53, %v19322_v13  ;;  %11616 = vmatprep.subr.bf16.mxu0 %v21411_v21  ;;  %v8652_v13 = vrot.slane %v19442_v50, %v16732_v31  ;;  %v8693_v62 = vmul.f32 %v8640_v58, %v8465_v46  ;;  %v8467_v57 = vpop.f32.mrb[9].mxu0  ;;  %v21414_v34 = vld [vmem:[#allocation96_spill] sm:$0xff] }
 0x372   :  { %14047 = vmatmul.mubr.msk.bf16.vlgmr.msra.gmra.mrb[112].mxu1 %vm177_vm1, %v19447_v42  ;;  %v8694_v26 = vmul.f32 %v8644_v54, %v8467_v57  ;;  %v8469_v55 = vpop.f32.mrb[10].mxu0  ;;  %v13977_v58 = vld [vmem:[%s20654_s2 + $0x101] ss:$8 sm:$0xf0] }
 0x373   :  { %11576 = vmatpush1.bf16.msra.mxu1 %v21412_v9  ;;  %11607 = vmatprep.mubr.bf16.mxu1 %v21001_v29  ;;  %v19480_v56 = vadd.f32 %v8693_v62, %v19339_v20  ;;  %v8470_v7 = vpop.f32.mrb[11].mxu0  ;;  %v21416_v54 = vld [vmem:[#allocation97_spill] sm:$0xff]  ;;  %v21417_v9 = vld [vmem:[#allocation46_spill] sm:$0xff] }
 0x374   :  { %11657 = vmatprep.subr.bf16.mxu1 %v21413_v63  ;;  %v19483_v37 = vadd.f32 %v8694_v26, %v19342_v22  ;;  %v8660_v22 = vrot.slane %v19442_v50, %v16768_v15 }
 0x375   :  { %v8506_v23 = vpop.f32.mrb[8].mxu1  ;;  %14048 = vmatmul.mubr.msk.bf16.vlgmr.msra.gmra.mrb[116].mxu0 %vm177_vm1, %v19447_v42 }
 0x376   :  { %v8695_v8 = vmul.f32 %v8648_v40, %v8506_v23  ;;  %v8508_v45 = vpop.f32.mrb[9].mxu1  ;;  %11617 = vmatpush1.bf16.msra.mxu0 %v21414_v34  ;;  %11648 = vmatprep.mubr.bf16.mxu0 %v21001_v29  ;;  %v8668_v40 = vrot.slane %v19442_v50, %v16776_v2  ;;  %v21418_v34 = vld [vmem:[#allocation47_spill] sm:$0xff] }
 0x377   :  { %v8696_v5 = vmul.f32 %v8652_v13, %v8508_v45  ;;  %v8510_v14 = vpop.f32.mrb[10].mxu1 }
 0x378   :  { %v19486_v60 = vadd.f32 %v8695_v8, %v19345_v49  ;;  %v8511_v53 = vpop.f32.mrb[11].mxu1  ;;  %v13976_v49 = vld [vmem:[%s20654_s2 + $0x101] ss:$8 sm:$0xf]  ;;  %v8547_v21 = vpop.f32.mrb[12].mxu0 }
 0x379   :  { %v19493_v20 = vadd.f32 %v8696_v5, %v19352_v35  ;;  %v21415_v35 = vld [vmem:[#allocation42_spill] sm:$0xff]  ;;  %v8697_v46 = vmul.f32 %v8656_v18, %v8547_v21  ;;  %v8549_v13 = vpop.f32.mrb[13].mxu0  ;;  %v19515_v63 = vor.u32 %v13977_v58, %v13976_v49  ;;  %v21420_v49 = vld [vmem:[#allocation85_spill] sm:$0xff] }
 0x37a   :  { %14049 = vmatmul.mubr.msk.bf16.vlgmr.msra.gmra.mrb[116].mxu1 %vm177_vm1, %v19447_v42  ;;  %11698 = vmatprep.subr.bf16.mxu0 %v21415_v35  ;;  %v8698_v62 = vmul.f32 %v8660_v22, %v8549_v13  ;;  %v8551_v26 = vpop.f32.mrb[14].mxu0  ;;  %v21421_v35 = vld [vmem:[#allocation101_spill] sm:$0xff] }
 0x37b   :  { %11658 = vmatpush1.bf16.msra.mxu1 %v21416_v54  ;;  %11689 = vmatprep.mubr.bf16.mxu1 %v21001_v29  ;;  %v19518_v23 = vadd.f32 %v8697_v46, %v19377_v1  ;;  %v8552_v45 = vpop.f32.mrb[15].mxu0  ;;  %v9063_v18 = vrot.slane %v19515_v63, %v16711_v3  ;;  %v9071_v22 = vrot.slane %v19515_v63, %v16721_v43 }
 0x37c   :  { %11739 = vmatprep.subr.bf16.mxu1 %v21417_v9  ;;  %v19521_v7 = vadd.f32 %v8698_v62, %v19380_v38  ;;  %v9067_v38 = vrot.slane %v19515_v63, %v16713_v44 }
 0x37d   :  { %v8588_v57 = vpop.f32.mrb[12].mxu1  ;;  %14050 = vmatmul.mubr.msk.bf16.vlgmr.msra.gmra.mrb[120].mxu0 %vm177_vm1, %v19447_v42 }
 0x37e   :  { %v8699_v55 = vmul.f32 %v8664_v24, %v8588_v57  ;;  %v8590_v8 = vpop.f32.mrb[13].mxu1  ;;  %11699 = vmatpush1.bf16.msra.mxu0 %v21418_v34  ;;  %11730 = vmatprep.mubr.bf16.mxu0 %v21001_v29  ;;  %v9087_v34 = vrot.slane %v19515_v63, %v16770_v36 }
 0x37f   :  { %v8700_v50 = vmul.f32 %v8668_v40, %v8590_v8  ;;  %v8592_v5 = vpop.f32.mrb[14].mxu1 }
 0x380   :  { %v19524_v14 = vadd.f32 %v8699_v55, %v19383_v39  ;;  %v8593_v53 = vpop.f32.mrb[15].mxu1  ;;  %v21419_v39 = vld [vmem:[#allocation100_spill] sm:$0xff]  ;;  %v8756_v58 = vpop.f32.mrb[16].mxu0  ;;  %v9079_v5 = vrot.slane %v19515_v63, %v16766_v4 }
 0x381   :  { %v19531_v1 = vadd.f32 %v8700_v50, %v19390_v19  ;;  %11907 = vmatprep.subr.bf16.mxu0 %v21419_v39  ;;  %v9075_v19 = vrot.slane %v19515_v63, %v16732_v31  ;;  %v9140_v24 = vmul.f32 %v9063_v18, %v8756_v58  ;;  %v8758_v54 = vpop.f32.mrb[17].mxu0  ;;  %v21422_v53 = vld [vmem:[#allocation104_spill] sm:$0xff] }
 0x382   :  { %14051 = vmatmul.mubr.msk.bf16.vlgmr.msra.gmra.mrb[120].mxu1 %vm177_vm1, %v19447_v42  ;;  %v9141_v21 = vmul.f32 %v9067_v38, %v8758_v54  ;;  %v8760_v9 = vpop.f32.mrb[18].mxu0  ;;  %v13979_v18 = vld [vmem:[%s20654_s2 + $0x141] ss:$8 sm:$0xf0] }
 0x383   :  { %11740 = vmatpush1.bf16.msra.mxu1 %v21420_v49  ;;  %11771 = vmatprep.mubr.bf16.mxu1 %v21001_v29  ;;  %v19548_v46 = vadd.f32 %v9140_v24, %v19407_v52  ;;  %v8761_v57 = vpop.f32.mrb[19].mxu0  ;;  %v21424_v38 = vld [vmem:[#allocation105_spill] sm:$0xff]  ;;  %v21425_v49 = vld [vmem:[#allocation106_spill] sm:$0xff] }
 0x384   :  { %11948 = vmatprep.subr.bf16.mxu1 %v21421_v35  ;;  %v19551_v26 = vadd.f32 %v9141_v21, %v19410_v41  ;;  %v9083_v41 = vrot.slane %v19515_v63, %v16768_v15  ;;  %v19588_v21 = vld [vmem:[%s20653_s3 + $0x60] sm:$0xf] }
 0x385   :  { %v8797_v40 = vpop.f32.mrb[16].mxu1  ;;  %14052 = vmatmul.mubr.msk.bf16.vlgmr.msra.gmra.mrb[124].mxu0 %vm177_vm1, %v19447_v42 }
 0x386   :  { %v9142_v13 = vmul.f32 %v9071_v22, %v8797_v40  ;;  %v8799_v62 = vpop.f32.mrb[17].mxu1  ;;  %11908 = vmatpush1.bf16.msra.mxu0 %v21422_v53  ;;  %11939 = vmatprep.mubr.bf16.mxu0 %v21001_v29  ;;  %v9091_v22 = vrot.slane %v19515_v63, %v16776_v2  ;;  %v21426_v53 = vld [vmem:[#allocation107_spill] sm:$0xff] }
 0x387   :  { %v9143_v55 = vmul.f32 %v9075_v19, %v8799_v62  ;;  %v8801_v8 = vpop.f32.mrb[18].mxu1 }
 0x388   :  { %v19554_v45 = vadd.f32 %v9142_v13, %v19413_v61  ;;  %v8802_v50 = vpop.f32.mrb[19].mxu1  ;;  %v13978_v61 = vld [vmem:[%s20654_s2 + $0x141] ss:$8 sm:$0xf]  ;;  %v8838_v39 = vpop.f32.mrb[20].mxu0 }
 0x389   :  { %v19561_v52 = vadd.f32 %v9143_v55, %v19420_v27  ;;  %v21423_v27 = vld [vmem:[#allocation103_spill] sm:$0xff]  ;;  %v9144_v58 = vmul.f32 %v9079_v5, %v8838_v39  ;;  %v8840_v19 = vpop.f32.mrb[21].mxu0  ;;  %v19583_v35 = vor.u32 %v13979_v18, %v13978_v61  ;;  %v21428_v61 = vld [vmem:[#allocation109_spill] sm:$0xff] }
 0x38a   :  { %14053 = vmatmul.mubr.msk.bf16.vlgmr.msra.gmra.mrb[124].mxu1 %vm177_vm1, %v19447_v42  ;;  %11989 = vmatprep.subr.bf16.mxu0 %v21423_v27  ;;  %v9145_v42 = vmul.f32 %v9083_v41, %v8840_v19  ;;  %v8842_v54 = vpop.f32.mrb[22].mxu0  ;;  %v21429_v27 = vld [vmem:[#allocation110_spill] sm:$0xff] }
 0x38b   :  { %11949 = vmatpush1.bf16.msra.mxu1 %v21424_v38  ;;  %11980 = vmatprep.mubr.bf16.mxu1 %v21001_v29  ;;  %v19591_v40 = vadd.f32 %v9144_v58, %v19450_v12  ;;  %v8843_v13 = vpop.f32.mrb[23].mxu0  ;;  %v9095_v5 = vrot.slane %v19583_v35, %v16711_v3  ;;  %v9103_v41 = vrot.slane %v19583_v35, %v16721_v43 }
 0x38c   :  { %12030 = vmatprep.subr.bf16.mxu1 %v21425_v49  ;;  %v19594_v62 = vadd.f32 %v9145_v42, %v19453_v0  ;;  %v9099_v0 = vrot.slane %v19583_v35, %v16713_v44 }
 0x38d   :  { %v8879_v24 = vpop.f32.mrb[20].mxu1  ;;  %14059 = vmatmul.mubr.msk.bf16.vlgmr.msra.gmra.mrb[128].mxu0 %vm177_vm1, %v19588_v21 }
 0x38e   :  { %v9146_v63 = vmul.f32 %v9087_v34, %v8879_v24  ;;  %v8881_v9 = vpop.f32.mrb[21].mxu1  ;;  %11990 = vmatpush1.bf16.msra.mxu0 %v21426_v53  ;;  %12021 = vmatprep.mubr.bf16.mxu0 %v21001_v29  ;;  %v9119_v53 = vrot.slane %v19583_v35, %v16770_v36 }
 0x38f   :  { %v9147_v57 = vmul.f32 %v9091_v22, %v8881_v9  ;;  %v8883_v55 = vpop.f32.mrb[22].mxu1 }
 0x390   :  { %v19597_v8 = vadd.f32 %v9146_v63, %v19456_v11  ;;  %v8884_v50 = vpop.f32.mrb[23].mxu1  ;;  %v21427_v11 = vld [vmem:[#allocation108_spill] sm:$0xff]  ;;  %v8920_v18 = vpop.f32.mrb[24].mxu0  ;;  %v9111_v55 = vrot.slane %v19583_v35, %v16766_v4 }
 0x391   :  { %v19604_v12 = vadd.f32 %v9147_v57, %v19463_v59  ;;  %12071 = vmatprep.subr.bf16.mxu0 %v21427_v11  ;;  %v9107_v59 = vrot.slane %v19583_v35, %v16732_v31  ;;  %v9148_v34 = vmul.f32 %v9095_v5, %v8920_v18  ;;  %v8922_v38 = vpop.f32.mrb[25].mxu0  ;;  %v21430_v50 = vld [vmem:[#allocation112_spill] sm:$0xff] }
 0x392   :  { %14060 = vmatmul.mubr.msk.bf16.vlgmr.msra.gmra.mrb[128].mxu1 %vm177_vm1, %v19588_v21  ;;  %v9149_v39 = vmul.f32 %v9099_v0, %v8922_v38  ;;  %v8924_v49 = vpop.f32.mrb[26].mxu0  ;;  %v13990_v5 = vld [vmem:[%s20654_s2 + $0x102] ss:$8 sm:$0xf0] }
 0x393   :  { %12031 = vmatpush1.bf16.msra.mxu1 %v21428_v61  ;;  %12062 = vmatprep.mubr.bf16.mxu1 %v21001_v29  ;;  %v19621_v58 = vadd.f32 %v9148_v34, %v19480_v56  ;;  %v8925_v24 = vpop.f32.mrb[27].mxu0  ;;  %v21432_v0 = vld [vmem:[#allocation113_spill] sm:$0xff]  ;;  %v21433_v61 = vld [vmem:[#allocation98_spill] sm:$0xff] }
 0x394   :  { %12112 = vmatprep.subr.bf16.mxu1 %v21429_v27  ;;  %v19624_v54 = vadd.f32 %v9149_v39, %v19483_v37  ;;  %v9115_v37 = vrot.slane %v19583_v35, %v16768_v15 }
 0x395   :  { %v8961_v22 = vpop.f32.mrb[24].mxu1  ;;  %14061 = vmatmul.mubr.msk.bf16.vlgmr.msra.gmra.mrb[132].mxu0 %vm177_vm1, %v19588_v21 }
 0x396   :  { %v9150_v19 = vmul.f32 %v9103_v41, %v8961_v22  ;;  %v8963_v42 = vpop.f32.mrb[25].mxu1  ;;  %12072 = vmatpush1.bf16.msra.mxu0 %v21430_v50  ;;  %12103 = vmatprep.mubr.bf16.mxu0 %v21001_v29  ;;  %v9123_v41 = vrot.slane %v19583_v35, %v16776_v2  ;;  %v21434_v50 = vld [vmem:[#allocation99_spill] sm:$0xff] }
 0x397   :  { %v9151_v63 = vmul.f32 %v9107_v59, %v8963_v42  ;;  %v8965_v9 = vpop.f32.mrb[26].mxu1 }
 0x398   :  { %v19627_v13 = vadd.f32 %v9150_v19, %v19486_v60  ;;  %v8966_v57 = vpop.f32.mrb[27].mxu1  ;;  %v13989_v60 = vld [vmem:[%s20654_s2 + $0x102] ss:$8 sm:$0xf]  ;;  %v9002_v11 = vpop.f32.mrb[28].mxu0 }
 0x399   :  { %v19634_v56 = vadd.f32 %v9151_v63, %v19493_v20  ;;  %v21431_v20 = vld [vmem:[#allocation95_spill] sm:$0xff]  ;;  %v9152_v18 = vmul.f32 %v9111_v55, %v9002_v11  ;;  %v9004_v59 = vpop.f32.mrb[29].mxu0  ;;  %v19656_v27 = vor.u32 %v13990_v5, %v13989_v60  ;;  %v21436_v60 = vld [vmem:[#allocation102_spill] sm:$0xff] }
 0x39a   :  { %14062 = vmatmul.mubr.msk.bf16.vlgmr.msra.gmra.mrb[132].mxu1 %vm177_vm1, %v19588_v21  ;;  %12153 = vmatprep.subr.bf16.mxu0 %v21431_v20  ;;  %v9153_v34 = vmul.f32 %v9115_v37, %v9004_v59  ;;  %v9006_v39 = vpop.f32.mrb[30].mxu0  ;;  %v21437_v20 = vld [vmem:[#allocation118_spill] sm:$0xff] }
 0x39b   :  { %12113 = vmatpush1.bf16.msra.mxu1 %v21432_v0  ;;  %12144 = vmatprep.mubr.bf16.mxu1 %v21001_v29  ;;  %v19659_v22 = vadd.f32 %v9152_v18, %v19518_v23  ;;  %v9007_v42 = vpop.f32.mrb[31].mxu0  ;;  %v9518_v55 = vrot.slane %v19656_v27, %v16711_v3  ;;  %v9526_v37 = vrot.slane %v19656_v27, %v16721_v43 }
 0x39c   :  { %12194 = vmatprep.subr.bf16.mxu1 %v21433_v61  ;;  %v19662_v24 = vadd.f32 %v9153_v34, %v19521_v7  ;;  %v9522_v7 = vrot.slane %v19656_v27, %v16713_v44 }
 0x39d   :  { %v9043_v38 = vpop.f32.mrb[28].mxu1  ;;  %14063 = vmatmul.mubr.msk.bf16.vlgmr.msra.gmra.mrb[136].mxu0 %vm177_vm1, %v19588_v21 }
 0x39e   :  { %v9154_v49 = vmul.f32 %v9119_v53, %v9043_v38  ;;  %v9045_v19 = vpop.f32.mrb[29].mxu1  ;;  %12154 = vmatpush1.bf16.msra.mxu0 %v21434_v50  ;;  %12185 = vmatprep.mubr.bf16.mxu0 %v21001_v29  ;;  %v9542_v50 = vrot.slane %v19656_v27, %v16770_v36 }
 0x39f   :  { %v9155_v35 = vmul.f32 %v9123_v41, %v9045_v19  ;;  %v9047_v63 = vpop.f32.mrb[30].mxu1 }
 0x3a0   :  { %v19665_v9 = vadd.f32 %v9154_v49, %v19524_v14  ;;  %v9048_v57 = vpop.f32.mrb[31].mxu1  ;;  %v21435_v14 = vld [vmem:[#allocation116_spill] sm:$0xff]  ;;  %v9211_v5 = vpop.f32.mrb[32].mxu0  ;;  %v9534_v63 = vrot.slane %v19656_v27, %v16766_v4 }
 0x3a1   :  { %v19672_v23 = vadd.f32 %v9155_v35, %v19531_v1  ;;  %12362 = vmatprep.subr.bf16.mxu0 %v21435_v14  ;;  %v9530_v1 = vrot.slane %v19656_v27, %v16732_v31  ;;  %v9595_v53 = vmul.f32 %v9518_v55, %v9211_v5  ;;  %v9213_v0 = vpop.f32.mrb[33].mxu0  ;;  %v21438_v57 = vld [vmem:[#allocation119_spill] sm:$0xff]  ;;  %v21440_v14 = vld [vmem:[#allocation120_spill] sm:$0xff]  ;;  %v21441_v5 = vld [vmem:[#allocation122_spill] sm:$0xff] }
 0x3a2   :  { %14064 = vmatmul.mubr.msk.bf16.vlgmr.msra.gmra.mrb[136].mxu1 %vm177_vm1, %v19588_v21  ;;  %v9596_v11 = vmul.f32 %v9522_v7, %v9213_v0  ;;  %v9215_v61 = vpop.f32.mrb[34].mxu0  ;;  %v13992_v55 = vld [vmem:[%s20654_s2 + $0x142] ss:$8 sm:$0xf0] }
 0x3a3   :  { %12195 = vmatpush1.bf16.msra.mxu1 %v21436_v60  ;;  %12226 = vmatprep.mubr.bf16.mxu1 %v21001_v29  ;;  %v19689_v18 = vadd.f32 %v9595_v53, %v19548_v46  ;;  %v9216_v38 = vpop.f32.mrb[35].mxu0  ;;  %v13267_v7 = vld [vmem:[%s20655_s4] sm:$0xff]  ;;  %v9546_v60 = vrot.slane %v19656_v27, %v16776_v2 }
 0x3a4   :  { %12403 = vmatprep.subr.bf16.mxu1 %v21437_v20  ;;  %v19692_v39 = vadd.f32 %v9596_v11, %v19551_v26  ;;  %v9538_v26 = vrot.slane %v19656_v27, %v16768_v15  ;;  %13270 = vperm.xlu0 %14762, %v13267_v7  }
 0x3a5   :  { %v9252_v41 = vpop.f32.mrb[32].mxu1  ;;  %14065 = vmatmul.mubr.msk.bf16.vlgmr.msra.gmra.mrb[140].mxu0 %vm177_vm1, %v19588_v21 }
 0x3a6   :  { %v9597_v59 = vmul.f32 %v9526_v37, %v9252_v41  ;;  %v9254_v34 = vpop.f32.mrb[33].mxu1  ;;  %12363 = vmatpush1.bf16.msra.mxu0 %v21438_v57  ;;  %12394 = vmatprep.mubr.bf16.mxu0 %v21001_v29  ;;  %v19732_v41 = vld [vmem:[%s20653_s3 + $0x64] sm:$0xf] }
 0x3a7   :  { %v9598_v49 = vmul.f32 %v9530_v1, %v9254_v34  ;;  %v9256_v19 = vpop.f32.mrb[34].mxu1 }
 0x3a8   :  { %v19695_v42 = vadd.f32 %v9597_v59, %v19554_v45  ;;  %v9257_v35 = vpop.f32.mrb[35].mxu1  ;;  %v13991_v45 = vld [vmem:[%s20654_s2 + $0x142] ss:$8 sm:$0xf]  ;;  %v9293_v37 = vpop.f32.mrb[36].mxu0 }
 0x3a9   :  { %v19702_v46 = vadd.f32 %v9598_v49, %v19561_v52  ;;  %v21439_v52 = vld [vmem:[#allocation121_spill] sm:$0xff]  ;;  %v9295_v1 = vpop.f32.mrb[37].mxu0  ;;  %v19727_v20 = vor.u32 %v13992_v55, %v13991_v45  ;;  %v21444_v55 = vld [vmem:[#allocation124_spill] sm:$0xff] }
 0x3aa   :  { %14066 = vmatmul.mubr.msk.bf16.vlgmr.msra.gmra.mrb[140].mxu1 %vm177_vm1, %v19588_v21  ;;  %12444 = vmatprep.subr.bf16.mxu0 %v21439_v52  ;;  %v9599_v21 = vmul.f32 %v9534_v63, %v9293_v37  ;;  %v9600_v53 = vmul.f32 %v9538_v26, %v9295_v1  ;;  %v9297_v11 = vpop.f32.mrb[38].mxu0  ;;  %v21442_v26 = vld [vmem:[#allocation123_spill] sm:$0xff] }
 0x3ab   :  { %12404 = vmatpush1.bf16.msra.mxu1 %v21440_v14  ;;  %12435 = vmatprep.mubr.bf16.mxu1 %v21001_v29  ;;  %v9298_v34 = vpop.f32.mrb[39].mxu0  ;;  %v9550_v57 = vrot.slane %v19727_v20, %v16711_v3  ;;  %v9558_v45 = vrot.slane %v19727_v20, %v16721_v43 }
 0x3ac   :  { %12485 = vmatprep.subr.bf16.mxu1 %v21441_v5  ;;  %v19735_v61 = vadd.f32 %v9599_v21, %v19591_v40  ;;  %v19738_v38 = vadd.f32 %v9600_v53, %v19594_v62  ;;  %v9554_v62 = vrot.slane %v19727_v20, %v16713_v44 }
 0x3ad   :  { %v9334_v0 = vpop.f32.mrb[36].mxu1  ;;  %14072 = vmatmul.mubr.msk.bf16.vlgmr.msra.gmra.mrb[144].mxu0 %vm177_vm1, %v19732_v41 }
 0x3ae   :  { %v9601_v27 = vmul.f32 %v9542_v50, %v9334_v0  ;;  %v9336_v59 = vpop.f32.mrb[37].mxu1  ;;  %12445 = vmatpush1.bf16.msra.mxu0 %v21442_v26  ;;  %12476 = vmatprep.mubr.bf16.mxu0 %v21001_v29  ;;  %v21445_v50 = vld [vmem:[#allocation125_spill] sm:$0xff]  ;;  %v9574_v26 = vrot.slane %v19727_v20, %v16770_v36 }
 0x3af   :  { %v9602_v49 = vmul.f32 %v9546_v60, %v9336_v59  ;;  %v9338_v19 = vpop.f32.mrb[38].mxu1 }
 0x3b0   :  { %v19741_v35 = vadd.f32 %v9601_v27, %v19597_v8  ;;  %v9339_v63 = vpop.f32.mrb[39].mxu1  ;;  %v21443_v8 = vld [vmem:[#allocation126_spill] sm:$0xff]  ;;  %v9375_v52 = vpop.f32.mrb[40].mxu0  ;;  %v9566_v19 = vrot.slane %v19727_v20, %v16766_v4 }
 0x3b1   :  { %v19748_v40 = vadd.f32 %v9602_v49, %v19604_v12  ;;  %12526 = vmatprep.subr.bf16.mxu0 %v21443_v8  ;;  %v9562_v12 = vrot.slane %v19727_v20, %v16732_v31  ;;  %v9603_v7 = vmul.f32 %v9550_v57, %v9375_v52  ;;  %v9377_v14 = vpop.f32.mrb[41].mxu0  ;;  %v21446_v63 = vld [vmem:[#allocation127_spill] sm:$0xff]  ;;  %v9578_v8 = vrot.slane %v19727_v20, %v16776_v2 }
 0x3b2   :  { %14073 = vmatmul.mubr.msk.bf16.vlgmr.msra.gmra.mrb[144].mxu1 %vm177_vm1, %v19732_v41  ;;  %v9604_v37 = vmul.f32 %v9554_v62, %v9377_v14  ;;  %v9379_v5 = vpop.f32.mrb[42].mxu0  ;;  %v14003_v57 = vld [vmem:[%s20654_s2 + $0x103] ss:$8 sm:$0xf0] }
 0x3b3   :  { %12486 = vmatpush1.bf16.msra.mxu1 %v21444_v55  ;;  %12517 = vmatprep.mubr.bf16.mxu1 %v21001_v29  ;;  %v19765_v21 = vadd.f32 %v9603_v7, %v19621_v58  ;;  %v9380_v0 = vpop.f32.mrb[43].mxu0 }
 0x3b4   :  { %12567 = vmatprep.subr.bf16.mxu1 %v21445_v50  ;;  %v19768_v11 = vadd.f32 %v9604_v37, %v19624_v54  ;;  %v9570_v54 = vrot.slane %v19727_v20, %v16768_v15 }
 0x3b5   :  { %v9416_v60 = vpop.f32.mrb[40].mxu1  ;;  %14074 = vmatmul.mubr.msk.bf16.vlgmr.msra.gmra.mrb[148].mxu0 %vm177_vm1, %v19732_v41 }
 0x3b6   :  { %v9605_v1 = vmul.f32 %v9558_v45, %v9416_v60  ;;  %v9418_v53 = vpop.f32.mrb[41].mxu1  ;;  %12527 = vmatpush1.bf16.msra.mxu0 %v21446_v63  ;;  %12558 = vmatprep.mubr.bf16.mxu0 %v21001_v29  ;;  %v21448_v45 = vld [vmem:[#allocation114_spill] sm:$0xff] }
 0x3b7   :  { %v9606_v27 = vmul.f32 %v9562_v12, %v9418_v53  ;;  %v9420_v59 = vpop.f32.mrb[42].mxu1 }
 0x3b8   :  { %v19771_v34 = vadd.f32 %v9605_v1, %v19627_v13  ;;  %v9421_v49 = vpop.f32.mrb[43].mxu1  ;;  %v14002_v13 = vld [vmem:[%s20654_s2 + $0x103] ss:$8 sm:$0xf]  ;;  %v9457_v62 = vpop.f32.mrb[44].mxu0 }
 0x3b9   :  { %v19778_v58 = vadd.f32 %v9606_v27, %v19634_v56  ;;  %v21447_v56 = vld [vmem:[#allocation111_spill] sm:$0xff]  ;;  %v9607_v55 = vmul.f32 %v9566_v19, %v9457_v62  ;;  %v9459_v52 = vpop.f32.mrb[45].mxu0  ;;  %v19800_v12 = vor.u32 %v14003_v57, %v14002_v13  ;;  %v21450_v19 = vld [vmem:[#allocation117_spill] sm:$0xff] }
 0x3ba   :  { %14075 = vmatmul.mubr.msk.bf16.vlgmr.msra.gmra.mrb[148].mxu1 %vm177_vm1, %v19732_v41  ;;  %12608 = vmatprep.subr.bf16.mxu0 %v21447_v56  ;;  %v9608_v50 = vmul.f32 %v9570_v54, %v9459_v52  ;;  %v9461_v14 = vpop.f32.mrb[46].mxu0 }
 0x3bb   :  { %12568 = vmatpush1.bf16.msra.mxu1 %v21323_v16  ;;  %12599 = vmatprep.mubr.bf16.mxu1 %v21001_v29  ;;  %v19803_v37 = vadd.f32 %v9607_v55, %v19659_v22  ;;  %v9462_v5 = vpop.f32.mrb[47].mxu0  ;;  %v9973_v59 = vrot.slane %v19800_v12, %v16711_v3  ;;  %v9981_v49 = vrot.slane %v19800_v12, %v16721_v43 }
 0x3bc   :  { %12649 = vmatprep.subr.bf16.mxu1 %v21448_v45  ;;  %v19806_v1 = vadd.f32 %v9608_v50, %v19662_v24  ;;  %v9977_v24 = vrot.slane %v19800_v12, %v16713_v44  ;;  %v9989_v14 = vrot.slane %v19800_v12, %v16766_v4 }
 0x3bd   :  { %v9498_v7 = vpop.f32.mrb[44].mxu1  ;;  %14076 = vmatmul.mubr.msk.bf16.vlgmr.msra.gmra.mrb[152].mxu0 %vm177_vm1, %v19732_v41 }
 0x3be   :  { %v9609_v60 = vmul.f32 %v9574_v26, %v9498_v7  ;;  %v9500_v16 = vpop.f32.mrb[45].mxu1  ;;  %12609 = vmatpush1.bf16.msra.mxu0 %v21325_v33  ;;  %12640 = vmatprep.mubr.bf16.mxu0 %v21001_v29 }
 0x3bf   :  { %v9610_v20 = vmul.f32 %v9578_v8, %v9500_v16  ;;  %v9502_v53 = vpop.f32.mrb[46].mxu1  ;;  %v10001_v16 = vrot.slane %v19800_v12, %v16776_v2 }
 0x3c0   :  { %v19809_v0 = vadd.f32 %v9609_v60, %v19665_v9  ;;  %v9503_v27 = vpop.f32.mrb[47].mxu1  ;;  %v21449_v9 = vld [vmem:[#allocation133_spill] sm:$0xff]  ;;  %v9666_v63 = vpop.f32.mrb[48].mxu0 }
 0x3c1   :  { %v19816_v22 = vadd.f32 %v9610_v20, %v19672_v23  ;;  %12817 = vmatprep.subr.bf16.mxu0 %v21449_v9  ;;  %v9985_v23 = vrot.slane %v19800_v12, %v16732_v31  ;;  %v10050_v33 = vmul.f32 %v9973_v59, %v9666_v63  ;;  %v9668_v54 = vpop.f32.mrb[49].mxu0  ;;  %v14005_v60 = vld [vmem:[%s20654_s2 + $0x143] ss:$8 sm:$0xf0] }
 0x3c2   :  { %14077 = vmatmul.mubr.msk.bf16.vlgmr.msra.gmra.mrb[152].mxu1 %vm177_vm1, %v19732_v41  ;;  %v10051_v13 = vmul.f32 %v9977_v24, %v9668_v54  ;;  %v9670_v56 = vpop.f32.mrb[50].mxu0  ;;  %v19873_v59 = vld [vmem:[%s20653_s3 + $0x68] sm:$0xf] }
 0x3c3   :  { %12650 = vmatpush1.bf16.msra.mxu1 %v21450_v19  ;;  %12681 = vmatprep.mubr.bf16.mxu1 %v21001_v29  ;;  %v19833_v26 = vadd.f32 %v10050_v33, %v19689_v18  ;;  %v9671_v45 = vpop.f32.mrb[51].mxu0 }
 0x3c4   :  { %12858 = vmatprep.subr.bf16.mxu1 %v17263_v17  ;;  %v19836_v55 = vadd.f32 %v10051_v13, %v19692_v39  ;;  %v9993_v39 = vrot.slane %v19800_v12, %v16768_v15 }
 0x3c5   :  { %v9707_v57 = vpop.f32.mrb[48].mxu1  ;;  %14078 = vmatmul.mubr.msk.bf16.vlgmr.msra.gmra.mrb[156].mxu0 %vm177_vm1, %v19732_v41 }
 0x3c6   :  { %v10052_v62 = vmul.f32 %v9981_v49, %v9707_v57  ;;  %v9709_v8 = vpop.f32.mrb[49].mxu1  ;;  %12818 = vmatpush1.bf16.msra.mxu0 %v17232_v30  ;;  %12849 = vmatprep.mubr.bf16.mxu0 %v21001_v29  ;;  %v9997_v30 = vrot.slane %v19800_v12, %v16770_v36 }
 0x3c7   :  { %v10053_v52 = vmul.f32 %v9985_v23, %v9709_v8  ;;  %v9711_v50 = vpop.f32.mrb[50].mxu1  ;;  %12899 = vmatprep.subr.bf16.mxu0 %v17278_v25 }
 0x3c8   :  { %v19839_v7 = vadd.f32 %v10052_v62, %v19695_v42  ;;  %v9712_v17 = vpop.f32.mrb[51].mxu1  ;;  %v14004_v42 = vld [vmem:[%s20654_s2 + $0x143] ss:$8 sm:$0xf] }
 0x3c9   :  { %v19846_v18 = vadd.f32 %v10053_v52, %v19702_v46  ;;  %v9748_v46 = vpop.f32.mrb[52].mxu0  ;;  %v19868_v53 = vor.u32 %v14005_v60, %v14004_v42 }
 0x3ca   :  { %14079 = vmatmul.mubr.msk.bf16.vlgmr.msra.gmra.mrb[156].mxu1 %vm177_vm1, %v19732_v41  ;;  %v10054_v5 = vmul.f32 %v9989_v14, %v9748_v46  ;;  %v9750_v20 = vpop.f32.mrb[53].mxu0  ;;  %v14016_v46 = vld [vmem:[%s20654_s2 + $0x104] ss:$8 sm:$0xf0] }
 0x3cb   :  { %12859 = vmatpush1.bf16.msra.mxu1 %v21327_v28  ;;  %12890 = vmatprep.mubr.bf16.mxu1 %v21001_v29  ;;  %v10055_v41 = vmul.f32 %v9993_v39, %v9750_v20  ;;  %v9752_v25 = vpop.f32.mrb[54].mxu0  ;;  %v10005_v33 = vrot.slane %v19868_v53, %v16711_v3  ;;  %v10013_v54 = vrot.slane %v19868_v53, %v16721_v43 }
 0x3cc   :  { %12940 = vmatprep.subr.bf16.mxu1 %v17343_v10  ;;  %v19876_v28 = vadd.f32 %v10054_v5, %v19735_v61  ;;  %v9753_v9 = vpop.f32.mrb[55].mxu0  ;;  %v10021_v60 = vrot.slane %v19868_v53, %v16766_v4  ;;  %v10033_v20 = vrot.slane %v19868_v53, %v16776_v2 }
 0x3cd   :  { %v9789_v27 = vpop.f32.mrb[52].mxu1  ;;  %v19879_v10 = vadd.f32 %v10055_v41, %v19738_v38  ;;  %14085 = vmatmul.mubr.msk.bf16.vlgmr.msra.gmra.mrb[160].mxu0 %vm177_vm1, %v19873_v59  ;;  %v10009_v38 = vrot.slane %v19868_v53, %v16713_v44  ;;  %v21454_v41 = vld [vmem:[#allocation130_spill] sm:$0xff] }
 0x3ce   :  { %v10056_v12 = vmul.f32 %v9997_v30, %v9789_v27  ;;  %v9791_v24 = vpop.f32.mrb[53].mxu1  ;;  %12900 = vmatpush1.bf16.msra.mxu0 %v17314_v6  ;;  %12931 = vmatprep.mubr.bf16.mxu0 %v21001_v29  ;;  %v21452_v30 = vld [vmem:[#allocation136_spill] sm:$0xff] }
 0x3cf   :  { %v10057_v49 = vmul.f32 %v10001_v16, %v9791_v24  ;;  %v9793_v19 = vpop.f32.mrb[54].mxu1  ;;  %v10029_v16 = vrot.slane %v19868_v53, %v16770_v36 }
 0x3d0   :  { %v19882_v63 = vadd.f32 %v10056_v12, %v19741_v35  ;;  %v9794_v23 = vpop.f32.mrb[55].mxu1  ;;  %v21451_v35 = vld [vmem:[#allocation135_spill] sm:$0xff]  ;;  %v9830_v13 = vpop.f32.mrb[56].mxu0 }
 0x3d1   :  { %v19889_v61 = vadd.f32 %v10057_v49, %v19748_v40  ;;  %12981 = vmatprep.subr.bf16.mxu0 %v21451_v35  ;;  %v10017_v40 = vrot.slane %v19868_v53, %v16732_v31  ;;  %v10058_v6 = vmul.f32 %v10005_v33, %v9830_v13  ;;  %v9832_v57 = vpop.f32.mrb[57].mxu0 }
 0x3d2   :  { %14086 = vmatmul.mubr.msk.bf16.vlgmr.msra.gmra.mrb[160].mxu1 %vm177_vm1, %v19873_v59  ;;  %v10059_v56 = vmul.f32 %v10009_v38, %v9832_v57  ;;  %v9834_v8 = vpop.f32.mrb[58].mxu0 }
 0x3d3   :  { %12941 = vmatpush1.bf16.msra.mxu1 %v17327_v48  ;;  %12972 = vmatprep.mubr.bf16.mxu1 %v21001_v29  ;;  %v19906_v45 = vadd.f32 %v10058_v6, %v19765_v21  ;;  %v9835_v17 = vpop.f32.mrb[59].mxu0  ;;  %v21455_v6 = vld [vmem:[#allocation132_spill] sm:$0xff] }
 0x3d4   :  { %13022 = vmatprep.subr.bf16.mxu1 %v17360_v47  ;;  %v19909_v48 = vadd.f32 %v10059_v56, %v19768_v11  ;;  %v10025_v11 = vrot.slane %v19868_v53, %v16768_v15 }
 0x3d5   :  { %v9871_v62 = vpop.f32.mrb[56].mxu1  ;;  %14087 = vmatmul.mubr.msk.bf16.vlgmr.msra.gmra.mrb[164].mxu0 %vm177_vm1, %v19873_v59 }
 0x3d6   :  { %v10060_v52 = vmul.f32 %v10013_v54, %v9871_v62  ;;  %v9873_v50 = vpop.f32.mrb[57].mxu1  ;;  %12982 = vmatpush1.bf16.msra.mxu0 %v21452_v30  ;;  %13013 = vmatprep.mubr.bf16.mxu0 %v21001_v29 }
 0x3d7   :  { %v10061_v14 = vmul.f32 %v10017_v40, %v9873_v50  ;;  %v9875_v39 = vpop.f32.mrb[58].mxu1 }
 0x3d8   :  { %v19912_v42 = vadd.f32 %v10060_v52, %v19771_v34  ;;  %v9876_v47 = vpop.f32.mrb[59].mxu1  ;;  %v14015_v34 = vld [vmem:[%s20654_s2 + $0x104] ss:$8 sm:$0xf]  ;;  %v9912_v5 = vpop.f32.mrb[60].mxu0 }
 0x3d9   :  { %v19919_v21 = vadd.f32 %v10061_v14, %v19778_v58  ;;  %v21453_v58 = vld [vmem:[#allocation129_spill] sm:$0xff]  ;;  %v10062_v27 = vmul.f32 %v10021_v60, %v9912_v5  ;;  %v9914_v25 = vpop.f32.mrb[61].mxu0  ;;  %v19941_v12 = vor.u32 %v14016_v46, %v14015_v34 }
 0x3da   :  { %14088 = vmatmul.mubr.msk.bf16.vlgmr.msra.gmra.mrb[164].mxu1 %vm177_vm1, %v19873_v59  ;;  %13063 = vmatprep.subr.bf16.mxu0 %v21453_v58  ;;  %v10063_v24 = vmul.f32 %v10025_v11, %v9914_v25  ;;  %v9916_v49 = vpop.f32.mrb[62].mxu0 }
 0x3db   :  { %13023 = vmatpush1.bf16.msra.mxu1 %v17406_v51  ;;  %13054 = vmatprep.mubr.bf16.mxu1 %v21001_v29  ;;  %v19944_v19 = vadd.f32 %v10062_v27, %v19803_v37  ;;  %v9917_v33 = vpop.f32.mrb[63].mxu0  ;;  %v10428_v40 = vrot.slane %v19941_v12, %v16711_v3  ;;  %v10444_v46 = vrot.slane %v19941_v12, %v16766_v4 }
 0x3dc   :  { %13104 = vmatprep.subr.bf16.mxu1 %v21454_v41  ;;  %v19947_v38 = vadd.f32 %v10063_v24, %v19806_v1  ;;  %v10432_v1 = vrot.slane %v19941_v12, %v16713_v44  ;;  %v10448_v58 = vrot.slane %v19941_v12, %v16768_v15  ;;  %v10456_v5 = vrot.slane %v19941_v12, %v16776_v2 }
 0x3dd   :  { %v9953_v9 = vpop.f32.mrb[60].mxu1  ;;  %14089 = vmatmul.mubr.msk.bf16.vlgmr.msra.gmra.mrb[168].mxu0 %vm177_vm1, %v19873_v59 }
 0x3de   :  { %v10064_v23 = vmul.f32 %v10029_v16, %v9953_v9  ;;  %v9955_v51 = vpop.f32.mrb[61].mxu1  ;;  %13064 = vmatpush1.bf16.msra.mxu0 %v21329_v32  ;;  %13095 = vmatprep.mubr.bf16.mxu0 %v21001_v29 }
 0x3df   :  { %v10065_v53 = vmul.f32 %v10033_v20, %v9955_v51  ;;  %v9957_v35 = vpop.f32.mrb[62].mxu1 }
 0x3e0   :  { %v19950_v54 = vadd.f32 %v10064_v23, %v19809_v0  ;;  %v9958_v13 = vpop.f32.mrb[63].mxu1  ;;  %v10436_v0 = vrot.slane %v19941_v12, %v16721_v43  ;;  %v10121_v57 = vpop.f32.mrb[64].mxu0 }
 0x3e1   :  { %v19957_v37 = vadd.f32 %v10065_v53, %v19816_v22  ;;  %v10440_v22 = vrot.slane %v19941_v12, %v16732_v31  ;;  %v10505_v32 = vmul.f32 %v10428_v40, %v10121_v57  ;;  %v10123_v56 = vpop.f32.mrb[65].mxu0 }
 0x3e2   :  { %14090 = vmatmul.mubr.msk.bf16.vlgmr.msra.gmra.mrb[168].mxu1 %vm177_vm1, %v19873_v59  ;;  %v10506_v62 = vmul.f32 %v10432_v1, %v10123_v56  ;;  %v10125_v52 = vpop.f32.mrb[66].mxu0 }
 0x3e3   :  { %13105 = vmatpush1.bf16.msra.mxu1 %v21455_v6  ;;  %13136 = vmatprep.mubr.bf16.mxu1 %v21001_v29  ;;  %v19972_v50 = vadd.f32 %v10505_v32, %v19833_v26  ;;  %v10126_v39 = vpop.f32.mrb[67].mxu0 }
 0x3e4   :  { %v19975_v47 = vadd.f32 %v10506_v62, %v19836_v55  ;;  %v14017_v55 = vld [vmem:[%s20654_s2 + $0x144] ss:$8 sm:$0xf] }
 0x3e5   :  { %v10162_v8 = vpop.f32.mrb[64].mxu1  ;;  %14091 = vmatmul.mubr.msk.bf16.vlgmr.msra.gmra.mrb[172].mxu0 %vm177_vm1, %v19873_v59 }
 0x3e6   :  { %v10507_v17 = vmul.f32 %v10436_v0, %v10162_v8  ;;  %v10164_v14 = vpop.f32.mrb[65].mxu1  ;;  %13429 = vmatprep.mubr.bf16.mxu0 %v21001_v29 }
 0x3e7   :  { %v10508_v60 = vmul.f32 %v10440_v22, %v10164_v14  ;;  %v10166_v30 = vpop.f32.mrb[66].mxu1 }
 0x3e8   :  { %v19978_v11 = vadd.f32 %v10507_v17, %v19839_v7  ;;  %v10167_v34 = vpop.f32.mrb[67].mxu1  ;;  %v14018_v7 = vld [vmem:[%s20654_s2 + $0x144] ss:$8 sm:$0xf0]  ;;  %v10203_v16 = vpop.f32.mrb[68].mxu0 }
 0x3e9   :  { %v19985_v26 = vadd.f32 %v10508_v60, %v19846_v18  ;;  %v10452_v18 = vrot.slane %v19941_v12, %v16770_v36  ;;  %v10509_v20 = vmul.f32 %v10444_v46, %v10203_v16  ;;  %v10205_v41 = vpop.f32.mrb[69].mxu0  ;;  %v10422_v27 = vor.u32 %v14018_v7, %v14017_v55 }
 0x3ea   :  { %14092 = vmatmul.mubr.msk.bf16.vlgmr.msra.gmra.mrb[172].mxu1 %vm177_vm1, %v19873_v59  ;;  %v10510_v25 = vmul.f32 %v10448_v58, %v10205_v41  ;;  %v10207_v9 = vpop.f32.mrb[70].mxu0  ;;  %v14028_v58 = vld [vmem:[%s20654_s2 + $0x105] ss:$8 sm:$0xf] }
 0x3eb   :  { %13470 = vmatprep.mubr.bf16.mxu1 %v21001_v29  ;;  %v20004_v49 = vadd.f32 %v10509_v20, %v19876_v28  ;;  %v10208_v51 = vpop.f32.mrb[71].mxu0  ;;  %v10460_v40 = vrot.slane %v10422_v27, %v16711_v3  ;;  %v10464_v28 = vrot.slane %v10422_v27, %v16713_v44  ;;  %v10468_v0 = vrot.slane %v10422_v27, %v16721_v43 }
 0x3ec   :  { %v20007_v33 = vadd.f32 %v10510_v25, %v19879_v10  ;;  %v10472_v57 = vrot.slane %v10422_v27, %v16732_v31  ;;  %v10476_v34 = vrot.slane %v10422_v27, %v16766_v4  ;;  %v10484_v55 = vrot.slane %v10422_v27, %v16770_v36 }
 0x3ed   :  { %v10244_v24 = vpop.f32.mrb[68].mxu1  ;;  %v10488_v7 = vrot.slane %v10422_v27, %v16776_v2 }
 0x3ee   :  { %v10511_v23 = vmul.f32 %v10452_v18, %v10244_v24  ;;  %v10246_v59 = vpop.f32.mrb[69].mxu1 }
 0x3ef   :  { %v10512_v53 = vmul.f32 %v10456_v5, %v10246_v59  ;;  %v10248_v35 = vpop.f32.mrb[70].mxu1 }
 0x3f0   :  { %v20010_v12 = vadd.f32 %v10511_v23, %v19882_v63  ;;  %v10249_v13 = vpop.f32.mrb[71].mxu1  ;;  %v10285_v6 = vpop.f32.mrb[72].mxu0 }
 0x3f1   :  { %v20014_v1 = vadd.f32 %v10512_v53, %v19889_v61  ;;  %v10513_v10 = vmul.f32 %v10460_v40, %v10285_v6  ;;  %v10287_v22 = vpop.f32.mrb[73].mxu0 }
 0x3f2   :  { %v10514_v32 = vmul.f32 %v10464_v28, %v10287_v22  ;;  %v10289_v62 = vpop.f32.mrb[74].mxu0 }
 0x3f3   :  { %v20020_v63 = vadd.f32 %v10513_v10, %v19906_v45  ;;  %v10290_v17 = vpop.f32.mrb[75].mxu0  ;;  %v10480_v45 = vrot.slane %v10422_v27, %v16768_v15 }
 0x3f4   :  { %v20023_v61 = vadd.f32 %v10514_v32, %v19909_v48  ;;  %v14029_v48 = vld [vmem:[%s20654_s2 + $0x105] ss:$8 sm:$0xf0] }
 0x3f5   :  { %v10326_v56 = vpop.f32.mrb[72].mxu1  ;;  %v10873_v5 = vor.u32 %v14029_v48, %v14028_v58 }
 0x3f6   :  { %v10515_v8 = vmul.f32 %v10468_v0, %v10326_v56  ;;  %v10328_v52 = vpop.f32.mrb[73].mxu1 }
 0x3f7   :  { %v10516_v14 = vmul.f32 %v10472_v57, %v10328_v52  ;;  %v10330_v39 = vpop.f32.mrb[74].mxu1  ;;  %v10883_v13 = vrot.slane %v10873_v5, %v16711_v3  ;;  %v10891_v28 = vrot.slane %v10873_v5, %v16721_v43  ;;  %v10895_v6 = vrot.slane %v10873_v5, %v16732_v31 }
 0x3f8   :  { %v20026_v60 = vadd.f32 %v10515_v8, %v19912_v42  ;;  %v10331_v30 = vpop.f32.mrb[75].mxu1  ;;  %v10367_v42 = vpop.f32.mrb[76].mxu0  ;;  %v10907_v58 = vrot.slane %v10873_v5, %v16770_v36  ;;  %v10911_v48 = vrot.slane %v10873_v5, %v16776_v2 }
 0x3f9   :  { %v20030_v46 = vadd.f32 %v10516_v14, %v19919_v21  ;;  %v10517_v18 = vmul.f32 %v10476_v34, %v10367_v42  ;;  %v10369_v16 = vpop.f32.mrb[77].mxu0  ;;  %v10899_v30 = vrot.slane %v10873_v5, %v16766_v4 }
 0x3fa   :  { %v10518_v21 = vmul.f32 %v10480_v45, %v10369_v16  ;;  %v10371_v41 = vpop.f32.mrb[78].mxu0  ;;  %v14030_v45 = vld [vmem:[%s20654_s2 + $0x145] ss:$8 sm:$0xf] }
 0x3fb   :  { %v20042_v25 = vadd.f32 %v10517_v18, %v19944_v19  ;;  %v10372_v23 = vpop.f32.mrb[79].mxu0  ;;  %v10887_v19 = vrot.slane %v10873_v5, %v16713_v44 }
 0x3fc   :  { %v20045_v59 = vadd.f32 %v10518_v21, %v19947_v38 }
 0x3fd   :  { %v10408_v20 = vpop.f32.mrb[76].mxu1 }
 0x3fe   :  { %v10519_v24 = vmul.f32 %v10484_v55, %v10408_v20  ;;  %v10410_v9 = vpop.f32.mrb[77].mxu1 }
 0x3ff   :  { %v10520_v51 = vmul.f32 %v10488_v7, %v10410_v9  ;;  %v10412_v53 = vpop.f32.mrb[78].mxu1 }
 0x400   :  { %v20048_v35 = vadd.f32 %v10519_v24, %v19950_v54  ;;  %v10413_v27 = vpop.f32.mrb[79].mxu1  ;;  %v10576_v0 = vpop.f32.mrb[80].mxu0 }
 0x401   :  { %v20052_v40 = vadd.f32 %v10520_v51, %v19957_v37  ;;  %v10960_v38 = vmul.f32 %v10883_v13, %v10576_v0  ;;  %v10578_v57 = vpop.f32.mrb[81].mxu0 }
 0x402   :  { %v10961_v10 = vmul.f32 %v10887_v19, %v10578_v57  ;;  %v10580_v32 = vpop.f32.mrb[82].mxu0 }
 0x403   :  { %v20058_v54 = vadd.f32 %v10960_v38, %v19972_v50  ;;  %v10581_v8 = vpop.f32.mrb[83].mxu0  ;;  %v10903_v50 = vrot.slane %v10873_v5, %v16768_v15 }
 0x404   :  { %v20061_v37 = vadd.f32 %v10961_v10, %v19975_v47  ;;  %v14031_v47 = vld [vmem:[%s20654_s2 + $0x145] ss:$8 sm:$0xf0] }
 0x405   :  { %v10617_v22 = vpop.f32.mrb[80].mxu1  ;;  %v10877_v7 = vor.u32 %v14031_v47, %v14030_v45 }
 0x406   :  { %v10962_v56 = vmul.f32 %v10891_v28, %v10617_v22  ;;  %v10619_v62 = vpop.f32.mrb[81].mxu1 }
 0x407   :  { %v10963_v52 = vmul.f32 %v10895_v6, %v10619_v62  ;;  %v10621_v17 = vpop.f32.mrb[82].mxu1  ;;  %v10915_v27 = vrot.slane %v10877_v7, %v16711_v3  ;;  %v10923_v19 = vrot.slane %v10877_v7, %v16721_v43  ;;  %v10927_v0 = vrot.slane %v10877_v7, %v16732_v31 }
 0x408   :  { %v20064_v14 = vadd.f32 %v10962_v56, %v19978_v11  ;;  %v10622_v39 = vpop.f32.mrb[83].mxu1  ;;  %v10658_v11 = vpop.f32.mrb[84].mxu0  ;;  %v10939_v45 = vrot.slane %v10877_v7, %v16770_v36  ;;  %v10943_v47 = vrot.slane %v10877_v7, %v16776_v2 }
 0x409   :  { %v20068_v34 = vadd.f32 %v10963_v52, %v19985_v26  ;;  %v10964_v55 = vmul.f32 %v10899_v30, %v10658_v11  ;;  %v10660_v42 = vpop.f32.mrb[85].mxu0  ;;  %v10931_v39 = vrot.slane %v10877_v7, %v16766_v4 }
 0x40a   :  { %v10965_v26 = vmul.f32 %v10903_v50, %v10660_v42  ;;  %v10662_v16 = vpop.f32.mrb[86].mxu0  ;;  %v14041_v50 = vld [vmem:[%s20654_s2 + $0x106] ss:$8 sm:$0xf] }
 0x40b   :  { %v20080_v21 = vadd.f32 %v10964_v55, %v20004_v49  ;;  %v10663_v24 = vpop.f32.mrb[87].mxu0  ;;  %v10919_v49 = vrot.slane %v10877_v7, %v16713_v44 }
 0x40c   :  { %v20083_v9 = vadd.f32 %v10965_v26, %v20007_v33 }
 0x40d   :  { %v10699_v18 = vpop.f32.mrb[84].mxu1 }
 0x40e   :  { %v10966_v20 = vmul.f32 %v10907_v58, %v10699_v18  ;;  %v10701_v41 = vpop.f32.mrb[85].mxu1 }
 0x40f   :  { %v10967_v23 = vmul.f32 %v10911_v48, %v10701_v41  ;;  %v10703_v51 = vpop.f32.mrb[86].mxu1 }
 0x410   :  { %v20086_v53 = vadd.f32 %v10966_v20, %v20010_v12  ;;  %v10704_v5 = vpop.f32.mrb[87].mxu1  ;;  %v10740_v28 = vpop.f32.mrb[88].mxu0 }
 0x411   :  { %v20090_v13 = vadd.f32 %v10967_v23, %v20014_v1  ;;  %v10968_v33 = vmul.f32 %v10915_v27, %v10740_v28  ;;  %v10742_v6 = vpop.f32.mrb[89].mxu0 }
 0x412   :  { %v10969_v38 = vmul.f32 %v10919_v49, %v10742_v6  ;;  %v10744_v10 = vpop.f32.mrb[90].mxu0 }
 0x413   :  { %v20096_v12 = vadd.f32 %v10968_v33, %v20020_v63  ;;  %v10745_v56 = vpop.f32.mrb[91].mxu0  ;;  %v10935_v63 = vrot.slane %v10877_v7, %v16768_v15 }
 0x414   :  { %v20099_v1 = vadd.f32 %v10969_v38, %v20023_v61  ;;  %v14042_v61 = vld [vmem:[%s20654_s2 + $0x106] ss:$8 sm:$0xf0] }
 0x415   :  { %v10781_v57 = vpop.f32.mrb[88].mxu1  ;;  %v11328_v48 = vor.u32 %v14042_v61, %v14041_v50 }
 0x416   :  { %v10970_v22 = vmul.f32 %v10923_v19, %v10781_v57  ;;  %v10783_v32 = vpop.f32.mrb[89].mxu1 }
 0x417   :  { %v10971_v62 = vmul.f32 %v10927_v0, %v10783_v32  ;;  %v10785_v8 = vpop.f32.mrb[90].mxu1  ;;  %v11338_v5 = vrot.slane %v11328_v48, %v16711_v3  ;;  %v11346_v49 = vrot.slane %v11328_v48, %v16721_v43  ;;  %v11350_v28 = vrot.slane %v11328_v48, %v16732_v31 }
 0x418   :  { %v20102_v52 = vadd.f32 %v10970_v22, %v20026_v60  ;;  %v10786_v17 = vpop.f32.mrb[91].mxu1  ;;  %v10822_v60 = vpop.f32.mrb[92].mxu0  ;;  %v11362_v50 = vrot.slane %v11328_v48, %v16770_v36  ;;  %v11366_v61 = vrot.slane %v11328_v48, %v16776_v2 }
 0x419   :  { %v20106_v30 = vadd.f32 %v10971_v62, %v20030_v46  ;;  %v10972_v58 = vmul.f32 %v10931_v39, %v10822_v60  ;;  %v10824_v11 = vpop.f32.mrb[93].mxu0  ;;  %v11354_v17 = vrot.slane %v11328_v48, %v16766_v4 }
 0x41a   :  { %v10973_v46 = vmul.f32 %v10935_v63, %v10824_v11  ;;  %v10826_v42 = vpop.f32.mrb[94].mxu0  ;;  %v14043_v63 = vld [vmem:[%s20654_s2 + $0x146] ss:$8 sm:$0xf] }
 0x41b   :  { %v20118_v26 = vadd.f32 %v10972_v58, %v20042_v25  ;;  %v10827_v20 = vpop.f32.mrb[95].mxu0  ;;  %v11342_v25 = vrot.slane %v11328_v48, %v16713_v44 }
 0x41c   :  { %v20121_v41 = vadd.f32 %v10973_v46, %v20045_v59 }
 0x41d   :  { %v10863_v55 = vpop.f32.mrb[92].mxu1 }
 0x41e   :  { %v10974_v18 = vmul.f32 %v10939_v45, %v10863_v55  ;;  %v10865_v16 = vpop.f32.mrb[93].mxu1 }
 0x41f   :  { %v10975_v24 = vmul.f32 %v10943_v47, %v10865_v16  ;;  %v10867_v23 = vpop.f32.mrb[94].mxu1 }
 0x420   :  { %v20124_v51 = vadd.f32 %v10974_v18, %v20048_v35  ;;  %v10868_v7 = vpop.f32.mrb[95].mxu1  ;;  %v11031_v19 = vpop.f32.mrb[96].mxu0 }
 0x421   :  { %v20128_v27 = vadd.f32 %v10975_v24, %v20052_v40  ;;  %v11415_v59 = vmul.f32 %v11338_v5, %v11031_v19  ;;  %v11033_v0 = vpop.f32.mrb[97].mxu0 }
 0x422   :  { %v11416_v33 = vmul.f32 %v11342_v25, %v11033_v0  ;;  %v11035_v38 = vpop.f32.mrb[98].mxu0 }
 0x423   :  { %v20134_v35 = vadd.f32 %v11415_v59, %v20058_v54  ;;  %v11036_v22 = vpop.f32.mrb[99].mxu0  ;;  %v11358_v54 = vrot.slane %v11328_v48, %v16768_v15 }
 0x424   :  { %v20137_v40 = vadd.f32 %v11416_v33, %v20061_v37  ;;  %v14044_v37 = vld [vmem:[%s20654_s2 + $0x146] ss:$8 sm:$0xf0] }
 0x425   :  { %v11072_v6 = vpop.f32.mrb[96].mxu1  ;;  %v11332_v47 = vor.u32 %v14044_v37, %v14043_v63 }
 0x426   :  { %v11417_v57 = vmul.f32 %v11346_v49, %v11072_v6  ;;  %v11074_v10 = vpop.f32.mrb[97].mxu1 }
 0x427   :  { %v11418_v32 = vmul.f32 %v11350_v28, %v11074_v10  ;;  %v11076_v56 = vpop.f32.mrb[98].mxu1  ;;  %v11370_v7 = vrot.slane %v11332_v47, %v16711_v3  ;;  %v11378_v25 = vrot.slane %v11332_v47, %v16721_v43  ;;  %v11382_v19 = vrot.slane %v11332_v47, %v16732_v31 }
 0x428   :  { %v20140_v62 = vadd.f32 %v11417_v57, %v20064_v14  ;;  %v11077_v8 = vpop.f32.mrb[99].mxu1  ;;  %v11113_v14 = vpop.f32.mrb[100].mxu0  ;;  %v11394_v63 = vrot.slane %v11332_v47, %v16770_v36  ;;  %v11398_v37 = vrot.slane %v11332_v47, %v16776_v2 }
 0x429   :  { %v20144_v39 = vadd.f32 %v11418_v32, %v20068_v34  ;;  %v11419_v45 = vmul.f32 %v11354_v17, %v11113_v14  ;;  %v11115_v60 = vpop.f32.mrb[101].mxu0  ;;  %v11386_v8 = vrot.slane %v11332_v47, %v16766_v4 }
 0x42a   :  { %v11420_v34 = vmul.f32 %v11358_v54, %v11115_v60  ;;  %v11117_v11 = vpop.f32.mrb[102].mxu0  ;;  %v14054_v54 = vld [vmem:[%s20654_s2 + $0x107] ss:$8 sm:$0xf] }
 0x42b   :  { %v20156_v46 = vadd.f32 %v11419_v45, %v20080_v21  ;;  %v11118_v18 = vpop.f32.mrb[103].mxu0  ;;  %v11374_v21 = vrot.slane %v11332_v47, %v16713_v44 }
 0x42c   :  { %v20159_v16 = vadd.f32 %v11420_v34, %v20083_v9 }
 0x42d   :  { %v11154_v58 = vpop.f32.mrb[100].mxu1 }
 0x42e   :  { %v11421_v55 = vmul.f32 %v11362_v50, %v11154_v58  ;;  %v11156_v42 = vpop.f32.mrb[101].mxu1 }
 0x42f   :  { %v11422_v20 = vmul.f32 %v11366_v61, %v11156_v42  ;;  %v11158_v24 = vpop.f32.mrb[102].mxu1 }
 0x430   :  { %v20162_v23 = vadd.f32 %v11421_v55, %v20086_v53  ;;  %v11159_v48 = vpop.f32.mrb[103].mxu1  ;;  %v11195_v49 = vpop.f32.mrb[104].mxu0 }
 0x431   :  { %v20166_v5 = vadd.f32 %v11422_v20, %v20090_v13  ;;  %v11423_v9 = vmul.f32 %v11370_v7, %v11195_v49  ;;  %v11197_v28 = vpop.f32.mrb[105].mxu0 }
 0x432   :  { %v11424_v59 = vmul.f32 %v11374_v21, %v11197_v28  ;;  %v11199_v33 = vpop.f32.mrb[106].mxu0 }
 0x433   :  { %v20172_v53 = vadd.f32 %v11423_v9, %v20096_v12  ;;  %v11200_v57 = vpop.f32.mrb[107].mxu0  ;;  %v11390_v12 = vrot.slane %v11332_v47, %v16768_v15 }
 0x434   :  { %v20175_v13 = vadd.f32 %v11424_v59, %v20099_v1  ;;  %v14055_v1 = vld [vmem:[%s20654_s2 + $0x107] ss:$8 sm:$0xf0] }
 0x435   :  { %v11236_v0 = vpop.f32.mrb[104].mxu1  ;;  %v11783_v61 = vor.u32 %v14055_v1, %v14054_v54 }
 0x436   :  { %v11425_v6 = vmul.f32 %v11378_v25, %v11236_v0  ;;  %v11238_v38 = vpop.f32.mrb[105].mxu1 }
 0x437   :  { %v11426_v10 = vmul.f32 %v11382_v19, %v11238_v38  ;;  %v11240_v22 = vpop.f32.mrb[106].mxu1  ;;  %v11793_v48 = vrot.slane %v11783_v61, %v16711_v3  ;;  %v11801_v21 = vrot.slane %v11783_v61, %v16721_v43  ;;  %v11805_v49 = vrot.slane %v11783_v61, %v16732_v31 }
 0x438   :  { %v20178_v32 = vadd.f32 %v11425_v6, %v20102_v52  ;;  %v11241_v56 = vpop.f32.mrb[107].mxu1  ;;  %v11277_v52 = vpop.f32.mrb[108].mxu0  ;;  %v11817_v54 = vrot.slane %v11783_v61, %v16770_v36  ;;  %v11821_v1 = vrot.slane %v11783_v61, %v16776_v2 }
 0x439   :  { %v20182_v17 = vadd.f32 %v11426_v10, %v20106_v30  ;;  %v11427_v50 = vmul.f32 %v11386_v8, %v11277_v52  ;;  %v11279_v14 = vpop.f32.mrb[109].mxu0  ;;  %v11809_v56 = vrot.slane %v11783_v61, %v16766_v4 }
 0x43a   :  { %v11428_v30 = vmul.f32 %v11390_v12, %v11279_v14  ;;  %v11281_v60 = vpop.f32.mrb[110].mxu0  ;;  %v14056_v12 = vld [vmem:[%s20654_s2 + $0x147] ss:$8 sm:$0xf] }
 0x43b   :  { %v20194_v34 = vadd.f32 %v11427_v50, %v20118_v26  ;;  %v11282_v55 = vpop.f32.mrb[111].mxu0  ;;  %v11797_v26 = vrot.slane %v11783_v61, %v16713_v44 }
 0x43c   :  { %v20197_v42 = vadd.f32 %v11428_v30, %v20121_v41 }
 0x43d   :  { %v11318_v45 = vpop.f32.mrb[108].mxu1 }
 0x43e   :  { %v11429_v58 = vmul.f32 %v11394_v63, %v11318_v45  ;;  %v11320_v11 = vpop.f32.mrb[109].mxu1 }
 0x43f   :  { %v11430_v18 = vmul.f32 %v11398_v37, %v11320_v11  ;;  %v11322_v20 = vpop.f32.mrb[110].mxu1  ;;  %v13338_v11 = vld [vmem:[%s20656_s6] sm:$0xff] }
 0x440   :  { %v20200_v24 = vadd.f32 %v11429_v58, %v20124_v51  ;;  %v11323_v47 = vpop.f32.mrb[111].mxu1  ;;  %v11486_v25 = vpop.f32.mrb[112].mxu0  ;;  %13341 = vperm.xlu1 %14763, %v13338_v11  }
 0x441   :  { %v20204_v7 = vadd.f32 %v11430_v18, %v20128_v27  ;;  %v11870_v41 = vmul.f32 %v11793_v48, %v11486_v25  ;;  %v11488_v19 = vpop.f32.mrb[113].mxu0 }
 0x442   :  { %v11871_v9 = vmul.f32 %v11797_v26, %v11488_v19  ;;  %v11490_v59 = vpop.f32.mrb[114].mxu0 }
 0x443   :  { %v20210_v51 = vadd.f32 %v11870_v41, %v20134_v35  ;;  %v11491_v6 = vpop.f32.mrb[115].mxu0  ;;  %v11813_v35 = vrot.slane %v11783_v61, %v16768_v15 }
 0x444   :  { %v20213_v27 = vadd.f32 %v11871_v9, %v20137_v40  ;;  %v14057_v40 = vld [vmem:[%s20654_s2 + $0x147] ss:$8 sm:$0xf0] }
 0x445   :  { %v11527_v28 = vpop.f32.mrb[112].mxu1  ;;  %v11787_v37 = vor.u32 %v14057_v40, %v14056_v12  ;;  %v14067_v12 = vld [vmem:[%s20654_s2 + $0x180] ss:$8 sm:$0xf] }
 0x446   :  { %v11872_v0 = vmul.f32 %v11801_v21, %v11527_v28  ;;  %v11529_v33 = vpop.f32.mrb[113].mxu1 }
 0x447   :  { %v11873_v38 = vmul.f32 %v11805_v49, %v11529_v33  ;;  %v11531_v57 = vpop.f32.mrb[114].mxu1  ;;  %v11829_v26 = vrot.slane %v11787_v37, %v16713_v44  ;;  %v11833_v21 = vrot.slane %v11787_v37, %v16721_v43  ;;  %v11849_v40 = vrot.slane %v11787_v37, %v16770_v36 }
 0x448   :  { %v20216_v10 = vadd.f32 %v11872_v0, %v20140_v62  ;;  %v11532_v22 = vpop.f32.mrb[115].mxu1  ;;  %v11568_v62 = vpop.f32.mrb[116].mxu0 }
 0x449   :  { %v20220_v8 = vadd.f32 %v11873_v38, %v20144_v39  ;;  %v11874_v63 = vmul.f32 %v11809_v56, %v11568_v62  ;;  %v11570_v52 = vpop.f32.mrb[117].mxu0  ;;  %v11841_v56 = vrot.slane %v11787_v37, %v16766_v4 }
 0x44a   :  { %v11875_v39 = vmul.f32 %v11813_v35, %v11570_v52  ;;  %v11572_v14 = vpop.f32.mrb[118].mxu0 }
 0x44b   :  { %v20232_v30 = vadd.f32 %v11874_v63, %v20156_v46  ;;  %v11573_v58 = vpop.f32.mrb[119].mxu0  ;;  %v11825_v46 = vrot.slane %v11787_v37, %v16711_v3 }
 0x44c   :  { %v20238_v55 = vadd.f32 %v11875_v39, %v20159_v16  ;;  %v11837_v16 = vrot.slane %v11787_v37, %v16732_v31 }
 0x44d   :  { %v11609_v50 = vpop.f32.mrb[116].mxu1 }
 0x44e   :  { %v11876_v45 = vmul.f32 %v11817_v54, %v11609_v50  ;;  %v11611_v60 = vpop.f32.mrb[117].mxu1  ;;  %v11853_v54 = vrot.slane %v11787_v37, %v16776_v2 }
 0x44f   :  { %v11877_v61 = vmul.f32 %v11821_v1, %v11611_v60  ;;  %v11613_v18 = vpop.f32.mrb[118].mxu1 }
 0x450   :  { %v20241_v20 = vadd.f32 %v11876_v45, %v20162_v23  ;;  %v11614_v47 = vpop.f32.mrb[119].mxu1  ;;  %v11650_v25 = vpop.f32.mrb[120].mxu0 }
 0x451   :  { %v20245_v48 = vadd.f32 %v11877_v61, %v20166_v5  ;;  %v11878_v49 = vmul.f32 %v11825_v46, %v11650_v25  ;;  %v11652_v41 = vpop.f32.mrb[121].mxu0 }
 0x452   :  { %v11879_v19 = vmul.f32 %v11829_v26, %v11652_v41  ;;  %v11654_v28 = vpop.f32.mrb[122].mxu0 }
 0x453   :  { %v20251_v23 = vadd.f32 %v11878_v49, %v20172_v53  ;;  %v11655_v33 = vpop.f32.mrb[123].mxu0  ;;  %v11845_v53 = vrot.slane %v11787_v37, %v16768_v15 }
 0x454   :  { %v20254_v5 = vadd.f32 %v11879_v19, %v20175_v13  ;;  %v14068_v13 = vld [vmem:[%s20654_s2 + $0x180] ss:$8 sm:$0xf0] }
 0x455   :  { %v11691_v9 = vpop.f32.mrb[120].mxu1  ;;  %v12238_v63 = vor.u32 %v14068_v13, %v14067_v12 }
 0x456   :  { %v11880_v59 = vmul.f32 %v11833_v21, %v11691_v9  ;;  %v11693_v0 = vpop.f32.mrb[121].mxu1 }
 0x457   :  { %v11881_v6 = vmul.f32 %v11837_v16, %v11693_v0  ;;  %v11695_v38 = vpop.f32.mrb[122].mxu1  ;;  %v12248_v47 = vrot.slane %v12238_v63, %v16711_v3  ;;  %v12256_v26 = vrot.slane %v12238_v63, %v16721_v43  ;;  %v12260_v25 = vrot.slane %v12238_v63, %v16732_v31 }
 0x458   :  { %v20257_v57 = vadd.f32 %v11880_v59, %v20178_v32  ;;  %v11696_v22 = vpop.f32.mrb[123].mxu1  ;;  %v11732_v32 = vpop.f32.mrb[124].mxu0  ;;  %v12272_v12 = vrot.slane %v12238_v63, %v16770_v36  ;;  %v12276_v13 = vrot.slane %v12238_v63, %v16776_v2 }
 0x459   :  { %v20261_v35 = vadd.f32 %v11881_v6, %v20182_v17  ;;  %v11882_v62 = vmul.f32 %v11841_v56, %v11732_v32  ;;  %v11734_v1 = vpop.f32.mrb[125].mxu0  ;;  %v12264_v22 = vrot.slane %v12238_v63, %v16766_v4 }
 0x45a   :  { %v11883_v17 = vmul.f32 %v11845_v53, %v11734_v1  ;;  %v11736_v39 = vpop.f32.mrb[126].mxu0  ;;  %v14069_v53 = vld [vmem:[%s20654_s2 + $0x1c0] ss:$8 sm:$0xf] }
 0x45b   :  { %v20273_v50 = vadd.f32 %v11882_v62, %v20194_v34  ;;  %v11737_v60 = vpop.f32.mrb[127].mxu0  ;;  %v12252_v34 = vrot.slane %v12238_v63, %v16713_v44 }
 0x45c   :  { %v20276_v58 = vadd.f32 %v11883_v17, %v20197_v42 }
 0x45d   :  { %v11773_v52 = vpop.f32.mrb[124].mxu1 }
 0x45e   :  { %v11884_v14 = vmul.f32 %v11849_v40, %v11773_v52  ;;  %v11775_v45 = vpop.f32.mrb[125].mxu1 }
 0x45f   :  { %v11885_v11 = vmul.f32 %v11853_v54, %v11775_v45  ;;  %v11777_v61 = vpop.f32.mrb[126].mxu1 }
 0x460   :  { %v20279_v18 = vadd.f32 %v11884_v14, %v20200_v24  ;;  %v11778_v37 = vpop.f32.mrb[127].mxu1  ;;  %v11941_v21 = vpop.f32.mrb[128].mxu0 }
 0x461   :  { %v20283_v46 = vadd.f32 %v11885_v11, %v20204_v7  ;;  %v12325_v42 = vmul.f32 %v12248_v47, %v11941_v21  ;;  %v11943_v16 = vpop.f32.mrb[129].mxu0 }
 0x462   :  { %v12326_v49 = vmul.f32 %v12252_v34, %v11943_v16  ;;  %v11945_v19 = vpop.f32.mrb[130].mxu0 }
 0x463   :  { %v20289_v24 = vadd.f32 %v12325_v42, %v20210_v51  ;;  %v11946_v59 = vpop.f32.mrb[131].mxu0  ;;  %v12268_v51 = vrot.slane %v12238_v63, %v16768_v15 }
 0x464   :  { %v20292_v7 = vadd.f32 %v12326_v49, %v20213_v27  ;;  %v14070_v27 = vld [vmem:[%s20654_s2 + $0x1c0] ss:$8 sm:$0xf0] }
 0x465   :  { %v11982_v41 = vpop.f32.mrb[128].mxu1  ;;  %v12242_v54 = vor.u32 %v14070_v27, %v14069_v53 }
 0x466   :  { %v12327_v9 = vmul.f32 %v12256_v26, %v11982_v41  ;;  %v11984_v28 = vpop.f32.mrb[129].mxu1 }
 0x467   :  { %v12328_v0 = vmul.f32 %v12260_v25, %v11984_v28  ;;  %v11986_v33 = vpop.f32.mrb[130].mxu1  ;;  %v12280_v37 = vrot.slane %v12242_v54, %v16711_v3  ;;  %v12288_v34 = vrot.slane %v12242_v54, %v16721_v43  ;;  %v12292_v21 = vrot.slane %v12242_v54, %v16732_v31 }
 0x468   :  { %v20295_v6 = vadd.f32 %v12327_v9, %v20216_v10  ;;  %v11987_v38 = vpop.f32.mrb[131].mxu1  ;;  %v12023_v10 = vpop.f32.mrb[132].mxu0  ;;  %v12304_v53 = vrot.slane %v12242_v54, %v16770_v36  ;;  %v12308_v27 = vrot.slane %v12242_v54, %v16776_v2 }
 0x469   :  { %v20299_v56 = vadd.f32 %v12328_v0, %v20220_v8  ;;  %v12329_v40 = vmul.f32 %v12264_v22, %v12023_v10  ;;  %v12025_v32 = vpop.f32.mrb[133].mxu0  ;;  %v12296_v38 = vrot.slane %v12242_v54, %v16766_v4 }
 0x46a   :  { %v12330_v8 = vmul.f32 %v12268_v51, %v12025_v32  ;;  %v12027_v1 = vpop.f32.mrb[134].mxu0  ;;  %v14080_v51 = vld [vmem:[%s20654_s2 + $0x181] ss:$8 sm:$0xf] }
 0x46b   :  { %v20311_v17 = vadd.f32 %v12329_v40, %v20232_v30  ;;  %v12028_v14 = vpop.f32.mrb[135].mxu0  ;;  %v12284_v30 = vrot.slane %v12242_v54, %v16713_v44 }
 0x46c   :  { %v20314_v45 = vadd.f32 %v12330_v8, %v20238_v55 }
 0x46d   :  { %v12064_v62 = vpop.f32.mrb[132].mxu1 }
 0x46e   :  { %v12331_v52 = vmul.f32 %v12272_v12, %v12064_v62  ;;  %v12066_v39 = vpop.f32.mrb[133].mxu1 }
 0x46f   :  { %v12332_v60 = vmul.f32 %v12276_v13, %v12066_v39  ;;  %v12068_v11 = vpop.f32.mrb[134].mxu1 }
 0x470   :  { %v20317_v61 = vadd.f32 %v12331_v52, %v20241_v20  ;;  %v12069_v63 = vpop.f32.mrb[135].mxu1  ;;  %v12105_v26 = vpop.f32.mrb[136].mxu0 }
 0x471   :  { %v20321_v47 = vadd.f32 %v12332_v60, %v20245_v48  ;;  %v12333_v55 = vmul.f32 %v12280_v37, %v12105_v26  ;;  %v12107_v25 = vpop.f32.mrb[137].mxu0 }
 0x472   :  { %v12334_v42 = vmul.f32 %v12284_v30, %v12107_v25  ;;  %v12109_v49 = vpop.f32.mrb[138].mxu0 }
 0x473   :  { %v20327_v20 = vadd.f32 %v12333_v55, %v20251_v23  ;;  %v12110_v9 = vpop.f32.mrb[139].mxu0  ;;  %v12300_v23 = vrot.slane %v12242_v54, %v16768_v15 }
 0x474   :  { %v20330_v48 = vadd.f32 %v12334_v42, %v20254_v5  ;;  %v14081_v5 = vld [vmem:[%s20654_s2 + $0x181] ss:$8 sm:$0xf0] }
 0x475   :  { %v12146_v16 = vpop.f32.mrb[136].mxu1  ;;  %v12693_v13 = vor.u32 %v14081_v5, %v14080_v51 }
 0x476   :  { %v12335_v41 = vmul.f32 %v12288_v34, %v12146_v16  ;;  %v12148_v19 = vpop.f32.mrb[137].mxu1 }
 0x477   :  { %v12336_v28 = vmul.f32 %v12292_v21, %v12148_v19  ;;  %v12150_v59 = vpop.f32.mrb[138].mxu1  ;;  %v12703_v63 = vrot.slane %v12693_v13, %v16711_v3  ;;  %v12711_v30 = vrot.slane %v12693_v13, %v16721_v43  ;;  %v12715_v26 = vrot.slane %v12693_v13, %v16732_v31 }
 0x478   :  { %v20333_v0 = vadd.f32 %v12335_v41, %v20257_v57  ;;  %v12151_v33 = vpop.f32.mrb[139].mxu1  ;;  %v12187_v57 = vpop.f32.mrb[140].mxu0  ;;  %v12727_v51 = vrot.slane %v12693_v13, %v16770_v36  ;;  %v12731_v5 = vrot.slane %v12693_v13, %v16776_v2 }
 0x479   :  { %v20337_v22 = vadd.f32 %v12336_v28, %v20261_v35  ;;  %v12337_v12 = vmul.f32 %v12296_v38, %v12187_v57  ;;  %v12189_v10 = vpop.f32.mrb[141].mxu0  ;;  %v12719_v33 = vrot.slane %v12693_v13, %v16766_v4 }
 0x47a   :  { %v12338_v35 = vmul.f32 %v12300_v23, %v12189_v10  ;;  %v12191_v32 = vpop.f32.mrb[142].mxu0  ;;  %v14082_v23 = vld [vmem:[%s20654_s2 + $0x1c1] ss:$8 sm:$0xf] }
 0x47b   :  { %v20349_v8 = vadd.f32 %v12337_v12, %v20273_v50  ;;  %v12192_v52 = vpop.f32.mrb[143].mxu0  ;;  %v12707_v50 = vrot.slane %v12693_v13, %v16713_v44 }
 0x47c   :  { %v20352_v39 = vadd.f32 %v12338_v35, %v20276_v58 }
 0x47d   :  { %v12228_v40 = vpop.f32.mrb[140].mxu1 }
 0x47e   :  { %v12339_v62 = vmul.f32 %v12304_v53, %v12228_v40  ;;  %v12230_v1 = vpop.f32.mrb[141].mxu1 }
 0x47f   :  { %v12340_v14 = vmul.f32 %v12308_v27, %v12230_v1  ;;  %v12232_v60 = vpop.f32.mrb[142].mxu1 }
 0x480   :  { %v20355_v11 = vadd.f32 %v12339_v62, %v20279_v18  ;;  %v12233_v54 = vpop.f32.mrb[143].mxu1  ;;  %v12396_v34 = vpop.f32.mrb[144].mxu0 }
 0x481   :  { %v20359_v37 = vadd.f32 %v12340_v14, %v20283_v46  ;;  %v12780_v58 = vmul.f32 %v12703_v63, %v12396_v34  ;;  %v12398_v21 = vpop.f32.mrb[145].mxu0 }
 0x482   :  { %v12781_v55 = vmul.f32 %v12707_v50, %v12398_v21  ;;  %v12400_v42 = vpop.f32.mrb[146].mxu0 }
 0x483   :  { %v20365_v18 = vadd.f32 %v12780_v58, %v20289_v24  ;;  %v12401_v41 = vpop.f32.mrb[147].mxu0  ;;  %v12723_v24 = vrot.slane %v12693_v13, %v16768_v15 }
 0x484   :  { %v20368_v46 = vadd.f32 %v12781_v55, %v20292_v7  ;;  %v14083_v7 = vld [vmem:[%s20654_s2 + $0x1c1] ss:$8 sm:$0xf0] }
 0x485   :  { %v12437_v25 = vpop.f32.mrb[144].mxu1  ;;  %v12697_v27 = vor.u32 %v14083_v7, %v14082_v23 }
 0x486   :  { %v12782_v16 = vmul.f32 %v12711_v30, %v12437_v25  ;;  %v12439_v49 = vpop.f32.mrb[145].mxu1 }
 0x487   :  { %v12783_v19 = vmul.f32 %v12715_v26, %v12439_v49  ;;  %v12441_v9 = vpop.f32.mrb[146].mxu1  ;;  %v12735_v54 = vrot.slane %v12697_v27, %v16711_v3  ;;  %v12743_v50 = vrot.slane %v12697_v27, %v16721_v43  ;;  %v12747_v34 = vrot.slane %v12697_v27, %v16732_v31 }
 0x488   :  { %v20371_v28 = vadd.f32 %v12782_v16, %v20295_v6  ;;  %v12442_v59 = vpop.f32.mrb[147].mxu1  ;;  %v12478_v6 = vpop.f32.mrb[148].mxu0  ;;  %v12759_v23 = vrot.slane %v12697_v27, %v16770_v36  ;;  %v12763_v7 = vrot.slane %v12697_v27, %v16776_v2 }
 0x489   :  { %v20375_v38 = vadd.f32 %v12783_v19, %v20299_v56  ;;  %v12784_v53 = vmul.f32 %v12719_v33, %v12478_v6  ;;  %v12480_v57 = vpop.f32.mrb[149].mxu0  ;;  %v12751_v59 = vrot.slane %v12697_v27, %v16766_v4 }
 0x48a   :  { %v12785_v56 = vmul.f32 %v12723_v24, %v12480_v57  ;;  %v12482_v10 = vpop.f32.mrb[150].mxu0  ;;  %v14093_v24 = vld [vmem:[%s20654_s2 + $0x182] ss:$8 sm:$0xf] }
 0x48b   :  { %v20387_v35 = vadd.f32 %v12784_v53, %v20311_v17  ;;  %v12483_v62 = vpop.f32.mrb[151].mxu0  ;;  %v12739_v17 = vrot.slane %v12697_v27, %v16713_v44 }
 0x48c   :  { %v20390_v1 = vadd.f32 %v12785_v56, %v20314_v45 }
 0x48d   :  { %v12519_v12 = vpop.f32.mrb[148].mxu1 }
 0x48e   :  { %v12786_v40 = vmul.f32 %v12727_v51, %v12519_v12  ;;  %v12521_v32 = vpop.f32.mrb[149].mxu1 }
 0x48f   :  { %v12787_v52 = vmul.f32 %v12731_v5, %v12521_v32  ;;  %v12523_v14 = vpop.f32.mrb[150].mxu1 }
 0x490   :  { %v20393_v60 = vadd.f32 %v12786_v40, %v20317_v61  ;;  %v12524_v13 = vpop.f32.mrb[151].mxu1  ;;  %v12560_v30 = vpop.f32.mrb[152].mxu0 }
 0x491   :  { %v20397_v63 = vadd.f32 %v12787_v52, %v20321_v47  ;;  %v12788_v45 = vmul.f32 %v12735_v54, %v12560_v30  ;;  %v12562_v26 = vpop.f32.mrb[153].mxu0 }
 0x492   :  { %v12789_v58 = vmul.f32 %v12739_v17, %v12562_v26  ;;  %v12564_v55 = vpop.f32.mrb[154].mxu0 }
 0x493   :  { %v20403_v61 = vadd.f32 %v12788_v45, %v20327_v20  ;;  %v12565_v16 = vpop.f32.mrb[155].mxu0  ;;  %v12755_v20 = vrot.slane %v12697_v27, %v16768_v15 }
 0x494   :  { %v20406_v47 = vadd.f32 %v12789_v58, %v20330_v48  ;;  %v14094_v48 = vld [vmem:[%s20654_s2 + $0x182] ss:$8 sm:$0xf0] }
 0x495   :  { %v12601_v21 = vpop.f32.mrb[152].mxu1  ;;  %v20424_v5 = vor.u32 %v14094_v48, %v14093_v24 }
 0x496   :  { %v12790_v25 = vmul.f32 %v12743_v50, %v12601_v21  ;;  %v12603_v42 = vpop.f32.mrb[153].mxu1 }
 0x497   :  { %v12791_v49 = vmul.f32 %v12747_v34, %v12603_v42  ;;  %v12605_v41 = vpop.f32.mrb[154].mxu1  ;;  %v13158_v13 = vrot.slane %v20424_v5, %v16711_v3  ;;  %v13166_v17 = vrot.slane %v20424_v5, %v16721_v43  ;;  %v13170_v50 = vrot.slane %v20424_v5, %v16732_v31  ;;  %v20446_v34 = vpop.permute.xlu0 %13270 }
 0x498   :  { %v20409_v19 = vadd.f32 %v12790_v25, %v20333_v0  ;;  %v12606_v9 = vpop.f32.mrb[155].mxu1  ;;  %v12642_v0 = vpop.f32.mrb[156].mxu0  ;;  %v14095_v41 = vld [vmem:[%s20654_s2 + $0x1c2] ss:$8 sm:$0xf]  ;;  %v13178_v48 = vrot.slane %v20424_v5, %v16768_v15 }
 0x499   :  { %v20413_v33 = vadd.f32 %v12791_v49, %v20337_v22  ;;  %v12792_v51 = vmul.f32 %v12751_v59, %v12642_v0  ;;  %v12644_v6 = vpop.f32.mrb[157].mxu0  ;;  %v13186_v0 = vrot.slane %v20424_v5, %v16776_v2 }
 0x49a   :  { %v12793_v22 = vmul.f32 %v12755_v20, %v12644_v6  ;;  %v12646_v57 = vpop.f32.mrb[158].mxu0  ;;  %v13174_v20 = vrot.slane %v20424_v5, %v16766_v4 }
 0x49b   :  { %v20427_v56 = vadd.f32 %v12792_v51, %v20349_v8  ;;  %v12647_v40 = vpop.f32.mrb[159].mxu0  ;;  %v13162_v8 = vrot.slane %v20424_v5, %v16713_v44 }
 0x49c   :  { %v20430_v32 = vadd.f32 %v12793_v22, %v20352_v39 }
 0x49d   :  { %v12683_v53 = vpop.f32.mrb[156].mxu1 }
 0x49e   :  { %v12794_v12 = vmul.f32 %v12759_v23, %v12683_v53  ;;  %v12685_v10 = vpop.f32.mrb[157].mxu1 }
 0x49f   :  { %v12795_v62 = vmul.f32 %v12763_v7, %v12685_v10  ;;  %v12687_v52 = vpop.f32.mrb[158].mxu1 }
 0x4a0   :  { %v20433_v27 = vadd.f32 %v12794_v12, %v20355_v11  ;;  %v12688_v14 = vpop.f32.mrb[159].mxu1  ;;  %v12851_v39 = vpop.f32.mrb[160].mxu0 }
 0x4a1   :  { %v20438_v54 = vadd.f32 %v12795_v62, %v20359_v37  ;;  %v13235_v30 = vmul.f32 %v13158_v13, %v12851_v39  ;;  %v12853_v11 = vpop.f32.mrb[161].mxu0 }
 0x4a2   :  { %v13236_v45 = vmul.f32 %v13162_v8, %v12853_v11  ;;  %v12855_v58 = vpop.f32.mrb[162].mxu0 }
 0x4a3   :  { %v13251_v37 = vadd.f32 %v13235_v30, %v20365_v18  ;;  %v12856_v25 = vpop.f32.mrb[163].mxu0  ;;  %v14096_v18 = vld [vmem:[%s20654_s2 + $0x1c2] ss:$8 sm:$0xf0] }
 0x4a4   :  { %v13252_v42 = vadd.f32 %v13236_v45, %v20368_v46 }
 0x4a5   :  { %v12892_v26 = vpop.f32.mrb[160].mxu1  ;;  %v13273_v24 = vadd.f32 %v20446_v34, %v13251_v37 }
 0x4a6   :  { %v13237_v21 = vmul.f32 %v13166_v17, %v12892_v26  ;;  %v12894_v55 = vpop.f32.mrb[161].mxu1  ;;  %v13274_v23 = vadd.f32 %v20446_v34, %v13252_v42  ;;  %v20496_v42 = vld [vmem:[%s20658_s5] sm:$0xf] }
 0x4a7   :  { %v13238_v16 = vmul.f32 %v13170_v50, %v12894_v55  ;;  %v12896_v49 = vpop.f32.mrb[162].mxu1  ;;  %v13289_v7 = vmax.f32 %v13273_v24, 0.0 }
 0x4a8   :  { %v13253_v9 = vadd.f32 %v13237_v21, %v20371_v28  ;;  %v12897_v59 = vpop.f32.mrb[163].mxu1  ;;  %v13182_v28 = vrot.slane %v20424_v5, %v16770_v36  ;;  %v12933_v6 = vpop.f32.mrb[164].mxu0  ;;  %v13290_v22 = vmax.f32 %v13274_v23, 0.0 }
 0x4a9   :  { %v13254_v46 = vadd.f32 %v13238_v16, %v20375_v38  ;;  %v20470_v38 = vor.u32 %v14096_v18, %v14095_v41  ;;  %v13239_v57 = vmul.f32 %v13174_v20, %v12933_v6  ;;  %v12935_v12 = vpop.f32.mrb[165].mxu0  ;;  %13305 = vst [vmem:[%s20657_s8] sm:$0xff] %v13289_v7  ;;  %v13322_v10 = vpack.c.bf16 %v13289_v7, %v13289_v7 }
 0x4aa   :  { %v13275_v51 = vadd.f32 %v20446_v34, %v13253_v9  ;;  %v13240_v62 = vmul.f32 %v13178_v48, %v12935_v12  ;;  %v12937_v52 = vpop.f32.mrb[166].mxu0  ;;  %13306 = vst [vmem:[%s20657_s8 + $0x8] sm:$0xff] %v13290_v22  ;;  %v13323_v14 = vpack.c.bf16 %v13290_v22, %v13290_v22 }
 0x4ab   :  { %v13276_v53 = vadd.f32 %v20446_v34, %v13254_v46  ;;  %v13255_v8 = vadd.f32 %v13239_v57, %v20387_v35  ;;  %v12938_v50 = vpop.f32.mrb[167].mxu0  ;;  %v13350_v30 = vsel %vm13348_vm9, %v13322_v10, 0  ;;  %v13190_v37 = vrot.slane %v20470_v38, %v16711_v3 }
 0x4ac   :  { %v13291_v40 = vmax.f32 %v13275_v51, 0.0  ;;  %v13256_v45 = vadd.f32 %v13240_v62, %v20390_v1  ;;  %14097 = vmatprep.subr.msk.bf16.mxu0 %vm13348_vm9, %v13323_v14  ;;  %v13194_v3 = vrot.slane %v20470_v38, %v16713_v44  ;;  %v13198_v9 = vrot.slane %v20470_v38, %v16721_v43 }
 0x4ad   :  { %v12974_v5 = vpop.f32.mrb[164].mxu1  ;;  %v13292_v13 = vmax.f32 %v13276_v53, 0.0  ;;  %v13277_v21 = vadd.f32 %v20446_v34, %v13255_v8  ;;  %13398 = vmatpush1.bf16.msra.mxu0 %v13350_v30  ;;  %v13202_v18 = vrot.slane %v20470_v38, %v16732_v31 }
 0x4ae   :  { %v13241_v17 = vmul.f32 %v13182_v28, %v12974_v5  ;;  %v12976_v39 = vpop.f32.mrb[165].mxu1  ;;  %13307 = vst [vmem:[%s20657_s8 + $0x10] sm:$0xff] %v13291_v40  ;;  %v13324_v11 = vpack.c.bf16 %v13291_v40, %v13291_v40  ;;  %v13278_v16 = vadd.f32 %v20446_v34, %v13256_v45  ;;  %v13218_v45 = vrot.slane %v20470_v38, %v16776_v2 }
 0x4af   :  { %v13242_v26 = vmul.f32 %v13186_v0, %v12976_v39  ;;  %v12978_v58 = vpop.f32.mrb[166].mxu1  ;;  %13308 = vst [vmem:[%s20657_s8 + $0x18] sm:$0xff] %v13292_v13  ;;  %v13325_v35 = vpack.c.bf16 %v13292_v13, %v13292_v13  ;;  %v13206_v13 = vrot.slane %v20470_v38, %v16766_v4 }
 0x4b0   :  { %v13257_v55 = vadd.f32 %v13241_v17, %v20393_v60  ;;  %v12979_v25 = vpop.f32.mrb[167].mxu1  ;;  %v13356_v1 = vsel %vm13348_vm9, %v13324_v11, 0  ;;  %v13293_v60 = vmax.f32 %v13277_v21, 0.0  ;;  %v13294_v59 = vmax.f32 %v13278_v16, 0.0  ;;  %v13015_v24 = vpop.f32.mrb[168].mxu0  ;;  %14098 = vmatmul.mubr.msk.bf16.vlgmr.msra.gmra.mrb[176].mxu0 %vm13344_vm10, %v20496_v42 }
 0x4b1   :  { %v13258_v49 = vadd.f32 %v13242_v26, %v20397_v63  ;;  %14099 = vmatprep.subr.msk.bf16.mxu1 %vm13348_vm9, %v13325_v35  ;;  %v13243_v63 = vmul.f32 %v13190_v37, %v13015_v24  ;;  %v13017_v46 = vpop.f32.mrb[169].mxu0  ;;  %13511 = vmatprep.mubr.bf16.mxu0 %v21001_v29 }
 0x4b2   :  { %v13279_v41 = vadd.f32 %v20446_v34, %v13257_v55  ;;  %13439 = vmatpush1.bf16.msra.mxu1 %v13356_v1  ;;  %13309 = vst [vmem:[%s20657_s8 + $0x20] sm:$0xff] %v13293_v60  ;;  %v13326_v48 = vpack.c.bf16 %v13293_v60, %v13293_v60  ;;  %13310 = vst [vmem:[%s20657_s8 + $0x28] sm:$0xff] %v13294_v59  ;;  %v13327_v43 = vpack.c.bf16 %v13294_v59, %v13294_v59  ;;  %v13019_v0 = vpop.f32.mrb[170].mxu0 }
 0x4b3   :  { %v13280_v20 = vadd.f32 %v20446_v34, %v13258_v49  ;;  %v13244_v31 = vmul.f32 %v13194_v3, %v13017_v46  ;;  %v13259_v7 = vadd.f32 %v13243_v63, %v20403_v61  ;;  %v13020_v22 = vpop.f32.mrb[171].mxu0 }
 0x4b4   :  { %v13295_v44 = vmax.f32 %v13279_v41, 0.0  ;;  %v13362_v53 = vsel %vm13348_vm9, %v13326_v48, 0  ;;  %14101 = vmatprep.subr.msk.bf16.mxu0 %vm13348_vm9, %v13327_v43 }
 0x4b5   :  { %v13296_v23 = vmax.f32 %v13280_v20, 0.0  ;;  %v13056_v28 = vpop.f32.mrb[168].mxu1  ;;  %14100 = vmatmul.mubr.msk.bf16.vlgmr.msra.gmra.mrb[176].mxu1 %vm13344_vm10, %v20496_v42  ;;  %v13260_v10 = vadd.f32 %v13244_v31, %v20406_v47  ;;  %v13281_v61 = vadd.f32 %v20446_v34, %v13259_v7  ;;  %13480 = vmatpush1.bf16.msra.mxu0 %v13362_v53  ;;  %v13210_v47 = vrot.slane %v20470_v38, %v16768_v15 }
 0x4b6   :  { %13311 = vst [vmem:[%s20657_s8 + $0x30] sm:$0xff] %v13295_v44  ;;  %v13245_v51 = vmul.f32 %v13198_v9, %v13056_v28  ;;  %v13058_v6 = vpop.f32.mrb[169].mxu1  ;;  %v13328_v57 = vpack.c.bf16 %v13295_v44, %v13295_v44  ;;  %13552 = vmatprep.mubr.bf16.mxu1 %v21001_v29 }
 0x4b7   :  { %13312 = vst [vmem:[%s20657_s8 + $0x38] sm:$0xff] %v13296_v23  ;;  %v13329_v12 = vpack.c.bf16 %v13296_v23, %v13296_v23  ;;  %v13246_v40 = vmul.f32 %v13202_v18, %v13058_v6  ;;  %v13060_v62 = vpop.f32.mrb[170].mxu1  ;;  %v13282_v8 = vadd.f32 %v20446_v34, %v13260_v10  ;;  %v13297_v39 = vmax.f32 %v13281_v61, 0.0 }
 0x4b8   :  { %v13261_v5 = vadd.f32 %v13245_v51, %v20409_v19  ;;  %v13061_v52 = vpop.f32.mrb[171].mxu1  ;;  %v13368_v14 = vsel %vm13348_vm9, %v13328_v57, 0  ;;  %v13214_v19 = vrot.slane %v20470_v38, %v16770_v36  ;;  %v13097_v4 = vpop.f32.mrb[172].mxu0  ;;  %14102 = vmatmul.mubr.msk.bf16.vlgmr.msra.gmra.mrb[180].mxu0 %vm13344_vm10, %v20496_v42 }
 0x4b9   :  { %v13262_v17 = vadd.f32 %v13246_v40, %v20413_v33  ;;  %14103 = vmatprep.subr.msk.bf16.mxu1 %vm13348_vm9, %v13329_v12  ;;  %v13298_v30 = vmax.f32 %v13282_v8, 0.0  ;;  %13313 = vst [vmem:[%s20657_s8 + $0x40] sm:$0xff] %v13297_v39  ;;  %v13247_v33 = vmul.f32 %v13206_v13, %v13097_v4  ;;  %v13099_v26 = vpop.f32.mrb[173].mxu0  ;;  %v13330_v58 = vpack.c.bf16 %v13297_v39, %v13297_v39 }
 0x4ba   :  { %v13283_v50 = vadd.f32 %v20446_v34, %v13261_v5  ;;  %13521 = vmatpush1.bf16.msra.mxu1 %v13368_v14  ;;  %13593 = vmatprep.mubr.bf16.mxu0 %v21001_v29  ;;  %v13248_v2 = vmul.f32 %v13210_v47, %v13099_v26  ;;  %v13101_v37 = vpop.f32.mrb[174].mxu0 }
 0x4bb   :  { %v13284_v11 = vadd.f32 %v20446_v34, %v13262_v17  ;;  %13314 = vst [vmem:[%s20657_s8 + $0x48] sm:$0xff] %v13298_v30  ;;  %v13331_v36 = vpack.c.bf16 %v13298_v30, %v13298_v30  ;;  %v13263_v21 = vadd.f32 %v13247_v33, %v20427_v56  ;;  %v13102_v1 = vpop.f32.mrb[175].mxu0  ;;  %v13374_v16 = vsel %vm13348_vm9, %v13330_v58, 0 }
 0x4bc   :  { %v13299_v15 = vmax.f32 %v13283_v50, 0.0  ;;  %v13264_v60 = vadd.f32 %v13248_v2, %v20430_v32 }
 0x4bd   :  { %v13300_v35 = vmax.f32 %v13284_v11, 0.0  ;;  %v13138_v38 = vpop.f32.mrb[172].mxu1  ;;  %14104 = vmatmul.mubr.msk.bf16.vlgmr.msra.gmra.mrb[180].mxu1 %vm13344_vm10, %v20496_v42  ;;  %14105 = vmatprep.subr.msk.bf16.mxu0 %vm13348_vm9, %v13331_v36  ;;  %v13285_v56 = vadd.f32 %v20446_v34, %v13263_v21 }
 0x4be   :  { %13315 = vst [vmem:[%s20657_s8 + $0x50] sm:$0xff] %v13299_v15  ;;  %v13249_v55 = vmul.f32 %v13214_v19, %v13138_v38  ;;  %v13140_v25 = vpop.f32.mrb[173].mxu1  ;;  %v13332_v49 = vpack.c.bf16 %v13299_v15, %v13299_v15  ;;  %13634 = vmatprep.mubr.bf16.mxu1 %v21001_v29  ;;  %13562 = vmatpush1.bf16.msra.mxu0 %v13374_v16 }
 0x4bf   :  { %13316 = vst [vmem:[%s20657_s8 + $0x58] sm:$0xff] %v13300_v35  ;;  %v13333_v3 = vpack.c.bf16 %v13300_v35, %v13300_v35  ;;  %v13250_v41 = vmul.f32 %v13218_v45, %v13140_v25  ;;  %v13142_v9 = vpop.f32.mrb[174].mxu1  ;;  %v13286_v18 = vadd.f32 %v20446_v34, %v13264_v60  ;;  %v13301_v63 = vmax.f32 %v13285_v56, 0.0 }
 0x4c0   :  { %v13265_v59 = vadd.f32 %v13249_v55, %v20433_v27  ;;  %v13143_v20 = vpop.f32.mrb[175].mxu1  ;;  %v13380_v24 = vsel %vm13348_vm9, %v13332_v49, 0 }
 0x4c1   :  { %v13266_v44 = vadd.f32 %v13250_v41, %v20438_v54  ;;  %14107 = vmatprep.subr.msk.bf16.mxu1 %vm13348_vm9, %v13333_v3  ;;  %v13302_v46 = vmax.f32 %v13286_v18, 0.0  ;;  %14106 = vmatmul.mubr.msk.bf16.vlgmr.msra.gmra.mrb[184].mxu0 %vm13344_vm10, %v20496_v42  ;;  %13317 = vst [vmem:[%s20657_s8 + $0x60] sm:$0xff] %v13301_v63  ;;  %v13334_v43 = vpack.c.bf16 %v13301_v63, %v13301_v63 }
 0x4c2   :  { %v13287_v32 = vadd.f32 %v20446_v34, %v13265_v59  ;;  %13603 = vmatpush1.bf16.msra.mxu1 %v13380_v24  ;;  %13675 = vmatprep.mubr.bf16.mxu0 %v21001_v29 }
 0x4c3   :  { %v13288_v48 = vadd.f32 %v20446_v34, %v13266_v44  ;;  %13318 = vst [vmem:[%s20657_s8 + $0x68] sm:$0xff] %v13302_v46  ;;  %v13335_v54 = vpack.c.bf16 %v13302_v46, %v13302_v46  ;;  %v13386_v34 = vsel %vm13348_vm9, %v13334_v43, 0 }
 0x4c4   :  { %v13303_v27 = vmax.f32 %v13287_v32, 0.0 }
 0x4c5   :  { %v13304_v23 = vmax.f32 %v13288_v48, 0.0  ;;  %14108 = vmatmul.mubr.msk.bf16.vlgmr.msra.gmra.mrb[184].mxu1 %vm13344_vm10, %v20496_v42  ;;  %14109 = vmatprep.subr.msk.bf16.mxu0 %vm13348_vm9, %v13335_v54 }
 0x4c6   :  { %13319 = vst [vmem:[%s20657_s8 + $0x70] sm:$0xff] %v13303_v27  ;;  %v13336_v31 = vpack.c.bf16 %v13303_v27, %v13303_v27  ;;  %13716 = vmatprep.mubr.bf16.mxu1 %v21001_v29  ;;  %13644 = vmatpush1.bf16.msra.mxu0 %v13386_v34  ;;  %v13342_v29 = vpop.permute.xlu1 %13341 }
 0x4c7   :  { %13320 = vst [vmem:[%s20657_s8 + $0x78] sm:$0xff] %v13304_v23  ;;  %v13337_v28 = vpack.c.bf16 %v13304_v23, %v13304_v23 }
 0x4c8   :  { %v13392_v0 = vsel %vm13348_vm9, %v13336_v31, 0 }
 0x4c9   :  { %14111 = vmatprep.subr.msk.bf16.mxu1 %vm13348_vm9, %v13337_v28  ;;  %14110 = vmatmul.mubr.msk.bf16.vlgmr.msra.gmra.mrb[188].mxu0 %vm13344_vm10, %v20496_v42 }
 0x4ca   :  { %13685 = vmatpush1.bf16.msra.mxu1 %v13392_v0 }
 0x4cd   :  { %14112 = vmatmul.mubr.msk.bf16.vlgmr.msra.gmra.mrb[188].mxu1 %vm13344_vm10, %v20496_v42 }
 0x583   :  { %v13431_v7 = vpop.f32.mrb[176].mxu0 }
 0x584   :  { %v13433_v51 = vpop.f32.mrb[177].mxu0  ;;  %v13432_v6 = vadd.f32 %v13431_v7, %v13342_v29 }
 0x585   :  { %v13435_v53 = vpop.f32.mrb[178].mxu0  ;;  %v13434_v57 = vadd.f32 %v13433_v51, %v13342_v29 }
 0x586   :  { %13725 = vst [vmem:[%s20659_s7] sm:$0xff] %v13432_v6  ;;  %v13436_v40 = vpop.f32.mrb[179].mxu0 }
 0x587   :  { %13726 = vst [vmem:[%s20659_s7 + $0x8] sm:$0xff] %v13434_v57 }
 0x588   :  { %v13472_v22 = vpop.f32.mrb[176].mxu1 }
 0x589   :  { %v13474_v12 = vpop.f32.mrb[177].mxu1  ;;  %v13473_v10 = vadd.f32 %v13472_v22, %v13342_v29 }
 0x58a   :  { %v13476_v62 = vpop.f32.mrb[178].mxu1  ;;  %v13475_v61 = vadd.f32 %v13474_v12, %v13342_v29 }
 0x58b   :  { %13727 = vst [vmem:[%s20659_s7 + $0x10] sm:$0xff] %v13473_v10  ;;  %v13477_v42 = vpop.f32.mrb[179].mxu1  ;;  %v13513_v5 = vpop.f32.mrb[180].mxu0 }
 0x58c   :  { %13728 = vst [vmem:[%s20659_s7 + $0x18] sm:$0xff] %v13475_v61  ;;  %v13514_v52 = vadd.f32 %v13513_v5, %v13342_v29  ;;  %v13515_v14 = vpop.f32.mrb[181].mxu0 }
 0x58d   :  { %v13516_v8 = vadd.f32 %v13515_v14, %v13342_v29  ;;  %v13517_v17 = vpop.f32.mrb[182].mxu0 }
 0x58e   :  { %13729 = vst [vmem:[%s20659_s7 + $0x20] sm:$0xff] %v13514_v52  ;;  %v13518_v50 = vpop.f32.mrb[183].mxu0 }
 0x58f   :  { %13730 = vst [vmem:[%s20659_s7 + $0x28] sm:$0xff] %v13516_v8 }
 0x590   :  { %v13554_v13 = vpop.f32.mrb[180].mxu1 }
 0x591   :  { %v13555_v47 = vadd.f32 %v13554_v13, %v13342_v29  ;;  %v13556_v39 = vpop.f32.mrb[181].mxu1 }
 0x592   :  { %v13557_v19 = vadd.f32 %v13556_v39, %v13342_v29  ;;  %v13558_v30 = vpop.f32.mrb[182].mxu1 }
 0x593   :  { %13731 = vst [vmem:[%s20659_s7 + $0x30] sm:$0xff] %v13555_v47  ;;  %v13559_v11 = vpop.f32.mrb[183].mxu1 }
 0x594   :  { %13732 = vst [vmem:[%s20659_s7 + $0x38] sm:$0xff] %v13557_v19  ;;  %v13595_v4 = vpop.f32.mrb[184].mxu0 }
 0x595   :  { %v13596_v45 = vadd.f32 %v13595_v4, %v13342_v29  ;;  %v13597_v15 = vpop.f32.mrb[185].mxu0 }
 0x596   :  { %v13598_v26 = vadd.f32 %v13597_v15, %v13342_v29  ;;  %v13599_v58 = vpop.f32.mrb[186].mxu0 }
 0x597   :  { %13733 = vst [vmem:[%s20659_s7 + $0x40] sm:$0xff] %v13596_v45  ;;  %v13600_v2 = vpop.f32.mrb[187].mxu0 }
 0x598   :  { %v13636_v33 = vpop.f32.mrb[184].mxu1  ;;  %13734 = vst [vmem:[%s20659_s7 + $0x48] sm:$0xff] %v13598_v26 }
 0x599   :  { %v13637_v36 = vadd.f32 %v13636_v33, %v13342_v29  ;;  %v13638_v35 = vpop.f32.mrb[185].mxu1 }
 0x59a   :  { %v13639_v38 = vadd.f32 %v13638_v35, %v13342_v29  ;;  %v13640_v37 = vpop.f32.mrb[186].mxu1 }
 0x59b   :  { %13735 = vst [vmem:[%s20659_s7 + $0x50] sm:$0xff] %v13637_v36  ;;  %v13641_v21 = vpop.f32.mrb[187].mxu1 }
 0x59c   :  { %13736 = vst [vmem:[%s20659_s7 + $0x58] sm:$0xff] %v13639_v38  ;;  %v13677_v55 = vpop.f32.mrb[188].mxu0 }
 0x59d   :  { %v13678_v25 = vadd.f32 %v13677_v55, %v13342_v29  ;;  %v13679_v1 = vpop.f32.mrb[189].mxu0 }
 0x59e   :  { %v13680_v49 = vadd.f32 %v13679_v1, %v13342_v29  ;;  %v13681_v3 = vpop.f32.mrb[190].mxu0 }
 0x59f   :  { %13737 = vst [vmem:[%s20659_s7 + $0x60] sm:$0xff] %v13678_v25  ;;  %v13682_v9 = vpop.f32.mrb[191].mxu0 }
 0x5a0   :  { %v13718_v16 = vpop.f32.mrb[188].mxu1  ;;  %13738 = vst [vmem:[%s20659_s7 + $0x68] sm:$0xff] %v13680_v49 }
 0x5a1   :  { %v13719_v60 = vadd.f32 %v13718_v16, %v13342_v29  ;;  %v13720_v41 = vpop.f32.mrb[189].mxu1 }
 0x5a2   :  { %v13721_v56 = vadd.f32 %v13720_v41, %v13342_v29  ;;  %v13722_v59 = vpop.f32.mrb[190].mxu1 }
 0x5a3   :  { %13739 = vst [vmem:[%s20659_s7 + $0x70] sm:$0xff] %v13719_v60  ;;  %v13723_v20 = vpop.f32.mrb[191].mxu1 }
 0x5a4   :  { %13740 = vst [vmem:[%s20659_s7 + $0x78] sm:$0xff] %v13721_v56 }

</bundles_post_ra>
